<compile_context>
chip_gen: v7x
topology: tpu7x:2x2x1
jax: 0.10.0
libtpu: 0.0.40
codegen_flags: <defaults>
</compile_context>

<pallas_src>
import jax
import jax.numpy as jnp
from jax.experimental import pallas as pl
from jax.experimental.pallas import tpu as pltpu


def _make_fusionnet_kernel(H, W, S, C, OFF, L):
    Hp, Wp = H + 2, W + 2
    PADF = Hp * Wp            # flattened padded image length
    NP = H * Wp               # compute span: rows 1..H, all Wp columns
    BASE = OFF + Wp           # scratch column of padded position (y=1, x=0)

    def conv3x3(src_ref, w, b):
        # src_ref: (C, L) f32 scratch; padded flat position p lives at col OFF+p,
        #          borders (top/bottom rows, x=0/x=Wp-1 cols, guards) are zero.
        # w: (Cout, 9*C) bf16, columns ordered (ky, kx, cin).
        # b: (Cout, 1) f32.
        # Returns (Cout, NP) f32: conv over rows 1..H, ALL Wp columns (the two
        # x-border columns are don't-care and get masked by the caller).
        slabs = []
        for ky in range(3):
            for kx in range(3):
                s = (ky - 1) * Wp + (kx - 1)
                slabs.append(
                    src_ref[:, BASE + s:BASE + s + NP].astype(jnp.bfloat16))
        patch = jnp.concatenate(slabs, axis=0)                 # (9C, NP) bf16
        r = jax.lax.dot_general(w, patch, (((1,), (0,)), ((), ())),
                                preferred_element_type=jnp.float32)
        return r + b                                           # (Cout, NP) f32

    def kernel(lms_ref, pan_ref, mask_ref, w1_ref, b1_ref, rw_ref, rb_ref,
               w3_ref, b3_ref, o_ref, act_ref, tmp_ref):
        f32 = jnp.float32
        # Zero only the guard / top-row / bottom-row regions (never written by
        # the conv stores below).  Done every step so results are correct no
        # matter how a multi-TensorCore chip assigns "parallel" grid steps.
        zeros_lo = jnp.zeros((C, BASE), f32)
        zeros_hi = jnp.zeros((C, L - (BASE + NP)), f32)
        act_ref[:, 0:BASE] = zeros_lo
        act_ref[:, BASE + NP:] = zeros_hi
        tmp_ref[:, 0:BASE] = zeros_lo
        tmp_ref[:, BASE + NP:] = zeros_hi

        # x-border mask (0 at x==0 / x==Wp-1), hoisted broadcast (done once).
        mask = jnp.broadcast_to(mask_ref[...], (C, NP))

        # conv1 input = pan (broadcast over spectral bands) - lms; already
        # zero-padded by the wrapper.  Channels S..C-1 are explicitly zeroed so
        # nothing stale leaks in from the previous grid step.
        inp = pan_ref[0] - lms_ref[0]                          # (S, PADF) f32
        tmp_ref[0:S, OFF:OFF + PADF] = inp
        tmp_ref[S:C, OFF:OFF + PADF] = jnp.zeros((C - S, PADF), f32)

        # conv1 + ReLU -> act
        a = conv3x3(tmp_ref, w1_ref[...], b1_ref[...])
        act_ref[:, BASE:BASE + NP] = jnp.maximum(a, 0.0) * mask

        # 4 Resblocks: x = x + conv21(relu(conv20(x)))   (adds in f32)
        for i in range(4):
            t = conv3x3(act_ref, rw_ref[2 * i], rb_ref[2 * i])
            tmp_ref[:, BASE:BASE + NP] = jnp.maximum(t, 0.0) * mask
            r = conv3x3(tmp_ref, rw_ref[2 * i + 1], rb_ref[2 * i + 1])
            act_ref[:, BASE:BASE + NP] = act_ref[:, BASE:BASE + NP] + r * mask

        # conv3 + lms skip -> output (x-border columns discarded by wrapper)
        y = conv3x3(act_ref, w3_ref[...], b3_ref[...])
        o_ref[0] = (y + lms_ref[0][:, Wp:Wp + NP]).astype(o_ref.dtype)

    return kernel


def _pack_w(w):
    """HWIO (3,3,Cin,Cout) -> (Cout, 9*Cin) bf16, columns ordered (ky,kx,cin)."""
    cout = w.shape[-1]
    return jnp.transpose(w, (3, 0, 1, 2)).reshape(cout, -1).astype(jnp.bfloat16)


@jax.jit
def fusionnet_forward(params, lms, pan):
    """lms: (N, H, W, S) f32, pan: (N, H, W, 1) f32 -> (N, H, W, S) f32."""
    N, H, W, S = lms.shape
    C = params["res_w"].shape[-1]
    Hp, Wp = H + 2, W + 2
    PADF = Hp * Wp
    NP = H * Wp
    # Guard offset so per-layer interior stores start at a lane multiple of 128.
    OFF = ((-Wp) % 128) or 128
    L = -(-(OFF + 2 * Wp + 1 + NP) // 128) * 128    # scratch row length

    # --- layout plumbing (tiny XLA ops outside the kernel): channels-major,
    # zero-padded, flat-spatial, lane-dense inputs ---
    lms_cm = jnp.transpose(lms, (0, 3, 1, 2))                     # (N,S,H,W)
    pan_cm = jnp.transpose(pan, (0, 3, 1, 2))                     # (N,1,H,W)
    pad = ((0, 0), (0, 0), (1, 1), (1, 1))
    lms_pad = jnp.pad(lms_cm, pad).reshape(N, S, PADF)
    pan_pad = jnp.pad(pan_cm, pad).reshape(N, 1, PADF)

    # x-border mask over the compute span (0 at x==0 / x==Wp-1, else 1)
    col = jnp.arange(NP, dtype=jnp.int32) % Wp
    mask = jnp.where((col == 0) | (col == Wp - 1), 0.0, 1.0)
    mask = mask.astype(jnp.float32).reshape(1, NP)

    # --- weight packing: (Cout, 9*Cin) bf16; conv1's Cin zero-padded S -> C so
    # every layer runs the same K=9*C matmul ---
    w1_full = jnp.zeros((3, 3, C, C), jnp.float32).at[:, :, :S, :].set(
        params["conv1_w"])
    w1 = _pack_w(w1_full)                                         # (C, 9C)
    b1 = params["conv1_b"].reshape(C, 1).astype(jnp.float32)
    rw = jnp.stack([_pack_w(params["res_w"][i, j])
                    for i in range(4) for j in range(2)])         # (8, C, 9C)
    rb = params["res_b"].reshape(8, C, 1).astype(jnp.float32)
    w3 = _pack_w(params["conv3_w"])                               # (S, 9C)
    b3 = params["conv3_b"].reshape(S, 1).astype(jnp.float32)

    kernel = _make_fusionnet_kernel(H, W, S, C, OFF, L)

    flops = 2 * NP * (9 * C) * (9 * C + S) * N
    bytes_accessed = ((lms_pad.size + pan_pad.size + N * S * NP) * 4
                      + (w1.size + rw.size + w3.size) * 2)

    out_flat = pl.pallas_call(
        kernel,
        out_shape=jax.ShapeDtypeStruct((N, S, NP), jnp.float32),
        grid=(N,),
        in_specs=[
            pl.BlockSpec((1, S, PADF), lambda n: (n, 0, 0)),      # lms (padded)
            pl.BlockSpec((1, 1, PADF), lambda n: (n, 0, 0)),      # pan (padded)
            pl.BlockSpec((1, NP), lambda n: (0, 0)),              # border mask
            pl.BlockSpec((C, 9 * C), lambda n: (0, 0)),           # conv1 w
            pl.BlockSpec((C, 1), lambda n: (0, 0)),               # conv1 b
            pl.BlockSpec((8, C, 9 * C), lambda n: (0, 0, 0)),     # res weights
            pl.BlockSpec((8, C, 1), lambda n: (0, 0, 0)),         # res biases
            pl.BlockSpec((S, 9 * C), lambda n: (0, 0)),           # conv3 w
            pl.BlockSpec((S, 1), lambda n: (0, 0)),               # conv3 b
        ],
        out_specs=pl.BlockSpec((1, S, NP), lambda n: (n, 0, 0)),
        scratch_shapes=[
            pltpu.VMEM((C, L), jnp.float32),    # act (resident, zero-bordered)
            pltpu.VMEM((C, L), jnp.float32),    # tmp (resident, zero-bordered)
        ],
        compiler_params=pltpu.CompilerParams(
            dimension_semantics=("parallel",)),
        cost_estimate=pl.CostEstimate(
            flops=flops, transcendentals=0, bytes_accessed=bytes_accessed),
    )(lms_pad, pan_pad, mask, w1, b1, rw, rb, w3, b3)

    out = out_flat.reshape(N, S, H, Wp)[:, :, :, 1:W + 1]         # drop x borders
    return jnp.transpose(out, (0, 2, 3, 1))                       # back to NHWC


def init_fusionnet_params(key, spectral_num, channel=32):
    """Deterministic synthetic params; weights stored HWIO = (3, 3, Cin, Cout)."""
    def conv_init(k, cin, cout, scale=0.05):
        kw, kb = jax.random.split(k)
        return (scale * jax.random.normal(kw, (3, 3, cin, cout), jnp.float32),
                scale * jax.random.normal(kb, (cout,), jnp.float32))

    keys = jax.random.split(key, 10)
    p = {}
    p["conv1_w"], p["conv1_b"] = conv_init(keys[0], spectral_num, channel)
    rw, rb = [], []
    for i in range(4):
        w0, b0 = conv_init(keys[1 + 2 * i], channel, channel)
        w1, b1 = conv_init(keys[2 + 2 * i], channel, channel)
        rw.append(jnp.stack([w0, w1]))
        rb.append(jnp.stack([b0, b1]))
    p["res_w"] = jnp.stack(rw)          # (4, 2, 3, 3, C, C)
    p["res_b"] = jnp.stack(rb)          # (4, 2, C)
    p["conv3_w"], p["conv3_b"] = conv_init(keys[9], channel, spectral_num)
    return p


def _conv_ref(x, w, b):
    y = jax.lax.conv_general_dilated(
        x, w, window_strides=(1, 1), padding=((1, 1), (1, 1)),
        dimension_numbers=("NHWC", "HWIO", "NHWC"))
    return y + b.reshape(1, 1, 1, -1)


@jax.jit
def fusionnet_reference(params, lms, pan):
    """Pure-JAX f32 reference of FusionNet.forward (sanity check only)."""
    x = jnp.broadcast_to(pan, lms.shape) - lms
    rs = jax.nn.relu(_conv_ref(x, params["conv1_w"], params["conv1_b"]))
    for i in range(4):
        t = jax.nn.relu(_conv_ref(rs, params["res_w"][i, 0], params["res_b"][i, 0]))
        rs = rs + _conv_ref(t, params["res_w"][i, 1], params["res_b"][i, 1])
    return _conv_ref(rs, params["conv3_w"], params["conv3_b"]) + lms


if __name__ == "__main__":
    N, S, H, W = 2, 4, 16, 16          # batch=2, spectral_num=4, 16x16 spatial
    key = jax.random.PRNGKey(0)
    k_lms, k_pan, k_par = jax.random.split(key, 3)

    lms = jax.random.normal(k_lms, (N, H, W, S), jnp.float32)   # NHWC
    pan = jax.random.normal(k_pan, (N, H, W, 1), jnp.float32)   # NHWC
    params = init_fusionnet_params(k_par, S, channel=32)

    out = jax.block_until_ready(fusionnet_forward(params, lms, pan))
    assert out.shape == (N, H, W, S) and out.dtype == jnp.float32

    # Sanity check vs. f32 XLA reference (kernel matmuls run in bf16, f32 acc).
    ref = jax.block_until_ready(fusionnet_reference(params, lms, pan))
    err = float(jnp.max(jnp.abs(out - ref)))
    assert err < 0.15, f"max abs err vs reference: {err}"
    print("KERNEL_OK")
</pallas_src>

<mosaic_0001>
module attributes {stable_mosaic.version = 11 : i64} {
  func.func @kernel(%arg0: i32, %arg1: memref<1x4x324xf32, #tpu.memory_space<vmem>>, %arg2: memref<1x1x324xf32, #tpu.memory_space<vmem>>, %arg3: memref<1x288xf32, #tpu.memory_space<vmem>>, %arg4: memref<32x288xbf16, #tpu.memory_space<vmem>>, %arg5: memref<32x1xf32, #tpu.memory_space<vmem>>, %arg6: memref<8x32x288xbf16, #tpu.memory_space<vmem>>, %arg7: memref<8x32x1xf32, #tpu.memory_space<vmem>>, %arg8: memref<4x288xbf16, #tpu.memory_space<vmem>>, %arg9: memref<4x1xf32, #tpu.memory_space<vmem>>, %arg10: memref<1x4x288xf32, #tpu.memory_space<vmem>>, %arg11: memref<32x512xf32, #tpu.memory_space<vmem>>, %arg12: memref<32x512xf32, #tpu.memory_space<vmem>>) attributes {dimension_semantics = [#tpu.dimension_semantics<parallel>], iteration_bounds = array<i64: 2>, scalar_prefetch = 0 : i64, scratch_operands = 2 : i64, tpu.core_type = #tpu.core_type<tc>, window_params = [{transform_indices = @transform_0, window_bounds = array<i64: 1, 4, 324>}, {transform_indices = @transform_1, window_bounds = array<i64: 1, 1, 324>}, {pipeline_mode = #tpu.pipeline_mode<synchronous>, transform_indices = @transform_2, window_bounds = array<i64: 1, 288>}, {pipeline_mode = #tpu.pipeline_mode<synchronous>, transform_indices = @transform_3, window_bounds = array<i64: 32, 288>}, {pipeline_mode = #tpu.pipeline_mode<synchronous>, transform_indices = @transform_4, window_bounds = array<i64: 32, 1>}, {pipeline_mode = #tpu.pipeline_mode<synchronous>, transform_indices = @transform_5, window_bounds = array<i64: 8, 32, 288>}, {pipeline_mode = #tpu.pipeline_mode<synchronous>, transform_indices = @transform_6, window_bounds = array<i64: 8, 32, 1>}, {pipeline_mode = #tpu.pipeline_mode<synchronous>, transform_indices = @transform_7, window_bounds = array<i64: 4, 288>}, {pipeline_mode = #tpu.pipeline_mode<synchronous>, transform_indices = @transform_8, window_bounds = array<i64: 4, 1>}, {transform_indices = @transform_9, window_bounds = array<i64: 1, 4, 288>}]} {
    %cst = arith.constant 0.000000e+00 : f32
    %0 = vector.broadcast %cst : f32 to vector<32x128xf32>
    %cst_0 = arith.constant 0.000000e+00 : f32
    %1 = vector.broadcast %cst_0 : f32 to vector<32x96xf32>
    %c0 = arith.constant 0 : index
    %c0_1 = arith.constant 0 : index
    %2 = vector.load %arg11[%c0, %c0_1] : memref<32x512xf32, #tpu.memory_space<vmem>>, vector<32x128xf32>
    tpu.vector_store %arg11[%c0, %c0_1], %0 {strides = array<i32>} : memref<32x512xf32, #tpu.memory_space<vmem>>, vector<32x128xf32>,
    %c0_2 = arith.constant 0 : index
    %c416 = arith.constant 416 : index
    %3 = vector.load %arg11[%c0_2, %c416] : memref<32x512xf32, #tpu.memory_space<vmem>>, vector<32x96xf32>
    tpu.vector_store %arg11[%c0_2, %c416], %1 {strides = array<i32>} : memref<32x512xf32, #tpu.memory_space<vmem>>, vector<32x96xf32>,
    %c0_3 = arith.constant 0 : index
    %c0_4 = arith.constant 0 : index
    %4 = vector.load %arg12[%c0_3, %c0_4] : memref<32x512xf32, #tpu.memory_space<vmem>>, vector<32x128xf32>
    tpu.vector_store %arg12[%c0_3, %c0_4], %0 {strides = array<i32>} : memref<32x512xf32, #tpu.memory_space<vmem>>, vector<32x128xf32>,
    %c0_5 = arith.constant 0 : index
    %c416_6 = arith.constant 416 : index
    %5 = vector.load %arg12[%c0_5, %c416_6] : memref<32x512xf32, #tpu.memory_space<vmem>>, vector<32x96xf32>
    tpu.vector_store %arg12[%c0_5, %c416_6], %1 {strides = array<i32>} : memref<32x512xf32, #tpu.memory_space<vmem>>, vector<32x96xf32>,
    %c0_7 = arith.constant 0 : index
    %c0_8 = arith.constant 0 : index
    %6 = vector.load %arg3[%c0_7, %c0_8] : memref<1x288xf32, #tpu.memory_space<vmem>>, vector<1x288xf32>
    %7 = vector.shape_cast %6 : vector<1x288xf32> to vector<1x288xf32>
    %8 = vector.broadcast %7 : vector<1x288xf32> to vector<32x288xf32>
    %c0_9 = arith.constant 0 : index
    %c0_10 = arith.constant 0 : index
    %c0_11 = arith.constant 0 : index
    %9 = vector.load %arg2[%c0_9, %c0_10, %c0_11] : memref<1x1x324xf32, #tpu.memory_space<vmem>>, vector<1x1x324xf32>
    %10 = vector.shape_cast %9 : vector<1x1x324xf32> to vector<1x324xf32>
    %c0_12 = arith.constant 0 : index
    %c0_13 = arith.constant 0 : index
    %c0_14 = arith.constant 0 : index
    %11 = vector.load %arg1[%c0_12, %c0_13, %c0_14] : memref<1x4x324xf32, #tpu.memory_space<vmem>>, vector<1x4x324xf32>
    %12 = vector.shape_cast %11 : vector<1x4x324xf32> to vector<4x324xf32>
    %13 = vector.broadcast %10 : vector<1x324xf32> to vector<4x324xf32>
    %14 = arith.subf %13, %12 : vector<4x324xf32>
    %c0_15 = arith.constant 0 : index
    %c110 = arith.constant 110 : index
    %15 = vector.load %arg12[%c0_15, %c110] : memref<32x512xf32, #tpu.memory_space<vmem>>, vector<4x324xf32>
    tpu.vector_store %arg12[%c0_15, %c110], %14 {strides = array<i32>} : memref<32x512xf32, #tpu.memory_space<vmem>>, vector<4x324xf32>,
    %cst_16 = arith.constant 0.000000e+00 : f32
    %16 = vector.broadcast %cst_16 : f32 to vector<28x324xf32>
    %c4 = arith.constant 4 : index
    %c110_17 = arith.constant 110 : index
    %17 = vector.load %arg12[%c4, %c110_17] : memref<32x512xf32, #tpu.memory_space<vmem>>, vector<28x324xf32>
    tpu.vector_store %arg12[%c4, %c110_17], %16 {strides = array<i32>} : memref<32x512xf32, #tpu.memory_space<vmem>>, vector<28x324xf32>,
    %c0_18 = arith.constant 0 : index
    %c0_19 = arith.constant 0 : index
    %18 = vector.load %arg4[%c0_18, %c0_19] : memref<32x288xbf16, #tpu.memory_space<vmem>>, vector<32x288xbf16>
    %c0_20 = arith.constant 0 : index
    %c0_21 = arith.constant 0 : index
    %19 = vector.load %arg5[%c0_20, %c0_21] : memref<32x1xf32, #tpu.memory_space<vmem>>, vector<32x1xf32>
    %c0_22 = arith.constant 0 : index
    %c109 = arith.constant 109 : index
    %20 = vector.load %arg12[%c0_22, %c109] : memref<32x512xf32, #tpu.memory_space<vmem>>, vector<32x288xf32>
    %21 = arith.truncf %20 : vector<32x288xf32> to vector<32x288xbf16>
    %c0_23 = arith.constant 0 : index
    %c110_24 = arith.constant 110 : index
    %22 = vector.load %arg12[%c0_23, %c110_24] : memref<32x512xf32, #tpu.memory_space<vmem>>, vector<32x288xf32>
    %23 = arith.truncf %22 : vector<32x288xf32> to vector<32x288xbf16>
    %c0_25 = arith.constant 0 : index
    %c111 = arith.constant 111 : index
    %24 = vector.load %arg12[%c0_25, %c111] : memref<32x512xf32, #tpu.memory_space<vmem>>, vector<32x288xf32>
    %25 = arith.truncf %24 : vector<32x288xf32> to vector<32x288xbf16>
    %c0_26 = arith.constant 0 : index
    %c127 = arith.constant 127 : index
    %26 = vector.load %arg12[%c0_26, %c127] : memref<32x512xf32, #tpu.memory_space<vmem>>, vector<32x288xf32>
    %27 = arith.truncf %26 : vector<32x288xf32> to vector<32x288xbf16>
    %c0_27 = arith.constant 0 : index
    %c128 = arith.constant 128 : index
    %28 = vector.load %arg12[%c0_27, %c128] : memref<32x512xf32, #tpu.memory_space<vmem>>, vector<32x288xf32>
    %29 = arith.truncf %28 : vector<32x288xf32> to vector<32x288xbf16>
    %c0_28 = arith.constant 0 : index
    %c129 = arith.constant 129 : index
    %30 = vector.load %arg12[%c0_28, %c129] : memref<32x512xf32, #tpu.memory_space<vmem>>, vector<32x288xf32>
    %31 = arith.truncf %30 : vector<32x288xf32> to vector<32x288xbf16>
    %c0_29 = arith.constant 0 : index
    %c145 = arith.constant 145 : index
    %32 = vector.load %arg12[%c0_29, %c145] : memref<32x512xf32, #tpu.memory_space<vmem>>, vector<32x288xf32>
    %33 = arith.truncf %32 : vector<32x288xf32> to vector<32x288xbf16>
    %c0_30 = arith.constant 0 : index
    %c146 = arith.constant 146 : index
    %34 = vector.load %arg12[%c0_30, %c146] : memref<32x512xf32, #tpu.memory_space<vmem>>, vector<32x288xf32>
    %35 = arith.truncf %34 : vector<32x288xf32> to vector<32x288xbf16>
    %c0_31 = arith.constant 0 : index
    %c147 = arith.constant 147 : index
    %36 = vector.load %arg12[%c0_31, %c147] : memref<32x512xf32, #tpu.memory_space<vmem>>, vector<32x288xf32>
    %37 = arith.truncf %36 : vector<32x288xf32> to vector<32x288xbf16>
    %38 = tpu.concatenate %21, %23, %25, %27, %29, %31, %33, %35, %37 in 0 : vector<32x288xbf16>, vector<32x288xbf16>, vector<32x288xbf16>, vector<32x288xbf16>, vector<32x288xbf16>, vector<32x288xbf16>, vector<32x288xbf16>, vector<32x288xbf16>, vector<32x288xbf16> -> vector<288x288xbf16>
    %cst_32 = arith.constant dense<0.000000e+00> : vector<32x288xf32>
    %39 = tpu.matmul %18, %38, %cst_32 {dimension_numbers = #tpu.dot_dimension_numbers<[1], [0], [0], [1], [0, 0, 1, 1], [], []>} : vector<32x288xbf16>, vector<288x288xbf16>, vector<32x288xf32> -> vector<32x288xf32>
    %40 = vector.broadcast %19 : vector<32x1xf32> to vector<32x288xf32>
    %41 = arith.addf %39, %40 : vector<32x288xf32>
    %cst_33 = arith.constant 0.000000e+00 : f32
    %42 = vector.broadcast %cst_33 : f32 to vector<32x288xf32>
    %43 = arith.maximumf %41, %42 : vector<32x288xf32>
    %44 = arith.mulf %43, %8 : vector<32x288xf32>
    %c0_34 = arith.constant 0 : index
    %c128_35 = arith.constant 128 : index
    %45 = vector.load %arg11[%c0_34, %c128_35] : memref<32x512xf32, #tpu.memory_space<vmem>>, vector<32x288xf32>
    tpu.vector_store %arg11[%c0_34, %c128_35], %44 {strides = array<i32>} : memref<32x512xf32, #tpu.memory_space<vmem>>, vector<32x288xf32>,
    %c0_36 = arith.constant 0 : index
    %c0_37 = arith.constant 0 : index
    %c0_38 = arith.constant 0 : index
    %46 = vector.load %arg6[%c0_36, %c0_37, %c0_38] : memref<8x32x288xbf16, #tpu.memory_space<vmem>>, vector<1x32x288xbf16>
    %47 = vector.shape_cast %46 : vector<1x32x288xbf16> to vector<32x288xbf16>
    %c0_39 = arith.constant 0 : index
    %c0_40 = arith.constant 0 : index
    %c0_41 = arith.constant 0 : index
    %48 = vector.load %arg7[%c0_39, %c0_40, %c0_41] : memref<8x32x1xf32, #tpu.memory_space<vmem>>, vector<1x32x1xf32>
    %49 = vector.shape_cast %48 : vector<1x32x1xf32> to vector<32x1xf32>
    %c0_42 = arith.constant 0 : index
    %c109_43 = arith.constant 109 : index
    %50 = vector.load %arg11[%c0_42, %c109_43] : memref<32x512xf32, #tpu.memory_space<vmem>>, vector<32x288xf32>
    %51 = arith.truncf %50 : vector<32x288xf32> to vector<32x288xbf16>
    %c0_44 = arith.constant 0 : index
    %c110_45 = arith.constant 110 : index
    %52 = vector.load %arg11[%c0_44, %c110_45] : memref<32x512xf32, #tpu.memory_space<vmem>>, vector<32x288xf32>
    %53 = arith.truncf %52 : vector<32x288xf32> to vector<32x288xbf16>
    %c0_46 = arith.constant 0 : index
    %c111_47 = arith.constant 111 : index
    %54 = vector.load %arg11[%c0_46, %c111_47] : memref<32x512xf32, #tpu.memory_space<vmem>>, vector<32x288xf32>
    %55 = arith.truncf %54 : vector<32x288xf32> to vector<32x288xbf16>
    %c0_48 = arith.constant 0 : index
    %c127_49 = arith.constant 127 : index
    %56 = vector.load %arg11[%c0_48, %c127_49] : memref<32x512xf32, #tpu.memory_space<vmem>>, vector<32x288xf32>
    %57 = arith.truncf %56 : vector<32x288xf32> to vector<32x288xbf16>
    %c0_50 = arith.constant 0 : index
    %c128_51 = arith.constant 128 : index
    %58 = vector.load %arg11[%c0_50, %c128_51] : memref<32x512xf32, #tpu.memory_space<vmem>>, vector<32x288xf32>
    %59 = arith.truncf %58 : vector<32x288xf32> to vector<32x288xbf16>
    %c0_52 = arith.constant 0 : index
    %c129_53 = arith.constant 129 : index
    %60 = vector.load %arg11[%c0_52, %c129_53] : memref<32x512xf32, #tpu.memory_space<vmem>>, vector<32x288xf32>
    %61 = arith.truncf %60 : vector<32x288xf32> to vector<32x288xbf16>
    %c0_54 = arith.constant 0 : index
    %c145_55 = arith.constant 145 : index
    %62 = vector.load %arg11[%c0_54, %c145_55] : memref<32x512xf32, #tpu.memory_space<vmem>>, vector<32x288xf32>
    %63 = arith.truncf %62 : vector<32x288xf32> to vector<32x288xbf16>
    %c0_56 = arith.constant 0 : index
    %c146_57 = arith.constant 146 : index
    %64 = vector.load %arg11[%c0_56, %c146_57] : memref<32x512xf32, #tpu.memory_space<vmem>>, vector<32x288xf32>
    %65 = arith.truncf %64 : vector<32x288xf32> to vector<32x288xbf16>
    %c0_58 = arith.constant 0 : index
    %c147_59 = arith.constant 147 : index
    %66 = vector.load %arg11[%c0_58, %c147_59] : memref<32x512xf32, #tpu.memory_space<vmem>>, vector<32x288xf32>
    %67 = arith.truncf %66 : vector<32x288xf32> to vector<32x288xbf16>
    %68 = tpu.concatenate %51, %53, %55, %57, %59, %61, %63, %65, %67 in 0 : vector<32x288xbf16>, vector<32x288xbf16>, vector<32x288xbf16>, vector<32x288xbf16>, vector<32x288xbf16>, vector<32x288xbf16>, vector<32x288xbf16>, vector<32x288xbf16>, vector<32x288xbf16> -> vector<288x288xbf16>
    %cst_60 = arith.constant dense<0.000000e+00> : vector<32x288xf32>
    %69 = tpu.matmul %47, %68, %cst_60 {dimension_numbers = #tpu.dot_dimension_numbers<[1], [0], [0], [1], [0, 0, 1, 1], [], []>} : vector<32x288xbf16>, vector<288x288xbf16>, vector<32x288xf32> -> vector<32x288xf32>
    %70 = vector.broadcast %49 : vector<32x1xf32> to vector<32x288xf32>
    %71 = arith.addf %69, %70 : vector<32x288xf32>
    %cst_61 = arith.constant 0.000000e+00 : f32
    %72 = vector.broadcast %cst_61 : f32 to vector<32x288xf32>
    %73 = arith.maximumf %71, %72 : vector<32x288xf32>
    %74 = arith.mulf %73, %8 : vector<32x288xf32>
    %c0_62 = arith.constant 0 : index
    %c128_63 = arith.constant 128 : index
    %75 = vector.load %arg12[%c0_62, %c128_63] : memref<32x512xf32, #tpu.memory_space<vmem>>, vector<32x288xf32>
    tpu.vector_store %arg12[%c0_62, %c128_63], %74 {strides = array<i32>} : memref<32x512xf32, #tpu.memory_space<vmem>>, vector<32x288xf32>,
    %c1 = arith.constant 1 : index
    %c0_64 = arith.constant 0 : index
    %c0_65 = arith.constant 0 : index
    %76 = vector.load %arg6[%c1, %c0_64, %c0_65] : memref<8x32x288xbf16, #tpu.memory_space<vmem>>, vector<1x32x288xbf16>
    %77 = vector.shape_cast %76 : vector<1x32x288xbf16> to vector<32x288xbf16>
    %c1_66 = arith.constant 1 : index
    %c0_67 = arith.constant 0 : index
    %c0_68 = arith.constant 0 : index
    %78 = vector.load %arg7[%c1_66, %c0_67, %c0_68] : memref<8x32x1xf32, #tpu.memory_space<vmem>>, vector<1x32x1xf32>
    %79 = vector.shape_cast %78 : vector<1x32x1xf32> to vector<32x1xf32>
    %c0_69 = arith.constant 0 : index
    %c109_70 = arith.constant 109 : index
    %80 = vector.load %arg12[%c0_69, %c109_70] : memref<32x512xf32, #tpu.memory_space<vmem>>, vector<32x288xf32>
    %81 = arith.truncf %80 : vector<32x288xf32> to vector<32x288xbf16>
    %c0_71 = arith.constant 0 : index
    %c110_72 = arith.constant 110 : index
    %82 = vector.load %arg12[%c0_71, %c110_72] : memref<32x512xf32, #tpu.memory_space<vmem>>, vector<32x288xf32>
    %83 = arith.truncf %82 : vector<32x288xf32> to vector<32x288xbf16>
    %c0_73 = arith.constant 0 : index
    %c111_74 = arith.constant 111 : index
    %84 = vector.load %arg12[%c0_73, %c111_74] : memref<32x512xf32, #tpu.memory_space<vmem>>, vector<32x288xf32>
    %85 = arith.truncf %84 : vector<32x288xf32> to vector<32x288xbf16>
    %c0_75 = arith.constant 0 : index
    %c127_76 = arith.constant 127 : index
    %86 = vector.load %arg12[%c0_75, %c127_76] : memref<32x512xf32, #tpu.memory_space<vmem>>, vector<32x288xf32>
    %87 = arith.truncf %86 : vector<32x288xf32> to vector<32x288xbf16>
    %c0_77 = arith.constant 0 : index
    %c128_78 = arith.constant 128 : index
    %88 = vector.load %arg12[%c0_77, %c128_78] : memref<32x512xf32, #tpu.memory_space<vmem>>, vector<32x288xf32>
    %89 = arith.truncf %88 : vector<32x288xf32> to vector<32x288xbf16>
    %c0_79 = arith.constant 0 : index
    %c129_80 = arith.constant 129 : index
    %90 = vector.load %arg12[%c0_79, %c129_80] : memref<32x512xf32, #tpu.memory_space<vmem>>, vector<32x288xf32>
    %91 = arith.truncf %90 : vector<32x288xf32> to vector<32x288xbf16>
    %c0_81 = arith.constant 0 : index
    %c145_82 = arith.constant 145 : index
    %92 = vector.load %arg12[%c0_81, %c145_82] : memref<32x512xf32, #tpu.memory_space<vmem>>, vector<32x288xf32>
    %93 = arith.truncf %92 : vector<32x288xf32> to vector<32x288xbf16>
    %c0_83 = arith.constant 0 : index
    %c146_84 = arith.constant 146 : index
    %94 = vector.load %arg12[%c0_83, %c146_84] : memref<32x512xf32, #tpu.memory_space<vmem>>, vector<32x288xf32>
    %95 = arith.truncf %94 : vector<32x288xf32> to vector<32x288xbf16>
    %c0_85 = arith.constant 0 : index
    %c147_86 = arith.constant 147 : index
    %96 = vector.load %arg12[%c0_85, %c147_86] : memref<32x512xf32, #tpu.memory_space<vmem>>, vector<32x288xf32>
    %97 = arith.truncf %96 : vector<32x288xf32> to vector<32x288xbf16>
    %98 = tpu.concatenate %81, %83, %85, %87, %89, %91, %93, %95, %97 in 0 : vector<32x288xbf16>, vector<32x288xbf16>, vector<32x288xbf16>, vector<32x288xbf16>, vector<32x288xbf16>, vector<32x288xbf16>, vector<32x288xbf16>, vector<32x288xbf16>, vector<32x288xbf16> -> vector<288x288xbf16>
    %cst_87 = arith.constant dense<0.000000e+00> : vector<32x288xf32>
    %99 = tpu.matmul %77, %98, %cst_87 {dimension_numbers = #tpu.dot_dimension_numbers<[1], [0], [0], [1], [0, 0, 1, 1], [], []>} : vector<32x288xbf16>, vector<288x288xbf16>, vector<32x288xf32> -> vector<32x288xf32>
    %100 = vector.broadcast %79 : vector<32x1xf32> to vector<32x288xf32>
    %101 = arith.addf %99, %100 : vector<32x288xf32>
    %c0_88 = arith.constant 0 : index
    %c128_89 = arith.constant 128 : index
    %102 = vector.load %arg11[%c0_88, %c128_89] : memref<32x512xf32, #tpu.memory_space<vmem>>, vector<32x288xf32>
    %103 = arith.mulf %101, %8 : vector<32x288xf32>
    %104 = arith.addf %102, %103 : vector<32x288xf32>
    %c0_90 = arith.constant 0 : index
    %c128_91 = arith.constant 128 : index
    %105 = vector.load %arg11[%c0_90, %c128_91] : memref<32x512xf32, #tpu.memory_space<vmem>>, vector<32x288xf32>
    tpu.vector_store %arg11[%c0_90, %c128_91], %104 {strides = array<i32>} : memref<32x512xf32, #tpu.memory_space<vmem>>, vector<32x288xf32>,
    %c2 = arith.constant 2 : index
    %c0_92 = arith.constant 0 : index
    %c0_93 = arith.constant 0 : index
    %106 = vector.load %arg6[%c2, %c0_92, %c0_93] : memref<8x32x288xbf16, #tpu.memory_space<vmem>>, vector<1x32x288xbf16>
    %107 = vector.shape_cast %106 : vector<1x32x288xbf16> to vector<32x288xbf16>
    %c2_94 = arith.constant 2 : index
    %c0_95 = arith.constant 0 : index
    %c0_96 = arith.constant 0 : index
    %108 = vector.load %arg7[%c2_94, %c0_95, %c0_96] : memref<8x32x1xf32, #tpu.memory_space<vmem>>, vector<1x32x1xf32>
    %109 = vector.shape_cast %108 : vector<1x32x1xf32> to vector<32x1xf32>
    %c0_97 = arith.constant 0 : index
    %c109_98 = arith.constant 109 : index
    %110 = vector.load %arg11[%c0_97, %c109_98] : memref<32x512xf32, #tpu.memory_space<vmem>>, vector<32x288xf32>
    %111 = arith.truncf %110 : vector<32x288xf32> to vector<32x288xbf16>
    %c0_99 = arith.constant 0 : index
    %c110_100 = arith.constant 110 : index
    %112 = vector.load %arg11[%c0_99, %c110_100] : memref<32x512xf32, #tpu.memory_space<vmem>>, vector<32x288xf32>
    %113 = arith.truncf %112 : vector<32x288xf32> to vector<32x288xbf16>
    %c0_101 = arith.constant 0 : index
    %c111_102 = arith.constant 111 : index
    %114 = vector.load %arg11[%c0_101, %c111_102] : memref<32x512xf32, #tpu.memory_space<vmem>>, vector<32x288xf32>
    %115 = arith.truncf %114 : vector<32x288xf32> to vector<32x288xbf16>
    %c0_103 = arith.constant 0 : index
    %c127_104 = arith.constant 127 : index
    %116 = vector.load %arg11[%c0_103, %c127_104] : memref<32x512xf32, #tpu.memory_space<vmem>>, vector<32x288xf32>
    %117 = arith.truncf %116 : vector<32x288xf32> to vector<32x288xbf16>
    %c0_105 = arith.constant 0 : index
    %c128_106 = arith.constant 128 : index
    %118 = vector.load %arg11[%c0_105, %c128_106] : memref<32x512xf32, #tpu.memory_space<vmem>>, vector<32x288xf32>
    %119 = arith.truncf %118 : vector<32x288xf32> to vector<32x288xbf16>
    %c0_107 = arith.constant 0 : index
    %c129_108 = arith.constant 129 : index
    %120 = vector.load %arg11[%c0_107, %c129_108] : memref<32x512xf32, #tpu.memory_space<vmem>>, vector<32x288xf32>
    %121 = arith.truncf %120 : vector<32x288xf32> to vector<32x288xbf16>
    %c0_109 = arith.constant 0 : index
    %c145_110 = arith.constant 145 : index
    %122 = vector.load %arg11[%c0_109, %c145_110] : memref<32x512xf32, #tpu.memory_space<vmem>>, vector<32x288xf32>
    %123 = arith.truncf %122 : vector<32x288xf32> to vector<32x288xbf16>
    %c0_111 = arith.constant 0 : index
    %c146_112 = arith.constant 146 : index
    %124 = vector.load %arg11[%c0_111, %c146_112] : memref<32x512xf32, #tpu.memory_space<vmem>>, vector<32x288xf32>
    %125 = arith.truncf %124 : vector<32x288xf32> to vector<32x288xbf16>
    %c0_113 = arith.constant 0 : index
    %c147_114 = arith.constant 147 : index
    %126 = vector.load %arg11[%c0_113, %c147_114] : memref<32x512xf32, #tpu.memory_space<vmem>>, vector<32x288xf32>
    %127 = arith.truncf %126 : vector<32x288xf32> to vector<32x288xbf16>
    %128 = tpu.concatenate %111, %113, %115, %117, %119, %121, %123, %125, %127 in 0 : vector<32x288xbf16>, vector<32x288xbf16>, vector<32x288xbf16>, vector<32x288xbf16>, vector<32x288xbf16>, vector<32x288xbf16>, vector<32x288xbf16>, vector<32x288xbf16>, vector<32x288xbf16> -> vector<288x288xbf16>
    %cst_115 = arith.constant dense<0.000000e+00> : vector<32x288xf32>
    %129 = tpu.matmul %107, %128, %cst_115 {dimension_numbers = #tpu.dot_dimension_numbers<[1], [0], [0], [1], [0, 0, 1, 1], [], []>} : vector<32x288xbf16>, vector<288x288xbf16>, vector<32x288xf32> -> vector<32x288xf32>
    %130 = vector.broadcast %109 : vector<32x1xf32> to vector<32x288xf32>
    %131 = arith.addf %129, %130 : vector<32x288xf32>
    %cst_116 = arith.constant 0.000000e+00 : f32
    %132 = vector.broadcast %cst_116 : f32 to vector<32x288xf32>
    %133 = arith.maximumf %131, %132 : vector<32x288xf32>
    %134 = arith.mulf %133, %8 : vector<32x288xf32>
    %c0_117 = arith.constant 0 : index
    %c128_118 = arith.constant 128 : index
    %135 = vector.load %arg12[%c0_117, %c128_118] : memref<32x512xf32, #tpu.memory_space<vmem>>, vector<32x288xf32>
    tpu.vector_store %arg12[%c0_117, %c128_118], %134 {strides = array<i32>} : memref<32x512xf32, #tpu.memory_space<vmem>>, vector<32x288xf32>,
    %c3 = arith.constant 3 : index
    %c0_119 = arith.constant 0 : index
    %c0_120 = arith.constant 0 : index
    %136 = vector.load %arg6[%c3, %c0_119, %c0_120] : memref<8x32x288xbf16, #tpu.memory_space<vmem>>, vector<1x32x288xbf16>
    %137 = vector.shape_cast %136 : vector<1x32x288xbf16> to vector<32x288xbf16>
    %c3_121 = arith.constant 3 : index
    %c0_122 = arith.constant 0 : index
    %c0_123 = arith.constant 0 : index
    %138 = vector.load %arg7[%c3_121, %c0_122, %c0_123] : memref<8x32x1xf32, #tpu.memory_space<vmem>>, vector<1x32x1xf32>
    %139 = vector.shape_cast %138 : vector<1x32x1xf32> to vector<32x1xf32>
    %c0_124 = arith.constant 0 : index
    %c109_125 = arith.constant 109 : index
    %140 = vector.load %arg12[%c0_124, %c109_125] : memref<32x512xf32, #tpu.memory_space<vmem>>, vector<32x288xf32>
    %141 = arith.truncf %140 : vector<32x288xf32> to vector<32x288xbf16>
    %c0_126 = arith.constant 0 : index
    %c110_127 = arith.constant 110 : index
    %142 = vector.load %arg12[%c0_126, %c110_127] : memref<32x512xf32, #tpu.memory_space<vmem>>, vector<32x288xf32>
    %143 = arith.truncf %142 : vector<32x288xf32> to vector<32x288xbf16>
    %c0_128 = arith.constant 0 : index
    %c111_129 = arith.constant 111 : index
    %144 = vector.load %arg12[%c0_128, %c111_129] : memref<32x512xf32, #tpu.memory_space<vmem>>, vector<32x288xf32>
    %145 = arith.truncf %144 : vector<32x288xf32> to vector<32x288xbf16>
    %c0_130 = arith.constant 0 : index
    %c127_131 = arith.constant 127 : index
    %146 = vector.load %arg12[%c0_130, %c127_131] : memref<32x512xf32, #tpu.memory_space<vmem>>, vector<32x288xf32>
    %147 = arith.truncf %146 : vector<32x288xf32> to vector<32x288xbf16>
    %c0_132 = arith.constant 0 : index
    %c128_133 = arith.constant 128 : index
    %148 = vector.load %arg12[%c0_132, %c128_133] : memref<32x512xf32, #tpu.memory_space<vmem>>, vector<32x288xf32>
    %149 = arith.truncf %148 : vector<32x288xf32> to vector<32x288xbf16>
    %c0_134 = arith.constant 0 : index
    %c129_135 = arith.constant 129 : index
    %150 = vector.load %arg12[%c0_134, %c129_135] : memref<32x512xf32, #tpu.memory_space<vmem>>, vector<32x288xf32>
    %151 = arith.truncf %150 : vector<32x288xf32> to vector<32x288xbf16>
    %c0_136 = arith.constant 0 : index
    %c145_137 = arith.constant 145 : index
    %152 = vector.load %arg12[%c0_136, %c145_137] : memref<32x512xf32, #tpu.memory_space<vmem>>, vector<32x288xf32>
    %153 = arith.truncf %152 : vector<32x288xf32> to vector<32x288xbf16>
    %c0_138 = arith.constant 0 : index
    %c146_139 = arith.constant 146 : index
    %154 = vector.load %arg12[%c0_138, %c146_139] : memref<32x512xf32, #tpu.memory_space<vmem>>, vector<32x288xf32>
    %155 = arith.truncf %154 : vector<32x288xf32> to vector<32x288xbf16>
    %c0_140 = arith.constant 0 : index
    %c147_141 = arith.constant 147 : index
    %156 = vector.load %arg12[%c0_140, %c147_141] : memref<32x512xf32, #tpu.memory_space<vmem>>, vector<32x288xf32>
    %157 = arith.truncf %156 : vector<32x288xf32> to vector<32x288xbf16>
    %158 = tpu.concatenate %141, %143, %145, %147, %149, %151, %153, %155, %157 in 0 : vector<32x288xbf16>, vector<32x288xbf16>, vector<32x288xbf16>, vector<32x288xbf16>, vector<32x288xbf16>, vector<32x288xbf16>, vector<32x288xbf16>, vector<32x288xbf16>, vector<32x288xbf16> -> vector<288x288xbf16>
    %cst_142 = arith.constant dense<0.000000e+00> : vector<32x288xf32>
    %159 = tpu.matmul %137, %158, %cst_142 {dimension_numbers = #tpu.dot_dimension_numbers<[1], [0], [0], [1], [0, 0, 1, 1], [], []>} : vector<32x288xbf16>, vector<288x288xbf16>, vector<32x288xf32> -> vector<32x288xf32>
    %160 = vector.broadcast %139 : vector<32x1xf32> to vector<32x288xf32>
    %161 = arith.addf %159, %160 : vector<32x288xf32>
    %c0_143 = arith.constant 0 : index
    %c128_144 = arith.constant 128 : index
    %162 = vector.load %arg11[%c0_143, %c128_144] : memref<32x512xf32, #tpu.memory_space<vmem>>, vector<32x288xf32>
    %163 = arith.mulf %161, %8 : vector<32x288xf32>
    %164 = arith.addf %162, %163 : vector<32x288xf32>
    %c0_145 = arith.constant 0 : index
    %c128_146 = arith.constant 128 : index
    %165 = vector.load %arg11[%c0_145, %c128_146] : memref<32x512xf32, #tpu.memory_space<vmem>>, vector<32x288xf32>
    tpu.vector_store %arg11[%c0_145, %c128_146], %164 {strides = array<i32>} : memref<32x512xf32, #tpu.memory_space<vmem>>, vector<32x288xf32>,
    %c4_147 = arith.constant 4 : index
    %c0_148 = arith.constant 0 : index
    %c0_149 = arith.constant 0 : index
    %166 = vector.load %arg6[%c4_147, %c0_148, %c0_149] : memref<8x32x288xbf16, #tpu.memory_space<vmem>>, vector<1x32x288xbf16>
    %167 = vector.shape_cast %166 : vector<1x32x288xbf16> to vector<32x288xbf16>
    %c4_150 = arith.constant 4 : index
    %c0_151 = arith.constant 0 : index
    %c0_152 = arith.constant 0 : index
    %168 = vector.load %arg7[%c4_150, %c0_151, %c0_152] : memref<8x32x1xf32, #tpu.memory_space<vmem>>, vector<1x32x1xf32>
    %169 = vector.shape_cast %168 : vector<1x32x1xf32> to vector<32x1xf32>
    %c0_153 = arith.constant 0 : index
    %c109_154 = arith.constant 109 : index
    %170 = vector.load %arg11[%c0_153, %c109_154] : memref<32x512xf32, #tpu.memory_space<vmem>>, vector<32x288xf32>
    %171 = arith.truncf %170 : vector<32x288xf32> to vector<32x288xbf16>
    %c0_155 = arith.constant 0 : index
    %c110_156 = arith.constant 110 : index
    %172 = vector.load %arg11[%c0_155, %c110_156] : memref<32x512xf32, #tpu.memory_space<vmem>>, vector<32x288xf32>
    %173 = arith.truncf %172 : vector<32x288xf32> to vector<32x288xbf16>
    %c0_157 = arith.constant 0 : index
    %c111_158 = arith.constant 111 : index
    %174 = vector.load %arg11[%c0_157, %c111_158] : memref<32x512xf32, #tpu.memory_space<vmem>>, vector<32x288xf32>
    %175 = arith.truncf %174 : vector<32x288xf32> to vector<32x288xbf16>
    %c0_159 = arith.constant 0 : index
    %c127_160 = arith.constant 127 : index
    %176 = vector.load %arg11[%c0_159, %c127_160] : memref<32x512xf32, #tpu.memory_space<vmem>>, vector<32x288xf32>
    %177 = arith.truncf %176 : vector<32x288xf32> to vector<32x288xbf16>
    %c0_161 = arith.constant 0 : index
    %c128_162 = arith.constant 128 : index
    %178 = vector.load %arg11[%c0_161, %c128_162] : memref<32x512xf32, #tpu.memory_space<vmem>>, vector<32x288xf32>
    %179 = arith.truncf %178 : vector<32x288xf32> to vector<32x288xbf16>
    %c0_163 = arith.constant 0 : index
    %c129_164 = arith.constant 129 : index
    %180 = vector.load %arg11[%c0_163, %c129_164] : memref<32x512xf32, #tpu.memory_space<vmem>>, vector<32x288xf32>
    %181 = arith.truncf %180 : vector<32x288xf32> to vector<32x288xbf16>
    %c0_165 = arith.constant 0 : index
    %c145_166 = arith.constant 145 : index
    %182 = vector.load %arg11[%c0_165, %c145_166] : memref<32x512xf32, #tpu.memory_space<vmem>>, vector<32x288xf32>
    %183 = arith.truncf %182 : vector<32x288xf32> to vector<32x288xbf16>
    %c0_167 = arith.constant 0 : index
    %c146_168 = arith.constant 146 : index
    %184 = vector.load %arg11[%c0_167, %c146_168] : memref<32x512xf32, #tpu.memory_space<vmem>>, vector<32x288xf32>
    %185 = arith.truncf %184 : vector<32x288xf32> to vector<32x288xbf16>
    %c0_169 = arith.constant 0 : index
    %c147_170 = arith.constant 147 : index
    %186 = vector.load %arg11[%c0_169, %c147_170] : memref<32x512xf32, #tpu.memory_space<vmem>>, vector<32x288xf32>
    %187 = arith.truncf %186 : vector<32x288xf32> to vector<32x288xbf16>
    %188 = tpu.concatenate %171, %173, %175, %177, %179, %181, %183, %185, %187 in 0 : vector<32x288xbf16>, vector<32x288xbf16>, vector<32x288xbf16>, vector<32x288xbf16>, vector<32x288xbf16>, vector<32x288xbf16>, vector<32x288xbf16>, vector<32x288xbf16>, vector<32x288xbf16> -> vector<288x288xbf16>
    %cst_171 = arith.constant dense<0.000000e+00> : vector<32x288xf32>
    %189 = tpu.matmul %167, %188, %cst_171 {dimension_numbers = #tpu.dot_dimension_numbers<[1], [0], [0], [1], [0, 0, 1, 1], [], []>} : vector<32x288xbf16>, vector<288x288xbf16>, vector<32x288xf32> -> vector<32x288xf32>
    %190 = vector.broadcast %169 : vector<32x1xf32> to vector<32x288xf32>
    %191 = arith.addf %189, %190 : vector<32x288xf32>
    %cst_172 = arith.constant 0.000000e+00 : f32
    %192 = vector.broadcast %cst_172 : f32 to vector<32x288xf32>
    %193 = arith.maximumf %191, %192 : vector<32x288xf32>
    %194 = arith.mulf %193, %8 : vector<32x288xf32>
    %c0_173 = arith.constant 0 : index
    %c128_174 = arith.constant 128 : index
    %195 = vector.load %arg12[%c0_173, %c128_174] : memref<32x512xf32, #tpu.memory_space<vmem>>, vector<32x288xf32>
    tpu.vector_store %arg12[%c0_173, %c128_174], %194 {strides = array<i32>} : memref<32x512xf32, #tpu.memory_space<vmem>>, vector<32x288xf32>,
    %c5 = arith.constant 5 : index
    %c0_175 = arith.constant 0 : index
    %c0_176 = arith.constant 0 : index
    %196 = vector.load %arg6[%c5, %c0_175, %c0_176] : memref<8x32x288xbf16, #tpu.memory_space<vmem>>, vector<1x32x288xbf16>
    %197 = vector.shape_cast %196 : vector<1x32x288xbf16> to vector<32x288xbf16>
    %c5_177 = arith.constant 5 : index
    %c0_178 = arith.constant 0 : index
    %c0_179 = arith.constant 0 : index
    %198 = vector.load %arg7[%c5_177, %c0_178, %c0_179] : memref<8x32x1xf32, #tpu.memory_space<vmem>>, vector<1x32x1xf32>
    %199 = vector.shape_cast %198 : vector<1x32x1xf32> to vector<32x1xf32>
    %c0_180 = arith.constant 0 : index
    %c109_181 = arith.constant 109 : index
    %200 = vector.load %arg12[%c0_180, %c109_181] : memref<32x512xf32, #tpu.memory_space<vmem>>, vector<32x288xf32>
    %201 = arith.truncf %200 : vector<32x288xf32> to vector<32x288xbf16>
    %c0_182 = arith.constant 0 : index
    %c110_183 = arith.constant 110 : index
    %202 = vector.load %arg12[%c0_182, %c110_183] : memref<32x512xf32, #tpu.memory_space<vmem>>, vector<32x288xf32>
    %203 = arith.truncf %202 : vector<32x288xf32> to vector<32x288xbf16>
    %c0_184 = arith.constant 0 : index
    %c111_185 = arith.constant 111 : index
    %204 = vector.load %arg12[%c0_184, %c111_185] : memref<32x512xf32, #tpu.memory_space<vmem>>, vector<32x288xf32>
    %205 = arith.truncf %204 : vector<32x288xf32> to vector<32x288xbf16>
    %c0_186 = arith.constant 0 : index
    %c127_187 = arith.constant 127 : index
    %206 = vector.load %arg12[%c0_186, %c127_187] : memref<32x512xf32, #tpu.memory_space<vmem>>, vector<32x288xf32>
    %207 = arith.truncf %206 : vector<32x288xf32> to vector<32x288xbf16>
    %c0_188 = arith.constant 0 : index
    %c128_189 = arith.constant 128 : index
    %208 = vector.load %arg12[%c0_188, %c128_189] : memref<32x512xf32, #tpu.memory_space<vmem>>, vector<32x288xf32>
    %209 = arith.truncf %208 : vector<32x288xf32> to vector<32x288xbf16>
    %c0_190 = arith.constant 0 : index
    %c129_191 = arith.constant 129 : index
    %210 = vector.load %arg12[%c0_190, %c129_191] : memref<32x512xf32, #tpu.memory_space<vmem>>, vector<32x288xf32>
    %211 = arith.truncf %210 : vector<32x288xf32> to vector<32x288xbf16>
    %c0_192 = arith.constant 0 : index
    %c145_193 = arith.constant 145 : index
    %212 = vector.load %arg12[%c0_192, %c145_193] : memref<32x512xf32, #tpu.memory_space<vmem>>, vector<32x288xf32>
    %213 = arith.truncf %212 : vector<32x288xf32> to vector<32x288xbf16>
    %c0_194 = arith.constant 0 : index
    %c146_195 = arith.constant 146 : index
    %214 = vector.load %arg12[%c0_194, %c146_195] : memref<32x512xf32, #tpu.memory_space<vmem>>, vector<32x288xf32>
    %215 = arith.truncf %214 : vector<32x288xf32> to vector<32x288xbf16>
    %c0_196 = arith.constant 0 : index
    %c147_197 = arith.constant 147 : index
    %216 = vector.load %arg12[%c0_196, %c147_197] : memref<32x512xf32, #tpu.memory_space<vmem>>, vector<32x288xf32>
    %217 = arith.truncf %216 : vector<32x288xf32> to vector<32x288xbf16>
    %218 = tpu.concatenate %201, %203, %205, %207, %209, %211, %213, %215, %217 in 0 : vector<32x288xbf16>, vector<32x288xbf16>, vector<32x288xbf16>, vector<32x288xbf16>, vector<32x288xbf16>, vector<32x288xbf16>, vector<32x288xbf16>, vector<32x288xbf16>, vector<32x288xbf16> -> vector<288x288xbf16>
    %cst_198 = arith.constant dense<0.000000e+00> : vector<32x288xf32>
    %219 = tpu.matmul %197, %218, %cst_198 {dimension_numbers = #tpu.dot_dimension_numbers<[1], [0], [0], [1], [0, 0, 1, 1], [], []>} : vector<32x288xbf16>, vector<288x288xbf16>, vector<32x288xf32> -> vector<32x288xf32>
    %220 = vector.broadcast %199 : vector<32x1xf32> to vector<32x288xf32>
    %221 = arith.addf %219, %220 : vector<32x288xf32>
    %c0_199 = arith.constant 0 : index
    %c128_200 = arith.constant 128 : index
    %222 = vector.load %arg11[%c0_199, %c128_200] : memref<32x512xf32, #tpu.memory_space<vmem>>, vector<32x288xf32>
    %223 = arith.mulf %221, %8 : vector<32x288xf32>
    %224 = arith.addf %222, %223 : vector<32x288xf32>
    %c0_201 = arith.constant 0 : index
    %c128_202 = arith.constant 128 : index
    %225 = vector.load %arg11[%c0_201, %c128_202] : memref<32x512xf32, #tpu.memory_space<vmem>>, vector<32x288xf32>
    tpu.vector_store %arg11[%c0_201, %c128_202], %224 {strides = array<i32>} : memref<32x512xf32, #tpu.memory_space<vmem>>, vector<32x288xf32>,
    %c6 = arith.constant 6 : index
    %c0_203 = arith.constant 0 : index
    %c0_204 = arith.constant 0 : index
    %226 = vector.load %arg6[%c6, %c0_203, %c0_204] : memref<8x32x288xbf16, #tpu.memory_space<vmem>>, vector<1x32x288xbf16>
    %227 = vector.shape_cast %226 : vector<1x32x288xbf16> to vector<32x288xbf16>
    %c6_205 = arith.constant 6 : index
    %c0_206 = arith.constant 0 : index
    %c0_207 = arith.constant 0 : index
    %228 = vector.load %arg7[%c6_205, %c0_206, %c0_207] : memref<8x32x1xf32, #tpu.memory_space<vmem>>, vector<1x32x1xf32>
    %229 = vector.shape_cast %228 : vector<1x32x1xf32> to vector<32x1xf32>
    %c0_208 = arith.constant 0 : index
    %c109_209 = arith.constant 109 : index
    %230 = vector.load %arg11[%c0_208, %c109_209] : memref<32x512xf32, #tpu.memory_space<vmem>>, vector<32x288xf32>
    %231 = arith.truncf %230 : vector<32x288xf32> to vector<32x288xbf16>
    %c0_210 = arith.constant 0 : index
    %c110_211 = arith.constant 110 : index
    %232 = vector.load %arg11[%c0_210, %c110_211] : memref<32x512xf32, #tpu.memory_space<vmem>>, vector<32x288xf32>
    %233 = arith.truncf %232 : vector<32x288xf32> to vector<32x288xbf16>
    %c0_212 = arith.constant 0 : index
    %c111_213 = arith.constant 111 : index
    %234 = vector.load %arg11[%c0_212, %c111_213] : memref<32x512xf32, #tpu.memory_space<vmem>>, vector<32x288xf32>
    %235 = arith.truncf %234 : vector<32x288xf32> to vector<32x288xbf16>
    %c0_214 = arith.constant 0 : index
    %c127_215 = arith.constant 127 : index
    %236 = vector.load %arg11[%c0_214, %c127_215] : memref<32x512xf32, #tpu.memory_space<vmem>>, vector<32x288xf32>
    %237 = arith.truncf %236 : vector<32x288xf32> to vector<32x288xbf16>
    %c0_216 = arith.constant 0 : index
    %c128_217 = arith.constant 128 : index
    %238 = vector.load %arg11[%c0_216, %c128_217] : memref<32x512xf32, #tpu.memory_space<vmem>>, vector<32x288xf32>
    %239 = arith.truncf %238 : vector<32x288xf32> to vector<32x288xbf16>
    %c0_218 = arith.constant 0 : index
    %c129_219 = arith.constant 129 : index
    %240 = vector.load %arg11[%c0_218, %c129_219] : memref<32x512xf32, #tpu.memory_space<vmem>>, vector<32x288xf32>
    %241 = arith.truncf %240 : vector<32x288xf32> to vector<32x288xbf16>
    %c0_220 = arith.constant 0 : index
    %c145_221 = arith.constant 145 : index
    %242 = vector.load %arg11[%c0_220, %c145_221] : memref<32x512xf32, #tpu.memory_space<vmem>>, vector<32x288xf32>
    %243 = arith.truncf %242 : vector<32x288xf32> to vector<32x288xbf16>
    %c0_222 = arith.constant 0 : index
    %c146_223 = arith.constant 146 : index
    %244 = vector.load %arg11[%c0_222, %c146_223] : memref<32x512xf32, #tpu.memory_space<vmem>>, vector<32x288xf32>
    %245 = arith.truncf %244 : vector<32x288xf32> to vector<32x288xbf16>
    %c0_224 = arith.constant 0 : index
    %c147_225 = arith.constant 147 : index
    %246 = vector.load %arg11[%c0_224, %c147_225] : memref<32x512xf32, #tpu.memory_space<vmem>>, vector<32x288xf32>
    %247 = arith.truncf %246 : vector<32x288xf32> to vector<32x288xbf16>
    %248 = tpu.concatenate %231, %233, %235, %237, %239, %241, %243, %245, %247 in 0 : vector<32x288xbf16>, vector<32x288xbf16>, vector<32x288xbf16>, vector<32x288xbf16>, vector<32x288xbf16>, vector<32x288xbf16>, vector<32x288xbf16>, vector<32x288xbf16>, vector<32x288xbf16> -> vector<288x288xbf16>
    %cst_226 = arith.constant dense<0.000000e+00> : vector<32x288xf32>
    %249 = tpu.matmul %227, %248, %cst_226 {dimension_numbers = #tpu.dot_dimension_numbers<[1], [0], [0], [1], [0, 0, 1, 1], [], []>} : vector<32x288xbf16>, vector<288x288xbf16>, vector<32x288xf32> -> vector<32x288xf32>
    %250 = vector.broadcast %229 : vector<32x1xf32> to vector<32x288xf32>
    %251 = arith.addf %249, %250 : vector<32x288xf32>
    %cst_227 = arith.constant 0.000000e+00 : f32
    %252 = vector.broadcast %cst_227 : f32 to vector<32x288xf32>
    %253 = arith.maximumf %251, %252 : vector<32x288xf32>
    %254 = arith.mulf %253, %8 : vector<32x288xf32>
    %c0_228 = arith.constant 0 : index
    %c128_229 = arith.constant 128 : index
    %255 = vector.load %arg12[%c0_228, %c128_229] : memref<32x512xf32, #tpu.memory_space<vmem>>, vector<32x288xf32>
    tpu.vector_store %arg12[%c0_228, %c128_229], %254 {strides = array<i32>} : memref<32x512xf32, #tpu.memory_space<vmem>>, vector<32x288xf32>,
    %c7 = arith.constant 7 : index
    %c0_230 = arith.constant 0 : index
    %c0_231 = arith.constant 0 : index
    %256 = vector.load %arg6[%c7, %c0_230, %c0_231] : memref<8x32x288xbf16, #tpu.memory_space<vmem>>, vector<1x32x288xbf16>
    %257 = vector.shape_cast %256 : vector<1x32x288xbf16> to vector<32x288xbf16>
    %c7_232 = arith.constant 7 : index
    %c0_233 = arith.constant 0 : index
    %c0_234 = arith.constant 0 : index
    %258 = vector.load %arg7[%c7_232, %c0_233, %c0_234] : memref<8x32x1xf32, #tpu.memory_space<vmem>>, vector<1x32x1xf32>
    %259 = vector.shape_cast %258 : vector<1x32x1xf32> to vector<32x1xf32>
    %c0_235 = arith.constant 0 : index
    %c109_236 = arith.constant 109 : index
    %260 = vector.load %arg12[%c0_235, %c109_236] : memref<32x512xf32, #tpu.memory_space<vmem>>, vector<32x288xf32>
    %261 = arith.truncf %260 : vector<32x288xf32> to vector<32x288xbf16>
    %c0_237 = arith.constant 0 : index
    %c110_238 = arith.constant 110 : index
    %262 = vector.load %arg12[%c0_237, %c110_238] : memref<32x512xf32, #tpu.memory_space<vmem>>, vector<32x288xf32>
    %263 = arith.truncf %262 : vector<32x288xf32> to vector<32x288xbf16>
    %c0_239 = arith.constant 0 : index
    %c111_240 = arith.constant 111 : index
    %264 = vector.load %arg12[%c0_239, %c111_240] : memref<32x512xf32, #tpu.memory_space<vmem>>, vector<32x288xf32>
    %265 = arith.truncf %264 : vector<32x288xf32> to vector<32x288xbf16>
    %c0_241 = arith.constant 0 : index
    %c127_242 = arith.constant 127 : index
    %266 = vector.load %arg12[%c0_241, %c127_242] : memref<32x512xf32, #tpu.memory_space<vmem>>, vector<32x288xf32>
    %267 = arith.truncf %266 : vector<32x288xf32> to vector<32x288xbf16>
    %c0_243 = arith.constant 0 : index
    %c128_244 = arith.constant 128 : index
    %268 = vector.load %arg12[%c0_243, %c128_244] : memref<32x512xf32, #tpu.memory_space<vmem>>, vector<32x288xf32>
    %269 = arith.truncf %268 : vector<32x288xf32> to vector<32x288xbf16>
    %c0_245 = arith.constant 0 : index
    %c129_246 = arith.constant 129 : index
    %270 = vector.load %arg12[%c0_245, %c129_246] : memref<32x512xf32, #tpu.memory_space<vmem>>, vector<32x288xf32>
    %271 = arith.truncf %270 : vector<32x288xf32> to vector<32x288xbf16>
    %c0_247 = arith.constant 0 : index
    %c145_248 = arith.constant 145 : index
    %272 = vector.load %arg12[%c0_247, %c145_248] : memref<32x512xf32, #tpu.memory_space<vmem>>, vector<32x288xf32>
    %273 = arith.truncf %272 : vector<32x288xf32> to vector<32x288xbf16>
    %c0_249 = arith.constant 0 : index
    %c146_250 = arith.constant 146 : index
    %274 = vector.load %arg12[%c0_249, %c146_250] : memref<32x512xf32, #tpu.memory_space<vmem>>, vector<32x288xf32>
    %275 = arith.truncf %274 : vector<32x288xf32> to vector<32x288xbf16>
    %c0_251 = arith.constant 0 : index
    %c147_252 = arith.constant 147 : index
    %276 = vector.load %arg12[%c0_251, %c147_252] : memref<32x512xf32, #tpu.memory_space<vmem>>, vector<32x288xf32>
    %277 = arith.truncf %276 : vector<32x288xf32> to vector<32x288xbf16>
    %278 = tpu.concatenate %261, %263, %265, %267, %269, %271, %273, %275, %277 in 0 : vector<32x288xbf16>, vector<32x288xbf16>, vector<32x288xbf16>, vector<32x288xbf16>, vector<32x288xbf16>, vector<32x288xbf16>, vector<32x288xbf16>, vector<32x288xbf16>, vector<32x288xbf16> -> vector<288x288xbf16>
    %cst_253 = arith.constant dense<0.000000e+00> : vector<32x288xf32>
    %279 = tpu.matmul %257, %278, %cst_253 {dimension_numbers = #tpu.dot_dimension_numbers<[1], [0], [0], [1], [0, 0, 1, 1], [], []>} : vector<32x288xbf16>, vector<288x288xbf16>, vector<32x288xf32> -> vector<32x288xf32>
    %280 = vector.broadcast %259 : vector<32x1xf32> to vector<32x288xf32>
    %281 = arith.addf %279, %280 : vector<32x288xf32>
    %c0_254 = arith.constant 0 : index
    %c128_255 = arith.constant 128 : index
    %282 = vector.load %arg11[%c0_254, %c128_255] : memref<32x512xf32, #tpu.memory_space<vmem>>, vector<32x288xf32>
    %283 = arith.mulf %281, %8 : vector<32x288xf32>
    %284 = arith.addf %282, %283 : vector<32x288xf32>
    %c0_256 = arith.constant 0 : index
    %c128_257 = arith.constant 128 : index
    %285 = vector.load %arg11[%c0_256, %c128_257] : memref<32x512xf32, #tpu.memory_space<vmem>>, vector<32x288xf32>
    tpu.vector_store %arg11[%c0_256, %c128_257], %284 {strides = array<i32>} : memref<32x512xf32, #tpu.memory_space<vmem>>, vector<32x288xf32>,
    %c0_258 = arith.constant 0 : index
    %c0_259 = arith.constant 0 : index
    %286 = vector.load %arg8[%c0_258, %c0_259] : memref<4x288xbf16, #tpu.memory_space<vmem>>, vector<4x288xbf16>
    %c0_260 = arith.constant 0 : index
    %c0_261 = arith.constant 0 : index
    %287 = vector.load %arg9[%c0_260, %c0_261] : memref<4x1xf32, #tpu.memory_space<vmem>>, vector<4x1xf32>
    %c0_262 = arith.constant 0 : index
    %c109_263 = arith.constant 109 : index
    %288 = vector.load %arg11[%c0_262, %c109_263] : memref<32x512xf32, #tpu.memory_space<vmem>>, vector<32x288xf32>
    %289 = arith.truncf %288 : vector<32x288xf32> to vector<32x288xbf16>
    %c0_264 = arith.constant 0 : index
    %c110_265 = arith.constant 110 : index
    %290 = vector.load %arg11[%c0_264, %c110_265] : memref<32x512xf32, #tpu.memory_space<vmem>>, vector<32x288xf32>
    %291 = arith.truncf %290 : vector<32x288xf32> to vector<32x288xbf16>
    %c0_266 = arith.constant 0 : index
    %c111_267 = arith.constant 111 : index
    %292 = vector.load %arg11[%c0_266, %c111_267] : memref<32x512xf32, #tpu.memory_space<vmem>>, vector<32x288xf32>
    %293 = arith.truncf %292 : vector<32x288xf32> to vector<32x288xbf16>
    %c0_268 = arith.constant 0 : index
    %c127_269 = arith.constant 127 : index
    %294 = vector.load %arg11[%c0_268, %c127_269] : memref<32x512xf32, #tpu.memory_space<vmem>>, vector<32x288xf32>
    %295 = arith.truncf %294 : vector<32x288xf32> to vector<32x288xbf16>
    %c0_270 = arith.constant 0 : index
    %c128_271 = arith.constant 128 : index
    %296 = vector.load %arg11[%c0_270, %c128_271] : memref<32x512xf32, #tpu.memory_space<vmem>>, vector<32x288xf32>
    %297 = arith.truncf %296 : vector<32x288xf32> to vector<32x288xbf16>
    %c0_272 = arith.constant 0 : index
    %c129_273 = arith.constant 129 : index
    %298 = vector.load %arg11[%c0_272, %c129_273] : memref<32x512xf32, #tpu.memory_space<vmem>>, vector<32x288xf32>
    %299 = arith.truncf %298 : vector<32x288xf32> to vector<32x288xbf16>
    %c0_274 = arith.constant 0 : index
    %c145_275 = arith.constant 145 : index
    %300 = vector.load %arg11[%c0_274, %c145_275] : memref<32x512xf32, #tpu.memory_space<vmem>>, vector<32x288xf32>
    %301 = arith.truncf %300 : vector<32x288xf32> to vector<32x288xbf16>
    %c0_276 = arith.constant 0 : index
    %c146_277 = arith.constant 146 : index
    %302 = vector.load %arg11[%c0_276, %c146_277] : memref<32x512xf32, #tpu.memory_space<vmem>>, vector<32x288xf32>
    %303 = arith.truncf %302 : vector<32x288xf32> to vector<32x288xbf16>
    %c0_278 = arith.constant 0 : index
    %c147_279 = arith.constant 147 : index
    %304 = vector.load %arg11[%c0_278, %c147_279] : memref<32x512xf32, #tpu.memory_space<vmem>>, vector<32x288xf32>
    %305 = arith.truncf %304 : vector<32x288xf32> to vector<32x288xbf16>
    %306 = tpu.concatenate %289, %291, %293, %295, %297, %299, %301, %303, %305 in 0 : vector<32x288xbf16>, vector<32x288xbf16>, vector<32x288xbf16>, vector<32x288xbf16>, vector<32x288xbf16>, vector<32x288xbf16>, vector<32x288xbf16>, vector<32x288xbf16>, vector<32x288xbf16> -> vector<288x288xbf16>
    %cst_280 = arith.constant dense<0.000000e+00> : vector<4x288xf32>
    %307 = tpu.matmul %286, %306, %cst_280 {dimension_numbers = #tpu.dot_dimension_numbers<[1], [0], [0], [1], [0, 0, 1, 1], [], []>} : vector<4x288xbf16>, vector<288x288xbf16>, vector<4x288xf32> -> vector<4x288xf32>
    %308 = vector.broadcast %287 : vector<4x1xf32> to vector<4x288xf32>
    %309 = arith.addf %307, %308 : vector<4x288xf32>
    %c0_281 = arith.constant 0 : index
    %c0_282 = arith.constant 0 : index
    %c0_283 = arith.constant 0 : index
    %310 = vector.load %arg1[%c0_281, %c0_282, %c0_283] : memref<1x4x324xf32, #tpu.memory_space<vmem>>, vector<1x4x324xf32>
    %311 = vector.shape_cast %310 : vector<1x4x324xf32> to vector<4x324xf32>
    %312 = vector.extract_strided_slice %311 {offsets = [0, 18], sizes = [4, 288], strides = [1, 1]} : vector<4x324xf32> to vector<4x288xf32>
    %313 = arith.addf %309, %312 : vector<4x288xf32>
    %c0_284 = arith.constant 0 : index
    %c0_285 = arith.constant 0 : index
    %c0_286 = arith.constant 0 : index
    %314 = vector.load %arg10[%c0_284, %c0_285, %c0_286] : memref<1x4x288xf32, #tpu.memory_space<vmem>>, vector<1x4x288xf32>
    %315 = vector.shape_cast %314 : vector<1x4x288xf32> to vector<4x288xf32>
    %316 = vector.shape_cast %313 : vector<4x288xf32> to vector<1x4x288xf32>
    tpu.vector_store %arg10[%c0_284, %c0_285, %c0_286], %316 {strides = array<i32>} : memref<1x4x288xf32, #tpu.memory_space<vmem>>, vector<1x4x288xf32>,
    return
  }
  func.func @transform_0(%arg0: i32) -> (i32, i32, i32) {
    %c0_i32 = arith.constant 0 : i32
    %c0_i32_0 = arith.constant 0 : i32
    %c0_i32_1 = arith.constant 0 : i32
    return %arg0, %c0_i32, %c0_i32_0 : i32, i32, i32
  }
  func.func @transform_1(%arg0: i32) -> (i32, i32, i32) {
    %c0_i32 = arith.constant 0 : i32
    %c0_i32_0 = arith.constant 0 : i32
    %c0_i32_1 = arith.constant 0 : i32
    return %arg0, %c0_i32, %c0_i32_0 : i32, i32, i32
  }
  func.func @transform_2(%arg0: i32) -> (i32, i32) {
    %c0_i32 = arith.constant 0 : i32
    %c0_i32_0 = arith.constant 0 : i32
    %c0_i32_1 = arith.constant 0 : i32
    return %c0_i32, %c0_i32_0 : i32, i32
  }
  func.func @transform_3(%arg0: i32) -> (i32, i32) {
    %c0_i32 = arith.constant 0 : i32
    %c0_i32_0 = arith.constant 0 : i32
    %c0_i32_1 = arith.constant 0 : i32
    return %c0_i32, %c0_i32_0 : i32, i32
  }
  func.func @transform_4(%arg0: i32) -> (i32, i32) {
    %c0_i32 = arith.constant 0 : i32
    %c0_i32_0 = arith.constant 0 : i32
    %c0_i32_1 = arith.constant 0 : i32
    return %c0_i32, %c0_i32_0 : i32, i32
  }
  func.func @transform_5(%arg0: i32) -> (i32, i32, i32) {
    %c0_i32 = arith.constant 0 : i32
    %c0_i32_0 = arith.constant 0 : i32
    %c0_i32_1 = arith.constant 0 : i32
    %c0_i32_2 = arith.constant 0 : i32
    return %c0_i32, %c0_i32_0, %c0_i32_1 : i32, i32, i32
  }
  func.func @transform_6(%arg0: i32) -> (i32, i32, i32) {
    %c0_i32 = arith.constant 0 : i32
    %c0_i32_0 = arith.constant 0 : i32
    %c0_i32_1 = arith.constant 0 : i32
    %c0_i32_2 = arith.constant 0 : i32
    return %c0_i32, %c0_i32_0, %c0_i32_1 : i32, i32, i32
  }
  func.func @transform_7(%arg0: i32) -> (i32, i32) {
    %c0_i32 = arith.constant 0 : i32
    %c0_i32_0 = arith.constant 0 : i32
    %c0_i32_1 = arith.constant 0 : i32
    return %c0_i32, %c0_i32_0 : i32, i32
  }
  func.func @transform_8(%arg0: i32) -> (i32, i32) {
    %c0_i32 = arith.constant 0 : i32
    %c0_i32_0 = arith.constant 0 : i32
    %c0_i32_1 = arith.constant 0 : i32
    return %c0_i32, %c0_i32_0 : i32, i32
  }
  func.func @transform_9(%arg0: i32) -> (i32, i32, i32) {
    %c0_i32 = arith.constant 0 : i32
    %c0_i32_0 = arith.constant 0 : i32
    %c0_i32_1 = arith.constant 0 : i32
    return %arg0, %c0_i32, %c0_i32_0 : i32, i32, i32
  }
}

</mosaic_0001>

<bundles_post_ra>
// kernel: fusionnet_forward.1
= control target key start
LH: loop header
LB: loop body
LE: loop exit
PB: predicated region body
PF: predicated region fallthrough
CT: control target
= control target key end

     0   :  { %s8780_s30 = smov 0   ;;  %s13944_s0 = inlined_call_operand.vmem [shape: f32[2,4,324], index: 0, kind: input, shape index: {}]   ;;  %s13945_s1 = inlined_call_operand.vmem [shape: f32[2,1,324], index: 1, kind: input, shape index: {}]   ;;  %s13946_s2 = inlined_call_operand.vmem [shape: f32[1,288], index: 2, kind: input, shape index: {}]   ;;  %s13947_s3 = inlined_call_operand.vmem [shape: bf16[32,288], index: 3, kind: input, shape index: {}]   ;;  %s13948_s4 = inlined_call_operand.vmem [shape: f32[32,1], index: 4, kind: input, shape index: {}]   ;;  %s13949_s5 = inlined_call_operand.vmem [shape: bf16[8,32,288], index: 5, kind: input, shape index: {}]   ;;  %s13950_s6 = inlined_call_operand.vmem [shape: f32[8,32,1], index: 6, kind: input, shape index: {}]   ;;  %s13951_s7 = inlined_call_operand.vmem [shape: bf16[4,288], index: 7, kind: input, shape index: {}]   ;;  %s13952_s8 = inlined_call_operand.vmem [shape: f32[4,1], index: 8, kind: input, shape index: {}]   ;;  %s13953_s9 = inlined_call_operand.vmem [shape: f32[2,4,288], index: 9, kind: output, shape index: {}]  }
   0x1 LB: > { %s7880_s10 = sadd.s32 4294967295, %s8714_s30   ;;  %p7884_p0 = scmp.ge.s32.totalorder %s8714_s30, 1  ;;  %s8714_s30 = sphi %s8780_s30, %s19_s30  }
   0x2   : > { %p296_p1 = scmp.lt.s32.totalorder %s8714_s30, 3 }
   0x4   : > { %p297_p2 = pnand %p7884_p0, %p296_p1 }
   0x5   : > { %v370_v0 = vlaneseq (!%p297_p2)  ;;  %vm355_vm0 = vcmask (!%p297_p2), 1047808   ;;  %v8716_v1 = vmov (!%p297_p2), 0.0   ;;  %p8797_p3 = scmp.lt.s32.totalorder (!%p297_p2), %s7880_s10, 1  ;;  %vm442_vm1 = vcmask (!%p297_p2), 408576   ;;  %s8718_s12 = smov (!%p297_p2), 127  }
   0x6   : > { %300 = sbr.rel (%p297_p2) target bundleno = 6479 (0x194f), region = 56  ;;  %351 = vst [vmem:[#allocation2] sm:$0xff] (!%p297_p2), %v8716_v1  ;;  %360 = vst [vmem:[#allocation3] sm:$0xff] (!%p297_p2), %v8716_v1  ;;  %vm438_vm2 = vcmask (!%p297_p2), 1048432   ;;  %vm432_vm3 = vcmask (!%p297_p2), 1048436   ;;  %v8717_v3 = vmov (!%p297_p2), 0.0|0.0  }
   0x7   : > { %361 = vst [vmem:[#allocation3 + $0x20] sm:$0xff] (!%p297_p2), %v8716_v1  ;;  %362 = vst [vmem:[#allocation3 + $0x40] sm:$0xff] (!%p297_p2), %v8716_v1  ;;  %v8817_v2 = vshrl.u32 (!%p297_p2), %v370_v0, 7  ;;  %508 = vrot.lane.b32.xlu0 (!%p297_p2), %v8717_v3, %s8718_s12  ;;  %506 = vrot.lane.b32.xlu1 (!%p297_p2), %v8717_v3, %s8718_s12  ;;  %vm436_vm4 = vcmask (!%p297_p2), 408580   ;;  %s8719_s15 = smov (!%p297_p2), 126   ;;  %s8720_s22 = smov (!%p297_p2), 110  }
   0x8   : > { %363 = vst [vmem:[#allocation3 + $0x60] sm:$0xff] (!%p297_p2), %v8716_v1  ;;  %434 = vst [vmem:[#allocation3 + $0x8] sm:$0xf0] (!%p297_p2), %v8716_v1  ;;  %s8721_s23 = smov (!%p297_p2), 109   ;;  %s8722_s24 = smov (!%p297_p2), 108   ;;  %vm512_vm5 = vcmask (!%p297_p2), 1039360  }
   0x9   : > { %435 = vst [vmem:[#allocation3 + $0x10] sm:$0xf0] (!%p297_p2), %v8716_v1  ;;  %366 = vst.msk [vmem:[#allocation3 + $0x58] sm:$0xff] (!%p297_p2), %vm355_vm0, %v8716_v1  ;;  %v372_v4 = vsub.s32 (!%p297_p2), 0, %v8817_v2  ;;  %v380_v5 = vsub.s32 (!%p297_p2), 2, %v8817_v2  ;;  %v376_v6 = vsub.s32 (!%p297_p2), 1, %v8817_v2 }
   0xa   : > { %367 = vst.msk [vmem:[#allocation3 + $0x78] sm:$0xff] (!%p297_p2), %vm355_vm0, %v8716_v1  ;;  %356 = vst.msk [vmem:[#allocation2 + $0x18] sm:$0xff] (!%p297_p2), %vm355_vm0, %v8716_v1  ;;  %s8723_s25 = smov (!%p297_p2), 92   ;;  %s8724_s26 = smov (!%p297_p2), 91   ;;  %vm426_vm6 = vcmask (!%p297_p2), 1044336   ;;  %vm430_vm7 = vcmask (!%p297_p2), 404480  }
   0xb   : > { %357 = vst.msk [vmem:[#allocation2 + $0x38] sm:$0xff] (!%p297_p2), %vm355_vm0, %v8716_v1  ;;  %358 = vst.msk [vmem:[#allocation2 + $0x58] sm:$0xff] (!%p297_p2), %vm355_vm0, %v8716_v1  ;;  %529 = vrot.lane.b32.xlu1 (!%p297_p2), %v8717_v3, %s8719_s15  ;;  %s8725_s27 = smov (!%p297_p2), 19   ;;  %s8726_s28 = smov (!%p297_p2), 90   ;;  %vm419_vm8 = vcmask (!%p297_p2), 900096   ;;  %vm535_vm9 = vcmask (!%p297_p2), 1031168  }
   0xc   : > { %359 = vst.msk [vmem:[#allocation2 + $0x78] sm:$0xff] (!%p297_p2), %vm355_vm0, %v8716_v1  ;;  %364 = vst.msk [vmem:[#allocation3 + $0x18] sm:$0xff] (!%p297_p2), %vm355_vm0, %v8716_v1  ;;  %vm577_vm10 = vcmask (!%p297_p2), 891904   ;;  %vm594_vm11 = vcmask (!%p297_p2), 883712   ;;  %vm611_vm12 = vcmask (!%p297_p2), 752640   ;;  %vm844_vm13 = vcmask (!%p297_p2), 154624  }
   0xd   : > { %365 = vst.msk [vmem:[#allocation3 + $0x38] sm:$0xff] %vm355_vm0, %v8716_v1  ;;  %s13956_s10 = smov (!%p8797_p3, %s7880_s10), 1  ;;  %vm628_vm14 = vcmask 744448   ;;  %vm645_vm15 = vcmask 736256   ;;  %vm953_vm0 = vcmask 261120  }
   0xe   : > { %447 = vst.msk [vmem:[#allocation3 + $0x58] sm:$0xff] %vm442_vm1, %v8716_v1  ;;  %451 = vst.msk [vmem:[#allocation3 + $0x78] sm:$0xff] %vm442_vm1, %v8716_v1  ;;  %s8602_s13 = smul.u32 12, %s13956_s10 }
   0xf   : > { %444 = vst.msk [vmem:[#allocation3 + $0x40] sm:$0xff] %vm438_vm2, %v8716_v1  ;;  %448 = vst.msk [vmem:[#allocation3 + $0x60] sm:$0xff] %vm438_vm2, %v8716_v1  ;;  %s8603_s14 = smul.u32 3, %s13956_s10 }
  0x10   : > { %439 = vst.msk [vmem:[#allocation3 + $0x20] sm:$0xff] %vm438_vm2, %v8716_v1  ;;  %s8849_s18 = scalar_lea.vmem %s13944_s0, %s8602_s13  ;;  %vm7811_vm2 = vcmask 257024  }
  0x11   : > { %443 = vst.msk [vmem:[#allocation3 + $0x38] sm:$0xff] %vm442_vm1, %v8716_v1  ;;  %s344_s21 = scalar_lea.vmem %s13945_s1, %s8603_s14  ;;  %v386_v8 = vld [vmem:[%s8849_s18] sm:$0xff]  ;;  %v387_v9 = vld [vmem:[%s8849_s18 + $0x8] sm:$0xf]  ;;  %vm8729_vm1 = vmmov 0  }
  0x12   : > { %433 = vst.msk [vmem:[#allocation3] sm:$0xf0] %vm432_vm3, %v8716_v1  ;;  %v385_v7 = vld [vmem:[%s344_s21] sm:$0x7]  ;;  %v405_v13 = vcombine.high %v386_v8, %v386_v8 }
  0x13   : > { %437 = vst.msk [vmem:[#allocation3 + $0x18] sm:$0xf0] %vm436_vm4, %v8716_v1  ;;  %v392_v10 = vrot.slane %v385_v7, %v372_v4  ;;  %v400_v11 = vrot.slane %v385_v7, %v380_v5  ;;  %v396_v12 = vrot.slane %v385_v7, %v376_v6 }
  0x15   : > { %v475_v14 = vld [vmem:[#allocation3 + $0x58] sm:$0xff]  ;;  %v407_v16 = vsub.f32 %v392_v10, %v386_v8  ;;  %v409_v17 = vsub.f32 %v400_v11, %v387_v9  ;;  %v408_v19 = vsub.f32 %v396_v12, %v405_v13 }
  0x16   : > { %v479_v15 = vld [vmem:[#allocation3 + $0x78] sm:$0xff]  ;;  %v472_v18 = vld [vmem:[#allocation3 + $0x40] sm:$0xff] }
  0x17   : > { %413 = vrot.lane.b32.xlu0 %v407_v16, %s8720_s22  ;;  %417 = vrot.lane.b32.xlu1 %v409_v17, %s8720_s22  ;;  %v8864_v20 = vpack.c.bf16 %v479_v15, %v475_v14  ;;  %v476_v21 = vld [vmem:[#allocation3 + $0x60] sm:$0xff] }
  0x18   : > { %v484_v22 = vpack.c.bf16 %v476_v21, %v472_v18  ;;  %v471_v37 = vld [vmem:[#allocation3 + $0x38] sm:$0xff]  ;;  %v468_v43 = vld [vmem:[#allocation3 + $0x20] sm:$0xff] }
  0x1b   : > { %415 = vrot.lane.b32.xlu0 %v408_v19, %s8720_s22  ;;  %510 = vrot.lane.b32.xlu1 %v8864_v20, %s8718_s12 }
  0x1f   : > { %504 = vrot.lane.b32.xlu0 %v484_v22, %s8718_s12  ;;  %533 = vrot.lane.b32.xlu1 %v8864_v20, %s8719_s15 }
  0x23   : > { %531 = vrot.lane.b32.xlu0 %v8717_v3, %s8719_s15  ;;  %552 = vrot.lane.b32.xlu1 %v8717_v3, %s8720_s22 }
  0x27   : > { %527 = vrot.lane.b32.xlu0 %v484_v22, %s8719_s15  ;;  %556 = vrot.lane.b32.xlu1 %v8864_v20, %s8720_s22 }
  0x2b   : > { %554 = vrot.lane.b32.xlu0 %v8717_v3, %s8720_s22  ;;  %573 = vrot.lane.b32.xlu1 %v8717_v3, %s8721_s23 }
  0x2f   : > { %550 = vrot.lane.b32.xlu0 %v484_v22, %s8720_s22  ;;  %590 = vrot.lane.b32.xlu1 %v8717_v3, %s8722_s24 }
  0x33   : > { %571 = vrot.lane.b32.xlu0 %v8717_v3, %s8721_s23  ;;  %607 = vrot.lane.b32.xlu1 %v8717_v3, %s8723_s25 }
  0x37   : > { %575 = vrot.lane.b32.xlu0 %v8864_v20, %s8721_s23  ;;  %624 = vrot.lane.b32.xlu1 %v8717_v3, %s8724_s26 }
  0x3b   : > { %588 = vrot.lane.b32.xlu0 %v8717_v3, %s8722_s24  ;;  %712 = vrot.lane.b32.xlu1 %v8717_v3, %s8725_s27 }
  0x3f   : > { %592 = vrot.lane.b32.xlu0 %v8864_v20, %s8722_s24  ;;  %641 = vrot.lane.b32.xlu1 %v8717_v3, %s8726_s28 }
  0x43   : > { %605 = vrot.lane.b32.xlu0 %v8717_v3, %s8723_s25 }
  0x47   : > { %609 = vrot.lane.b32.xlu0 %v8864_v20, %s8723_s25 }
  0x4b   : > { %622 = vrot.lane.b32.xlu0 %v8717_v3, %s8724_s26 }
  0x4f   : > { %626 = vrot.lane.b32.xlu0 %v8864_v20, %s8724_s26 }
  0x53   : > { %710 = vrot.lane.b32.xlu0 %v8717_v3, %s8725_s27 }
  0x57   : > { %708 = vrot.lane.b32.xlu0 %v484_v22, %s8725_s27 }
  0x5b   : > { %639 = vrot.lane.b32.xlu0 %v8717_v3, %s8726_s28 }
  0x5f   : > { %643 = vrot.lane.b32.xlu0 %v8864_v20, %s8726_s28 }
  0x79   : > { %v509_v23 = vpop.permute.xlu0 %508  ;;  %v507_v24 = vpop.permute.xlu1 %506 }
  0x7a   : > { %v517_v25 = vsel %vm512_vm5, %v507_v24, %v509_v23 }
  0x7b   : > { %726 = vrot.lane.b32.xlu0 %v517_v25, %s8725_s27 }
  0x7d   : > { %v8919_v26 = vpop.permute.xlu1 %529 }
  0x89   : > { %v414_v27 = vpop.permute.xlu0 %413  ;;  %v418_v28 = vpop.permute.xlu1 %417 }
  0x8a   : > { %427 = vst.msk [vmem:[#allocation3] sm:$0xf] %vm426_vm6, %v414_v27 }
  0x8b   : > { %431 = vst.msk [vmem:[#allocation3 + $0x18] sm:$0xf] %vm430_vm7, %v418_v28 }
  0x8d   : > { %v416_v29 = vpop.permute.xlu0 %415  ;;  %v8921_v30 = vpop.permute.xlu1 %510 }
  0x8e   : > { %v420_v31 = vsel %vm419_vm8, %v414_v27, %v416_v29  ;;  %v421_v32 = vsel %vm419_vm8, %v416_v29, %v418_v28  ;;  %v518_v33 = vsel %vm512_vm5, %v509_v23, %v8921_v30 }
  0x8f   : > { %428 = vst [vmem:[#allocation3 + $0x8] sm:$0xf] %v420_v31  ;;  %429 = vst [vmem:[#allocation3 + $0x10] sm:$0xf] %v421_v32  ;;  %728 = vrot.lane.b32.xlu1 %v518_v33, %s8725_s27 }
  0x91   : > { %v505_v34 = vpop.permute.xlu0 %504  ;;  %v8930_v36 = vpop.permute.xlu1 %533  ;;  %v464_v42 = vld [vmem:[#allocation3] sm:$0xff] }
  0x92   : > { %v516_v35 = vsel %vm512_vm5, %v505_v34, %v507_v24  ;;  %v467_v39 = vld [vmem:[#allocation3 + $0x18] sm:$0xff]  ;;  %v480_v45 = vpack.c.bf16 %v468_v43, %v464_v42 }
  0x93   : > { %724 = vrot.lane.b32.xlu1 %v516_v35, %s8725_s27  ;;  %v8938_v44 = vpack.c.bf16 %v471_v37, %v467_v39 }
  0x95   : > { %v532_v38 = vpop.permute.xlu0 %531  ;;  %v553_v55 = vpop.permute.xlu1 %552 }
  0x96   : > { %v540_v40 = vsel %vm535_vm9, %v8919_v26, %v532_v38  ;;  %v541_v41 = vsel %vm535_vm9, %v532_v38, %v8930_v36  ;;  %v466_v46 = vld [vmem:[#allocation3 + $0x10] sm:$0xff]  ;;  %v465_v50 = vld [vmem:[#allocation3 + $0x8] sm:$0xff] }
  0x97   : > { %742 = vrot.lane.b32.xlu0 %v540_v40, %s8725_s27  ;;  %744 = vrot.lane.b32.xlu1 %v541_v41, %s8725_s27  ;;  %v482_v47 = vpack.c.bf16 %v8716_v1, %v466_v46  ;;  %v481_v52 = vpack.c.bf16 %v8716_v1, %v465_v50 }
  0x99   : > { %v528_v48 = vpop.permute.xlu0 %527  ;;  %v8980_v58 = vpop.permute.xlu1 %556 }
  0x9a   : > { %v539_v57 = vsel %vm535_vm9, %v528_v48, %v8919_v26 }
  0x9b   : > { %496 = vrot.lane.b32.xlu0 %v480_v45, %s8718_s12  ;;  %502 = vrot.lane.b32.xlu1 %v8938_v44, %s8718_s12 }
  0x9d   : > { %v555_v49 = vpop.permute.xlu0 %554  ;;  %v574_v62 = vpop.permute.xlu1 %573 }
  0x9e   : > { %v563_v60 = vsel %vm419_vm8, %v553_v55, %v555_v49  ;;  %v564_v1 = vsel %vm419_vm8, %v555_v49, %v8980_v58 }
  0x9f   : > { %519 = vrot.lane.b32.xlu0 %v480_v45, %s8719_s15  ;;  %525 = vrot.lane.b32.xlu1 %v8938_v44, %s8719_s15 }
  0xa1   : > { %v551_v51 = vpop.permute.xlu0 %550  ;;  %v591_v9 = vpop.permute.xlu1 %590 }
  0xa2   : > { %v562_v61 = vsel %vm419_vm8, %v551_v51, %v553_v55 }
  0xa3   : > { %542 = vrot.lane.b32.xlu0 %v480_v45, %s8720_s22  ;;  %548 = vrot.lane.b32.xlu1 %v8938_v44, %s8720_s22 }
  0xa5   : > { %v572_v53 = vpop.permute.xlu0 %571  ;;  %v9011_v12 = vpop.permute.xlu1 %607 }
  0xa6   : > { %v580_v7 = vsel %vm577_vm10, %v572_v53, %v574_v62 }
  0xa7   : > { %637 = vrot.lane.b32.xlu0 %v8938_v44, %s8726_s28  ;;  %569 = vrot.lane.b32.xlu1 %v8938_v44, %s8721_s23 }
  0xa9   : > { %v576_v54 = vpop.permute.xlu0 %575  ;;  %v9021_v15 = vpop.permute.xlu1 %624 }
  0xaa   : > { %v581_v0 = vsel %vm577_vm10, %v574_v62, %v576_v54 }
  0xab   : > { %500 = vrot.lane.b32.xlu0 %v482_v47, %s8718_s12  ;;  %586 = vrot.lane.b32.xlu1 %v8938_v44, %s8722_s24 }
  0xad   : > { %v589_v56 = vpop.permute.xlu0 %588  ;;  %v9026_v17 = vpop.permute.xlu1 %712 }
  0xae   : > { %v597_v13 = vsel %vm594_vm11, %v589_v56, %v591_v9 }
  0xaf   : > { %523 = vrot.lane.b32.xlu0 %v482_v47, %s8719_s15  ;;  %603 = vrot.lane.b32.xlu1 %v8938_v44, %s8723_s25 }
  0xb1   : > { %v593_v59 = vpop.permute.xlu0 %592  ;;  %v9030_v19 = vpop.permute.xlu1 %641 }
  0xb2   : > { %v598_v10 = vsel %vm594_vm11, %v591_v9, %v593_v59 }
  0xb3   : > { %546 = vrot.lane.b32.xlu0 %v482_v47, %s8720_s22  ;;  %620 = vrot.lane.b32.xlu1 %v8938_v44, %s8724_s26 }
  0xb5   : > { %v8986_v63 = vpop.permute.xlu0 %605 }
  0xb6   : > { %v614_v62 = vsel %vm611_vm12, %v8986_v63, %v9011_v12 }
  0xb7   : > { %567 = vrot.lane.b32.xlu0 %v482_v47, %s8721_s23  ;;  %700 = vrot.lane.b32.xlu1 %v480_v45, %s8725_s27 }
  0xb9   : > { %v8994_v3 = vpop.permute.xlu0 %609 }
  0xba   : > { %v615_v49 = vsel %vm611_vm12, %v9011_v12, %v8994_v3 }
  0xbb   : > { %584 = vrot.lane.b32.xlu0 %v482_v47, %s8722_s24  ;;  %498 = vrot.lane.b32.xlu1 %v481_v52, %s8718_s12 }
  0xbd   : > { %v9000_v8 = vpop.permute.xlu0 %622 }
  0xbf   : > { %601 = vrot.lane.b32.xlu0 %v482_v47, %s8723_s25  ;;  %521 = vrot.lane.b32.xlu1 %v481_v52, %s8719_s15 }
  0xc1   : > { %v9006_v11 = vpop.permute.xlu0 %626 }
  0xc3   : > { %618 = vrot.lane.b32.xlu0 %v482_v47, %s8724_s26  ;;  %544 = vrot.lane.b32.xlu1 %v481_v52, %s8720_s22 }
  0xc5   : > { %v9016_v14 = vpop.permute.xlu0 %710 }
  0xc7   : > { %702 = vrot.lane.b32.xlu0 %v481_v52, %s8725_s27  ;;  %565 = vrot.lane.b32.xlu1 %v481_v52, %s8721_s23 }
  0xc9   : > { %v9023_v16 = vpop.permute.xlu0 %708 }
  0xca   : > { %v848_v9 = vsel %vm844_vm13, %v9023_v16, %v9016_v14 }
  0xcb   : > { %633 = vrot.lane.b32.xlu0 %v481_v52, %s8726_s28  ;;  %582 = vrot.lane.b32.xlu1 %v481_v52, %s8722_s24 }
  0xcd   : > { %v9028_v18 = vpop.permute.xlu0 %639 }
  0xcf   : > { %740 = vrot.lane.b32.xlu0 %v539_v57, %s8725_s27  ;;  %599 = vrot.lane.b32.xlu1 %v481_v52, %s8723_s25 }
  0xd3   : > { %758 = vrot.lane.b32.xlu0 %v563_v60, %s8725_s27  ;;  %616 = vrot.lane.b32.xlu1 %v481_v52, %s8724_s26 }
  0xd7   : > { %756 = vrot.lane.b32.xlu0 %v562_v61, %s8725_s27  ;;  %704 = vrot.lane.b32.xlu1 %v482_v47, %s8725_s27 }
  0xdb   : > { %776 = vrot.lane.b32.xlu0 %v581_v0, %s8725_s27  ;;  %760 = vrot.lane.b32.xlu1 %v564_v1, %s8725_s27 }
  0xdf   : > { %772 = vrot.lane.b32.xlu0 %v572_v53, %s8725_s27  ;;  %774 = vrot.lane.b32.xlu1 %v580_v7, %s8725_s27  ;;  %v849_v7 = vsel %vm844_vm13, %v9016_v14, %v9026_v17  ;;  %v632_v14 = vsel %vm628_vm14, %v9021_v15, %v9006_v11 }
  0xe3   : > { %714 = vrot.lane.b32.xlu0 %v8864_v20, %s8725_s27  ;;  %635 = vrot.lane.b32.xlu1 %v482_v47, %s8726_s28  ;;  %v9032_v20 = vpop.permute.xlu0 %643 }
  0xe7   : > { %792 = vrot.lane.b32.xlu0 %v598_v10, %s8725_s27  ;;  %706 = vrot.lane.b32.xlu1 %v8938_v44, %s8725_s27 }
  0xeb   : > { %788 = vrot.lane.b32.xlu0 %v589_v56, %s8725_s27  ;;  %778 = vrot.lane.b32.xlu1 %v576_v54, %s8725_s27 }
  0xed   : > { %v9036_v22 = vpop.permute.xlu0 %726 }
  0xef   : > { %730 = vrot.lane.b32.xlu0 %v8921_v30, %s8725_s27  ;;  %790 = vrot.lane.b32.xlu1 %v597_v13, %s8725_s27 }
  0xf3   : > { %794 = vrot.lane.b32.xlu1 %v593_v59, %s8725_s27 }
 0x101   : > { %v9034_v21 = vpop.permute.xlu1 %728 }
 0x105   : > { %v9038_v23 = vpop.permute.xlu1 %724 }
 0x109   : > { %v9040_v24 = vpop.permute.xlu0 %742  ;;  %v9042_v25 = vpop.permute.xlu1 %744 }
 0x10d   : > { %v497_v26 = vpop.permute.xlu0 %496  ;;  %v503_v27 = vpop.permute.xlu1 %502 }
 0x10e   : > { %722 = vrot.lane.b32.xlu1 %v503_v27, %s8725_s27 }
 0x111   : > { %v9045_v28 = vpop.permute.xlu0 %519  ;;  %v9047_v29 = vpop.permute.xlu1 %525 }
 0x115   : > { %v9049_v30 = vpop.permute.xlu0 %542  ;;  %v9051_v31 = vpop.permute.xlu1 %548 }
 0x119   : > { %v9053_v32 = vpop.permute.xlu0 %637  ;;  %v570_v33 = vpop.permute.xlu1 %569 }
 0x11a   : > { %770 = vrot.lane.b32.xlu0 %v570_v33, %s8725_s27 }
 0x11d   : > { %v9056_v34 = vpop.permute.xlu1 %586  ;;  %v501_v35 = vpop.permute.xlu0 %500 }
 0x11e   : > { %786 = vrot.lane.b32.xlu0 %v9056_v34, %s8725_s27  ;;  %v515_v38 = vsel %vm512_vm5, %v501_v35, %v503_v27 }
 0x121   : > { %v9060_v37 = vpop.permute.xlu1 %603  ;;  %v524_v39 = vpop.permute.xlu0 %523 }
 0x122   : > { %720 = vrot.lane.b32.xlu0 %v515_v38, %s8725_s27  ;;  %v538_v13 = vsel %vm535_vm9, %v524_v39, %v9047_v29 }
 0x125   : > { %v9064_v40 = vpop.permute.xlu1 %620  ;;  %v547_v42 = vpop.permute.xlu0 %546 }
 0x126   : > { %802 = vrot.lane.b32.xlu0 %v9060_v37, %s8725_s27  ;;  %v561_v51 = vsel %vm419_vm8, %v547_v42, %v9051_v31 }
 0x129   : > { %v701_v41 = vpop.permute.xlu1 %700  ;;  %v9068_v44 = vpop.permute.xlu0 %567 }
 0x12a   : > { %v579_v56 = vsel %vm577_vm10, %v9068_v44, %v570_v33 }
 0x12d   : > { %v499_v43 = vpop.permute.xlu1 %498  ;;  %v9072_v48 = vpop.permute.xlu0 %584 }
 0x12e   : > { %v514_v59 = vsel %vm512_vm5, %v499_v43, %v501_v35 }
 0x131   : > { %v522_v45 = vpop.permute.xlu1 %521  ;;  %v9082_v52 = vpop.permute.xlu0 %601 }
 0x132   : > { %v537_v46 = vsel %vm535_vm9, %v522_v45, %v524_v39  ;;  %v536_v16 = vsel %vm535_vm9, %v9045_v28, %v522_v45  ;;  %v631_v45 = vsel %vm628_vm14, %v9000_v8, %v9021_v15 }
 0x133   : > { %734 = vrot.lane.b32.xlu0 %v537_v46, %s8725_s27  ;;  %v8630_v46 = vld [vmem:[%s13947_s3 + $0x4] ss:$12 sps:$4 sm:$0xff]  }
 0x134   : > { %992 = vmatprep.mubr.bf16.mxu0 %v8630_v46  ;;  %1098 = vmatprep.mubr.bf16.mxu1 %v8630_v46 }
 0x135   : > { %v545_v47 = vpop.permute.xlu1 %544  ;;  %v9087_v55 = vpop.permute.xlu0 %618 }
 0x136   : > { %v559_v38 = vsel %vm419_vm8, %v9049_v30, %v545_v47 }
 0x137   : > { %808 = vrot.lane.b32.xlu0 %v615_v49, %s8725_s27 }
 0x139   : > { %v566_v50 = vpop.permute.xlu1 %565  ;;  %v703_v60 = vpop.permute.xlu0 %702 }
 0x13a   : > { %764 = vrot.lane.b32.xlu1 %v566_v50, %s8725_s27  ;;  %v578_v39 = vsel %vm577_vm10, %v566_v50, %v9068_v44  ;;  %v649_v44 = vsel %vm645_vm15, %v9030_v19, %v9032_v20  ;;  %v461_v50 = vld [vmem:[%s13948_s4 + $0x8] sm:$0xff] }
 0x13b   : > { %752 = vrot.lane.b32.xlu0 %v561_v51, %s8725_s27  ;;  %v460_v51 = vld [vmem:[%s13948_s4] sm:$0xff] }
 0x13d   : > { %v583_v53 = vpop.permute.xlu1 %582  ;;  %v634_v12 = vpop.permute.xlu0 %633 }
 0x13e   : > { %780 = vrot.lane.b32.xlu1 %v583_v53, %s8725_s27  ;;  %v595_v0 = vsel %vm594_vm11, %v583_v53, %v9072_v48  ;;  %v462_v53 = vld [vmem:[%s13948_s4 + $0x10] sm:$0xff] }
 0x13f   : > { %804 = vrot.lane.b32.xlu0 %v8986_v63, %s8725_s27  ;;  %v513_v63 = vsel %vm512_vm5, %v497_v26, %v499_v43  ;;  %v596_v43 = vsel %vm594_vm11, %v9072_v48, %v9056_v34 }
 0x141   : > { %v600_v54 = vpop.permute.xlu1 %599  ;;  %v9136_v27 = vpop.permute.xlu0 %740 }
 0x142   : > { %796 = vrot.lane.b32.xlu1 %v600_v54, %s8725_s27  ;;  %v612_v10 = vsel %vm611_vm12, %v600_v54, %v9082_v52 }
 0x143   : > { %768 = vrot.lane.b32.xlu0 %v579_v56, %s8725_s27 }
 0x145   : > { %v617_v57 = vpop.permute.xlu1 %616  ;;  %v9145_v35 = vpop.permute.xlu0 %758 }
 0x146   : > { %718 = vrot.lane.b32.xlu1 %v514_v59, %s8725_s27  ;;  %v629_v26 = vsel %vm628_vm14, %v617_v57, %v9087_v55 }
 0x147   : > { %746 = vrot.lane.b32.xlu0 %v8930_v36, %s8725_s27  ;;  %v845_v36 = vsel %vm844_vm13, %v701_v41, %v703_v60 }
 0x149   : > { %v9097_v61 = vpop.permute.xlu1 %704  ;;  %v9157_v41 = vpop.permute.xlu0 %756 }
 0x14a   : > { %806 = vrot.lane.b32.xlu1 %v614_v62, %s8725_s27  ;;  %v846_v1 = vsel %vm844_vm13, %v703_v60, %v9097_v61 }
 0x14b   : > { %782 = vrot.lane.b32.xlu0 %v595_v0, %s8725_s27  ;;  %960 = vmatprep.subr.bf16.mxu0 %v846_v1 }
 0x14c   : > { %961 = vmatpush1.bf16.msra.mxu0 %v845_v36 }
 0x14d   : > { %962 = vmatprep.subr.bf16.mxu0 %v849_v7  ;;  %v9138_v33 = vpop.permute.xlu1 %760 }
 0x14e   : > { %716 = vrot.lane.b32.xlu1 %v513_v63, %s8725_s27 }
 0x14f   : > { %818 = vrot.lane.b32.xlu0 %v9064_v40, %s8725_s27 }
 0x150   : > { %963 = vmatpush1.bf16.msra.mxu0 %v848_v9 }
 0x151   : > { %v9147_v28 = vpop.permute.xlu1 %774 }
 0x152   : > { %738 = vrot.lane.b32.xlu1 %v9047_v29, %s8725_s27  ;;  %v560_v29 = vsel %vm419_vm8, %v545_v47, %v547_v42  ;;  %v8727_v47 = vmov 0  }
 0x153   : > { %798 = vrot.lane.b32.xlu0 %v612_v10, %s8725_s27  ;;  %8625 = vset.pattern.permute.xlu1 %v8727_v47 }
 0x154   : > { %8626 = vset.pattern.permute.xlu0 %v8727_v47 }
 0x155   : > { %v636_v42 = vpop.permute.xlu1 %635 }
 0x156   : > { %736 = vrot.lane.b32.xlu1 %v538_v13, %s8725_s27  ;;  %v647_v30 = vsel %vm645_vm15, %v636_v42, %v9053_v32 }
 0x157   : > { %824 = vrot.lane.b32.xlu0 %v632_v14, %s8725_s27 }
 0x159   : > { %v707_v49 = vpop.permute.xlu1 %706 }
 0x15a   : > { %732 = vrot.lane.b32.xlu1 %v536_v16, %s8725_s27  ;;  %v847_v10 = vsel %vm844_vm13, %v9097_v61, %v707_v49 }
 0x15b   : > { %814 = vrot.lane.b32.xlu0 %v629_v26, %s8725_s27 }
 0x15e   : > { %750 = vrot.lane.b32.xlu1 %v560_v29, %s8725_s27 }
 0x15f   : > { %820 = vrot.lane.b32.xlu0 %v9000_v8, %s8725_s27 }
 0x162   : > { %748 = vrot.lane.b32.xlu1 %v559_v38, %s8725_s27 }
 0x163   : > { %762 = vrot.lane.b32.xlu0 %v8980_v58, %s8725_s27  ;;  %v9166_v58 = vpop.permute.xlu0 %776 }
 0x166   : > { %766 = vrot.lane.b32.xlu1 %v578_v39, %s8725_s27 }
 0x167   : > { %834 = vrot.lane.b32.xlu0 %v9053_v32, %s8725_s27  ;;  %v613_v32 = vsel %vm611_vm12, %v9082_v52, %v9060_v37  ;;  %v779_v52 = vpop.permute.xlu1 %778 }
 0x168   : > { %v874_v13 = vsel %vm844_vm13, %v9166_v58, %v779_v52 }
 0x16a   : > { %810 = vrot.lane.b32.xlu1 %v8994_v3, %s8725_s27  ;;  %v9177_v3 = vpop.permute.xlu0 %772 }
 0x16b   : > { %832 = vrot.lane.b32.xlu0 %v647_v30, %s8725_s27  ;;  %v9230_v54 = vpop.permute.xlu1 %790 }
 0x16e   : > { %784 = vrot.lane.b32.xlu1 %v596_v43, %s8725_s27  ;;  %v715_v34 = vpop.permute.xlu0 %714  ;;  %v854_v43 = vsel %vm844_vm13, %v9038_v23, %v9036_v22 }
 0x16f   : > { %840 = vrot.lane.b32.xlu0 %v649_v44, %s8725_s27  ;;  %v9237_v56 = vpop.permute.xlu1 %794  ;;  %v850_v26 = vsel %vm844_vm13, %v9026_v17, %v715_v34 }
 0x172   : > { %812 = vrot.lane.b32.xlu1 %v617_v57, %s8725_s27  ;;  %v9196_v37 = vpop.permute.xlu0 %792 }
 0x173   : > { %842 = vrot.lane.b32.xlu0 %v9032_v20, %s8725_s27  ;;  %v630_v20 = vsel %vm628_vm14, %v9087_v55, %v9064_v40  ;;  %v646_v40 = vsel %vm645_vm15, %v634_v12, %v636_v42  ;;  %v855_v42 = vsel %vm844_vm13, %v9036_v22, %v9034_v21  ;;  %v860_v22 = vsel %vm844_vm13, %v9136_v27, %v9040_v24 }
 0x176   : > { %800 = vrot.lane.b32.xlu1 %v613_v32, %s8725_s27  ;;  %v9200_v8 = vpop.permute.xlu0 %788 }
 0x177   : > { %657 = vperm.xlu0 %8626, %v461_v50   ;;  %v867_v50 = vsel %vm844_vm13, %v9145_v35, %v9138_v33 }
 0x17a   : > { %822 = vrot.lane.b32.xlu1 %v631_v45, %s8725_s27  ;;  %v9205_v15 = vpop.permute.xlu0 %730 }
 0x17e   : > { %816 = vrot.lane.b32.xlu1 %v630_v20, %s8725_s27  ;;  %v861_v20 = vsel %vm844_vm13, %v9040_v24, %v9042_v25  ;;  %v866_v24 = vsel %vm844_vm13, %v9157_v41, %v9145_v35 }
 0x180   : > { %v9239_v59 = vpop.permute.xlu1 %722 }
 0x182   : > { %754 = vrot.lane.b32.xlu1 %v9051_v31, %s8725_s27  ;;  %v648_v31 = vsel %vm645_vm15, %v9028_v18, %v9030_v19 }
 0x186   : > { %826 = vrot.lane.b32.xlu1 %v9006_v11, %s8725_s27 }
 0x18a   : > { %828 = vrot.lane.b32.xlu1 %v634_v12, %s8725_s27 }
 0x18c   : > { %v771_v48 = vpop.permute.xlu0 %770 }
 0x18e   : > { %830 = vrot.lane.b32.xlu1 %v646_v40, %s8725_s27 }
 0x190   : > { %v9215_v11 = vpop.permute.xlu0 %786 }
 0x192   : > { %838 = vrot.lane.b32.xlu1 %v648_v31, %s8725_s27 }
 0x194   : > { %v9225_v19 = vpop.permute.xlu0 %720 }
 0x196   : > { %836 = vrot.lane.b32.xlu1 %v9028_v18, %s8725_s27  ;;  %v463_v18 = vld [vmem:[%s13948_s4 + $0x18] sm:$0xff] }
 0x198   : > { %v9235_v55 = vpop.permute.xlu0 %802 }
 0x19a   : > { %652 = vperm.xlu1 %8625, %v460_v51  }
 0x19e   : > { %662 = vperm.xlu1 %8625, %v462_v53  }
 0x1a2   : > { %667 = vperm.xlu1 %8625, %v463_v18  }
 0x1a5   : > { %v735_v57 = vpop.permute.xlu0 %734 }
 0x1a9   : > { %v9241_v60 = vpop.permute.xlu0 %808 }
 0x1ac   : > { %v765_v62 = vpop.permute.xlu1 %764 }
 0x1ad   : > { %v9243_v0 = vpop.permute.xlu0 %752 }
 0x1b0   : > { %v9245_v1 = vpop.permute.xlu1 %780 }
 0x1b1   : > { %v9247_v36 = vpop.permute.xlu0 %804 }
 0x1b4   : > { %v9249_v7 = vpop.permute.xlu1 %796 }
 0x1b5   : > { %v769_v63 = vpop.permute.xlu0 %768 }
 0x1b6   : > { %v871_v9 = vsel %vm844_vm13, %v769_v63, %v771_v48 }
 0x1b7   : > { %8065 = vmatprep.subr.bf16.mxu1 %v871_v9  ;;  %v873_v9 = vsel %vm844_vm13, %v9147_v28, %v9166_v58  ;;  %v880_v58 = vsel %vm844_vm13, %v9196_v37, %v9237_v56  ;;  %v878_v56 = vsel %vm844_vm13, %v9200_v8, %v9230_v54 }
 0x1b8   : > { %v719_v12 = vpop.permute.xlu1 %718  ;;  %8066 = vmatpush3.bf16.msra.mxu1 %v847_v10 }
 0x1b9   : > { %8067 = vmatprep.subr.bf16.mxu1 %v874_v13  ;;  %v852_v14 = vsel %vm844_vm13, %v719_v12, %v9225_v19  ;;  %v9258_v16 = vpop.permute.xlu0 %746 }
 0x1ba   : > { %964 = vmatprep.subr.bf16.mxu0 %v852_v14 }
 0x1bc   : > { %v9262_v29 = vpop.permute.xlu1 %806  ;;  %8068 = vmatpush3.bf16.msra.mxu1 %v850_v26 }
 0x1bd   : > { %v783_v38 = vpop.permute.xlu0 %782 }
 0x1c0   : > { %v717_v61 = vpop.permute.xlu1 %716 }
 0x1c1   : > { %v851_v39 = vsel %vm844_vm13, %v717_v61, %v719_v12  ;;  %v9273_v17 = vpop.permute.xlu0 %818  ;;  %v872_v12 = vsel %vm844_vm13, %v9177_v3, %v9147_v28  ;;  %v875_v28 = vsel %vm844_vm13, %v9245_v1, %v783_v38  ;;  %v879_v3 = vsel %vm844_vm13, %v9230_v54, %v9196_v37 }
 0x1c2   : > { %965 = vmatpush1.bf16.msra.mxu0 %v851_v39  ;;  %v885_v54 = vsel %vm844_vm13, %v9262_v29, %v9241_v60  ;;  %v884_v61 = vsel %vm844_vm13, %v9247_v36, %v9262_v29 }
 0x1c3   : > { %966 = vmatprep.subr.bf16.mxu0 %v855_v42 }
 0x1c4   : > { %v9268_v30 = vpop.permute.xlu1 %738 }
 0x1c5   : > { %v799_v34 = vpop.permute.xlu0 %798 }
 0x1c6   : > { %967 = vmatpush1.bf16.msra.mxu0 %v854_v43  ;;  %v881_v8 = vsel %vm844_vm13, %v9249_v7, %v799_v34 }
 0x1c8   : > { %v737_v44 = vpop.permute.xlu1 %736 }
 0x1c9   : > { %v858_v32 = vsel %vm844_vm13, %v735_v57, %v737_v44  ;;  %v9285_v48 = vpop.permute.xlu0 %824  ;;  %v859_v37 = vsel %vm844_vm13, %v737_v44, %v9268_v30  ;;  %v8631_v44 = vld [vmem:[%s13947_s3 + $0x1c] ss:$12 sps:$4 sm:$0xff]  }
 0x1ca   : > { %968 = vmatprep.subr.bf16.mxu0 %v858_v32 }
 0x1cc   : > { %v733_v45 = vpop.permute.xlu1 %732 }
 0x1cd   : > { %v857_v46 = vsel %vm844_vm13, %v733_v45, %v735_v57  ;;  %v815_v51 = vpop.permute.xlu0 %814 }
 0x1ce   : > { %969 = vmatpush1.bf16.msra.mxu0 %v857_v46 }
 0x1cf   : > { %970 = vmatprep.subr.bf16.mxu0 %v861_v20 }
 0x1d0   : > { %v751_v40 = vpop.permute.xlu1 %750 }
 0x1d1   : > { %v864_v23 = vsel %vm844_vm13, %v751_v40, %v9243_v0  ;;  %v821_v57 = vpop.permute.xlu0 %820 }
 0x1d2   : > { %971 = vmatpush1.bf16.msra.mxu0 %v860_v22  ;;  %v8633_v22 = vld [vmem:[%s13947_s3 + $0x18] ss:$12 sps:$4 sm:$0xff]  }
 0x1d3   : > { %972 = vmatprep.subr.bf16.mxu0 %v864_v23  ;;  %v8634_v23 = vld [vmem:[%s13947_s3 + $0x8] ss:$12 sps:$4 sm:$0xff]  }
 0x1d4   : > { %v749_v31 = vpop.permute.xlu1 %748 }
 0x1d5   : > { %v863_v49 = vsel %vm844_vm13, %v749_v31, %v751_v40 }
 0x1d6   : > { %973 = vmatpush1.bf16.msra.mxu0 %v863_v49 }
 0x1d7   : > { %974 = vmatprep.subr.bf16.mxu0 %v867_v50 }
 0x1d8   : > { %v767_v52 = vpop.permute.xlu1 %766 }
 0x1d9   : > { %v870_v27 = vsel %vm844_vm13, %v767_v52, %v769_v63  ;;  %v869_v18 = vsel %vm844_vm13, %v765_v62, %v767_v52  ;;  %v853_v62 = vsel %vm844_vm13, %v9225_v19, %v9239_v59  ;;  %v763_v63 = vpop.permute.xlu0 %762  ;;  %v8702_v52 = vld [vmem:[#allocation2] sm:$0xff] }
 0x1da   : > { %975 = vmatpush1.bf16.msra.mxu0 %v866_v24  ;;  %v1228_v24 = vpack.c.bf16 %v8702_v52, %v8702_v52 }
 0x1db   : > { %976 = vmatprep.subr.bf16.mxu0 %v870_v27 }
 0x1dc   : > { %v811_v53 = vpop.permute.xlu1 %810  ;;  %1244 = vrot.lane.b32.xlu1 %v1228_v24, %s8718_s12  ;;  %1440 = vrot.lane.b32.xlu0 %v1228_v24, %s8725_s27 }
 0x1dd   : > { %v835_v14 = vpop.permute.xlu0 %834 }
 0x1de   : > { %977 = vmatpush1.bf16.msra.mxu0 %v869_v18 }
 0x1df   : > { %978 = vmatprep.subr.bf16.mxu0 %v873_v9 }
 0x1e0   : > { %v785_v10 = vpop.permute.xlu1 %784  ;;  %1252 = vrot.lane.b32.xlu1 %v1228_v24, %s8718_s12 }
 0x1e1   : > { %v877_v35 = vsel %vm844_vm13, %v785_v10, %v9215_v11  ;;  %v876_v41 = vsel %vm844_vm13, %v783_v38, %v785_v10  ;;  %v856_v11 = vsel %vm844_vm13, %v9034_v21, %v9205_v15  ;;  %v886_v21 = vsel %vm844_vm13, %v9241_v60, %v811_v53  ;;  %v833_v26 = vpop.permute.xlu0 %832 }
 0x1e2   : > { %979 = vmatpush1.bf16.msra.mxu0 %v872_v12  ;;  %8069 = vmatprep.subr.bf16.mxu1 %v877_v35  ;;  %v895_v32 = vsel %vm844_vm13, %v833_v26, %v835_v14 }
 0x1e3   : > { %980 = vmatprep.subr.bf16.mxu0 %v876_v41  ;;  %8070 = vmatpush3.bf16.msra.mxu1 %v853_v62 }
 0x1e4   : > { %v813_v13 = vpop.permute.xlu1 %812  ;;  %8071 = vmatprep.subr.bf16.mxu1 %v880_v58  ;;  %1266 = vrot.lane.b32.xlu1 %v1228_v24, %s8719_s15 }
 0x1e5   : > { %v887_v42 = vsel %vm844_vm13, %v813_v13, %v815_v51 }
 0x1e6   : > { %981 = vmatpush1.bf16.msra.mxu0 %v875_v28 }
 0x1e7   : > { %982 = vmatprep.subr.bf16.mxu0 %v879_v3  ;;  %8072 = vmatpush3.bf16.msra.mxu1 %v856_v11  ;;  %v368_v3 = vld [vmem:[%s13946_s2] sm:$0x7] }
 0x1e8   : > { %v801_v19 = vpop.permute.xlu1 %800  ;;  %1274 = vrot.lane.b32.xlu1 %v1228_v24, %s8719_s15  ;;  %v9397_v14 = vrot.slane %v368_v3, %v380_v5 }
 0x1e9   : > { %v883_v59 = vsel %vm844_vm13, %v801_v19, %v9235_v55  ;;  %v882_v1 = vsel %vm844_vm13, %v799_v34, %v801_v19  ;;  %v862_v55 = vsel %vm844_vm13, %v9042_v25, %v9258_v16  ;;  %v841_v16 = vpop.permute.xlu0 %840 }
 0x1ea   : > { %983 = vmatpush1.bf16.msra.mxu0 %v878_v56  ;;  %8073 = vmatprep.subr.bf16.mxu1 %v883_v59 }
 0x1eb   : > { %984 = vmatprep.subr.bf16.mxu0 %v882_v1  ;;  %8074 = vmatpush3.bf16.msra.mxu1 %v859_v37  ;;  %v9393_v1 = vrot.slane %v368_v3, %v372_v4 }
 0x1ec   : > { %v823_v15 = vpop.permute.xlu1 %822  ;;  %8075 = vmatprep.subr.bf16.mxu1 %v886_v21  ;;  %1288 = vrot.lane.b32.xlu1 %v1228_v24, %s8720_s22 }
 0x1ed   : > { %v891_v36 = vsel %vm844_vm13, %v823_v15, %v9285_v48  ;;  %v890_v30 = vsel %vm844_vm13, %v821_v57, %v823_v15  ;;  %v843_v34 = vpop.permute.xlu0 %842 }
 0x1ee   : > { %985 = vmatpush1.bf16.msra.mxu0 %v881_v8  ;;  %v898_v46 = vsel %vm844_vm13, %v841_v16, %v843_v34 }
 0x1ef   : > { %986 = vmatprep.subr.bf16.mxu0 %v885_v54  ;;  %8076 = vmatpush3.bf16.msra.mxu1 %v862_v55  ;;  %v9401_v54 = vrot.slane %v368_v3, %v376_v6 }
 0x1f0   : > { %v817_v38 = vpop.permute.xlu1 %816  ;;  %1296 = vrot.lane.b32.xlu1 %v1228_v24, %s8720_s22 }
 0x1f1   : > { %v889_v7 = vsel %vm844_vm13, %v817_v38, %v9273_v17  ;;  %v888_v39 = vsel %vm844_vm13, %v815_v51, %v817_v38  ;;  %v8628_v17 = vld [vmem:[%s13947_s3] ss:$12 sps:$4 sm:$0xff]  }
 0x1f2   : > { %987 = vmatpush1.bf16.msra.mxu0 %v884_v61  ;;  %8077 = vmatprep.subr.bf16.mxu1 %v889_v7  ;;  %v8635_v51 = vld [vmem:[%s13947_s3 + $0x20] ss:$12 sps:$4 sm:$0xff]  }
 0x1f3   : > { %988 = vmatprep.subr.bf16.mxu0 %v888_v39 }
 0x1f4   : > { %v755_v60 = vpop.permute.xlu1 %754  ;;  %1448 = vrot.lane.b32.xlu1 %v1228_v24, %s8725_s27 }
 0x1f5   : > { %v865_v25 = vsel %vm844_vm13, %v9243_v0, %v755_v60  ;;  %v868_v0 = vsel %vm844_vm13, %v9138_v33, %v763_v63 }
 0x1f6   : > { %989 = vmatpush1.bf16.msra.mxu0 %v887_v42  ;;  %8078 = vmatpush3.bf16.msra.mxu1 %v865_v25  ;;  %v658_v11 = vpop.permute.xlu0 %657 }
 0x1f7   : > { %990 = vmatprep.subr.bf16.mxu0 %v891_v36 }
 0x1f8   : > { %v827_v29 = vpop.permute.xlu1 %826 }
 0x1f9   : > { %v892_v43 = vsel %vm844_vm13, %v9285_v48, %v827_v29 }
 0x1fa   : > { %991 = vmatpush1.bf16.msra.mxu0 %v890_v30  ;;  %8079 = vmatprep.subr.bf16.mxu1 %v892_v43 }
 0x1fb   : > { %8080 = vmatpush3.bf16.msra.mxu1 %v868_v0 }
 0x1fc   : > { %v829_v45 = vpop.permute.xlu1 %828  ;;  %8378 = vmatprep.subr.bf16.mxu1 %v895_v32 }
 0x1fd   : > { %993 = vmatmul.mubr.bf16.vlgmr.msra.gmra.mrb[0].mxu0 %v8628_v17 }
 0x1fe   : > { %1099 = vmatmul.mubr.bf16.vlgmr.msra.gmra.mrb[0].mxu1 %v8628_v17  ;;  %1002 = vmatprep.mubr.bf16.mxu0 %v8631_v44 }
 0x1ff   : > { %8379 = vmatpush3.bf16.msra.mxu1 %v895_v32  ;;  %1106 = vmatprep.mubr.bf16.mxu1 %v8631_v44 }
 0x200   : > { %v831_v20 = vpop.permute.xlu1 %830  ;;  %8380 = vmatprep.subr.bf16.mxu1 %v898_v46 }
 0x201   : > { %v894_v33 = vsel %vm844_vm13, %v831_v20, %v833_v26  ;;  %v893_v40 = vsel %vm844_vm13, %v829_v45, %v831_v20 }
 0x202   : > { %1013 = vmatprep.subr.bf16.mxu0 %v894_v33 }
 0x203   : > { %1014 = vmatpush1.bf16.msra.mxu0 %v893_v40  ;;  %8381 = vmatpush3.bf16.msra.mxu1 %v898_v46 }
 0x204   : > { %v839_v48 = vpop.permute.xlu1 %838 }
 0x205   : > { %1003 = vmatmul.mubr.bf16.gmra.mrb[4].mxu0 %v8633_v22  ;;  %v897_v31 = vsel %vm844_vm13, %v839_v48, %v841_v16 }
 0x206   : > { %1015 = vmatprep.subr.bf16.mxu0 %v897_v31  ;;  %1107 = vmatmul.mubr.bf16.gmra.mrb[4].mxu1 %v8633_v22 }
 0x207   : > { %1045 = vmatprep.mubr.bf16.mxu0 %v8727_v47  ;;  %8382 = vmatprep.mubr.msk.bf16.mxu1 %vm953_vm0, %v8634_v23 }
 0x208   : > { %v837_v49 = vpop.permute.xlu1 %836 }
 0x209   : > { %v896_v50 = vsel %vm844_vm13, %v837_v49, %v839_v48 }
 0x20a   : > { %1016 = vmatpush1.bf16.msra.mxu0 %v896_v50 }
 0x20d   : > { %7893 = vmatmul.mubr.msk.bf16.vlgmr.msra.gmra.mrb[0].mxu0 %vm953_vm0, %v8634_v23 }
 0x20e   : > { %8383 = vmatmul.mubr.msk.bf16.vlgmr.msra.gmra.mrb[8].mxu1 %vm953_vm0, %v8635_v51  ;;  %1055 = vmatprep.mubr.bf16.mxu0 %v8727_v47 }
 0x215   : > { %7894 = vmatmul.mubr.msk.bf16.gmra.mrb[4].mxu0 %vm953_vm0, %v8635_v51 }
 0x219   : > { %v653_v9 = vpop.permute.xlu1 %652 }
 0x21d   : > { %v663_v41 = vpop.permute.xlu1 %662 }
 0x221   : > { %v668_v19 = vpop.permute.xlu1 %667 }
 0x2d1   : > { %v8081_v27 = vpop.f32.mrb[0].mxu1 }
 0x2d2   : > { %v8082_v53 = vpop.f32.mrb[1].mxu1 }
 0x2d3   : > { %v8083_v18 = vadd.f32 %v8082_v53, %v8081_v27  ;;  %v8084_v57 = vpop.f32.mrb[2].mxu1 }
 0x2d4   : > { %v8085_v10 = vpop.f32.mrb[3].mxu1 }
 0x2d5   : > { %v8086_v12 = vadd.f32 %v8085_v10, %v8084_v57  ;;  %v1101_v8 = vadd.f32 %v8083_v18, %v653_v9 }
 0x2d7   : > { %v1104_v5 = vadd.f32 %v8086_v12, %v658_v11 }
 0x2d9   : > { %v8087_v35 = vpop.f32.mrb[4].mxu1 }
 0x2da   : > { %v8088_v62 = vpop.f32.mrb[5].mxu1 }
 0x2db   : > { %v8089_v58 = vadd.f32 %v8088_v62, %v8087_v35  ;;  %v8090_v63 = vpop.f32.mrb[6].mxu1 }
 0x2dc   : > { %v8091_v13 = vpop.f32.mrb[7].mxu1 }
 0x2dd   : > { %v8092_v28 = vadd.f32 %v8091_v13, %v8090_v63  ;;  %v1109_v59 = vadd.f32 %v8089_v58, %v663_v41 }
 0x2df   : > { %v1112_v7 = vadd.f32 %v8092_v28, %v668_v19 }
 0x2e0   : > { %v1047_v56 = vpop.f32.mrb[0].mxu0 }
 0x2e1   : > { %v8458_v37 = vadd.f32 %v1047_v56, %v653_v9  ;;  %v1049_v21 = vpop.f32.mrb[1].mxu0  ;;  %v8384_v15 = vpop.f32.mrb[8].mxu1 }
 0x2e2   : > { %v8459_v55 = vadd.f32 %v1049_v21, %v653_v9  ;;  %v1158_v26 = vadd.f32 %v8384_v15, %v1109_v59  ;;  %v1051_v38 = vpop.f32.mrb[2].mxu0  ;;  %v1149_v61 = vpop.f32.mrb[9].mxu1 }
 0x2e3   : > { %v1164_v39 = vmax.f32 %v8458_v37, 0.0  ;;  %v8460_v4 = vadd.f32 %v1051_v38, %v658_v11  ;;  %v1150_v60 = vadd.f32 %v1149_v61, %v1101_v8  ;;  %v1053_v42 = vpop.f32.mrb[3].mxu0  ;;  %v8385_v25 = vpop.f32.mrb[10].mxu1 }
 0x2e4   : > { %v1165_v16 = vmax.f32 %v8459_v55, 0.0  ;;  %v1172_v36 = vmax.f32 %v1158_v26, 0.0  ;;  %v8461_v29 = vadd.f32 %v1053_v42, %v658_v11  ;;  %v1161_v30 = vadd.f32 %v8385_v25, %v1112_v7  ;;  %v1152_v43 = vpop.f32.mrb[11].mxu1  ;;  %v9480_v21 = vpop.permute.xlu1 %1244 }
 0x2e5   : > { %v1176_v17 = vmul.f32 %v1164_v39, %v9393_v1  ;;  %v1167_v6 = vmax.f32 %v8460_v4, 0.0  ;;  %v1166_v0 = vmax.f32 %v1150_v60, 0.0  ;;  %v1153_v44 = vadd.f32 %v1152_v43, %v1104_v5  ;;  %v9518_v7 = vpop.permute.xlu0 %1440 }
 0x2e6   : > { %v1177_v32 = vmul.f32 %v1165_v16, %v9401_v54  ;;  %v1184_v34 = vmul.f32 %v1172_v36, %v9397_v14  ;;  %v1168_v45 = vmax.f32 %v8461_v29, 0.0  ;;  %v1175_v46 = vmax.f32 %v1161_v30, 0.0 }
 0x2e7   : > { %1188 = vst [vmem:[#allocation2 + $0x8] sm:$0xff] %v1176_v17  ;;  %v1179_v20 = vmul.f32 %v1167_v6, %v9393_v1  ;;  %v1178_v33 = vmul.f32 %v1166_v0, %v9397_v14  ;;  %v1169_v40 = vmax.f32 %v1153_v44, 0.0 }
 0x2e8   : > { %1189 = vst [vmem:[#allocation2 + $0x10] sm:$0xff] %v1177_v32  ;;  %1196 = vst.msk [vmem:[#allocation2 + $0x58] sm:$0xff] %vm953_vm0, %v1184_v34  ;;  %v1180_v22 = vmul.f32 %v1168_v45, %v9401_v54  ;;  %v1187_v23 = vmul.f32 %v1175_v46, %v9397_v14  ;;  %v1057_v48 = vpop.f32.mrb[4].mxu0  ;;  %v9485_v15 = vpop.permute.xlu1 %1252 }
 0x2e9   : > { %1191 = vst [vmem:[#allocation2 + $0x28] sm:$0xff] %v1179_v20  ;;  %v9411_v31 = vpack.c.bf16 %v1179_v20, %v1176_v17  ;;  %1190 = vst.msk [vmem:[#allocation2 + $0x18] sm:$0xff] %vm953_vm0, %v1178_v33  ;;  %v1181_v49 = vmul.f32 %v1169_v40, %v9397_v14  ;;  %v8462_v50 = vadd.f32 %v1057_v48, %v663_v41  ;;  %v1059_v51 = vpop.f32.mrb[5].mxu0 }
 0x2ea   : > { %1192 = vst [vmem:[#allocation2 + $0x30] sm:$0xff] %v1180_v22  ;;  %v9415_v52 = vpack.c.bf16 %v1180_v22, %v1177_v32  ;;  %1199 = vst.msk [vmem:[#allocation2 + $0x78] sm:$0xff] %vm953_vm0, %v1187_v23  ;;  %v8463_v24 = vadd.f32 %v1059_v51, %v663_v41  ;;  %v1061_v27 = vpop.f32.mrb[6].mxu0 }
 0x2eb   : > { %1193 = vst.msk [vmem:[#allocation2 + $0x38] sm:$0xff] %vm953_vm0, %v1181_v49  ;;  %v1170_v53 = vmax.f32 %v8462_v50, 0.0  ;;  %v8464_v18 = vadd.f32 %v1061_v27, %v668_v19  ;;  %v1063_v57 = vpop.f32.mrb[7].mxu0 }
 0x2ec   : > { %v1171_v9 = vmax.f32 %v8463_v24, 0.0  ;;  %v8465_v10 = vadd.f32 %v1063_v57, %v668_v19  ;;  %v9491_v8 = vpop.permute.xlu1 %1266 }
 0x2ed   : > { %v1182_v12 = vmul.f32 %v1170_v53, %v9393_v1  ;;  %v1173_v35 = vmax.f32 %v8464_v18, 0.0 }
 0x2ee   : > { %v1183_v62 = vmul.f32 %v1171_v9, %v9401_v54  ;;  %v1174_v58 = vmax.f32 %v8465_v10, 0.0 }
 0x2ef   : > { %1194 = vst [vmem:[#allocation2 + $0x48] sm:$0xff] %v1182_v12  ;;  %v1185_v63 = vmul.f32 %v1173_v35, %v9393_v1  ;;  %v1223_v13 = vld [vmem:[#allocation2 + $0x58] sm:$0xff] }
 0x2f0   : > { %1195 = vst [vmem:[#allocation2 + $0x50] sm:$0xff] %v1183_v62  ;;  %v1186_v41 = vmul.f32 %v1174_v58, %v9401_v54  ;;  %v1215_v59 = vld [vmem:[#allocation2 + $0x18] sm:$0xff]  ;;  %v9496_v55 = vpop.permute.xlu1 %1274 }
 0x2f1   : > { %v1227_v28 = vld [vmem:[#allocation2 + $0x78] sm:$0xff]  ;;  %1197 = vst [vmem:[#allocation2 + $0x68] sm:$0xff] %v1185_v63  ;;  %v1233_v3 = vpack.c.bf16 %v1185_v63, %v1182_v12 }
 0x2f2   : > { %1198 = vst [vmem:[#allocation2 + $0x70] sm:$0xff] %v1186_v41  ;;  %v9423_v11 = vpack.c.bf16 %v1186_v41, %v1183_v62  ;;  %v1235_v19 = vpack.c.bf16 %v1227_v28, %v1223_v13  ;;  %v1219_v56 = vld [vmem:[#allocation2 + $0x38] sm:$0xff] }
 0x2f3   : > { %v1231_v37 = vpack.c.bf16 %v1219_v56, %v1215_v59 }
 0x2f4   : > { %1320 = vrot.lane.b32.xlu1 %v1235_v19, %s8721_s23  ;;  %1258 = vrot.lane.b32.xlu0 %v1235_v19, %s8718_s12  ;;  %v9506_v26 = vpop.permute.xlu1 %1288 }
 0x2f8   : > { %1336 = vrot.lane.b32.xlu1 %v1235_v19, %s8722_s24  ;;  %1280 = vrot.lane.b32.xlu0 %v1235_v19, %s8719_s15  ;;  %v9510_v38 = vpop.permute.xlu1 %1296 }
 0x2fc   : > { %1352 = vrot.lane.b32.xlu1 %v1235_v19, %s8723_s25  ;;  %1302 = vrot.lane.b32.xlu0 %v1235_v19, %s8720_s22  ;;  %v9516_v61 = vpop.permute.xlu1 %1448 }
 0x300   : > { %1368 = vrot.lane.b32.xlu1 %v1235_v19, %s8724_s26  ;;  %1250 = vrot.lane.b32.xlu0 %v1231_v37, %s8718_s12 }
 0x304   : > { %1384 = vrot.lane.b32.xlu1 %v1235_v19, %s8726_s28  ;;  %1272 = vrot.lane.b32.xlu0 %v1231_v37, %s8719_s15 }
 0x308   : > { %1454 = vrot.lane.b32.xlu1 %v1235_v19, %s8725_s27  ;;  %1294 = vrot.lane.b32.xlu0 %v1231_v37, %s8720_s22 }
 0x30c   : > { %1378 = vrot.lane.b32.xlu1 %v1231_v37, %s8726_s28  ;;  %1314 = vrot.lane.b32.xlu0 %v1231_v37, %s8721_s23 }
 0x310   : > { %1442 = vrot.lane.b32.xlu1 %v9411_v31, %s8725_s27  ;;  %1330 = vrot.lane.b32.xlu0 %v1231_v37, %s8722_s24 }
 0x314   : > { %1374 = vrot.lane.b32.xlu1 %v9411_v31, %s8726_s28  ;;  %1346 = vrot.lane.b32.xlu0 %v1231_v37, %s8723_s25 }
 0x318   : > { %1248 = vrot.lane.b32.xlu1 %v9415_v52, %s8718_s12  ;;  %1362 = vrot.lane.b32.xlu0 %v1231_v37, %s8724_s26 }
 0x31c   : > { %1270 = vrot.lane.b32.xlu1 %v9415_v52, %s8719_s15  ;;  %1446 = vrot.lane.b32.xlu0 %v1231_v37, %s8725_s27 }
 0x320   : > { %1292 = vrot.lane.b32.xlu1 %v9415_v52, %s8720_s22  ;;  %1246 = vrot.lane.b32.xlu0 %v9411_v31, %s8718_s12 }
 0x324   : > { %1312 = vrot.lane.b32.xlu1 %v9415_v52, %s8721_s23  ;;  %1268 = vrot.lane.b32.xlu0 %v9411_v31, %s8719_s15 }
 0x328   : > { %1328 = vrot.lane.b32.xlu1 %v9415_v52, %s8722_s24  ;;  %1290 = vrot.lane.b32.xlu0 %v9411_v31, %s8720_s22 }
 0x32c   : > { %1344 = vrot.lane.b32.xlu1 %v9415_v52, %s8723_s25  ;;  %1310 = vrot.lane.b32.xlu0 %v9411_v31, %s8721_s23 }
 0x330   : > { %1360 = vrot.lane.b32.xlu1 %v9415_v52, %s8724_s26  ;;  %1326 = vrot.lane.b32.xlu0 %v9411_v31, %s8722_s24 }
 0x334   : > { %1316 = vrot.lane.b32.xlu1 %v1233_v3, %s8721_s23  ;;  %1342 = vrot.lane.b32.xlu0 %v9411_v31, %s8723_s25 }
 0x338   : > { %1332 = vrot.lane.b32.xlu1 %v1233_v3, %s8722_s24  ;;  %1358 = vrot.lane.b32.xlu0 %v9411_v31, %s8724_s26 }
 0x33c   : > { %1348 = vrot.lane.b32.xlu1 %v1233_v3, %s8723_s25  ;;  %1444 = vrot.lane.b32.xlu0 %v9415_v52, %s8725_s27 }
 0x340   : > { %1364 = vrot.lane.b32.xlu1 %v1233_v3, %s8724_s26  ;;  %1376 = vrot.lane.b32.xlu0 %v9415_v52, %s8726_s28 }
 0x344   : > { %1450 = vrot.lane.b32.xlu1 %v1233_v3, %s8725_s27  ;;  %1254 = vrot.lane.b32.xlu0 %v1233_v3, %s8718_s12 }
 0x348   : > { %1380 = vrot.lane.b32.xlu1 %v1233_v3, %s8726_s28  ;;  %1276 = vrot.lane.b32.xlu0 %v1233_v3, %s8719_s15 }
 0x34c   : > { %1256 = vrot.lane.b32.xlu1 %v9423_v11, %s8718_s12  ;;  %1298 = vrot.lane.b32.xlu0 %v1233_v3, %s8720_s22 }
 0x350   : > { %1278 = vrot.lane.b32.xlu1 %v9423_v11, %s8719_s15  ;;  %1318 = vrot.lane.b32.xlu0 %v9423_v11, %s8721_s23 }
 0x354   : > { %1300 = vrot.lane.b32.xlu1 %v9423_v11, %s8720_s22  ;;  %1334 = vrot.lane.b32.xlu0 %v9423_v11, %s8722_s24 }
 0x358   : > { %1350 = vrot.lane.b32.xlu0 %v9423_v11, %s8723_s25 }
 0x35c   : > { %1366 = vrot.lane.b32.xlu0 %v9423_v11, %s8724_s26 }
 0x360   : > { %1452 = vrot.lane.b32.xlu0 %v9423_v11, %s8725_s27 }
 0x364   : > { %1382 = vrot.lane.b32.xlu0 %v9423_v11, %s8726_s28 }
 0x366   : > { %v9522_v39 = vpop.permute.xlu1 %1320  ;;  %v9524_v4 = vpop.permute.xlu0 %1258 }
 0x367   : > { %1470 = vrot.lane.b32.xlu1 %v9524_v4, %s8725_s27 }
 0x368   : > { %1518 = vrot.lane.b32.xlu0 %v9522_v39, %s8725_s27 }
 0x36a   : > { %v9530_v60 = vpop.permute.xlu1 %1336  ;;  %v9532_v42 = vpop.permute.xlu0 %1280 }
 0x36c   : > { %1534 = vrot.lane.b32.xlu0 %v9530_v60, %s8725_s27 }
 0x36e   : > { %v9536_v25 = vpop.permute.xlu1 %1352  ;;  %v9538_v5 = vpop.permute.xlu0 %1302 }
 0x372   : > { %v9540_v16 = vpop.permute.xlu1 %1368  ;;  %v1251_v36 = vpop.permute.xlu0 %1250 }
 0x373   : > { %1462 = vrot.lane.b32.xlu0 %v1251_v36, %s8725_s27 }
 0x376   : > { %v9543_v29 = vpop.permute.xlu1 %1384  ;;  %v9545_v30 = vpop.permute.xlu0 %1272 }
 0x37a   : > { %v9547_v43 = vpop.permute.xlu1 %1454  ;;  %v9549_v17 = vpop.permute.xlu0 %1294 }
 0x37e   : > { %v9551_v6 = vpop.permute.xlu1 %1378  ;;  %v1315_v0 = vpop.permute.xlu0 %1314 }
 0x37f   : > { %1510 = vrot.lane.b32.xlu1 %v1315_v0, %s8725_s27 }
 0x382   : > { %v1443_v44 = vpop.permute.xlu1 %1442  ;;  %v9554_v32 = vpop.permute.xlu0 %1330 }
 0x383   : > { %1526 = vrot.lane.b32.xlu1 %v9554_v32, %s8725_s27  ;;  %v1584_v56 = vsel %vm844_vm13, %v9518_v7, %v1443_v44 }
 0x386   : > { %v9558_v34 = vpop.permute.xlu1 %1374  ;;  %v9560_v45 = vpop.permute.xlu0 %1346 }
 0x38a   : > { %v1249_v46 = vpop.permute.xlu1 %1248  ;;  %v9562_v20 = vpop.permute.xlu0 %1362 }
 0x38b   : > { %v1262_v33 = vsel %vm512_vm5, %v1249_v46, %v1251_v36 }
 0x38c   : > { %1460 = vrot.lane.b32.xlu1 %v1262_v33, %s8725_s27 }
 0x38e   : > { %v1271_v40 = vpop.permute.xlu1 %1270  ;;  %v9566_v22 = vpop.permute.xlu0 %1446 }
 0x38f   : > { %v1284_v36 = vsel %vm535_vm9, %v1271_v40, %v9545_v30 }
 0x392   : > { %v1293_v23 = vpop.permute.xlu1 %1292  ;;  %v1247_v48 = vpop.permute.xlu0 %1246 }
 0x393   : > { %v1306_v24 = vsel %vm419_vm8, %v1293_v23, %v9549_v17  ;;  %v1260_v62 = vsel %vm512_vm5, %v9480_v21, %v1247_v48  ;;  %v1261_v21 = vsel %vm512_vm5, %v1247_v48, %v1249_v46 }
 0x396   : > { %v1313_v31 = vpop.permute.xlu1 %1312  ;;  %v1269_v49 = vpop.permute.xlu0 %1268 }
 0x397   : > { %v1283_v50 = vsel %vm535_vm9, %v1269_v49, %v1271_v40  ;;  %v1323_v18 = vsel %vm577_vm10, %v1313_v31, %v1315_v0  ;;  %v1282_v13 = vsel %vm535_vm9, %v9491_v8, %v1269_v49 }
 0x398   : > { %1474 = vrot.lane.b32.xlu1 %v1283_v50, %s8725_s27 }
 0x39a   : > { %v1329_v51 = vpop.permute.xlu1 %1328  ;;  %v1291_v52 = vpop.permute.xlu0 %1290 }
 0x39b   : > { %v1304_v11 = vsel %vm419_vm8, %v9506_v26, %v1291_v52  ;;  %v1305_v7 = vsel %vm419_vm8, %v1291_v52, %v1293_v23  ;;  %v1339_v23 = vsel %vm594_vm11, %v1329_v51, %v9554_v32 }
 0x39c   : > { %1492 = vrot.lane.b32.xlu1 %v1306_v24, %s8725_s27 }
 0x39e   : > { %v1345_v27 = vpop.permute.xlu1 %1344  ;;  %v1311_v53 = vpop.permute.xlu0 %1310 }
 0x39f   : > { %1504 = vrot.lane.b32.xlu0 %v1311_v53, %s8725_s27  ;;  %v1322_v48 = vsel %vm577_vm10, %v1311_v53, %v1313_v31  ;;  %v1355_v31 = vsel %vm611_vm12, %v1345_v27, %v9560_v45 }
 0x3a0   : > { %1508 = vrot.lane.b32.xlu1 %v1323_v18, %s8725_s27 }
 0x3a2   : > { %v9576_v57 = vpop.permute.xlu1 %1360  ;;  %v1327_v9 = vpop.permute.xlu0 %1326 }
 0x3a3   : > { %1520 = vrot.lane.b32.xlu0 %v1327_v9, %s8725_s27  ;;  %v1338_v10 = vsel %vm594_vm11, %v1327_v9, %v1329_v51 }
 0x3a4   : > { %1522 = vrot.lane.b32.xlu1 %v1338_v10, %s8725_s27 }
 0x3a6   : > { %v9581_v12 = vpop.permute.xlu1 %1316  ;;  %v1343_v35 = vpop.permute.xlu0 %1342 }
 0x3a7   : > { %1456 = vrot.lane.b32.xlu0 %v1260_v62, %s8725_s27  ;;  %v1354_v58 = vsel %vm611_vm12, %v1343_v35, %v1345_v27 }
 0x3a8   : > { %1538 = vrot.lane.b32.xlu1 %v1354_v58, %s8725_s27 }
 0x3aa   : > { %v9588_v63 = vpop.permute.xlu1 %1332  ;;  %v9590_v41 = vpop.permute.xlu0 %1358 }
 0x3ab   : > { %1472 = vrot.lane.b32.xlu0 %v1282_v13, %s8725_s27 }
 0x3ac   : > { %1512 = vrot.lane.b32.xlu1 %v9581_v12, %s8725_s27 }
 0x3ae   : > { %v9597_v28 = vpop.permute.xlu1 %1348  ;;  %v9599_v3 = vpop.permute.xlu0 %1444 }
 0x3af   : > { %1488 = vrot.lane.b32.xlu0 %v1304_v11, %s8725_s27  ;;  %v1585_v19 = vsel %vm844_vm13, %v1443_v44, %v9599_v3 }
 0x3b0   : > { %1528 = vrot.lane.b32.xlu1 %v9588_v63, %s8725_s27  ;;  %1698 = vmatprep.subr.bf16.mxu1 %v1585_v19 }
 0x3b1   : > { %1699 = vmatpush1.bf16.msra.mxu1 %v1584_v56 }
 0x3b2   : > { %v9610_v59 = vpop.permute.xlu1 %1364  ;;  %v9612_v37 = vpop.permute.xlu0 %1376 }
 0x3b3   : > { %1458 = vrot.lane.b32.xlu0 %v1261_v21, %s8725_s27  ;;  %v1386_v56 = vsel %vm645_vm15, %v9558_v34, %v9612_v37 }
 0x3b6   : > { %v1451_v8 = vpop.permute.xlu1 %1450  ;;  %v1255_v26 = vpop.permute.xlu0 %1254 }
 0x3b7   : > { %1476 = vrot.lane.b32.xlu0 %v1284_v36, %s8725_s27  ;;  %v1263_v32 = vsel %vm512_vm5, %v9485_v15, %v1255_v26  ;;  %v1956_v36 = vld [vmem:[#allocation3 + $0x20] sm:$0xff] }
 0x3ba   : > { %v9619_v0 = vpop.permute.xlu1 %1380  ;;  %v1277_v33 = vpop.permute.xlu0 %1276 }
 0x3bb   : > { %1490 = vrot.lane.b32.xlu0 %v1305_v7, %s8725_s27  ;;  %v1285_v44 = vsel %vm535_vm9, %v9496_v55, %v1277_v33  ;;  %v1964_v7 = vld [vmem:[#allocation3 + $0x60] sm:$0xff] }
 0x3bc   : > { %1480 = vrot.lane.b32.xlu1 %v1285_v44, %s8725_s27 }
 0x3be   : > { %v1299_v46 = vpop.permute.xlu0 %1298  ;;  %v1257_v49 = vpop.permute.xlu1 %1256 }
 0x3bf   : > { %1506 = vrot.lane.b32.xlu0 %v1322_v48, %s8725_s27  ;;  %v1307_v40 = vsel %vm419_vm8, %v9510_v38, %v1299_v46  ;;  %v1264_v55 = vsel %vm512_vm5, %v1255_v26, %v1257_v49  ;;  %v1265_v27 = vsel %vm512_vm5, %v1257_v49, %v9524_v4  ;;  %v1587_v4 = vsel %vm844_vm13, %v9516_v61, %v1451_v8  ;;  %v1952_v26 = vld [vmem:[#allocation3] sm:$0xff] }
 0x3c0   : > { %1496 = vrot.lane.b32.xlu1 %v1307_v40, %s8725_s27  ;;  %v1586_v40 = vsel %vm844_vm13, %v9599_v3, %v9566_v22  ;;  %v1208_v49 = vld [vmem:[%s13950_s6] sm:$0xff] }
 0x3c2   : > { %v1319_v50 = vpop.permute.xlu0 %1318  ;;  %v1279_v38 = vpop.permute.xlu1 %1278 }
 0x3c3   : > { %1524 = vrot.lane.b32.xlu0 %v1339_v23, %s8725_s27  ;;  %v1286_v51 = vsel %vm535_vm9, %v1277_v33, %v1279_v38  ;;  %v1287_v10 = vsel %vm535_vm9, %v1279_v38, %v9532_v42  ;;  %v1325_v62 = vsel %vm577_vm10, %v1319_v50, %v9522_v39  ;;  %v1324_v39 = vsel %vm577_vm10, %v9581_v12, %v1319_v50 }
 0x3c4   : > { %1466 = vrot.lane.b32.xlu1 %v1264_v55, %s8725_s27  ;;  %v1210_v55 = vld [vmem:[%s13950_s6 + $0x10] sm:$0xff] }
 0x3c6   : > { %v1335_v52 = vpop.permute.xlu0 %1334  ;;  %v1301_v18 = vpop.permute.xlu1 %1300 }
 0x3c7   : > { %1540 = vrot.lane.b32.xlu0 %v1355_v31, %s8725_s27  ;;  %v1308_v15 = vsel %vm419_vm8, %v1299_v46, %v1301_v18  ;;  %v1309_v61 = vsel %vm419_vm8, %v1301_v18, %v9538_v5  ;;  %v1341_v58 = vsel %vm594_vm11, %v1335_v52, %v9530_v60  ;;  %v1340_v60 = vsel %vm594_vm11, %v9588_v63, %v1335_v52 }
 0x3c8   : > { %1542 = vrot.lane.b32.xlu1 %v9560_v45, %s8725_s27  ;;  %v1387_v63 = vsel %vm645_vm15, %v9612_v37, %v9551_v6  ;;  %v1211_v37 = vld [vmem:[%s13950_s6 + $0x18] sm:$0xff]  ;;  %v1968_v46 = vpack.c.bf16 %v1956_v36, %v1952_v26 }
 0x3ca   : > { %v1351_v24 = vpop.permute.xlu0 %1350 }
 0x3cb   : > { %1464 = vrot.lane.b32.xlu0 %v1263_v32, %s8725_s27 }
 0x3cc   : > { %1482 = vrot.lane.b32.xlu1 %v1286_v51, %s8725_s27 }
 0x3ce   : > { %v1367_v53 = vpop.permute.xlu0 %1366 }
 0x3cf   : > { %1468 = vrot.lane.b32.xlu0 %v1265_v27, %s8725_s27 }
 0x3d0   : > { %1544 = vrot.lane.b32.xlu1 %v9597_v28, %s8725_s27 }
 0x3d2   : > { %v9651_v45 = vpop.permute.xlu0 %1452 }
 0x3d3   : > { %1536 = vrot.lane.b32.xlu0 %v1343_v35, %s8725_s27  ;;  %v1588_v9 = vsel %vm844_vm13, %v1451_v8, %v9651_v45  ;;  %v1370_v35 = vsel %vm628_vm14, %v9590_v41, %v9576_v57  ;;  %v1589_v36 = vsel %vm844_vm13, %v9651_v45, %v9547_v43 }
 0x3d4   : > { %1498 = vrot.lane.b32.xlu1 %v1308_v15, %s8725_s27  ;;  %1700 = vmatprep.subr.bf16.mxu1 %v1588_v9 }
 0x3d5   : > { %1701 = vmatpush1.bf16.msra.mxu1 %v1587_v4 }
 0x3d6   : > { %v1383_v13 = vpop.permute.xlu0 %1382 }
 0x3d7   : > { %1484 = vrot.lane.b32.xlu0 %v1287_v10, %s8725_s27 }
 0x3d8   : > { %1554 = vrot.lane.b32.xlu1 %v1370_v35, %s8725_s27 }
 0x3d9   : > { %v9710_v12 = vpop.permute.xlu1 %1470 }
 0x3da   : > { %v9727_v11 = vpop.permute.xlu0 %1518 }
 0x3db   : > { %1478 = vrot.lane.b32.xlu0 %v9545_v30, %s8725_s27  ;;  %v1357_v30 = vsel %vm611_vm12, %v1351_v24, %v9536_v25 }
 0x3dc   : > { %1516 = vrot.lane.b32.xlu1 %v1325_v62, %s8725_s27 }
 0x3df   : > { %1500 = vrot.lane.b32.xlu0 %v1309_v61, %s8725_s27 }
 0x3e0   : > { %1486 = vrot.lane.b32.xlu1 %v9532_v42, %s8725_s27  ;;  %v1371_v42 = vsel %vm628_vm14, %v9576_v57, %v9562_v20  ;;  %v8638_v57 = vld [vmem:[%s13949_s5 + $0x4] ss:$12 sps:$4 sm:$0xff]  }
 0x3e1   : > { %1730 = vmatprep.mubr.bf16.mxu1 %v8638_v57  ;;  %1836 = vmatprep.mubr.bf16.mxu0 %v8638_v57 }
 0x3e3   : > { %1550 = vrot.lane.b32.xlu0 %v9536_v25, %s8725_s27  ;;  %v1356_v25 = vsel %vm611_vm12, %v9597_v28, %v1351_v24  ;;  %v1372_v28 = vsel %vm628_vm14, %v9610_v59, %v1367_v53 }
 0x3e4   : > { %1532 = vrot.lane.b32.xlu1 %v1341_v58, %s8725_s27 }
 0x3e7   : > { %1514 = vrot.lane.b32.xlu0 %v1324_v39, %s8725_s27 }
 0x3e8   : > { %1558 = vrot.lane.b32.xlu1 %v9562_v20, %s8725_s27  ;;  %v1373_v20 = vsel %vm628_vm14, %v1367_v53, %v9540_v16 }
 0x3eb   : > { %1556 = vrot.lane.b32.xlu0 %v1371_v42, %s8725_s27 }
 0x3ec   : > { %1548 = vrot.lane.b32.xlu1 %v1357_v30, %s8725_s27 }
 0x3ef   : > { %1530 = vrot.lane.b32.xlu0 %v1340_v60, %s8725_s27 }
 0x3f0   : > { %1560 = vrot.lane.b32.xlu1 %v9610_v59, %s8725_s27 }
 0x3f3   : > { %1552 = vrot.lane.b32.xlu0 %v9590_v41, %s8725_s27  ;;  %v1511_v41 = vpop.permute.xlu1 %1510 }
 0x3f4   : > { %1564 = vrot.lane.b32.xlu1 %v1373_v20, %s8725_s27 }
 0x3f7   : > { %1546 = vrot.lane.b32.xlu0 %v1356_v25, %s8725_s27 }
 0x3f8   : > { %1502 = vrot.lane.b32.xlu1 %v9538_v5, %s8725_s27  ;;  %v9725_v5 = vpop.permute.xlu1 %1526 }
 0x3fb   : > { %1494 = vrot.lane.b32.xlu0 %v9549_v17, %s8725_s27  ;;  %v1389_v17 = vsel %vm645_vm15, %v1383_v13, %v9543_v29 }
 0x3fc   : > { %1572 = vrot.lane.b32.xlu1 %v1387_v63, %s8725_s27 }
 0x3fe   : > { %v9734_v19 = vpop.permute.xlu1 %1460 }
 0x3ff   : > { %1562 = vrot.lane.b32.xlu0 %v1372_v28, %s8725_s27 }
 0x400   : > { %1574 = vrot.lane.b32.xlu1 %v9551_v6, %s8725_s27  ;;  %v9742_v6 = vpop.permute.xlu0 %1534 }
 0x403   : > { %1566 = vrot.lane.b32.xlu0 %v9540_v16, %s8725_s27  ;;  %v1209_v16 = vld [vmem:[%s13950_s6 + $0x8] sm:$0xff] }
 0x404   : > { %1580 = vrot.lane.b32.xlu1 %v1389_v17, %s8725_s27  ;;  %v9751_v21 = vpop.permute.xlu0 %1462 }
 0x405   : > { %v1592_v43 = vsel %vm844_vm13, %v9734_v19, %v9751_v21 }
 0x407   : > { %1570 = vrot.lane.b32.xlu0 %v1386_v56, %s8725_s27 }
 0x408   : > { %1582 = vrot.lane.b32.xlu1 %v9543_v29, %s8725_s27  ;;  %v1388_v29 = vsel %vm645_vm15, %v9619_v0, %v1383_v13 }
 0x40a   : > { %v9747_v59 = vpop.permute.xlu1 %1474 }
 0x40b   : > { %1568 = vrot.lane.b32.xlu0 %v9558_v34, %s8725_s27  ;;  %v1960_v34 = vld [vmem:[#allocation3 + $0x40] sm:$0xff] }
 0x40c   : > { %1397 = vperm.xlu1 %8625, %v1209_v16   ;;  %v1972_v50 = vpack.c.bf16 %v1964_v7, %v1960_v34 }
 0x40e   : > { %v9756_v8 = vpop.permute.xlu1 %1492 }
 0x40f   : > { %1578 = vrot.lane.b32.xlu0 %v1388_v29, %s8725_s27 }
 0x410   : > { %1407 = vperm.xlu1 %8625, %v1211_v37  }
 0x411   : > { %v9761_v33 = vpop.permute.xlu0 %1504 }
 0x412   : > { %v9763_v44 = vpop.permute.xlu1 %1508 }
 0x413   : > { %1576 = vrot.lane.b32.xlu0 %v9619_v0, %s8725_s27  ;;  %v1610_v48 = vsel %vm844_vm13, %v9763_v44, %v1511_v41 }
 0x414   : > { %8097 = vmatprep.subr.bf16.mxu0 %v1610_v48  ;;  %1984 = vrot.lane.b32.xlu1 %v1968_v46, %s8718_s12 }
 0x415   : > { %8098 = vmatpush3.bf16.msra.mxu0 %v1586_v40  ;;  %v9776_v23 = vpop.permute.xlu0 %1520 }
 0x416   : > { %v9778_v0 = vpop.permute.xlu1 %1522 }
 0x417   : > { %1392 = vperm.xlu0 %8626, %v1208_v49  }
 0x418   : > { %1992 = vrot.lane.b32.xlu1 %v1972_v50, %s8718_s12 }
 0x419   : > { %v1457_v52 = vpop.permute.xlu0 %1456 }
 0x41a   : > { %v9785_v3 = vpop.permute.xlu1 %1538 }
 0x41b   : > { %1402 = vperm.xlu0 %8626, %v1210_v55  }
 0x41c   : > { %2006 = vrot.lane.b32.xlu1 %v1968_v46, %s8719_s15 }
 0x41d   : > { %v1473_v22 = vpop.permute.xlu0 %1472 }
 0x41e   : > { %v9789_v38 = vpop.permute.xlu1 %1512  ;;  %v1596_v41 = vsel %vm844_vm13, %v1473_v22, %v9747_v59 }
 0x41f   : > { %2180 = vrot.lane.b32.xlu0 %v1968_v46, %s8725_s27 }
 0x420   : > { %2014 = vrot.lane.b32.xlu1 %v1972_v50, %s8719_s15 }
 0x421   : > { %v1489_v31 = vpop.permute.xlu0 %1488 }
 0x422   : > { %v9798_v27 = vpop.permute.xlu1 %1528 }
 0x424   : > { %2028 = vrot.lane.b32.xlu1 %v1968_v46, %s8720_s22 }
 0x425   : > { %v1459_v24 = vpop.permute.xlu0 %1458 }
 0x426   : > { %v1591_v32 = vsel %vm844_vm13, %v1459_v24, %v9734_v19  ;;  %v1590_v51 = vsel %vm844_vm13, %v1457_v52, %v1459_v24  ;;  %v1614_v24 = vsel %vm844_vm13, %v9776_v23, %v9778_v0 }
 0x427   : > { %1702 = vmatprep.subr.bf16.mxu1 %v1591_v32 }
 0x428   : > { %1703 = vmatpush1.bf16.msra.mxu1 %v1590_v51  ;;  %2036 = vrot.lane.b32.xlu1 %v1972_v50, %s8720_s22 }
 0x429   : > { %v9796_v53 = vpop.permute.xlu0 %1476 }
 0x42a   : > { %v1597_v25 = vsel %vm844_vm13, %v9747_v59, %v9796_v53 }
 0x42c   : > { %2188 = vrot.lane.b32.xlu1 %v1972_v50, %s8725_s27 }
 0x42d   : > { %v1491_v18 = vpop.permute.xlu0 %1490 }
 0x42e   : > { %v1481_v15 = vpop.permute.xlu1 %1480  ;;  %v1603_v16 = vsel %vm844_vm13, %v1491_v18, %v9756_v8  ;;  %v1602_v26 = vsel %vm844_vm13, %v1489_v31, %v1491_v18 }
 0x431   : > { %v1507_v9 = vpop.permute.xlu0 %1506 }
 0x432   : > { %v1497_v4 = vpop.permute.xlu1 %1496  ;;  %v1609_v40 = vsel %vm844_vm13, %v1507_v9, %v9763_v44  ;;  %v1608_v49 = vsel %vm844_vm13, %v9761_v33, %v1507_v9 }
 0x435   : > { %v9801_v10 = vpop.permute.xlu0 %1524 }
 0x436   : > { %v1467_v35 = vpop.permute.xlu1 %1466  ;;  %v1616_v7 = vsel %vm844_vm13, %v9801_v10, %v9725_v5 }
 0x439   : > { %v9803_v62 = vpop.permute.xlu0 %1540 }
 0x43a   : > { %v1543_v61 = vpop.permute.xlu1 %1542  ;;  %v1621_v23 = vsel %vm844_vm13, %v9785_v3, %v9803_v62 }
 0x43b   : > { %v1622_v19 = vsel %vm844_vm13, %v9803_v62, %v1543_v61 }
 0x43d   : > { %v1465_v58 = vpop.permute.xlu0 %1464 }
 0x43e   : > { %v1483_v39 = vpop.permute.xlu1 %1482  ;;  %v1593_v20 = vsel %vm844_vm13, %v1465_v58, %v1467_v35 }
 0x43f   : > { %v1599_v56 = vsel %vm844_vm13, %v1481_v15, %v1483_v39 }
 0x441   : > { %v1469_v42 = vpop.permute.xlu0 %1468 }
 0x442   : > { %v9805_v30 = vpop.permute.xlu1 %1544  ;;  %v1594_v60 = vsel %vm844_vm13, %v1467_v35, %v1469_v42  ;;  %v1595_v55 = vsel %vm844_vm13, %v1469_v42, %v9710_v12  ;;  %v1615_v12 = vsel %vm844_vm13, %v9778_v0, %v9801_v10 }
 0x443   : > { %1704 = vmatprep.subr.bf16.mxu1 %v1594_v60 }
 0x444   : > { %1705 = vmatpush1.bf16.msra.mxu1 %v1593_v20 }
 0x445   : > { %1706 = vmatprep.subr.bf16.mxu1 %v1597_v25  ;;  %v9812_v57 = vpop.permute.xlu0 %1536 }
 0x446   : > { %v1499_v63 = vpop.permute.xlu1 %1498  ;;  %v1620_v10 = vsel %vm844_vm13, %v9812_v57, %v9785_v3 }
 0x448   : > { %1707 = vmatpush1.bf16.msra.mxu1 %v1596_v41 }
 0x449   : > { %v1485_v13 = vpop.permute.xlu0 %1484 }
 0x44a   : > { %v9816_v28 = vpop.permute.xlu1 %1554  ;;  %v1600_v17 = vsel %vm844_vm13, %v1483_v39, %v1485_v13 }
 0x44b   : > { %1708 = vmatprep.subr.bf16.mxu1 %v1600_v17 }
 0x44c   : > { %1709 = vmatpush1.bf16.msra.mxu1 %v1599_v56 }
 0x44d   : > { %1710 = vmatprep.subr.bf16.mxu1 %v1603_v16  ;;  %v1479_v37 = vpop.permute.xlu0 %1478 }
 0x44e   : > { %v1517_v29 = vpop.permute.xlu1 %1516 }
 0x44f   : > { %v1613_v59 = vsel %vm844_vm13, %v1517_v29, %v9727_v11  ;;  %v1605_v11 = vsel %vm844_vm13, %v1497_v4, %v1499_v63 }
 0x450   : > { %1711 = vmatpush1.bf16.msra.mxu1 %v1602_v26  ;;  %8099 = vmatprep.subr.bf16.mxu0 %v1613_v59  ;;  %v8641_v59 = vld [vmem:[%s13949_s5 + $0x18] ss:$12 sps:$4 sm:$0xff]  }
 0x451   : > { %8100 = vmatpush3.bf16.msra.mxu0 %v1589_v36  ;;  %v9828_v34 = vpop.permute.xlu0 %1500 }
 0x452   : > { %v1487_v46 = vpop.permute.xlu1 %1486  ;;  %8101 = vmatprep.subr.bf16.mxu0 %v1616_v7  ;;  %v1606_v48 = vsel %vm844_vm13, %v1499_v63, %v9828_v34  ;;  %v8636_v63 = vld [vmem:[%s13949_s5] ss:$12 sps:$4 sm:$0xff]   ;;  %v8642_v7 = vld [vmem:[%s13949_s5 + $0x8] ss:$12 sps:$4 sm:$0xff]  }
 0x453   : > { %1712 = vmatprep.subr.bf16.mxu1 %v1606_v48 }
 0x454   : > { %1713 = vmatpush1.bf16.msra.mxu1 %v1605_v11 }
 0x455   : > { %1714 = vmatprep.subr.bf16.mxu1 %v1609_v40  ;;  %8102 = vmatpush3.bf16.msra.mxu0 %v1592_v43  ;;  %v1551_v45 = vpop.permute.xlu0 %1550  ;;  %v8643_v43 = vld [vmem:[%s13949_s5 + $0x20] ss:$12 sps:$4 sm:$0xff]  }
 0x456   : > { %v1533_v5 = vpop.permute.xlu1 %1532 }
 0x457   : > { %v1619_v50 = vsel %vm844_vm13, %v1533_v5, %v9742_v6  ;;  %v1598_v6 = vsel %vm844_vm13, %v9796_v53, %v1479_v37 }
 0x458   : > { %1715 = vmatpush1.bf16.msra.mxu1 %v1608_v49  ;;  %8103 = vmatprep.subr.bf16.mxu0 %v1619_v50 }
 0x459   : > { %8104 = vmatpush3.bf16.msra.mxu0 %v1595_v55  ;;  %v1515_v44 = vpop.permute.xlu0 %1514 }
 0x45a   : > { %v1559_v21 = vpop.permute.xlu1 %1558  ;;  %8105 = vmatprep.subr.bf16.mxu0 %v1622_v19  ;;  %v1612_v52 = vsel %vm844_vm13, %v1515_v44, %v1517_v29  ;;  %v1611_v33 = vsel %vm844_vm13, %v9789_v38, %v1515_v44  ;;  %v1601_v38 = vsel %vm844_vm13, %v1485_v13, %v1487_v46 }
 0x45b   : > { %1716 = vmatprep.subr.bf16.mxu1 %v1612_v52 }
 0x45c   : > { %1717 = vmatpush1.bf16.msra.mxu1 %v1611_v33 }
 0x45d   : > { %1718 = vmatprep.subr.bf16.mxu1 %v1615_v12  ;;  %8106 = vmatpush3.bf16.msra.mxu0 %v1598_v6  ;;  %v1557_v22 = vpop.permute.xlu0 %1556 }
 0x45e   : > { %v1549_v31 = vpop.permute.xlu1 %1548  ;;  %v1628_v53 = vsel %vm844_vm13, %v1557_v22, %v1559_v21  ;;  %v1627_v62 = vsel %vm844_vm13, %v9816_v28, %v1557_v22 }
 0x45f   : > { %v1625_v32 = vsel %vm844_vm13, %v1549_v31, %v1551_v45 }
 0x460   : > { %1719 = vmatpush1.bf16.msra.mxu1 %v1614_v24  ;;  %8107 = vmatprep.subr.bf16.mxu0 %v1625_v32 }
 0x461   : > { %8108 = vmatpush3.bf16.msra.mxu0 %v1601_v38  ;;  %v1531_v51 = vpop.permute.xlu0 %1530 }
 0x462   : > { %v1561_v18 = vpop.permute.xlu1 %1560  ;;  %8109 = vmatprep.subr.bf16.mxu0 %v1628_v53  ;;  %v1618_v15 = vsel %vm844_vm13, %v1531_v51, %v1533_v5  ;;  %v1617_v9 = vsel %vm844_vm13, %v9798_v27, %v1531_v51 }
 0x463   : > { %1720 = vmatprep.subr.bf16.mxu1 %v1618_v15 }
 0x464   : > { %1721 = vmatpush1.bf16.msra.mxu1 %v1617_v9 }
 0x465   : > { %1722 = vmatprep.subr.bf16.mxu1 %v1621_v23  ;;  %v1553_v0 = vpop.permute.xlu0 %1552 }
 0x466   : > { %v1565_v4 = vpop.permute.xlu1 %1564  ;;  %v1626_v3 = vsel %vm844_vm13, %v1553_v0, %v9816_v28 }
 0x468   : > { %1723 = vmatpush1.bf16.msra.mxu1 %v1620_v10 }
 0x469   : > { %v1547_v35 = vpop.permute.xlu0 %1546 }
 0x46a   : > { %v1503_v61 = vpop.permute.xlu1 %1502  ;;  %v1624_v58 = vsel %vm844_vm13, %v1547_v35, %v1549_v31  ;;  %v1623_v27 = vsel %vm844_vm13, %v9805_v30, %v1547_v35 }
 0x46b   : > { %1724 = vmatprep.subr.bf16.mxu1 %v1624_v58  ;;  %v1607_v17 = vsel %vm844_vm13, %v9828_v34, %v1503_v61 }
 0x46c   : > { %1725 = vmatpush1.bf16.msra.mxu1 %v1623_v27 }
 0x46d   : > { %1726 = vmatprep.subr.bf16.mxu1 %v1627_v62  ;;  %v1495_v39 = vpop.permute.xlu0 %1494 }
 0x46e   : > { %v1604_v42 = vsel %vm844_vm13, %v9756_v8, %v1495_v39  ;;  %v1573_v60 = vpop.permute.xlu1 %1572  ;;  %v8639_v8 = vld [vmem:[%s13949_s5 + $0x1c] ss:$12 sps:$4 sm:$0xff]  }
 0x46f   : > { %8110 = vmatpush3.bf16.msra.mxu0 %v1604_v42 }
 0x470   : > { %1727 = vmatpush1.bf16.msra.mxu1 %v1626_v3 }
 0x471   : > { %v1563_v20 = vpop.permute.xlu0 %1562 }
 0x472   : > { %v1575_v25 = vpop.permute.xlu1 %1574  ;;  %v1630_v30 = vsel %vm844_vm13, %v1563_v20, %v1565_v4  ;;  %v1629_v57 = vsel %vm844_vm13, %v1561_v18, %v1563_v20 }
 0x473   : > { %1728 = vmatprep.subr.bf16.mxu1 %v1630_v30  ;;  %v1634_v56 = vsel %vm844_vm13, %v1573_v60, %v1575_v25 }
 0x474   : > { %1729 = vmatpush1.bf16.msra.mxu1 %v1629_v57 }
 0x475   : > { %v1567_v41 = vpop.permute.xlu0 %1566 }
 0x476   : > { %v1581_v13 = vpop.permute.xlu1 %1580  ;;  %v1631_v28 = vsel %vm844_vm13, %v1565_v4, %v1567_v41 }
 0x477   : > { %8111 = vmatprep.subr.bf16.mxu0 %v1631_v28  ;;  %1731 = vmatmul.mubr.bf16.vlgmr.msra.gmra.mrb[12].mxu1 %v8636_v63 }
 0x478   : > { %8112 = vmatpush3.bf16.msra.mxu0 %v1607_v17  ;;  %1740 = vmatprep.mubr.bf16.mxu1 %v8639_v8 }
 0x479   : > { %8386 = vmatprep.subr.bf16.mxu0 %v1634_v56  ;;  %v1571_v16 = vpop.permute.xlu0 %1570 }
 0x47a   : > { %v1583_v37 = vpop.permute.xlu1 %1582  ;;  %v1633_v29 = vsel %vm844_vm13, %v1571_v16, %v1573_v60 }
 0x47b   : > { %1751 = vmatprep.subr.bf16.mxu1 %v1633_v29  ;;  %1837 = vmatmul.mubr.bf16.vlgmr.msra.gmra.mrb[8].mxu0 %v8636_v63  ;;  %v1637_v26 = vsel %vm844_vm13, %v1581_v13, %v1583_v37 }
 0x47c   : > { %8387 = vmatpush3.bf16.msra.mxu0 %v1634_v56  ;;  %1844 = vmatprep.mubr.bf16.mxu0 %v8639_v8 }
 0x47d   : > { %8388 = vmatprep.subr.bf16.mxu0 %v1637_v26  ;;  %v1569_v36 = vpop.permute.xlu0 %1568 }
 0x47e   : > { %v1632_v34 = vsel %vm844_vm13, %v1569_v36, %v1571_v16 }
 0x47f   : > { %1752 = vmatpush1.bf16.msra.mxu1 %v1632_v34 }
 0x480   : > { %8389 = vmatpush3.bf16.msra.mxu0 %v1637_v26  ;;  %1741 = vmatmul.mubr.bf16.gmra.mrb[16].mxu1 %v8641_v59 }
 0x481   : > { %v1579_v46 = vpop.permute.xlu0 %1578  ;;  %1783 = vmatprep.mubr.bf16.mxu1 %v8727_v47 }
 0x482   : > { %v1636_v48 = vsel %vm844_vm13, %v1579_v46, %v1581_v13 }
 0x483   : > { %1753 = vmatprep.subr.bf16.mxu1 %v1636_v48  ;;  %1845 = vmatmul.mubr.bf16.gmra.mrb[12].mxu0 %v8641_v59 }
 0x484   : > { %8390 = vmatprep.mubr.msk.bf16.mxu0 %vm953_vm0, %v8642_v7 }
 0x485   : > { %v1577_v11 = vpop.permute.xlu0 %1576 }
 0x486   : > { %v1635_v40 = vsel %vm844_vm13, %v1577_v11, %v1579_v46 }
 0x487   : > { %1754 = vmatpush1.bf16.msra.mxu1 %v1635_v40 }
 0x48a   : > { %7903 = vmatmul.mubr.msk.bf16.vlgmr.msra.gmra.mrb[12].mxu1 %vm953_vm0, %v8642_v7 }
 0x48b   : > { %8391 = vmatmul.mubr.msk.bf16.vlgmr.msra.gmra.mrb[16].mxu0 %vm953_vm0, %v8643_v43  ;;  %1793 = vmatprep.mubr.bf16.mxu1 %v8727_v47  ;;  %v1398_v52 = vpop.permute.xlu1 %1397 }
 0x48f   : > { %v1408_v32 = vpop.permute.xlu1 %1407 }
 0x492   : > { %7904 = vmatmul.mubr.msk.bf16.gmra.mrb[16].mxu1 %vm953_vm0, %v8643_v43 }
 0x496   : > { %v1393_v19 = vpop.permute.xlu0 %1392 }
 0x49a   : > { %v1403_v24 = vpop.permute.xlu0 %1402 }
 0x54e   : > { %v8113_v45 = vpop.f32.mrb[8].mxu0 }
 0x54f   : > { %v8114_v5 = vpop.f32.mrb[9].mxu0 }
 0x550   : > { %v8115_v49 = vadd.f32 %v8114_v5, %v8113_v45  ;;  %v8116_v50 = vpop.f32.mrb[10].mxu0 }
 0x551   : > { %v8117_v55 = vpop.f32.mrb[11].mxu0 }
 0x552   : > { %v8118_v44 = vadd.f32 %v8117_v55, %v8116_v50  ;;  %v1839_v9 = vadd.f32 %v8115_v49, %v1393_v19 }
 0x554   : > { %v1842_v42 = vadd.f32 %v8118_v44, %v1398_v52 }
 0x556   : > { %v8119_v21 = vpop.f32.mrb[12].mxu0 }
 0x557   : > { %v8120_v33 = vpop.f32.mrb[13].mxu0 }
 0x558   : > { %v8121_v6 = vadd.f32 %v8120_v33, %v8119_v21  ;;  %v8122_v12 = vpop.f32.mrb[14].mxu0 }
 0x559   : > { %v8123_v22 = vpop.f32.mrb[15].mxu0 }
 0x55a   : > { %v8124_v31 = vadd.f32 %v8123_v22, %v8122_v12  ;;  %v1847_v51 = vadd.f32 %v8121_v6, %v1403_v24 }
 0x55c   : > { %v1850_v35 = vadd.f32 %v8124_v31, %v1408_v32 }
 0x55d   : > { %v1785_v38 = vpop.f32.mrb[12].mxu1 }
 0x55e   : > { %v8466_v53 = vadd.f32 %v1785_v38, %v1393_v19  ;;  %v1787_v18 = vpop.f32.mrb[13].mxu1  ;;  %v8392_v15 = vpop.f32.mrb[16].mxu0 }
 0x55f   : > { %v8467_v23 = vadd.f32 %v1787_v18, %v1393_v19  ;;  %v1896_v0 = vadd.f32 %v8392_v15, %v1847_v51  ;;  %v1789_v4 = vpop.f32.mrb[14].mxu1  ;;  %v1887_v10 = vpop.f32.mrb[17].mxu0 }
 0x560   : > { %v1902_v61 = vmax.f32 %v8466_v53, 0.0  ;;  %v8468_v58 = vadd.f32 %v1789_v4, %v1398_v52  ;;  %v1888_v27 = vadd.f32 %v1887_v10, %v1839_v9  ;;  %v1791_v62 = vpop.f32.mrb[15].mxu1  ;;  %v8393_v39 = vpop.f32.mrb[18].mxu0 }
 0x561   : > { %v1903_v60 = vmax.f32 %v8467_v23, 0.0  ;;  %v1910_v3 = vmax.f32 %v1896_v0, 0.0  ;;  %v8469_v20 = vadd.f32 %v1791_v62, %v1398_v52  ;;  %v1899_v25 = vadd.f32 %v8393_v39, %v1850_v35  ;;  %v1890_v30 = vpop.f32.mrb[19].mxu0  ;;  %v9969_v18 = vpop.permute.xlu1 %1984 }
 0x562   : > { %v1905_v57 = vmax.f32 %v8468_v58, 0.0  ;;  %v1904_v63 = vmax.f32 %v1888_v27, 0.0  ;;  %v1891_v8 = vadd.f32 %v1890_v30, %v1842_v42  ;;  %v1914_v17 = vmul.f32 %v1902_v61, %v9393_v1  ;;  %v10006_v35 = vpop.permute.xlu0 %2180 }
 0x563   : > { %v1922_v41 = vmul.f32 %v1910_v3, %v9397_v14  ;;  %v1906_v13 = vmax.f32 %v8469_v20, 0.0  ;;  %v1913_v28 = vmax.f32 %v1899_v25, 0.0  ;;  %v1915_v29 = vmul.f32 %v1903_v60, %v9401_v54 }
 0x564   : > { %v1917_v56 = vmul.f32 %v1905_v57, %v9393_v1  ;;  %v1916_v16 = vmul.f32 %v1904_v63, %v9397_v14  ;;  %v1907_v37 = vmax.f32 %v1891_v8, 0.0 }
 0x565   : > { %1934 = vst.msk [vmem:[#allocation3 + $0x58] sm:$0xff] %vm953_vm0, %v1922_v41  ;;  %v1918_v26 = vmul.f32 %v1906_v13, %v9401_v54  ;;  %v1925_v59 = vmul.f32 %v1913_v28, %v9397_v14  ;;  %v1795_v36 = vpop.f32.mrb[16].mxu1  ;;  %v9973_v15 = vpop.permute.xlu1 %1992 }
 0x566   : > { %1928 = vst.msk [vmem:[#allocation3 + $0x18] sm:$0xff] %vm953_vm0, %v1916_v16  ;;  %v1919_v34 = vmul.f32 %v1907_v37, %v9397_v14  ;;  %v8470_v7 = vadd.f32 %v1795_v36, %v1403_v24  ;;  %v1797_v46 = vpop.f32.mrb[17].mxu1  ;;  %v1969_v48 = vpack.c.bf16 %v1917_v56, %v1914_v17 }
 0x567   : > { %1937 = vst.msk [vmem:[#allocation3 + $0x78] sm:$0xff] %vm953_vm0, %v1925_v59  ;;  %v8471_v11 = vadd.f32 %v1797_v46, %v1403_v24  ;;  %v1799_v40 = vpop.f32.mrb[18].mxu1  ;;  %v1970_v43 = vpack.c.bf16 %v1918_v26, %v1915_v29 }
 0x568   : > { %1931 = vst.msk [vmem:[#allocation3 + $0x38] sm:$0xff] %vm953_vm0, %v1919_v34  ;;  %v1908_v45 = vmax.f32 %v8470_v7, 0.0  ;;  %v8472_v5 = vadd.f32 %v1799_v40, %v1408_v32  ;;  %v1801_v49 = vpop.f32.mrb[19].mxu1 }
 0x569   : > { %v1909_v50 = vmax.f32 %v8471_v11, 0.0  ;;  %v8473_v55 = vadd.f32 %v1801_v49, %v1408_v32  ;;  %v9979_v9 = vpop.permute.xlu1 %2006 }
 0x56a   : > { %v1911_v44 = vmax.f32 %v8472_v5, 0.0  ;;  %v1920_v21 = vmul.f32 %v1908_v45, %v9393_v1 }
 0x56b   : > { %v1912_v19 = vmax.f32 %v8473_v55, 0.0  ;;  %v1921_v33 = vmul.f32 %v1909_v50, %v9401_v54 }
 0x56c   : > { %v1923_v52 = vmul.f32 %v1911_v44, %v9393_v1  ;;  %v1963_v12 = vld [vmem:[#allocation3 + $0x58] sm:$0xff] }
 0x56d   : > { %v1924_v6 = vmul.f32 %v1912_v19, %v9401_v54  ;;  %v1955_v51 = vld [vmem:[#allocation3 + $0x18] sm:$0xff]  ;;  %v9984_v23 = vpop.permute.xlu1 %2014 }
 0x56e   : > { %v1967_v22 = vld [vmem:[#allocation3 + $0x78] sm:$0xff]  ;;  %v1973_v31 = vpack.c.bf16 %v1923_v52, %v1920_v21 }
 0x56f   : > { %v1975_v24 = vpack.c.bf16 %v1967_v22, %v1963_v12  ;;  %v9929_v38 = vpack.c.bf16 %v1924_v6, %v1921_v33  ;;  %v1959_v32 = vld [vmem:[#allocation3 + $0x38] sm:$0xff] }
 0x570   : > { %v1971_v53 = vpack.c.bf16 %v1959_v32, %v1955_v51 }
 0x571   : > { %2060 = vrot.lane.b32.xlu1 %v1975_v24, %s8721_s23  ;;  %1998 = vrot.lane.b32.xlu0 %v1975_v24, %s8718_s12  ;;  %v9994_v0 = vpop.permute.xlu1 %2028 }
 0x575   : > { %2076 = vrot.lane.b32.xlu1 %v1975_v24, %s8722_s24  ;;  %2020 = vrot.lane.b32.xlu0 %v1975_v24, %s8719_s15  ;;  %v9998_v4 = vpop.permute.xlu1 %2036 }
 0x579   : > { %2092 = vrot.lane.b32.xlu1 %v1975_v24, %s8723_s25  ;;  %2042 = vrot.lane.b32.xlu0 %v1975_v24, %s8720_s22  ;;  %v10004_v10 = vpop.permute.xlu1 %2188 }
 0x57d   : > { %2108 = vrot.lane.b32.xlu1 %v1975_v24, %s8724_s26  ;;  %1990 = vrot.lane.b32.xlu0 %v1971_v53, %s8718_s12 }
 0x581   : > { %2124 = vrot.lane.b32.xlu1 %v1975_v24, %s8726_s28  ;;  %2012 = vrot.lane.b32.xlu0 %v1971_v53, %s8719_s15 }
 0x585   : > { %2194 = vrot.lane.b32.xlu1 %v1975_v24, %s8725_s27  ;;  %2034 = vrot.lane.b32.xlu0 %v1971_v53, %s8720_s22 }
 0x589   : > { %2118 = vrot.lane.b32.xlu1 %v1971_v53, %s8726_s28  ;;  %2054 = vrot.lane.b32.xlu0 %v1971_v53, %s8721_s23 }
 0x58d   : > { %2182 = vrot.lane.b32.xlu1 %v1969_v48, %s8725_s27  ;;  %2070 = vrot.lane.b32.xlu0 %v1971_v53, %s8722_s24 }
 0x591   : > { %2114 = vrot.lane.b32.xlu1 %v1969_v48, %s8726_s28  ;;  %2086 = vrot.lane.b32.xlu0 %v1971_v53, %s8723_s25 }
 0x595   : > { %1988 = vrot.lane.b32.xlu1 %v1970_v43, %s8718_s12  ;;  %2102 = vrot.lane.b32.xlu0 %v1971_v53, %s8724_s26 }
 0x599   : > { %2010 = vrot.lane.b32.xlu1 %v1970_v43, %s8719_s15  ;;  %2186 = vrot.lane.b32.xlu0 %v1971_v53, %s8725_s27 }
 0x59d   : > { %2032 = vrot.lane.b32.xlu1 %v1970_v43, %s8720_s22  ;;  %1986 = vrot.lane.b32.xlu0 %v1969_v48, %s8718_s12 }
 0x5a1   : > { %2052 = vrot.lane.b32.xlu1 %v1970_v43, %s8721_s23  ;;  %2008 = vrot.lane.b32.xlu0 %v1969_v48, %s8719_s15 }
 0x5a5   : > { %2068 = vrot.lane.b32.xlu1 %v1970_v43, %s8722_s24  ;;  %2030 = vrot.lane.b32.xlu0 %v1969_v48, %s8720_s22 }
 0x5a9   : > { %2084 = vrot.lane.b32.xlu1 %v1970_v43, %s8723_s25  ;;  %2050 = vrot.lane.b32.xlu0 %v1969_v48, %s8721_s23 }
 0x5ad   : > { %2100 = vrot.lane.b32.xlu1 %v1970_v43, %s8724_s26  ;;  %2066 = vrot.lane.b32.xlu0 %v1969_v48, %s8722_s24 }
 0x5b1   : > { %2056 = vrot.lane.b32.xlu1 %v1973_v31, %s8721_s23  ;;  %2082 = vrot.lane.b32.xlu0 %v1969_v48, %s8723_s25 }
 0x5b5   : > { %2072 = vrot.lane.b32.xlu1 %v1973_v31, %s8722_s24  ;;  %2098 = vrot.lane.b32.xlu0 %v1969_v48, %s8724_s26 }
 0x5b9   : > { %2088 = vrot.lane.b32.xlu1 %v1973_v31, %s8723_s25  ;;  %2184 = vrot.lane.b32.xlu0 %v1970_v43, %s8725_s27 }
 0x5bd   : > { %2104 = vrot.lane.b32.xlu1 %v1973_v31, %s8724_s26  ;;  %2116 = vrot.lane.b32.xlu0 %v1970_v43, %s8726_s28 }
 0x5c1   : > { %2190 = vrot.lane.b32.xlu1 %v1973_v31, %s8725_s27  ;;  %1994 = vrot.lane.b32.xlu0 %v1973_v31, %s8718_s12 }
 0x5c5   : > { %2120 = vrot.lane.b32.xlu1 %v1973_v31, %s8726_s28  ;;  %2016 = vrot.lane.b32.xlu0 %v1973_v31, %s8719_s15 }
 0x5c9   : > { %1996 = vrot.lane.b32.xlu1 %v9929_v38, %s8718_s12  ;;  %2038 = vrot.lane.b32.xlu0 %v1973_v31, %s8720_s22 }
 0x5cd   : > { %2018 = vrot.lane.b32.xlu1 %v9929_v38, %s8719_s15  ;;  %2058 = vrot.lane.b32.xlu0 %v9929_v38, %s8721_s23 }
 0x5d1   : > { %2040 = vrot.lane.b32.xlu1 %v9929_v38, %s8720_s22  ;;  %2074 = vrot.lane.b32.xlu0 %v9929_v38, %s8722_s24 }
 0x5d5   : > { %2090 = vrot.lane.b32.xlu0 %v9929_v38, %s8723_s25 }
 0x5d9   : > { %2106 = vrot.lane.b32.xlu0 %v9929_v38, %s8724_s26 }
 0x5dd   : > { %2192 = vrot.lane.b32.xlu0 %v9929_v38, %s8725_s27 }
 0x5e1   : > { %2122 = vrot.lane.b32.xlu0 %v9929_v38, %s8726_s28 }
 0x5e3   : > { %v10010_v61 = vpop.permute.xlu1 %2060  ;;  %v10012_v58 = vpop.permute.xlu0 %1998 }
 0x5e4   : > { %2210 = vrot.lane.b32.xlu1 %v10012_v58, %s8725_s27 }
 0x5e5   : > { %2258 = vrot.lane.b32.xlu0 %v10010_v61, %s8725_s27 }
 0x5e7   : > { %v10018_v27 = vpop.permute.xlu1 %2076  ;;  %v10020_v62 = vpop.permute.xlu0 %2020 }
 0x5e9   : > { %2274 = vrot.lane.b32.xlu0 %v10018_v27, %s8725_s27 }
 0x5eb   : > { %v10024_v39 = vpop.permute.xlu1 %2092  ;;  %v10026_v42 = vpop.permute.xlu0 %2042 }
 0x5ef   : > { %v10028_v60 = vpop.permute.xlu1 %2108  ;;  %v1991_v3 = vpop.permute.xlu0 %1990 }
 0x5f0   : > { %2202 = vrot.lane.b32.xlu0 %v1991_v3, %s8725_s27 }
 0x5f3   : > { %v10031_v20 = vpop.permute.xlu1 %2124  ;;  %v10033_v25 = vpop.permute.xlu0 %2012 }
 0x5f7   : > { %v10035_v30 = vpop.permute.xlu1 %2194  ;;  %v10037_v57 = vpop.permute.xlu0 %2034 }
 0x5fb   : > { %v10039_v63 = vpop.permute.xlu1 %2118  ;;  %v2055_v8 = vpop.permute.xlu0 %2054 }
 0x5fc   : > { %2250 = vrot.lane.b32.xlu1 %v2055_v8, %s8725_s27 }
 0x5ff   : > { %v2183_v41 = vpop.permute.xlu1 %2182  ;;  %v10042_v13 = vpop.permute.xlu0 %2070 }
 0x600   : > { %2266 = vrot.lane.b32.xlu1 %v10042_v13, %s8725_s27  ;;  %v2324_v32 = vsel %vm844_vm13, %v10006_v35, %v2183_v41 }
 0x603   : > { %v10046_v28 = vpop.permute.xlu1 %2114  ;;  %v10048_v17 = vpop.permute.xlu0 %2086 }
 0x607   : > { %v1989_v56 = vpop.permute.xlu1 %1988  ;;  %v10050_v16 = vpop.permute.xlu0 %2102 }
 0x608   : > { %v2002_v37 = vsel %vm512_vm5, %v1989_v56, %v1991_v3 }
 0x609   : > { %2200 = vrot.lane.b32.xlu1 %v2002_v37, %s8725_s27 }
 0x60b   : > { %v2011_v29 = vpop.permute.xlu1 %2010  ;;  %v10054_v26 = vpop.permute.xlu0 %2186 }
 0x60c   : > { %v2024_v3 = vsel %vm535_vm9, %v2011_v29, %v10033_v25 }
 0x60f   : > { %v2033_v59 = vpop.permute.xlu1 %2032  ;;  %v1987_v36 = vpop.permute.xlu0 %1986 }
 0x610   : > { %v2046_v40 = vsel %vm419_vm8, %v2033_v59, %v10037_v57  ;;  %v2000_v21 = vsel %vm512_vm5, %v9969_v18, %v1987_v36  ;;  %v2001_v18 = vsel %vm512_vm5, %v1987_v36, %v1989_v56 }
 0x613   : > { %v2053_v34 = vpop.permute.xlu1 %2052  ;;  %v2009_v7 = vpop.permute.xlu0 %2008 }
 0x614   : > { %v2023_v46 = vsel %vm535_vm9, %v2009_v7, %v2011_v29  ;;  %v2063_v5 = vsel %vm577_vm10, %v2053_v34, %v2055_v8  ;;  %v2022_v12 = vsel %vm535_vm9, %v9979_v9, %v2009_v7 }
 0x615   : > { %2214 = vrot.lane.b32.xlu1 %v2023_v46, %s8725_s27 }
 0x617   : > { %v2069_v48 = vpop.permute.xlu1 %2068  ;;  %v2031_v11 = vpop.permute.xlu0 %2030 }
 0x618   : > { %v2044_v24 = vsel %vm419_vm8, %v9994_v0, %v2031_v11  ;;  %v2045_v35 = vsel %vm419_vm8, %v2031_v11, %v2033_v59  ;;  %v2079_v59 = vsel %vm594_vm11, %v2069_v48, %v10042_v13 }
 0x619   : > { %2232 = vrot.lane.b32.xlu1 %v2046_v40, %s8725_s27 }
 0x61b   : > { %v2085_v43 = vpop.permute.xlu1 %2084  ;;  %v2051_v45 = vpop.permute.xlu0 %2050 }
 0x61c   : > { %2244 = vrot.lane.b32.xlu0 %v2051_v45, %s8725_s27  ;;  %v2062_v36 = vsel %vm577_vm10, %v2051_v45, %v2053_v34  ;;  %v2095_v34 = vsel %vm611_vm12, %v2085_v43, %v10048_v17 }
 0x61d   : > { %2248 = vrot.lane.b32.xlu1 %v2063_v5, %s8725_s27 }
 0x61f   : > { %v10064_v49 = vpop.permute.xlu1 %2100  ;;  %v2067_v50 = vpop.permute.xlu0 %2066 }
 0x620   : > { %2260 = vrot.lane.b32.xlu0 %v2067_v50, %s8725_s27  ;;  %v2078_v55 = vsel %vm594_vm11, %v2067_v50, %v2069_v48 }
 0x621   : > { %2262 = vrot.lane.b32.xlu1 %v2078_v55, %s8725_s27 }
 0x623   : > { %v10069_v44 = vpop.permute.xlu1 %2056  ;;  %v2083_v19 = vpop.permute.xlu0 %2082 }
 0x624   : > { %2196 = vrot.lane.b32.xlu0 %v2000_v21, %s8725_s27  ;;  %v2094_v52 = vsel %vm611_vm12, %v2083_v19, %v2085_v43 }
 0x625   : > { %2278 = vrot.lane.b32.xlu1 %v2094_v52, %s8725_s27 }
 0x627   : > { %v10076_v33 = vpop.permute.xlu1 %2072  ;;  %v10078_v6 = vpop.permute.xlu0 %2098 }
 0x628   : > { %2212 = vrot.lane.b32.xlu0 %v2022_v12, %s8725_s27 }
 0x629   : > { %2252 = vrot.lane.b32.xlu1 %v10069_v44, %s8725_s27 }
 0x62b   : > { %v10085_v22 = vpop.permute.xlu1 %2088  ;;  %v10087_v31 = vpop.permute.xlu0 %2184 }
 0x62c   : > { %2228 = vrot.lane.b32.xlu0 %v2044_v24, %s8725_s27  ;;  %v2325_v38 = vsel %vm844_vm13, %v2183_v41, %v10087_v31 }
 0x62d   : > { %2268 = vrot.lane.b32.xlu1 %v10076_v33, %s8725_s27  ;;  %2438 = vmatprep.subr.bf16.mxu0 %v2325_v38 }
 0x62e   : > { %2439 = vmatpush1.bf16.msra.mxu0 %v2324_v32 }
 0x62f   : > { %v10098_v51 = vpop.permute.xlu1 %2104  ;;  %v10100_v53 = vpop.permute.xlu0 %2116 }
 0x630   : > { %2198 = vrot.lane.b32.xlu0 %v2001_v18, %s8725_s27  ;;  %v2126_v32 = vsel %vm645_vm15, %v10046_v28, %v10100_v53 }
 0x633   : > { %v2191_v9 = vpop.permute.xlu1 %2190  ;;  %v1995_v0 = vpop.permute.xlu0 %1994 }
 0x634   : > { %2216 = vrot.lane.b32.xlu0 %v2024_v3, %s8725_s27  ;;  %v2003_v13 = vsel %vm512_vm5, %v9973_v15, %v1995_v0 }
 0x637   : > { %v10107_v8 = vpop.permute.xlu1 %2120  ;;  %v2017_v37 = vpop.permute.xlu0 %2016 }
 0x638   : > { %2230 = vrot.lane.b32.xlu0 %v2045_v35, %s8725_s27  ;;  %v2025_v41 = vsel %vm535_vm9, %v9984_v23, %v2017_v37  ;;  %v7915_v35 = vld [vmem:[%s13950_s6 + $0x20] sm:$0xff] }
 0x639   : > { %2220 = vrot.lane.b32.xlu1 %v2025_v41, %s8725_s27 }
 0x63b   : > { %v2039_v56 = vpop.permute.xlu0 %2038  ;;  %v1997_v7 = vpop.permute.xlu1 %1996 }
 0x63c   : > { %2246 = vrot.lane.b32.xlu0 %v2062_v36, %s8725_s27  ;;  %v2047_v29 = vsel %vm419_vm8, %v9998_v4, %v2039_v56  ;;  %v2004_v23 = vsel %vm512_vm5, %v1995_v0, %v1997_v7  ;;  %v2005_v43 = vsel %vm512_vm5, %v1997_v7, %v10012_v58  ;;  %v2327_v58 = vsel %vm844_vm13, %v10004_v10, %v2191_v9 }
 0x63d   : > { %2236 = vrot.lane.b32.xlu1 %v2047_v29, %s8725_s27 }
 0x63f   : > { %v2059_v46 = vpop.permute.xlu0 %2058  ;;  %v2019_v4 = vpop.permute.xlu1 %2018 }
 0x640   : > { %2264 = vrot.lane.b32.xlu0 %v2079_v59, %s8725_s27  ;;  %v2026_v48 = vsel %vm535_vm9, %v2017_v37, %v2019_v4  ;;  %v2027_v55 = vsel %vm535_vm9, %v2019_v4, %v10020_v62  ;;  %v2065_v21 = vsel %vm577_vm10, %v2059_v46, %v10010_v61  ;;  %v2064_v61 = vsel %vm577_vm10, %v10069_v44, %v2059_v46 }
 0x641   : > { %2206 = vrot.lane.b32.xlu1 %v2004_v23, %s8725_s27  ;;  %v2326_v37 = vsel %vm844_vm13, %v10087_v31, %v10054_v26 }
 0x643   : > { %v2075_v11 = vpop.permute.xlu0 %2074  ;;  %v2041_v5 = vpop.permute.xlu1 %2040 }
 0x644   : > { %2280 = vrot.lane.b32.xlu0 %v2095_v34, %s8725_s27  ;;  %v2048_v15 = vsel %vm419_vm8, %v2039_v56, %v2041_v5  ;;  %v2049_v10 = vsel %vm419_vm8, %v2041_v5, %v10026_v42  ;;  %v2081_v52 = vsel %vm594_vm11, %v2075_v11, %v10018_v27  ;;  %v2080_v27 = vsel %vm594_vm11, %v10076_v33, %v2075_v11 }
 0x645   : > { %2282 = vrot.lane.b32.xlu1 %v10048_v17, %s8725_s27  ;;  %v2127_v33 = vsel %vm645_vm15, %v10100_v53, %v10039_v63  ;;  %v7918_v53 = vld [vmem:[%s13950_s6 + $0x38] sm:$0xff] }
 0x647   : > { %v2091_v40 = vpop.permute.xlu0 %2090 }
 0x648   : > { %2204 = vrot.lane.b32.xlu0 %v2003_v13, %s8725_s27 }
 0x649   : > { %2222 = vrot.lane.b32.xlu1 %v2026_v48, %s8725_s27 }
 0x64b   : > { %v2107_v45 = vpop.permute.xlu0 %2106 }
 0x64c   : > { %2208 = vrot.lane.b32.xlu0 %v2005_v43, %s8725_s27 }
 0x64d   : > { %2284 = vrot.lane.b32.xlu1 %v10085_v22, %s8725_s27 }
 0x64f   : > { %v10139_v17 = vpop.permute.xlu0 %2192 }
 0x650   : > { %2276 = vrot.lane.b32.xlu0 %v2083_v19, %s8725_s27  ;;  %v2328_v50 = vsel %vm844_vm13, %v2191_v9, %v10139_v17  ;;  %v2110_v19 = vsel %vm628_vm14, %v10078_v6, %v10064_v49 }
 0x651   : > { %2238 = vrot.lane.b32.xlu1 %v2048_v15, %s8725_s27  ;;  %2440 = vmatprep.subr.bf16.mxu0 %v2328_v50 }
 0x652   : > { %2441 = vmatpush1.bf16.msra.mxu0 %v2327_v58 }
 0x653   : > { %v2123_v12 = vpop.permute.xlu0 %2122 }
 0x654   : > { %2224 = vrot.lane.b32.xlu0 %v2027_v55, %s8725_s27 }
 0x655   : > { %2294 = vrot.lane.b32.xlu1 %v2110_v19, %s8725_s27 }
 0x656   : > { %v10198_v44 = vpop.permute.xlu1 %2210 }
 0x657   : > { %v10215_v24 = vpop.permute.xlu0 %2258 }
 0x658   : > { %2218 = vrot.lane.b32.xlu0 %v10033_v25, %s8725_s27  ;;  %v2097_v25 = vsel %vm611_vm12, %v2091_v40, %v10024_v39 }
 0x659   : > { %2256 = vrot.lane.b32.xlu1 %v2065_v21, %s8725_s27 }
 0x65c   : > { %2240 = vrot.lane.b32.xlu0 %v2049_v10, %s8725_s27 }
 0x65d   : > { %2226 = vrot.lane.b32.xlu1 %v10020_v62, %s8725_s27  ;;  %v2111_v62 = vsel %vm628_vm14, %v10064_v49, %v10050_v16  ;;  %v8646_v49 = vld [vmem:[%s13949_s5 + $0x34] ss:$12 sps:$4 sm:$0xff]  }
 0x65e   : > { %2470 = vmatprep.mubr.bf16.mxu0 %v8646_v49  ;;  %2576 = vmatprep.mubr.bf16.mxu1 %v8646_v49 }
 0x660   : > { %2290 = vrot.lane.b32.xlu0 %v10024_v39, %s8725_s27  ;;  %v2096_v39 = vsel %vm611_vm12, %v10085_v22, %v2091_v40  ;;  %v2112_v22 = vsel %vm628_vm14, %v10098_v51, %v2107_v45 }
 0x661   : > { %2272 = vrot.lane.b32.xlu1 %v2081_v52, %s8725_s27 }
 0x664   : > { %2254 = vrot.lane.b32.xlu0 %v2064_v61, %s8725_s27 }
 0x665   : > { %2298 = vrot.lane.b32.xlu1 %v10050_v16, %s8725_s27  ;;  %v2113_v16 = vsel %vm628_vm14, %v2107_v45, %v10028_v60 }
 0x668   : > { %2296 = vrot.lane.b32.xlu0 %v2111_v62, %s8725_s27 }
 0x669   : > { %2288 = vrot.lane.b32.xlu1 %v2097_v25, %s8725_s27 }
 0x66c   : > { %2270 = vrot.lane.b32.xlu0 %v2080_v27, %s8725_s27 }
 0x66d   : > { %2300 = vrot.lane.b32.xlu1 %v10098_v51, %s8725_s27 }
 0x670   : > { %2292 = vrot.lane.b32.xlu0 %v10078_v6, %s8725_s27  ;;  %v2251_v6 = vpop.permute.xlu1 %2250 }
 0x671   : > { %2304 = vrot.lane.b32.xlu1 %v2113_v16, %s8725_s27 }
 0x674   : > { %2286 = vrot.lane.b32.xlu0 %v2096_v39, %s8725_s27 }
 0x675   : > { %2242 = vrot.lane.b32.xlu1 %v10026_v42, %s8725_s27  ;;  %v10213_v42 = vpop.permute.xlu1 %2266 }
 0x678   : > { %2234 = vrot.lane.b32.xlu0 %v10037_v57, %s8725_s27  ;;  %v2129_v57 = vsel %vm645_vm15, %v2123_v12, %v10031_v20 }
 0x679   : > { %2312 = vrot.lane.b32.xlu1 %v2127_v33, %s8725_s27 }
 0x67b   : > { %v10222_v38 = vpop.permute.xlu1 %2200 }
 0x67c   : > { %2302 = vrot.lane.b32.xlu0 %v2112_v22, %s8725_s27 }
 0x67d   : > { %2314 = vrot.lane.b32.xlu1 %v10039_v63, %s8725_s27  ;;  %v10230_v63 = vpop.permute.xlu0 %2274 }
 0x680   : > { %2306 = vrot.lane.b32.xlu0 %v10028_v60, %s8725_s27  ;;  %v7916_v60 = vld [vmem:[%s13950_s6 + $0x28] sm:$0xff] }
 0x681   : > { %2320 = vrot.lane.b32.xlu1 %v2129_v57, %s8725_s27  ;;  %v10237_v18 = vpop.permute.xlu0 %2202 }
 0x684   : > { %2310 = vrot.lane.b32.xlu0 %v2126_v32, %s8725_s27  ;;  %v2329_v32 = vsel %vm844_vm13, %v10139_v17, %v10035_v30  ;;  %v2332_v30 = vsel %vm844_vm13, %v10222_v38, %v10237_v18 }
 0x685   : > { %2322 = vrot.lane.b32.xlu1 %v10031_v20, %s8725_s27  ;;  %v2128_v20 = vsel %vm645_vm15, %v10107_v8, %v2123_v12 }
 0x687   : > { %v2215_v51 = vpop.permute.xlu1 %2214 }
 0x688   : > { %2308 = vrot.lane.b32.xlu0 %v10046_v28, %s8725_s27 }
 0x689   : > { %2137 = vperm.xlu1 %8625, %v7916_v60  }
 0x68b   : > { %v10242_v9 = vpop.permute.xlu1 %2232 }
 0x68c   : > { %2318 = vrot.lane.b32.xlu0 %v2128_v20, %s8725_s27 }
 0x68d   : > { %2147 = vperm.xlu1 %8625, %v7918_v53  }
 0x68e   : > { %v10247_v0 = vpop.permute.xlu0 %2244 }
 0x68f   : > { %v10249_v3 = vpop.permute.xlu1 %2248 }
 0x690   : > { %2316 = vrot.lane.b32.xlu0 %v10107_v8, %s8725_s27  ;;  %v2350_v28 = vsel %vm844_vm13, %v10249_v3, %v2251_v6  ;;  %v7917_v8 = vld [vmem:[%s13950_s6 + $0x30] sm:$0xff] }
 0x691   : > { %8129 = vmatprep.subr.bf16.mxu1 %v2350_v28 }
 0x692   : > { %8130 = vmatpush3.bf16.msra.mxu1 %v2326_v37  ;;  %v10261_v41 = vpop.permute.xlu0 %2260 }
 0x693   : > { %v10263_v56 = vpop.permute.xlu1 %2262 }
 0x694   : > { %2132 = vperm.xlu0 %8626, %v7915_v35  }
 0x696   : > { %v2197_v36 = vpop.permute.xlu0 %2196 }
 0x697   : > { %v10268_v7 = vpop.permute.xlu1 %2278 }
 0x698   : > { %2142 = vperm.xlu0 %8626, %v7917_v8  }
 0x69a   : > { %v2213_v29 = vpop.permute.xlu0 %2212 }
 0x69b   : > { %v10270_v31 = vpop.permute.xlu1 %2252  ;;  %v2336_v25 = vsel %vm844_vm13, %v2213_v29, %v2215_v51 }
 0x69e   : > { %v2229_v26 = vpop.permute.xlu0 %2228 }
 0x69f   : > { %v10277_v34 = vpop.permute.xlu1 %2268 }
 0x6a2   : > { %v2199_v46 = vpop.permute.xlu0 %2198 }
 0x6a3   : > { %v2331_v59 = vsel %vm844_vm13, %v2199_v46, %v10222_v38  ;;  %v2330_v23 = vsel %vm844_vm13, %v2197_v36, %v2199_v46  ;;  %v2354_v46 = vsel %vm844_vm13, %v10261_v41, %v10263_v56 }
 0x6a4   : > { %2442 = vmatprep.subr.bf16.mxu0 %v2331_v59 }
 0x6a5   : > { %2443 = vmatpush1.bf16.msra.mxu0 %v2330_v23 }
 0x6a6   : > { %v10275_v11 = vpop.permute.xlu0 %2216 }
 0x6a7   : > { %v2337_v52 = vsel %vm844_vm13, %v2215_v51, %v10275_v11 }
 0x6aa   : > { %v2231_v4 = vpop.permute.xlu0 %2230 }
 0x6ab   : > { %v2221_v40 = vpop.permute.xlu1 %2220  ;;  %v2343_v33 = vsel %vm844_vm13, %v2231_v4, %v10242_v9  ;;  %v2342_v22 = vsel %vm844_vm13, %v2229_v26, %v2231_v4 }
 0x6ae   : > { %v2247_v13 = vpop.permute.xlu0 %2246 }
 0x6af   : > { %v2237_v48 = vpop.permute.xlu1 %2236  ;;  %v2349_v28 = vsel %vm844_vm13, %v2247_v13, %v10249_v3  ;;  %v2348_v37 = vsel %vm844_vm13, %v10247_v0, %v2247_v13 }
 0x6b2   : > { %v10279_v45 = vpop.permute.xlu0 %2264 }
 0x6b3   : > { %v2207_v43 = vpop.permute.xlu1 %2206  ;;  %v2356_v51 = vsel %vm844_vm13, %v10279_v45, %v10213_v42 }
 0x6b6   : > { %v10281_v5 = vpop.permute.xlu0 %2280 }
 0x6b7   : > { %v2283_v15 = vpop.permute.xlu1 %2282  ;;  %v2361_v41 = vsel %vm844_vm13, %v10268_v7, %v10281_v5 }
 0x6b8   : > { %v2362_v38 = vsel %vm844_vm13, %v10281_v5, %v2283_v15 }
 0x6ba   : > { %v2205_v50 = vpop.permute.xlu0 %2204 }
 0x6bb   : > { %v2223_v58 = vpop.permute.xlu1 %2222  ;;  %v2333_v10 = vsel %vm844_vm13, %v2205_v50, %v2207_v43 }
 0x6bc   : > { %v2339_v49 = vsel %vm844_vm13, %v2221_v40, %v2223_v58 }
 0x6be   : > { %v2209_v55 = vpop.permute.xlu0 %2208 }
 0x6bf   : > { %v10283_v19 = vpop.permute.xlu1 %2284  ;;  %v2334_v21 = vsel %vm844_vm13, %v2207_v43, %v2209_v55  ;;  %v2335_v8 = vsel %vm844_vm13, %v2209_v55, %v10198_v44  ;;  %v2355_v44 = vsel %vm844_vm13, %v10263_v56, %v10279_v45 }
 0x6c0   : > { %2444 = vmatprep.subr.bf16.mxu0 %v2334_v21 }
 0x6c1   : > { %2445 = vmatpush1.bf16.msra.mxu0 %v2333_v10 }
 0x6c2   : > { %2446 = vmatprep.subr.bf16.mxu0 %v2337_v52  ;;  %v10289_v61 = vpop.permute.xlu0 %2276 }
 0x6c3   : > { %v2239_v62 = vpop.permute.xlu1 %2238  ;;  %v2360_v45 = vsel %vm844_vm13, %v10289_v61, %v10268_v7 }
 0x6c5   : > { %2447 = vmatpush1.bf16.msra.mxu0 %v2336_v25 }
 0x6c6   : > { %v2225_v27 = vpop.permute.xlu0 %2224 }
 0x6c7   : > { %v10292_v16 = vpop.permute.xlu1 %2294  ;;  %v2340_v39 = vsel %vm844_vm13, %v2223_v58, %v2225_v27 }
 0x6c8   : > { %2448 = vmatprep.subr.bf16.mxu0 %v2340_v39 }
 0x6c9   : > { %2449 = vmatpush1.bf16.msra.mxu0 %v2339_v49 }
 0x6ca   : > { %2450 = vmatprep.subr.bf16.mxu0 %v2343_v33  ;;  %v2219_v6 = vpop.permute.xlu0 %2218 }
 0x6cb   : > { %v2257_v12 = vpop.permute.xlu1 %2256 }
 0x6cc   : > { %v2353_v57 = vsel %vm844_vm13, %v2257_v12, %v10215_v24  ;;  %v2345_v24 = vsel %vm844_vm13, %v2237_v48, %v2239_v62 }
 0x6cd   : > { %2451 = vmatpush1.bf16.msra.mxu0 %v2342_v22  ;;  %8131 = vmatprep.subr.bf16.mxu1 %v2353_v57  ;;  %v8649_v57 = vld [vmem:[%s13949_s5 + $0x48] ss:$12 sps:$4 sm:$0xff]  }
 0x6ce   : > { %8132 = vmatpush3.bf16.msra.mxu1 %v2329_v32  ;;  %v10304_v60 = vpop.permute.xlu0 %2240 }
 0x6cf   : > { %v2227_v53 = vpop.permute.xlu1 %2226  ;;  %8133 = vmatprep.subr.bf16.mxu1 %v2356_v51  ;;  %v2346_v20 = vsel %vm844_vm13, %v2239_v62, %v10304_v60  ;;  %v8644_v62 = vld [vmem:[%s13949_s5 + $0x30] ss:$12 sps:$4 sm:$0xff]   ;;  %v8650_v51 = vld [vmem:[%s13949_s5 + $0x38] ss:$12 sps:$4 sm:$0xff]  }
 0x6d0   : > { %2452 = vmatprep.subr.bf16.mxu0 %v2346_v20 }
 0x6d1   : > { %2453 = vmatpush1.bf16.msra.mxu0 %v2345_v24 }
 0x6d2   : > { %2454 = vmatprep.subr.bf16.mxu0 %v2349_v28  ;;  %8134 = vmatpush3.bf16.msra.mxu1 %v2332_v30  ;;  %v2291_v17 = vpop.permute.xlu0 %2290  ;;  %v8651_v30 = vld [vmem:[%s13949_s5 + $0x50] ss:$12 sps:$4 sm:$0xff]  }
 0x6d3   : > { %v2273_v42 = vpop.permute.xlu1 %2272 }
 0x6d4   : > { %v2359_v35 = vsel %vm844_vm13, %v2273_v42, %v10230_v63  ;;  %v2338_v63 = vsel %vm844_vm13, %v10275_v11, %v2219_v6 }
 0x6d5   : > { %2455 = vmatpush1.bf16.msra.mxu0 %v2348_v37  ;;  %8135 = vmatprep.subr.bf16.mxu1 %v2359_v35 }
 0x6d6   : > { %8136 = vmatpush3.bf16.msra.mxu1 %v2335_v8  ;;  %v2255_v3 = vpop.permute.xlu0 %2254 }
 0x6d7   : > { %v2299_v18 = vpop.permute.xlu1 %2298  ;;  %8137 = vmatprep.subr.bf16.mxu1 %v2362_v38  ;;  %v2352_v36 = vsel %vm844_vm13, %v2255_v3, %v2257_v12  ;;  %v2351_v0 = vsel %vm844_vm13, %v10270_v31, %v2255_v3  ;;  %v2341_v31 = vsel %vm844_vm13, %v2225_v27, %v2227_v53 }
 0x6d8   : > { %2456 = vmatprep.subr.bf16.mxu0 %v2352_v36 }
 0x6d9   : > { %2457 = vmatpush1.bf16.msra.mxu0 %v2351_v0 }
 0x6da   : > { %2458 = vmatprep.subr.bf16.mxu0 %v2355_v44  ;;  %8138 = vmatpush3.bf16.msra.mxu1 %v2338_v63  ;;  %v2297_v29 = vpop.permute.xlu0 %2296 }
 0x6db   : > { %v2289_v26 = vpop.permute.xlu1 %2288  ;;  %v2368_v11 = vsel %vm844_vm13, %v2297_v29, %v2299_v18  ;;  %v2367_v5 = vsel %vm844_vm13, %v10292_v16, %v2297_v29 }
 0x6dc   : > { %v2365_v59 = vsel %vm844_vm13, %v2289_v26, %v2291_v17  ;;  %v8703_v17 = vld [vmem:[#allocation2] sm:$0xff] }
 0x6dd   : > { %2459 = vmatpush1.bf16.msra.mxu0 %v2354_v46  ;;  %8139 = vmatprep.subr.bf16.mxu1 %v2365_v59 }
 0x6de   : > { %8140 = vmatpush3.bf16.msra.mxu1 %v2341_v31  ;;  %v2271_v23 = vpop.permute.xlu0 %2270 }
 0x6df   : > { %v2301_v4 = vpop.permute.xlu1 %2300  ;;  %8141 = vmatprep.subr.bf16.mxu1 %v2368_v11  ;;  %v2358_v40 = vsel %vm844_vm13, %v2271_v23, %v2273_v42  ;;  %v2357_v13 = vsel %vm844_vm13, %v10277_v34, %v2271_v23  ;;  %v2720_v42 = vpack.c.bf16 %v8703_v17, %v8703_v17 }
 0x6e0   : > { %2460 = vmatprep.subr.bf16.mxu0 %v2358_v40 }
 0x6e1   : > { %2461 = vmatpush1.bf16.msra.mxu0 %v2357_v13  ;;  %2736 = vrot.lane.b32.xlu1 %v2720_v42, %s8718_s12 }
 0x6e2   : > { %2462 = vmatprep.subr.bf16.mxu0 %v2361_v41  ;;  %v2293_v56 = vpop.permute.xlu0 %2292  ;;  %2932 = vrot.lane.b32.xlu0 %v2720_v42, %s8725_s27 }
 0x6e3   : > { %v2305_v48 = vpop.permute.xlu1 %2304  ;;  %v2366_v7 = vsel %vm844_vm13, %v2293_v56, %v10292_v16 }
 0x6e5   : > { %2463 = vmatpush1.bf16.msra.mxu0 %v2360_v45  ;;  %2744 = vrot.lane.b32.xlu1 %v2720_v42, %s8718_s12 }
 0x6e6   : > { %v2287_v43 = vpop.permute.xlu0 %2286 }
 0x6e7   : > { %v2243_v15 = vpop.permute.xlu1 %2242  ;;  %v2364_v50 = vsel %vm844_vm13, %v2287_v43, %v2289_v26  ;;  %v2363_v34 = vsel %vm844_vm13, %v10283_v19, %v2287_v43 }
 0x6e8   : > { %2464 = vmatprep.subr.bf16.mxu0 %v2364_v50  ;;  %v2347_v39 = vsel %vm844_vm13, %v10304_v60, %v2243_v15 }
 0x6e9   : > { %2465 = vmatpush1.bf16.msra.mxu0 %v2363_v34  ;;  %2758 = vrot.lane.b32.xlu1 %v2720_v42, %s8719_s15 }
 0x6ea   : > { %2466 = vmatprep.subr.bf16.mxu0 %v2367_v5  ;;  %v2235_v58 = vpop.permute.xlu0 %2234 }
 0x6eb   : > { %v2344_v55 = vsel %vm844_vm13, %v10242_v9, %v2235_v58  ;;  %v2313_v21 = vpop.permute.xlu1 %2312  ;;  %v8647_v9 = vld [vmem:[%s13949_s5 + $0x4c] ss:$12 sps:$4 sm:$0xff]  }
 0x6ec   : > { %8142 = vmatpush3.bf16.msra.mxu1 %v2344_v55 }
 0x6ed   : > { %2467 = vmatpush1.bf16.msra.mxu0 %v2366_v7  ;;  %2766 = vrot.lane.b32.xlu1 %v2720_v42, %s8719_s15 }
 0x6ee   : > { %v2303_v10 = vpop.permute.xlu0 %2302 }
 0x6ef   : > { %v2315_v52 = vpop.permute.xlu1 %2314  ;;  %v2370_v19 = vsel %vm844_vm13, %v2303_v10, %v2305_v48  ;;  %v2369_v61 = vsel %vm844_vm13, %v2301_v4, %v2303_v10  ;;  %v2642_v10 = vld [vmem:[#allocation2 + $0x8] sm:$0xff] }
 0x6f0   : > { %2468 = vmatprep.subr.bf16.mxu0 %v2370_v19  ;;  %v2374_v49 = vsel %vm844_vm13, %v2313_v21, %v2315_v52 }
 0x6f1   : > { %2469 = vmatpush1.bf16.msra.mxu0 %v2369_v61  ;;  %2780 = vrot.lane.b32.xlu1 %v2720_v42, %s8720_s22 }
 0x6f2   : > { %v2307_v25 = vpop.permute.xlu0 %2306 }
 0x6f3   : > { %v2321_v27 = vpop.permute.xlu1 %2320  ;;  %v2371_v16 = vsel %vm844_vm13, %v2305_v48, %v2307_v25 }
 0x6f4   : > { %8143 = vmatprep.subr.bf16.mxu1 %v2371_v16  ;;  %2471 = vmatmul.mubr.bf16.vlgmr.msra.gmra.mrb[20].mxu0 %v8644_v62  ;;  %v2650_v16 = vld [vmem:[#allocation2 + $0x58] sm:$0xff] }
 0x6f5   : > { %8144 = vmatpush3.bf16.msra.mxu1 %v2347_v39  ;;  %2480 = vmatprep.mubr.bf16.mxu0 %v8647_v9 }
 0x6f6   : > { %8394 = vmatprep.subr.bf16.mxu1 %v2374_v49  ;;  %v2311_v33 = vpop.permute.xlu0 %2310  ;;  %2788 = vrot.lane.b32.xlu1 %v2720_v42, %s8720_s22 }
 0x6f7   : > { %v2323_v6 = vpop.permute.xlu1 %2322  ;;  %v2373_v12 = vsel %vm844_vm13, %v2311_v33, %v2313_v21 }
 0x6f8   : > { %2491 = vmatprep.subr.bf16.mxu0 %v2373_v12  ;;  %2577 = vmatmul.mubr.bf16.vlgmr.msra.gmra.mrb[20].mxu1 %v8644_v62  ;;  %v2377_v22 = vsel %vm844_vm13, %v2321_v27, %v2323_v6 }
 0x6f9   : > { %8395 = vmatpush3.bf16.msra.mxu1 %v2374_v49  ;;  %2584 = vmatprep.mubr.bf16.mxu1 %v8647_v9 }
 0x6fa   : > { %8396 = vmatprep.subr.bf16.mxu1 %v2377_v22  ;;  %v2309_v32 = vpop.permute.xlu0 %2308  ;;  %2940 = vrot.lane.b32.xlu1 %v2720_v42, %s8725_s27  ;;  %v2647_v42 = vld [vmem:[#allocation2 + $0x38] sm:$0xff] }
 0x6fb   : > { %v2372_v60 = vsel %vm844_vm13, %v2309_v32, %v2311_v33 }
 0x6fc   : > { %2492 = vmatpush1.bf16.msra.mxu0 %v2372_v60 }
 0x6fd   : > { %8397 = vmatpush3.bf16.msra.mxu1 %v2377_v22  ;;  %2481 = vmatmul.mubr.bf16.gmra.mrb[24].mxu0 %v8649_v57  ;;  %v2645_v22 = vld [vmem:[#allocation2 + $0x28] sm:$0xff] }
 0x6fe   : > { %v2319_v53 = vpop.permute.xlu0 %2318  ;;  %2523 = vmatprep.mubr.bf16.mxu0 %v8727_v47 }
 0x6ff   : > { %v2376_v20 = vsel %vm844_vm13, %v2319_v53, %v2321_v27  ;;  %v2643_v27 = vld [vmem:[#allocation2 + $0x10] sm:$0xff] }
 0x700   : > { %2493 = vmatprep.subr.bf16.mxu0 %v2376_v20  ;;  %2585 = vmatmul.mubr.bf16.gmra.mrb[24].mxu1 %v8649_v57  ;;  %v2644_v57 = vld [vmem:[#allocation2 + $0x18] sm:$0xff]  ;;  %v2646_v20 = vld [vmem:[#allocation2 + $0x30] sm:$0xff] }
 0x701   : > { %8398 = vmatprep.mubr.msk.bf16.mxu1 %vm953_vm0, %v8650_v51 }
 0x702   : > { %v2317_v24 = vpop.permute.xlu0 %2316 }
 0x703   : > { %v2375_v28 = vsel %vm844_vm13, %v2317_v24, %v2319_v53  ;;  %v2653_v24 = vld [vmem:[#allocation2 + $0x78] sm:$0xff] }
 0x704   : > { %2494 = vmatpush1.bf16.msra.mxu0 %v2375_v28 }
 0x707   : > { %7925 = vmatmul.mubr.msk.bf16.vlgmr.msra.gmra.mrb[20].mxu0 %vm953_vm0, %v8650_v51 }
 0x708   : > { %8399 = vmatmul.mubr.msk.bf16.vlgmr.msra.gmra.mrb[28].mxu1 %vm953_vm0, %v8651_v30  ;;  %2533 = vmatprep.mubr.bf16.mxu0 %v8727_v47  ;;  %v2138_v63 = vpop.permute.xlu1 %2137 }
 0x70c   : > { %v10397_v23 = vpop.permute.xlu1 %2147 }
 0x70f   : > { %7926 = vmatmul.mubr.msk.bf16.gmra.mrb[24].mxu0 %vm953_vm0, %v8651_v30 }
 0x713   : > { %v2133_v36 = vpop.permute.xlu0 %2132 }
 0x717   : > { %v2143_v31 = vpop.permute.xlu0 %2142 }
 0x7cb   : > { %v8145_v37 = vpop.f32.mrb[20].mxu1 }
 0x7cc   : > { %v8146_v35 = vpop.f32.mrb[21].mxu1 }
 0x7cd   : > { %v8147_v8 = vadd.f32 %v8146_v35, %v8145_v37  ;;  %v8148_v3 = vpop.f32.mrb[22].mxu1 }
 0x7ce   : > { %v8149_v38 = vpop.f32.mrb[23].mxu1 }
 0x7cf   : > { %v8150_v18 = vadd.f32 %v8149_v38, %v8148_v3  ;;  %v2579_v56 = vadd.f32 %v8147_v8, %v2133_v36 }
 0x7d1   : > { %v2582_v7 = vadd.f32 %v8150_v18, %v2138_v63 }
 0x7d3   : > { %v8151_v0 = vpop.f32.mrb[24].mxu1 }
 0x7d4   : > { %v8152_v44 = vpop.f32.mrb[25].mxu1 }
 0x7d5   : > { %v8153_v29 = vadd.f32 %v8152_v44, %v8151_v0  ;;  %v8154_v26 = vpop.f32.mrb[26].mxu1 }
 0x7d6   : > { %v8155_v46 = vpop.f32.mrb[27].mxu1 }
 0x7d7   : > { %v8156_v59 = vadd.f32 %v8155_v46, %v8154_v26  ;;  %v2587_v4 = vadd.f32 %v8153_v29, %v2143_v31  ;;  %v2648_v26 = vld [vmem:[#allocation2 + $0x48] sm:$0xff] }
 0x7d9   : > { %v2590_v50 = vadd.f32 %v8156_v59, %v10397_v23 }
 0x7da   : > { %v2525_v11 = vpop.f32.mrb[20].mxu0 }
 0x7db   : > { %v8474_v40 = vadd.f32 %v2525_v11, %v2133_v36  ;;  %v2527_v13 = vpop.f32.mrb[21].mxu0  ;;  %v8400_v41 = vpop.f32.mrb[28].mxu1 }
 0x7dc   : > { %v8475_v48 = vadd.f32 %v2527_v13, %v2133_v36  ;;  %v2636_v45 = vadd.f32 %v8400_v41, %v2587_v4  ;;  %v2529_v43 = vpop.f32.mrb[22].mxu0  ;;  %v2627_v15 = vpop.f32.mrb[29].mxu1  ;;  %v2649_v4 = vld [vmem:[#allocation2 + $0x50] sm:$0xff]  ;;  %v2651_v13 = vld [vmem:[#allocation2 + $0x68] sm:$0xff] }
 0x7dd   : > { %v2654_v34 = vmul.f32 %v8474_v40, %v9393_v1  ;;  %v8476_v5 = vadd.f32 %v2529_v43, %v2138_v63  ;;  %v2628_v58 = vadd.f32 %v2627_v15, %v2579_v56  ;;  %v2531_v55 = vpop.f32.mrb[23].mxu0  ;;  %v8401_v21 = vpop.f32.mrb[30].mxu1 }
 0x7de   : > { %v2655_v52 = vmul.f32 %v8475_v48, %v9401_v54  ;;  %v2662_v19 = vmul.f32 %v2636_v45, %v9397_v14  ;;  %v8477_v61 = vadd.f32 %v2531_v55, %v2138_v63  ;;  %v2639_v62 = vadd.f32 %v8401_v21, %v2590_v50  ;;  %v2630_v9 = vpop.f32.mrb[31].mxu1  ;;  %v2652_v48 = vld [vmem:[#allocation2 + $0x70] sm:$0xff]  ;;  %v10479_v21 = vpop.permute.xlu1 %2736 }
 0x7df   : > { %v2666_v25 = vadd.f32 %v2654_v34, %v2642_v10  ;;  %v2657_v39 = vmul.f32 %v8476_v5, %v9393_v1  ;;  %v2656_v49 = vmul.f32 %v2628_v58, %v9397_v14  ;;  %v2631_v33 = vadd.f32 %v2630_v9, %v2582_v7  ;;  %v10517_v9 = vpop.permute.xlu0 %2932 }
 0x7e0   : > { %v2667_v6 = vadd.f32 %v2655_v52, %v2643_v27  ;;  %v2674_v12 = vadd.f32 %v2662_v19, %v2650_v16  ;;  %v2658_v32 = vmul.f32 %v8477_v61, %v9401_v54  ;;  %v2665_v60 = vmul.f32 %v2639_v62, %v9397_v14 }
 0x7e1   : > { %2678 = vst [vmem:[#allocation2 + $0x8] sm:$0xff] %v2666_v25  ;;  %v2669_v51 = vadd.f32 %v2657_v39, %v2645_v22  ;;  %v2668_v53 = vadd.f32 %v2656_v49, %v2644_v57  ;;  %v2659_v28 = vmul.f32 %v2631_v33, %v9397_v14 }
 0x7e2   : > { %2679 = vst [vmem:[#allocation2 + $0x10] sm:$0xff] %v2667_v6  ;;  %2686 = vst.msk [vmem:[#allocation2 + $0x58] sm:$0xff] %vm953_vm0, %v2674_v12  ;;  %v2670_v30 = vadd.f32 %v2658_v32, %v2646_v20  ;;  %v2677_v17 = vadd.f32 %v2665_v60, %v2653_v24  ;;  %v2535_v37 = vpop.f32.mrb[24].mxu0  ;;  %v10484_v7 = vpop.permute.xlu1 %2744 }
 0x7e3   : > { %2681 = vst [vmem:[#allocation2 + $0x28] sm:$0xff] %v2669_v51  ;;  %2680 = vst.msk [vmem:[#allocation2 + $0x18] sm:$0xff] %vm953_vm0, %v2668_v53  ;;  %v2671_v35 = vadd.f32 %v2659_v28, %v2647_v42  ;;  %v8478_v8 = vadd.f32 %v2535_v37, %v2143_v31  ;;  %v2537_v3 = vpop.f32.mrb[25].mxu0  ;;  %v10410_v38 = vpack.c.bf16 %v2669_v51, %v2666_v25 }
 0x7e4   : > { %2682 = vst [vmem:[#allocation2 + $0x30] sm:$0xff] %v2670_v30  ;;  %2689 = vst.msk [vmem:[#allocation2 + $0x78] sm:$0xff] %vm953_vm0, %v2677_v17  ;;  %v8479_v18 = vadd.f32 %v2537_v3, %v2143_v31  ;;  %v2539_v36 = vpop.f32.mrb[26].mxu0  ;;  %v10413_v0 = vpack.c.bf16 %v2670_v30, %v2667_v6 }
 0x7e5   : > { %2683 = vst.msk [vmem:[#allocation2 + $0x38] sm:$0xff] %vm953_vm0, %v2671_v35  ;;  %v2660_v63 = vmul.f32 %v8478_v8, %v9393_v1  ;;  %v8480_v44 = vadd.f32 %v2539_v36, %v10397_v23  ;;  %v2541_v29 = vpop.f32.mrb[27].mxu0 }
 0x7e6   : > { %v2661_v46 = vmul.f32 %v8479_v18, %v9401_v54  ;;  %v8481_v59 = vadd.f32 %v2541_v29, %v10397_v23  ;;  %v10490_v10 = vpop.permute.xlu1 %2758 }
 0x7e7   : > { %v2672_v11 = vadd.f32 %v2660_v63, %v2648_v26  ;;  %v2663_v40 = vmul.f32 %v8480_v44, %v9393_v1 }
 0x7e8   : > { %v2673_v31 = vadd.f32 %v2661_v46, %v2649_v4  ;;  %v2664_v41 = vmul.f32 %v8481_v59, %v9401_v54 }
 0x7e9   : > { %2684 = vst [vmem:[#allocation2 + $0x48] sm:$0xff] %v2672_v11  ;;  %v2675_v56 = vadd.f32 %v2663_v40, %v2651_v13  ;;  %v2715_v43 = vld [vmem:[#allocation2 + $0x58] sm:$0xff] }
 0x7ea   : > { %2685 = vst [vmem:[#allocation2 + $0x50] sm:$0xff] %v2673_v31  ;;  %v2676_v45 = vadd.f32 %v2664_v41, %v2652_v48  ;;  %v2707_v58 = vld [vmem:[#allocation2 + $0x18] sm:$0xff]  ;;  %v10495_v52 = vpop.permute.xlu1 %2766 }
 0x7eb   : > { %2687 = vst [vmem:[#allocation2 + $0x68] sm:$0xff] %v2675_v56  ;;  %v2719_v15 = vld [vmem:[#allocation2 + $0x78] sm:$0xff]  ;;  %v2725_v50 = vpack.c.bf16 %v2675_v56, %v2672_v11 }
 0x7ec   : > { %2688 = vst [vmem:[#allocation2 + $0x70] sm:$0xff] %v2676_v45  ;;  %v2727_v34 = vpack.c.bf16 %v2719_v15, %v2715_v43  ;;  %v10422_v23 = vpack.c.bf16 %v2676_v45, %v2673_v31  ;;  %v2711_v5 = vld [vmem:[#allocation2 + $0x38] sm:$0xff] }
 0x7ed   : > { %v2723_v55 = vpack.c.bf16 %v2711_v5, %v2707_v58 }
 0x7ee   : > { %2812 = vrot.lane.b32.xlu1 %v2727_v34, %s8721_s23  ;;  %2750 = vrot.lane.b32.xlu0 %v2727_v34, %s8718_s12  ;;  %v10505_v19 = vpop.permute.xlu1 %2780 }
 0x7f2   : > { %2828 = vrot.lane.b32.xlu1 %v2727_v34, %s8722_s24  ;;  %2772 = vrot.lane.b32.xlu0 %v2727_v34, %s8719_s15  ;;  %v10509_v61 = vpop.permute.xlu1 %2788 }
 0x7f6   : > { %2844 = vrot.lane.b32.xlu1 %v2727_v34, %s8723_s25  ;;  %2794 = vrot.lane.b32.xlu0 %v2727_v34, %s8720_s22  ;;  %v10515_v62 = vpop.permute.xlu1 %2940 }
 0x7fa   : > { %2860 = vrot.lane.b32.xlu1 %v2727_v34, %s8724_s26  ;;  %2742 = vrot.lane.b32.xlu0 %v2723_v55, %s8718_s12 }
 0x7fe   : > { %2876 = vrot.lane.b32.xlu1 %v2727_v34, %s8726_s28  ;;  %2764 = vrot.lane.b32.xlu0 %v2723_v55, %s8719_s15 }
 0x802   : > { %2946 = vrot.lane.b32.xlu1 %v2727_v34, %s8725_s27  ;;  %2786 = vrot.lane.b32.xlu0 %v2723_v55, %s8720_s22 }
 0x806   : > { %2870 = vrot.lane.b32.xlu1 %v2723_v55, %s8726_s28  ;;  %2806 = vrot.lane.b32.xlu0 %v2723_v55, %s8721_s23 }
 0x80a   : > { %2934 = vrot.lane.b32.xlu1 %v10410_v38, %s8725_s27  ;;  %2822 = vrot.lane.b32.xlu0 %v2723_v55, %s8722_s24 }
 0x80e   : > { %2866 = vrot.lane.b32.xlu1 %v10410_v38, %s8726_s28  ;;  %2838 = vrot.lane.b32.xlu0 %v2723_v55, %s8723_s25 }
 0x812   : > { %2740 = vrot.lane.b32.xlu1 %v10413_v0, %s8718_s12  ;;  %2854 = vrot.lane.b32.xlu0 %v2723_v55, %s8724_s26 }
 0x816   : > { %2762 = vrot.lane.b32.xlu1 %v10413_v0, %s8719_s15  ;;  %2938 = vrot.lane.b32.xlu0 %v2723_v55, %s8725_s27 }
 0x81a   : > { %2784 = vrot.lane.b32.xlu1 %v10413_v0, %s8720_s22  ;;  %2738 = vrot.lane.b32.xlu0 %v10410_v38, %s8718_s12 }
 0x81e   : > { %2804 = vrot.lane.b32.xlu1 %v10413_v0, %s8721_s23  ;;  %2760 = vrot.lane.b32.xlu0 %v10410_v38, %s8719_s15 }
 0x822   : > { %2820 = vrot.lane.b32.xlu1 %v10413_v0, %s8722_s24  ;;  %2782 = vrot.lane.b32.xlu0 %v10410_v38, %s8720_s22 }
 0x826   : > { %2836 = vrot.lane.b32.xlu1 %v10413_v0, %s8723_s25  ;;  %2802 = vrot.lane.b32.xlu0 %v10410_v38, %s8721_s23 }
 0x82a   : > { %2852 = vrot.lane.b32.xlu1 %v10413_v0, %s8724_s26  ;;  %2818 = vrot.lane.b32.xlu0 %v10410_v38, %s8722_s24 }
 0x82e   : > { %2808 = vrot.lane.b32.xlu1 %v2725_v50, %s8721_s23  ;;  %2834 = vrot.lane.b32.xlu0 %v10410_v38, %s8723_s25 }
 0x832   : > { %2824 = vrot.lane.b32.xlu1 %v2725_v50, %s8722_s24  ;;  %2850 = vrot.lane.b32.xlu0 %v10410_v38, %s8724_s26 }
 0x836   : > { %2840 = vrot.lane.b32.xlu1 %v2725_v50, %s8723_s25  ;;  %2936 = vrot.lane.b32.xlu0 %v10413_v0, %s8725_s27 }
 0x83a   : > { %2856 = vrot.lane.b32.xlu1 %v2725_v50, %s8724_s26  ;;  %2868 = vrot.lane.b32.xlu0 %v10413_v0, %s8726_s28 }
 0x83e   : > { %2942 = vrot.lane.b32.xlu1 %v2725_v50, %s8725_s27  ;;  %2746 = vrot.lane.b32.xlu0 %v2725_v50, %s8718_s12 }
 0x842   : > { %2872 = vrot.lane.b32.xlu1 %v2725_v50, %s8726_s28  ;;  %2768 = vrot.lane.b32.xlu0 %v2725_v50, %s8719_s15 }
 0x846   : > { %2748 = vrot.lane.b32.xlu1 %v10422_v23, %s8718_s12  ;;  %2790 = vrot.lane.b32.xlu0 %v2725_v50, %s8720_s22 }
 0x84a   : > { %2770 = vrot.lane.b32.xlu1 %v10422_v23, %s8719_s15  ;;  %2810 = vrot.lane.b32.xlu0 %v10422_v23, %s8721_s23 }
 0x84e   : > { %2792 = vrot.lane.b32.xlu1 %v10422_v23, %s8720_s22  ;;  %2826 = vrot.lane.b32.xlu0 %v10422_v23, %s8722_s24 }
 0x852   : > { %2842 = vrot.lane.b32.xlu0 %v10422_v23, %s8723_s25 }
 0x856   : > { %2858 = vrot.lane.b32.xlu0 %v10422_v23, %s8724_s26 }
 0x85a   : > { %2944 = vrot.lane.b32.xlu0 %v10422_v23, %s8725_s27 }
 0x85e   : > { %2874 = vrot.lane.b32.xlu0 %v10422_v23, %s8726_s28 }
 0x860   : > { %v10521_v25 = vpop.permute.xlu1 %2812  ;;  %v10523_v27 = vpop.permute.xlu0 %2750 }
 0x861   : > { %2962 = vrot.lane.b32.xlu1 %v10523_v27, %s8725_s27 }
 0x862   : > { %3010 = vrot.lane.b32.xlu0 %v10521_v25, %s8725_s27 }
 0x864   : > { %v10529_v16 = vpop.permute.xlu1 %2828  ;;  %v10531_v39 = vpop.permute.xlu0 %2772 }
 0x866   : > { %3026 = vrot.lane.b32.xlu0 %v10529_v16, %s8725_s27 }
 0x868   : > { %v10535_v49 = vpop.permute.xlu1 %2844  ;;  %v10537_v33 = vpop.permute.xlu0 %2794 }
 0x86c   : > { %v10539_v6 = vpop.permute.xlu1 %2860  ;;  %v2743_v12 = vpop.permute.xlu0 %2742 }
 0x86d   : > { %2954 = vrot.lane.b32.xlu0 %v2743_v12, %s8725_s27 }
 0x870   : > { %v10542_v22 = vpop.permute.xlu1 %2876  ;;  %v10544_v57 = vpop.permute.xlu0 %2764 }
 0x874   : > { %v10546_v32 = vpop.permute.xlu1 %2946  ;;  %v10548_v60 = vpop.permute.xlu0 %2786 }
 0x878   : > { %v10550_v51 = vpop.permute.xlu1 %2870  ;;  %v2807_v53 = vpop.permute.xlu0 %2806 }
 0x879   : > { %3002 = vrot.lane.b32.xlu1 %v2807_v53, %s8725_s27 }
 0x87c   : > { %v2935_v20 = vpop.permute.xlu1 %2934  ;;  %v10553_v24 = vpop.permute.xlu0 %2822 }
 0x87d   : > { %3018 = vrot.lane.b32.xlu1 %v10553_v24, %s8725_s27  ;;  %v3076_v5 = vsel %vm844_vm13, %v10517_v9, %v2935_v20 }
 0x880   : > { %v10557_v28 = vpop.permute.xlu1 %2866  ;;  %v10559_v30 = vpop.permute.xlu0 %2838 }
 0x884   : > { %v2741_v17 = vpop.permute.xlu1 %2740  ;;  %v10561_v42 = vpop.permute.xlu0 %2854 }
 0x885   : > { %v2754_v37 = vsel %vm512_vm5, %v2741_v17, %v2743_v12 }
 0x886   : > { %2952 = vrot.lane.b32.xlu1 %v2754_v37, %s8725_s27 }
 0x888   : > { %v2763_v35 = vpop.permute.xlu1 %2762  ;;  %v10565_v8 = vpop.permute.xlu0 %2938 }
 0x889   : > { %v2776_v12 = vsel %vm535_vm9, %v2763_v35, %v10544_v57 }
 0x88c   : > { %v2785_v3 = vpop.permute.xlu1 %2784  ;;  %v2739_v38 = vpop.permute.xlu0 %2738 }
 0x88d   : > { %v2798_v29 = vsel %vm419_vm8, %v2785_v3, %v10548_v60  ;;  %v2752_v41 = vsel %vm512_vm5, %v10479_v21, %v2739_v38  ;;  %v2753_v21 = vsel %vm512_vm5, %v2739_v38, %v2741_v17 }
 0x890   : > { %v2805_v18 = vpop.permute.xlu1 %2804  ;;  %v2761_v36 = vpop.permute.xlu0 %2760 }
 0x891   : > { %v2775_v0 = vsel %vm535_vm9, %v2761_v36, %v2763_v35  ;;  %v2815_v59 = vsel %vm577_vm10, %v2805_v18, %v2807_v53  ;;  %v2774_v43 = vsel %vm535_vm9, %v10490_v10, %v2761_v36 }
 0x892   : > { %2966 = vrot.lane.b32.xlu1 %v2775_v0, %s8725_s27 }
 0x894   : > { %v2821_v63 = vpop.permute.xlu1 %2820  ;;  %v2783_v44 = vpop.permute.xlu0 %2782 }
 0x895   : > { %v2796_v34 = vsel %vm419_vm8, %v10505_v19, %v2783_v44  ;;  %v2797_v9 = vsel %vm419_vm8, %v2783_v44, %v2785_v3  ;;  %v2831_v3 = vsel %vm594_vm11, %v2821_v63, %v10553_v24 }
 0x896   : > { %2984 = vrot.lane.b32.xlu1 %v2798_v29, %s8725_s27 }
 0x898   : > { %v2837_v26 = vpop.permute.xlu1 %2836  ;;  %v2803_v46 = vpop.permute.xlu0 %2802 }
 0x899   : > { %2996 = vrot.lane.b32.xlu0 %v2803_v46, %s8725_s27  ;;  %v2814_v38 = vsel %vm577_vm10, %v2803_v46, %v2805_v18  ;;  %v2847_v18 = vsel %vm611_vm12, %v2837_v26, %v10559_v30 }
 0x89a   : > { %3000 = vrot.lane.b32.xlu1 %v2815_v59, %s8725_s27 }
 0x89c   : > { %v10575_v11 = vpop.permute.xlu1 %2852  ;;  %v2819_v4 = vpop.permute.xlu0 %2818 }
 0x89d   : > { %3012 = vrot.lane.b32.xlu0 %v2819_v4, %s8725_s27  ;;  %v2830_v40 = vsel %vm594_vm11, %v2819_v4, %v2821_v63 }
 0x89e   : > { %3014 = vrot.lane.b32.xlu1 %v2830_v40, %s8725_s27 }
 0x8a0   : > { %v10580_v31 = vpop.permute.xlu1 %2808  ;;  %v2835_v13 = vpop.permute.xlu0 %2834 }
 0x8a1   : > { %2948 = vrot.lane.b32.xlu0 %v2752_v41, %s8725_s27  ;;  %v2846_v56 = vsel %vm611_vm12, %v2835_v13, %v2837_v26 }
 0x8a2   : > { %3030 = vrot.lane.b32.xlu1 %v2846_v56, %s8725_s27 }
 0x8a4   : > { %v10587_v48 = vpop.permute.xlu1 %2824  ;;  %v10589_v45 = vpop.permute.xlu0 %2850 }
 0x8a5   : > { %2964 = vrot.lane.b32.xlu0 %v2774_v43, %s8725_s27 }
 0x8a6   : > { %3004 = vrot.lane.b32.xlu1 %v10580_v31, %s8725_s27 }
 0x8a8   : > { %v10596_v15 = vpop.permute.xlu1 %2840  ;;  %v10598_v50 = vpop.permute.xlu0 %2936 }
 0x8a9   : > { %2980 = vrot.lane.b32.xlu0 %v2796_v34, %s8725_s27  ;;  %v3077_v23 = vsel %vm844_vm13, %v2935_v20, %v10598_v50 }
 0x8aa   : > { %3020 = vrot.lane.b32.xlu1 %v10587_v48, %s8725_s27  ;;  %3190 = vmatprep.subr.bf16.mxu1 %v3077_v23 }
 0x8ab   : > { %3191 = vmatpush1.bf16.msra.mxu1 %v3076_v5 }
 0x8ac   : > { %v10609_v58 = vpop.permute.xlu1 %2856  ;;  %v10611_v55 = vpop.permute.xlu0 %2868 }
 0x8ad   : > { %2950 = vrot.lane.b32.xlu0 %v2753_v21, %s8725_s27  ;;  %v2878_v5 = vsel %vm645_vm15, %v10557_v28, %v10611_v55 }
 0x8b0   : > { %v2943_v10 = vpop.permute.xlu1 %2942  ;;  %v2747_v19 = vpop.permute.xlu0 %2746 }
 0x8b1   : > { %2968 = vrot.lane.b32.xlu0 %v2776_v12, %s8725_s27  ;;  %v2755_v24 = vsel %vm512_vm5, %v10484_v7, %v2747_v19  ;;  %v3448_v12 = vld [vmem:[#allocation3 + $0x20] sm:$0xff] }
 0x8b4   : > { %v10618_v53 = vpop.permute.xlu1 %2872  ;;  %v2769_v37 = vpop.permute.xlu0 %2768 }
 0x8b5   : > { %2982 = vrot.lane.b32.xlu0 %v2797_v9, %s8725_s27  ;;  %v2777_v20 = vsel %vm535_vm9, %v10495_v52, %v2769_v37  ;;  %v3456_v9 = vld [vmem:[#allocation3 + $0x60] sm:$0xff] }
 0x8b6   : > { %2972 = vrot.lane.b32.xlu1 %v2777_v20, %s8725_s27 }
 0x8b8   : > { %v2791_v17 = vpop.permute.xlu0 %2790  ;;  %v2749_v36 = vpop.permute.xlu1 %2748 }
 0x8b9   : > { %2998 = vrot.lane.b32.xlu0 %v2814_v38, %s8725_s27  ;;  %v2799_v35 = vsel %vm419_vm8, %v10509_v61, %v2791_v17  ;;  %v2756_v52 = vsel %vm512_vm5, %v2747_v19, %v2749_v36  ;;  %v2757_v26 = vsel %vm512_vm5, %v2749_v36, %v10523_v27  ;;  %v3079_v27 = vsel %vm844_vm13, %v10515_v62, %v2943_v10  ;;  %v3444_v19 = vld [vmem:[#allocation3] sm:$0xff] }
 0x8ba   : > { %2988 = vrot.lane.b32.xlu1 %v2799_v35, %s8725_s27  ;;  %v3078_v35 = vsel %vm844_vm13, %v10598_v50, %v10565_v8  ;;  %v7937_v36 = vld [vmem:[%s13950_s6 + $0x40] sm:$0xff] }
 0x8bc   : > { %v2811_v0 = vpop.permute.xlu0 %2810  ;;  %v2771_v61 = vpop.permute.xlu1 %2770 }
 0x8bd   : > { %3016 = vrot.lane.b32.xlu0 %v2831_v3, %s8725_s27  ;;  %v2778_v63 = vsel %vm535_vm9, %v2769_v37, %v2771_v61  ;;  %v2779_v40 = vsel %vm535_vm9, %v2771_v61, %v10531_v39  ;;  %v2817_v41 = vsel %vm577_vm10, %v2811_v0, %v10521_v25  ;;  %v2816_v25 = vsel %vm577_vm10, %v10580_v31, %v2811_v0  ;;  %v8654_v31 = vld [vmem:[%s13949_s5 + $0x64] ss:$12 sps:$4 sm:$0xff]  }
 0x8be   : > { %2958 = vrot.lane.b32.xlu1 %v2756_v52, %s8725_s27  ;;  %3222 = vmatprep.mubr.bf16.mxu1 %v8654_v31  ;;  %v7939_v52 = vld [vmem:[%s13950_s6 + $0x50] sm:$0xff] }
 0x8bf   : > { %3328 = vmatprep.mubr.bf16.mxu0 %v8654_v31 }
 0x8c0   : > { %v2827_v44 = vpop.permute.xlu0 %2826  ;;  %v2793_v59 = vpop.permute.xlu1 %2792 }
 0x8c1   : > { %3032 = vrot.lane.b32.xlu0 %v2847_v18, %s8725_s27  ;;  %v2800_v7 = vsel %vm419_vm8, %v2791_v17, %v2793_v59  ;;  %v2801_v62 = vsel %vm419_vm8, %v2793_v59, %v10537_v33  ;;  %v2833_v56 = vsel %vm594_vm11, %v2827_v44, %v10529_v16  ;;  %v2832_v16 = vsel %vm594_vm11, %v10587_v48, %v2827_v44 }
 0x8c2   : > { %3034 = vrot.lane.b32.xlu1 %v10559_v30, %s8725_s27  ;;  %v2879_v48 = vsel %vm645_vm15, %v10611_v55, %v10550_v51  ;;  %v7940_v55 = vld [vmem:[%s13950_s6 + $0x58] sm:$0xff]  ;;  %v3460_v17 = vpack.c.bf16 %v3448_v12, %v3444_v19 }
 0x8c4   : > { %v2843_v29 = vpop.permute.xlu0 %2842 }
 0x8c5   : > { %2956 = vrot.lane.b32.xlu0 %v2755_v24, %s8725_s27 }
 0x8c6   : > { %2974 = vrot.lane.b32.xlu1 %v2778_v63, %s8725_s27 }
 0x8c8   : > { %v2859_v46 = vpop.permute.xlu0 %2858 }
 0x8c9   : > { %2960 = vrot.lane.b32.xlu0 %v2757_v26, %s8725_s27 }
 0x8ca   : > { %3036 = vrot.lane.b32.xlu1 %v10596_v15, %s8725_s27 }
 0x8cc   : > { %v10650_v30 = vpop.permute.xlu0 %2944 }
 0x8cd   : > { %3028 = vrot.lane.b32.xlu0 %v2835_v13, %s8725_s27  ;;  %v3080_v4 = vsel %vm844_vm13, %v2943_v10, %v10650_v30  ;;  %v2862_v13 = vsel %vm628_vm14, %v10589_v45, %v10575_v11  ;;  %v3081_v12 = vsel %vm844_vm13, %v10650_v30, %v10546_v32 }
 0x8ce   : > { %2990 = vrot.lane.b32.xlu1 %v2800_v7, %s8725_s27  ;;  %3192 = vmatprep.subr.bf16.mxu1 %v3080_v4 }
 0x8cf   : > { %3193 = vmatpush1.bf16.msra.mxu1 %v3079_v27 }
 0x8d0   : > { %v2875_v43 = vpop.permute.xlu0 %2874 }
 0x8d1   : > { %2976 = vrot.lane.b32.xlu0 %v2779_v40, %s8725_s27 }
 0x8d2   : > { %3046 = vrot.lane.b32.xlu1 %v2862_v13, %s8725_s27 }
 0x8d4   : > { %v10726_v34 = vpop.permute.xlu0 %3010 }
 0x8d5   : > { %2970 = vrot.lane.b32.xlu0 %v10544_v57, %s8725_s27  ;;  %v2849_v57 = vsel %vm611_vm12, %v2843_v29, %v10535_v49 }
 0x8d6   : > { %3008 = vrot.lane.b32.xlu1 %v2817_v41, %s8725_s27 }
 0x8d9   : > { %2992 = vrot.lane.b32.xlu0 %v2801_v62, %s8725_s27 }
 0x8da   : > { %2978 = vrot.lane.b32.xlu1 %v10531_v39, %s8725_s27  ;;  %v2863_v39 = vsel %vm628_vm14, %v10575_v11, %v10561_v42  ;;  %v10706_v11 = vpop.permute.xlu1 %2962 }
 0x8dd   : > { %3042 = vrot.lane.b32.xlu0 %v10535_v49, %s8725_s27  ;;  %v2848_v49 = vsel %vm611_vm12, %v10596_v15, %v2843_v29 }
 0x8de   : > { %3024 = vrot.lane.b32.xlu1 %v2833_v56, %s8725_s27 }
 0x8e1   : > { %3006 = vrot.lane.b32.xlu0 %v2816_v25, %s8725_s27 }
 0x8e2   : > { %3050 = vrot.lane.b32.xlu1 %v10561_v42, %s8725_s27  ;;  %v2865_v42 = vsel %vm628_vm14, %v2859_v46, %v10539_v6 }
 0x8e5   : > { %3048 = vrot.lane.b32.xlu0 %v2863_v39, %s8725_s27 }
 0x8e6   : > { %3040 = vrot.lane.b32.xlu1 %v2849_v57, %s8725_s27 }
 0x8e9   : > { %3022 = vrot.lane.b32.xlu0 %v2832_v16, %s8725_s27 }
 0x8ea   : > { %3052 = vrot.lane.b32.xlu1 %v10609_v58, %s8725_s27 }
 0x8ed   : > { %3044 = vrot.lane.b32.xlu0 %v10589_v45, %s8725_s27  ;;  %v3003_v45 = vpop.permute.xlu1 %3002 }
 0x8ee   : > { %3056 = vrot.lane.b32.xlu1 %v2865_v42, %s8725_s27 }
 0x8f1   : > { %3038 = vrot.lane.b32.xlu0 %v2848_v49, %s8725_s27  ;;  %v10724_v15 = vpop.permute.xlu1 %3018 }
 0x8f2   : > { %2994 = vrot.lane.b32.xlu1 %v10537_v33, %s8725_s27  ;;  %v2864_v33 = vsel %vm628_vm14, %v10609_v58, %v2859_v46 }
 0x8f5   : > { %2986 = vrot.lane.b32.xlu0 %v10548_v60, %s8725_s27  ;;  %v2881_v60 = vsel %vm645_vm15, %v2875_v43, %v10542_v22 }
 0x8f6   : > { %3064 = vrot.lane.b32.xlu1 %v2879_v48, %s8725_s27 }
 0x8f8   : > { %v10733_v23 = vpop.permute.xlu1 %2952 }
 0x8f9   : > { %3054 = vrot.lane.b32.xlu0 %v2864_v33, %s8725_s27 }
 0x8fa   : > { %3066 = vrot.lane.b32.xlu1 %v10550_v51, %s8725_s27  ;;  %v10741_v51 = vpop.permute.xlu0 %3026 }
 0x8fd   : > { %3058 = vrot.lane.b32.xlu0 %v10539_v6, %s8725_s27  ;;  %v7938_v6 = vld [vmem:[%s13950_s6 + $0x48] sm:$0xff] }
 0x8fe   : > { %3072 = vrot.lane.b32.xlu1 %v2881_v60, %s8725_s27  ;;  %v10750_v21 = vpop.permute.xlu0 %2954 }
 0x8ff   : > { %v3084_v32 = vsel %vm844_vm13, %v10733_v23, %v10750_v21 }
 0x901   : > { %3062 = vrot.lane.b32.xlu0 %v2878_v5, %s8725_s27 }
 0x902   : > { %3074 = vrot.lane.b32.xlu1 %v10542_v22, %s8725_s27  ;;  %v2880_v22 = vsel %vm645_vm15, %v10618_v53, %v2875_v43 }
 0x904   : > { %v10746_v58 = vpop.permute.xlu1 %2966 }
 0x905   : > { %3060 = vrot.lane.b32.xlu0 %v10557_v28, %s8725_s27  ;;  %v3452_v28 = vld [vmem:[#allocation3 + $0x40] sm:$0xff] }
 0x906   : > { %2889 = vperm.xlu1 %8625, %v7938_v6   ;;  %v3464_v0 = vpack.c.bf16 %v3456_v9, %v3452_v28 }
 0x908   : > { %v10755_v10 = vpop.permute.xlu1 %2984 }
 0x909   : > { %3070 = vrot.lane.b32.xlu0 %v2880_v22, %s8725_s27 }
 0x90a   : > { %2899 = vperm.xlu1 %8625, %v7940_v55  }
 0x90b   : > { %v10760_v37 = vpop.permute.xlu0 %2996 }
 0x90c   : > { %v10762_v20 = vpop.permute.xlu1 %3000 }
 0x90d   : > { %3068 = vrot.lane.b32.xlu0 %v10618_v53, %s8725_s27  ;;  %v3102_v38 = vsel %vm844_vm13, %v10762_v20, %v3003_v45 }
 0x90e   : > { %8161 = vmatprep.subr.bf16.mxu0 %v3102_v38  ;;  %3476 = vrot.lane.b32.xlu1 %v3460_v17, %s8718_s12 }
 0x90f   : > { %8162 = vmatpush3.bf16.msra.mxu0 %v3078_v35  ;;  %v10775_v3 = vpop.permute.xlu0 %3012 }
 0x910   : > { %v10777_v53 = vpop.permute.xlu1 %3014 }
 0x911   : > { %2884 = vperm.xlu0 %8626, %v7937_v36  }
 0x912   : > { %3484 = vrot.lane.b32.xlu1 %v3464_v0, %s8718_s12 }
 0x913   : > { %v2949_v44 = vpop.permute.xlu0 %2948 }
 0x914   : > { %v10784_v50 = vpop.permute.xlu1 %3030 }
 0x915   : > { %2894 = vperm.xlu0 %8626, %v7939_v52  }
 0x916   : > { %3498 = vrot.lane.b32.xlu1 %v3460_v17, %s8719_s15 }
 0x917   : > { %v2965_v8 = vpop.permute.xlu0 %2964 }
 0x918   : > { %v10788_v61 = vpop.permute.xlu1 %3004  ;;  %v3088_v45 = vsel %vm844_vm13, %v2965_v8, %v10746_v58 }
 0x919   : > { %3672 = vrot.lane.b32.xlu0 %v3460_v17, %s8725_s27 }
 0x91a   : > { %3506 = vrot.lane.b32.xlu1 %v3464_v0, %s8719_s15 }
 0x91b   : > { %v2981_v18 = vpop.permute.xlu0 %2980 }
 0x91c   : > { %v10797_v26 = vpop.permute.xlu1 %3020 }
 0x91e   : > { %3520 = vrot.lane.b32.xlu1 %v3460_v17, %s8720_s22 }
 0x91f   : > { %v2951_v29 = vpop.permute.xlu0 %2950 }
 0x920   : > { %v3083_v24 = vsel %vm844_vm13, %v2951_v29, %v10733_v23  ;;  %v3082_v63 = vsel %vm844_vm13, %v2949_v44, %v2951_v29  ;;  %v3106_v29 = vsel %vm844_vm13, %v10775_v3, %v10777_v53 }
 0x921   : > { %3194 = vmatprep.subr.bf16.mxu1 %v3083_v24 }
 0x922   : > { %3195 = vmatpush1.bf16.msra.mxu1 %v3082_v63  ;;  %3528 = vrot.lane.b32.xlu1 %v3464_v0, %s8720_s22 }
 0x923   : > { %v10795_v46 = vpop.permute.xlu0 %2968 }
 0x924   : > { %v3089_v49 = vsel %vm844_vm13, %v10746_v58, %v10795_v46 }
 0x926   : > { %3680 = vrot.lane.b32.xlu1 %v3464_v0, %s8725_s27 }
 0x927   : > { %v2983_v59 = vpop.permute.xlu0 %2982 }
 0x928   : > { %v2973_v7 = vpop.permute.xlu1 %2972  ;;  %v3095_v6 = vsel %vm844_vm13, %v2983_v59, %v10755_v10  ;;  %v3094_v19 = vsel %vm844_vm13, %v2981_v18, %v2983_v59 }
 0x92b   : > { %v2999_v4 = vpop.permute.xlu0 %2998 }
 0x92c   : > { %v2989_v27 = vpop.permute.xlu1 %2988  ;;  %v3101_v35 = vsel %vm844_vm13, %v2999_v4, %v10762_v20  ;;  %v3100_v36 = vsel %vm844_vm13, %v10760_v37, %v2999_v4 }
 0x92f   : > { %v10800_v40 = vpop.permute.xlu0 %3016 }
 0x930   : > { %v2959_v13 = vpop.permute.xlu1 %2958  ;;  %v3108_v9 = vsel %vm844_vm13, %v10800_v40, %v10724_v15 }
 0x933   : > { %v10802_v41 = vpop.permute.xlu0 %3032 }
 0x934   : > { %v3035_v62 = vpop.permute.xlu1 %3034  ;;  %v3113_v3 = vsel %vm844_vm13, %v10784_v50, %v10802_v41 }
 0x935   : > { %v3114_v23 = vsel %vm844_vm13, %v10802_v41, %v3035_v62 }
 0x937   : > { %v2957_v56 = vpop.permute.xlu0 %2956 }
 0x938   : > { %v2975_v25 = vpop.permute.xlu1 %2974  ;;  %v3085_v42 = vsel %vm844_vm13, %v2957_v56, %v2959_v13 }
 0x939   : > { %v3091_v5 = vsel %vm844_vm13, %v2973_v7, %v2975_v25 }
 0x93b   : > { %v2961_v39 = vpop.permute.xlu0 %2960 }
 0x93c   : > { %v10804_v57 = vpop.permute.xlu1 %3036  ;;  %v3086_v16 = vsel %vm844_vm13, %v2959_v13, %v2961_v39  ;;  %v3087_v52 = vsel %vm844_vm13, %v2961_v39, %v10706_v11  ;;  %v3107_v11 = vsel %vm844_vm13, %v10777_v53, %v10800_v40 }
 0x93d   : > { %3196 = vmatprep.subr.bf16.mxu1 %v3086_v16 }
 0x93e   : > { %3197 = vmatpush1.bf16.msra.mxu1 %v3085_v42 }
 0x93f   : > { %3198 = vmatprep.subr.bf16.mxu1 %v3089_v49  ;;  %v10811_v31 = vpop.permute.xlu0 %3028 }
 0x940   : > { %v2991_v48 = vpop.permute.xlu1 %2990  ;;  %v3112_v40 = vsel %vm844_vm13, %v10811_v31, %v10784_v50 }
 0x942   : > { %3199 = vmatpush1.bf16.msra.mxu1 %v3088_v45 }
 0x943   : > { %v2977_v43 = vpop.permute.xlu0 %2976 }
 0x944   : > { %v10815_v33 = vpop.permute.xlu1 %3046  ;;  %v3092_v60 = vsel %vm844_vm13, %v2975_v25, %v2977_v43 }
 0x945   : > { %3200 = vmatprep.subr.bf16.mxu1 %v3092_v60 }
 0x946   : > { %3201 = vmatpush1.bf16.msra.mxu1 %v3091_v5 }
 0x947   : > { %3202 = vmatprep.subr.bf16.mxu1 %v3095_v6  ;;  %v2971_v55 = vpop.permute.xlu0 %2970 }
 0x948   : > { %v3009_v22 = vpop.permute.xlu1 %3008 }
 0x949   : > { %v3105_v58 = vsel %vm844_vm13, %v3009_v22, %v10726_v34  ;;  %v3097_v34 = vsel %vm844_vm13, %v2989_v27, %v2991_v48 }
 0x94a   : > { %3203 = vmatpush1.bf16.msra.mxu1 %v3094_v19  ;;  %8163 = vmatprep.subr.bf16.mxu0 %v3105_v58  ;;  %v8657_v58 = vld [vmem:[%s13949_s5 + $0x78] ss:$12 sps:$4 sm:$0xff]  }
 0x94b   : > { %8164 = vmatpush3.bf16.msra.mxu0 %v3081_v12  ;;  %v10827_v28 = vpop.permute.xlu0 %2992 }
 0x94c   : > { %v2979_v17 = vpop.permute.xlu1 %2978  ;;  %8165 = vmatprep.subr.bf16.mxu0 %v3108_v9  ;;  %v3098_v38 = vsel %vm844_vm13, %v2991_v48, %v10827_v28  ;;  %v8652_v48 = vld [vmem:[%s13949_s5 + $0x60] ss:$12 sps:$4 sm:$0xff]   ;;  %v8658_v9 = vld [vmem:[%s13949_s5 + $0x68] ss:$12 sps:$4 sm:$0xff]  }
 0x94d   : > { %3204 = vmatprep.subr.bf16.mxu1 %v3098_v38 }
 0x94e   : > { %3205 = vmatpush1.bf16.msra.mxu1 %v3097_v34 }
 0x94f   : > { %3206 = vmatprep.subr.bf16.mxu1 %v3101_v35  ;;  %8166 = vmatpush3.bf16.msra.mxu0 %v3084_v32  ;;  %v3043_v30 = vpop.permute.xlu0 %3042  ;;  %v8659_v32 = vld [vmem:[%s13949_s5 + $0x80] ss:$12 sps:$4 sm:$0xff]  }
 0x950   : > { %v3025_v15 = vpop.permute.xlu1 %3024 }
 0x951   : > { %v3111_v0 = vsel %vm844_vm13, %v3025_v15, %v10741_v51  ;;  %v3090_v51 = vsel %vm844_vm13, %v10795_v46, %v2971_v55 }
 0x952   : > { %3207 = vmatpush1.bf16.msra.mxu1 %v3100_v36  ;;  %8167 = vmatprep.subr.bf16.mxu0 %v3111_v0 }
 0x953   : > { %8168 = vmatpush3.bf16.msra.mxu0 %v3087_v52  ;;  %v3007_v20 = vpop.permute.xlu0 %3006 }
 0x954   : > { %v3051_v21 = vpop.permute.xlu1 %3050  ;;  %8169 = vmatprep.subr.bf16.mxu0 %v3114_v23  ;;  %v3104_v44 = vsel %vm844_vm13, %v3007_v20, %v3009_v22  ;;  %v3103_v37 = vsel %vm844_vm13, %v10788_v61, %v3007_v20  ;;  %v3093_v61 = vsel %vm844_vm13, %v2977_v43, %v2979_v17 }
 0x955   : > { %3208 = vmatprep.subr.bf16.mxu1 %v3104_v44 }
 0x956   : > { %3209 = vmatpush1.bf16.msra.mxu1 %v3103_v37 }
 0x957   : > { %3210 = vmatprep.subr.bf16.mxu1 %v3107_v11  ;;  %8170 = vmatpush3.bf16.msra.mxu0 %v3090_v51  ;;  %v3049_v8 = vpop.permute.xlu0 %3048 }
 0x958   : > { %v3041_v18 = vpop.permute.xlu1 %3040  ;;  %v3120_v46 = vsel %vm844_vm13, %v3049_v8, %v3051_v21  ;;  %v3119_v41 = vsel %vm844_vm13, %v10815_v33, %v3049_v8 }
 0x959   : > { %v3117_v24 = vsel %vm844_vm13, %v3041_v18, %v3043_v30 }
 0x95a   : > { %3211 = vmatpush1.bf16.msra.mxu1 %v3106_v29  ;;  %8171 = vmatprep.subr.bf16.mxu0 %v3117_v24 }
 0x95b   : > { %8172 = vmatpush3.bf16.msra.mxu0 %v3093_v61  ;;  %v3023_v63 = vpop.permute.xlu0 %3022 }
 0x95c   : > { %v3053_v59 = vpop.permute.xlu1 %3052  ;;  %8173 = vmatprep.subr.bf16.mxu0 %v3120_v46  ;;  %v3110_v7 = vsel %vm844_vm13, %v3023_v63, %v3025_v15  ;;  %v3109_v4 = vsel %vm844_vm13, %v10797_v26, %v3023_v63 }
 0x95d   : > { %3212 = vmatprep.subr.bf16.mxu1 %v3110_v7 }
 0x95e   : > { %3213 = vmatpush1.bf16.msra.mxu1 %v3109_v4 }
 0x95f   : > { %3214 = vmatprep.subr.bf16.mxu1 %v3113_v3  ;;  %v3045_v53 = vpop.permute.xlu0 %3044 }
 0x960   : > { %v3057_v27 = vpop.permute.xlu1 %3056  ;;  %v3118_v50 = vsel %vm844_vm13, %v3045_v53, %v10815_v33 }
 0x962   : > { %3215 = vmatpush1.bf16.msra.mxu1 %v3112_v40 }
 0x963   : > { %v3039_v13 = vpop.permute.xlu0 %3038 }
 0x964   : > { %v2995_v62 = vpop.permute.xlu1 %2994  ;;  %v3116_v56 = vsel %vm844_vm13, %v3039_v13, %v3041_v18  ;;  %v3115_v26 = vsel %vm844_vm13, %v10804_v57, %v3039_v13 }
 0x965   : > { %3216 = vmatprep.subr.bf16.mxu1 %v3116_v56  ;;  %v3099_v60 = vsel %vm844_vm13, %v10827_v28, %v2995_v62 }
 0x966   : > { %3217 = vmatpush1.bf16.msra.mxu1 %v3115_v26 }
 0x967   : > { %3218 = vmatprep.subr.bf16.mxu1 %v3119_v41  ;;  %v2987_v25 = vpop.permute.xlu0 %2986 }
 0x968   : > { %v3096_v39 = vsel %vm844_vm13, %v10755_v10, %v2987_v25  ;;  %v3065_v16 = vpop.permute.xlu1 %3064  ;;  %v8655_v10 = vld [vmem:[%s13949_s5 + $0x7c] ss:$12 sps:$4 sm:$0xff]  }
 0x969   : > { %8174 = vmatpush3.bf16.msra.mxu0 %v3096_v39 }
 0x96a   : > { %3219 = vmatpush1.bf16.msra.mxu1 %v3118_v50 }
 0x96b   : > { %v3055_v42 = vpop.permute.xlu0 %3054 }
 0x96c   : > { %v3067_v49 = vpop.permute.xlu1 %3066  ;;  %v3122_v57 = vsel %vm844_vm13, %v3055_v42, %v3057_v27  ;;  %v3121_v31 = vsel %vm844_vm13, %v3053_v59, %v3055_v42 }
 0x96d   : > { %3220 = vmatprep.subr.bf16.mxu1 %v3122_v57  ;;  %v3126_v5 = vsel %vm844_vm13, %v3065_v16, %v3067_v49 }
 0x96e   : > { %3221 = vmatpush1.bf16.msra.mxu1 %v3121_v31 }
 0x96f   : > { %v3059_v45 = vpop.permute.xlu0 %3058 }
 0x970   : > { %v3073_v43 = vpop.permute.xlu1 %3072  ;;  %v3123_v33 = vsel %vm844_vm13, %v3057_v27, %v3059_v45 }
 0x971   : > { %8175 = vmatprep.subr.bf16.mxu0 %v3123_v33  ;;  %3223 = vmatmul.mubr.bf16.vlgmr.msra.gmra.mrb[32].mxu1 %v8652_v48 }
 0x972   : > { %8176 = vmatpush3.bf16.msra.mxu0 %v3099_v60  ;;  %3232 = vmatprep.mubr.bf16.mxu1 %v8655_v10 }
 0x973   : > { %8402 = vmatprep.subr.bf16.mxu0 %v3126_v5  ;;  %v3063_v6 = vpop.permute.xlu0 %3062 }
 0x974   : > { %v3075_v55 = vpop.permute.xlu1 %3074  ;;  %v3125_v22 = vsel %vm844_vm13, %v3063_v6, %v3065_v16 }
 0x975   : > { %3243 = vmatprep.subr.bf16.mxu1 %v3125_v22  ;;  %3329 = vmatmul.mubr.bf16.vlgmr.msra.gmra.mrb[28].mxu0 %v8652_v48  ;;  %v3129_v19 = vsel %vm844_vm13, %v3073_v43, %v3075_v55 }
 0x976   : > { %8403 = vmatpush3.bf16.msra.mxu0 %v3126_v5  ;;  %3336 = vmatprep.mubr.bf16.mxu0 %v8655_v10 }
 0x977   : > { %8404 = vmatprep.subr.bf16.mxu0 %v3129_v19  ;;  %v3061_v12 = vpop.permute.xlu0 %3060 }
 0x978   : > { %v3124_v28 = vsel %vm844_vm13, %v3061_v12, %v3063_v6 }
 0x979   : > { %3244 = vmatpush1.bf16.msra.mxu1 %v3124_v28 }
 0x97a   : > { %8405 = vmatpush3.bf16.msra.mxu0 %v3129_v19  ;;  %3233 = vmatmul.mubr.bf16.gmra.mrb[36].mxu1 %v8657_v58 }
 0x97b   : > { %v3071_v17 = vpop.permute.xlu0 %3070  ;;  %3275 = vmatprep.mubr.bf16.mxu1 %v8727_v47 }
 0x97c   : > { %v3128_v38 = vsel %vm844_vm13, %v3071_v17, %v3073_v43 }
 0x97d   : > { %3245 = vmatprep.subr.bf16.mxu1 %v3128_v38  ;;  %3337 = vmatmul.mubr.bf16.gmra.mrb[32].mxu0 %v8657_v58 }
 0x97e   : > { %8406 = vmatprep.mubr.msk.bf16.mxu0 %vm953_vm0, %v8658_v9 }
 0x97f   : > { %v3069_v34 = vpop.permute.xlu0 %3068 }
 0x980   : > { %v3127_v35 = vsel %vm844_vm13, %v3069_v34, %v3071_v17 }
 0x981   : > { %3246 = vmatpush1.bf16.msra.mxu1 %v3127_v35 }
 0x984   : > { %7947 = vmatmul.mubr.msk.bf16.vlgmr.msra.gmra.mrb[32].mxu1 %vm953_vm0, %v8658_v9 }
 0x985   : > { %8407 = vmatmul.mubr.msk.bf16.vlgmr.msra.gmra.mrb[36].mxu0 %vm953_vm0, %v8659_v32  ;;  %3285 = vmatprep.mubr.bf16.mxu1 %v8727_v47  ;;  %v2890_v44 = vpop.permute.xlu1 %2889 }
 0x989   : > { %v2900_v24 = vpop.permute.xlu1 %2899 }
 0x98c   : > { %7948 = vmatmul.mubr.msk.bf16.gmra.mrb[36].mxu1 %vm953_vm0, %v8659_v32 }
 0x990   : > { %v2885_v23 = vpop.permute.xlu0 %2884 }
 0x994   : > { %v2895_v29 = vpop.permute.xlu0 %2894 }
 0xa48   : > { %v8177_v30 = vpop.f32.mrb[28].mxu0 }
 0xa49   : > { %v8178_v15 = vpop.f32.mrb[29].mxu0 }
 0xa4a   : > { %v8179_v36 = vadd.f32 %v8178_v15, %v8177_v30  ;;  %v8180_v0 = vpop.f32.mrb[30].mxu0 }
 0xa4b   : > { %v8181_v52 = vpop.f32.mrb[31].mxu0 }
 0xa4c   : > { %v8182_v20 = vadd.f32 %v8181_v52, %v8180_v0  ;;  %v3331_v4 = vadd.f32 %v8179_v36, %v2885_v23 }
 0xa4e   : > { %v3334_v39 = vadd.f32 %v8182_v20, %v2890_v44 }
 0xa50   : > { %v8183_v21 = vpop.f32.mrb[32].mxu0 }
 0xa51   : > { %v8184_v37 = vpop.f32.mrb[33].mxu0 }
 0xa52   : > { %v8185_v51 = vadd.f32 %v8184_v37, %v8183_v21  ;;  %v8186_v11 = vpop.f32.mrb[34].mxu0 }
 0xa53   : > { %v8187_v8 = vpop.f32.mrb[35].mxu0 }
 0xa54   : > { %v8188_v18 = vadd.f32 %v8187_v8, %v8186_v11  ;;  %v3339_v63 = vadd.f32 %v8185_v51, %v2895_v29 }
 0xa56   : > { %v3342_v13 = vadd.f32 %v8188_v18, %v2900_v24 }
 0xa57   : > { %v3277_v61 = vpop.f32.mrb[32].mxu1 }
 0xa58   : > { %v8482_v46 = vadd.f32 %v3277_v61, %v2885_v23  ;;  %v3279_v59 = vpop.f32.mrb[33].mxu1  ;;  %v8408_v7 = vpop.f32.mrb[36].mxu0 }
 0xa59   : > { %v8483_v3 = vadd.f32 %v3279_v59, %v2885_v23  ;;  %v3388_v53 = vadd.f32 %v8408_v7, %v3339_v63  ;;  %v3281_v27 = vpop.f32.mrb[34].mxu1  ;;  %v3379_v40 = vpop.f32.mrb[37].mxu0 }
 0xa5a   : > { %v3394_v62 = vmax.f32 %v8482_v46, 0.0  ;;  %v8484_v56 = vadd.f32 %v3281_v27, %v2890_v44  ;;  %v3380_v26 = vadd.f32 %v3379_v40, %v3331_v4  ;;  %v3283_v41 = vpop.f32.mrb[35].mxu1  ;;  %v8409_v25 = vpop.f32.mrb[38].mxu0 }
 0xa5b   : > { %v3395_v16 = vmax.f32 %v8483_v3, 0.0  ;;  %v3402_v50 = vmax.f32 %v3388_v53, 0.0  ;;  %v8485_v42 = vadd.f32 %v3283_v41, %v2890_v44  ;;  %v3391_v49 = vadd.f32 %v8409_v25, %v3342_v13  ;;  %v3382_v57 = vpop.f32.mrb[39].mxu0  ;;  %v10968_v59 = vpop.permute.xlu1 %3476 }
 0xa5c   : > { %v3397_v31 = vmax.f32 %v8484_v56, 0.0  ;;  %v3396_v48 = vmax.f32 %v3380_v26, 0.0  ;;  %v3383_v10 = vadd.f32 %v3382_v57, %v3334_v39  ;;  %v3406_v60 = vmul.f32 %v3394_v62, %v9393_v1  ;;  %v11005_v13 = vpop.permute.xlu0 %3672 }
 0xa5d   : > { %v3414_v45 = vmul.f32 %v3402_v50, %v9397_v14  ;;  %v3398_v43 = vmax.f32 %v8485_v42, 0.0  ;;  %v3405_v33 = vmax.f32 %v3391_v49, 0.0  ;;  %v3407_v22 = vmul.f32 %v3395_v16, %v9401_v54 }
 0xa5e   : > { %v3409_v5 = vmul.f32 %v3397_v31, %v9393_v1  ;;  %v3408_v6 = vmul.f32 %v3396_v48, %v9397_v14  ;;  %v3399_v55 = vmax.f32 %v3383_v10, 0.0 }
 0xa5f   : > { %3426 = vst.msk [vmem:[#allocation3 + $0x58] sm:$0xff] %vm953_vm0, %v3414_v45  ;;  %v3410_v19 = vmul.f32 %v3398_v43, %v9401_v54  ;;  %v3417_v58 = vmul.f32 %v3405_v33, %v9397_v14  ;;  %v3287_v12 = vpop.f32.mrb[36].mxu1  ;;  %v10972_v7 = vpop.permute.xlu1 %3484 }
 0xa60   : > { %3420 = vst.msk [vmem:[#allocation3 + $0x18] sm:$0xff] %vm953_vm0, %v3408_v6  ;;  %v3411_v28 = vmul.f32 %v3399_v55, %v9397_v14  ;;  %v8486_v9 = vadd.f32 %v3287_v12, %v2895_v29  ;;  %v3289_v17 = vpop.f32.mrb[37].mxu1  ;;  %v3461_v38 = vpack.c.bf16 %v3409_v5, %v3406_v60 }
 0xa61   : > { %3429 = vst.msk [vmem:[#allocation3 + $0x78] sm:$0xff] %vm953_vm0, %v3417_v58  ;;  %v8487_v34 = vadd.f32 %v3289_v17, %v2895_v29  ;;  %v3291_v35 = vpop.f32.mrb[38].mxu1  ;;  %v3462_v32 = vpack.c.bf16 %v3410_v19, %v3407_v22 }
 0xa62   : > { %3423 = vst.msk [vmem:[#allocation3 + $0x38] sm:$0xff] %vm953_vm0, %v3411_v28  ;;  %v3400_v30 = vmax.f32 %v8486_v9, 0.0  ;;  %v8488_v15 = vadd.f32 %v3291_v35, %v2900_v24  ;;  %v3293_v36 = vpop.f32.mrb[39].mxu1 }
 0xa63   : > { %v3401_v0 = vmax.f32 %v8487_v34, 0.0  ;;  %v8489_v52 = vadd.f32 %v3293_v36, %v2900_v24  ;;  %v10978_v4 = vpop.permute.xlu1 %3498 }
 0xa64   : > { %v3403_v20 = vmax.f32 %v8488_v15, 0.0  ;;  %v3412_v21 = vmul.f32 %v3400_v30, %v9393_v1 }
 0xa65   : > { %v3404_v23 = vmax.f32 %v8489_v52, 0.0  ;;  %v3413_v37 = vmul.f32 %v3401_v0, %v9401_v54 }
 0xa66   : > { %v3415_v44 = vmul.f32 %v3403_v20, %v9393_v1  ;;  %v3455_v11 = vld [vmem:[#allocation3 + $0x58] sm:$0xff] }
 0xa67   : > { %v3416_v51 = vmul.f32 %v3404_v23, %v9401_v54  ;;  %v3447_v63 = vld [vmem:[#allocation3 + $0x18] sm:$0xff]  ;;  %v10983_v3 = vpop.permute.xlu1 %3506 }
 0xa68   : > { %v3459_v8 = vld [vmem:[#allocation3 + $0x78] sm:$0xff]  ;;  %v3465_v18 = vpack.c.bf16 %v3415_v44, %v3412_v21 }
 0xa69   : > { %v3467_v29 = vpack.c.bf16 %v3459_v8, %v3455_v11  ;;  %v10928_v61 = vpack.c.bf16 %v3416_v51, %v3413_v37  ;;  %v3451_v24 = vld [vmem:[#allocation3 + $0x38] sm:$0xff] }
 0xa6a   : > { %v3463_v46 = vpack.c.bf16 %v3451_v24, %v3447_v63 }
 0xa6b   : > { %3552 = vrot.lane.b32.xlu1 %v3467_v29, %s8721_s23  ;;  %3490 = vrot.lane.b32.xlu0 %v3467_v29, %s8718_s12  ;;  %v10993_v53 = vpop.permute.xlu1 %3520 }
 0xa6f   : > { %3568 = vrot.lane.b32.xlu1 %v3467_v29, %s8722_s24  ;;  %3512 = vrot.lane.b32.xlu0 %v3467_v29, %s8719_s15  ;;  %v10997_v27 = vpop.permute.xlu1 %3528 }
 0xa73   : > { %3584 = vrot.lane.b32.xlu1 %v3467_v29, %s8723_s25  ;;  %3534 = vrot.lane.b32.xlu0 %v3467_v29, %s8720_s22  ;;  %v11003_v40 = vpop.permute.xlu1 %3680 }
 0xa77   : > { %3600 = vrot.lane.b32.xlu1 %v3467_v29, %s8724_s26  ;;  %3482 = vrot.lane.b32.xlu0 %v3463_v46, %s8718_s12 }
 0xa7b   : > { %3616 = vrot.lane.b32.xlu1 %v3467_v29, %s8726_s28  ;;  %3504 = vrot.lane.b32.xlu0 %v3463_v46, %s8719_s15 }
 0xa7f   : > { %3686 = vrot.lane.b32.xlu1 %v3467_v29, %s8725_s27  ;;  %3526 = vrot.lane.b32.xlu0 %v3463_v46, %s8720_s22 }
 0xa83   : > { %3610 = vrot.lane.b32.xlu1 %v3463_v46, %s8726_s28  ;;  %3546 = vrot.lane.b32.xlu0 %v3463_v46, %s8721_s23 }
 0xa87   : > { %3674 = vrot.lane.b32.xlu1 %v3461_v38, %s8725_s27  ;;  %3562 = vrot.lane.b32.xlu0 %v3463_v46, %s8722_s24 }
 0xa8b   : > { %3606 = vrot.lane.b32.xlu1 %v3461_v38, %s8726_s28  ;;  %3578 = vrot.lane.b32.xlu0 %v3463_v46, %s8723_s25 }
 0xa8f   : > { %3480 = vrot.lane.b32.xlu1 %v3462_v32, %s8718_s12  ;;  %3594 = vrot.lane.b32.xlu0 %v3463_v46, %s8724_s26 }
 0xa93   : > { %3502 = vrot.lane.b32.xlu1 %v3462_v32, %s8719_s15  ;;  %3678 = vrot.lane.b32.xlu0 %v3463_v46, %s8725_s27 }
 0xa97   : > { %3524 = vrot.lane.b32.xlu1 %v3462_v32, %s8720_s22  ;;  %3478 = vrot.lane.b32.xlu0 %v3461_v38, %s8718_s12 }
 0xa9b   : > { %3544 = vrot.lane.b32.xlu1 %v3462_v32, %s8721_s23  ;;  %3500 = vrot.lane.b32.xlu0 %v3461_v38, %s8719_s15 }
 0xa9f   : > { %3560 = vrot.lane.b32.xlu1 %v3462_v32, %s8722_s24  ;;  %3522 = vrot.lane.b32.xlu0 %v3461_v38, %s8720_s22 }
 0xaa3   : > { %3576 = vrot.lane.b32.xlu1 %v3462_v32, %s8723_s25  ;;  %3542 = vrot.lane.b32.xlu0 %v3461_v38, %s8721_s23 }
 0xaa7   : > { %3592 = vrot.lane.b32.xlu1 %v3462_v32, %s8724_s26  ;;  %3558 = vrot.lane.b32.xlu0 %v3461_v38, %s8722_s24 }
 0xaab   : > { %3548 = vrot.lane.b32.xlu1 %v3465_v18, %s8721_s23  ;;  %3574 = vrot.lane.b32.xlu0 %v3461_v38, %s8723_s25 }
 0xaaf   : > { %3564 = vrot.lane.b32.xlu1 %v3465_v18, %s8722_s24  ;;  %3590 = vrot.lane.b32.xlu0 %v3461_v38, %s8724_s26 }
 0xab3   : > { %3580 = vrot.lane.b32.xlu1 %v3465_v18, %s8723_s25  ;;  %3676 = vrot.lane.b32.xlu0 %v3462_v32, %s8725_s27 }
 0xab7   : > { %3596 = vrot.lane.b32.xlu1 %v3465_v18, %s8724_s26  ;;  %3608 = vrot.lane.b32.xlu0 %v3462_v32, %s8726_s28 }
 0xabb   : > { %3682 = vrot.lane.b32.xlu1 %v3465_v18, %s8725_s27  ;;  %3486 = vrot.lane.b32.xlu0 %v3465_v18, %s8718_s12 }
 0xabf   : > { %3612 = vrot.lane.b32.xlu1 %v3465_v18, %s8726_s28  ;;  %3508 = vrot.lane.b32.xlu0 %v3465_v18, %s8719_s15 }
 0xac3   : > { %3488 = vrot.lane.b32.xlu1 %v10928_v61, %s8718_s12  ;;  %3530 = vrot.lane.b32.xlu0 %v3465_v18, %s8720_s22 }
 0xac7   : > { %3510 = vrot.lane.b32.xlu1 %v10928_v61, %s8719_s15  ;;  %3550 = vrot.lane.b32.xlu0 %v10928_v61, %s8721_s23 }
 0xacb   : > { %3532 = vrot.lane.b32.xlu1 %v10928_v61, %s8720_s22  ;;  %3566 = vrot.lane.b32.xlu0 %v10928_v61, %s8722_s24 }
 0xacf   : > { %3582 = vrot.lane.b32.xlu0 %v10928_v61, %s8723_s25 }
 0xad3   : > { %3598 = vrot.lane.b32.xlu0 %v10928_v61, %s8724_s26 }
 0xad7   : > { %3684 = vrot.lane.b32.xlu0 %v10928_v61, %s8725_s27 }
 0xadb   : > { %3614 = vrot.lane.b32.xlu0 %v10928_v61, %s8726_s28 }
 0xadd   : > { %v11009_v62 = vpop.permute.xlu1 %3552  ;;  %v11011_v56 = vpop.permute.xlu0 %3490 }
 0xade   : > { %3702 = vrot.lane.b32.xlu1 %v11011_v56, %s8725_s27 }
 0xadf   : > { %3750 = vrot.lane.b32.xlu0 %v11009_v62, %s8725_s27 }
 0xae1   : > { %v11017_v26 = vpop.permute.xlu1 %3568  ;;  %v11019_v41 = vpop.permute.xlu0 %3512 }
 0xae3   : > { %3766 = vrot.lane.b32.xlu0 %v11017_v26, %s8725_s27 }
 0xae5   : > { %v11023_v25 = vpop.permute.xlu1 %3584  ;;  %v11025_v39 = vpop.permute.xlu0 %3534 }
 0xae9   : > { %v11027_v16 = vpop.permute.xlu1 %3600  ;;  %v3483_v50 = vpop.permute.xlu0 %3482 }
 0xaea   : > { %3694 = vrot.lane.b32.xlu0 %v3483_v50, %s8725_s27 }
 0xaed   : > { %v11030_v42 = vpop.permute.xlu1 %3616  ;;  %v11032_v49 = vpop.permute.xlu0 %3504 }
 0xaf1   : > { %v11034_v57 = vpop.permute.xlu1 %3686  ;;  %v11036_v31 = vpop.permute.xlu0 %3526 }
 0xaf5   : > { %v11038_v48 = vpop.permute.xlu1 %3610  ;;  %v3547_v10 = vpop.permute.xlu0 %3546 }
 0xaf6   : > { %3742 = vrot.lane.b32.xlu1 %v3547_v10, %s8725_s27 }
 0xaf9   : > { %v3675_v45 = vpop.permute.xlu1 %3674  ;;  %v11041_v43 = vpop.permute.xlu0 %3562 }
 0xafa   : > { %3758 = vrot.lane.b32.xlu1 %v11041_v43, %s8725_s27  ;;  %v3816_v24 = vsel %vm844_vm13, %v11005_v13, %v3675_v45 }
 0xafd   : > { %v11045_v33 = vpop.permute.xlu1 %3606  ;;  %v11047_v60 = vpop.permute.xlu0 %3578 }
 0xb01   : > { %v3481_v5 = vpop.permute.xlu1 %3480  ;;  %v11049_v6 = vpop.permute.xlu0 %3594 }
 0xb02   : > { %v3494_v55 = vsel %vm512_vm5, %v3481_v5, %v3483_v50 }
 0xb03   : > { %3692 = vrot.lane.b32.xlu1 %v3494_v55, %s8725_s27 }
 0xb05   : > { %v3503_v22 = vpop.permute.xlu1 %3502  ;;  %v11053_v19 = vpop.permute.xlu0 %3678 }
 0xb06   : > { %v3516_v50 = vsel %vm535_vm9, %v3503_v22, %v11032_v49 }
 0xb09   : > { %v3525_v58 = vpop.permute.xlu1 %3524  ;;  %v3479_v12 = vpop.permute.xlu0 %3478 }
 0xb0a   : > { %v3538_v35 = vsel %vm419_vm8, %v3525_v58, %v11036_v31  ;;  %v3492_v21 = vsel %vm512_vm5, %v10968_v59, %v3479_v12  ;;  %v3493_v59 = vsel %vm512_vm5, %v3479_v12, %v3481_v5 }
 0xb0d   : > { %v3545_v28 = vpop.permute.xlu1 %3544  ;;  %v3501_v9 = vpop.permute.xlu0 %3500 }
 0xb0e   : > { %v3515_v17 = vsel %vm535_vm9, %v3501_v9, %v3503_v22  ;;  %v3555_v15 = vsel %vm577_vm10, %v3545_v28, %v3547_v10  ;;  %v3514_v11 = vsel %vm535_vm9, %v10978_v4, %v3501_v9 }
 0xb0f   : > { %3706 = vrot.lane.b32.xlu1 %v3515_v17, %s8725_s27 }
 0xb11   : > { %v3561_v38 = vpop.permute.xlu1 %3560  ;;  %v3523_v34 = vpop.permute.xlu0 %3522 }
 0xb12   : > { %v3536_v29 = vsel %vm419_vm8, %v10993_v53, %v3523_v34  ;;  %v3537_v13 = vsel %vm419_vm8, %v3523_v34, %v3525_v58  ;;  %v3571_v58 = vsel %vm594_vm11, %v3561_v38, %v11041_v43 }
 0xb13   : > { %3724 = vrot.lane.b32.xlu1 %v3538_v35, %s8725_s27 }
 0xb15   : > { %v3577_v32 = vpop.permute.xlu1 %3576  ;;  %v3543_v30 = vpop.permute.xlu0 %3542 }
 0xb16   : > { %3736 = vrot.lane.b32.xlu0 %v3543_v30, %s8725_s27  ;;  %v3554_v12 = vsel %vm577_vm10, %v3543_v30, %v3545_v28  ;;  %v3587_v28 = vsel %vm611_vm12, %v3577_v32, %v11047_v60 }
 0xb17   : > { %3740 = vrot.lane.b32.xlu1 %v3555_v15, %s8725_s27 }
 0xb19   : > { %v11063_v36 = vpop.permute.xlu1 %3592  ;;  %v3559_v0 = vpop.permute.xlu0 %3558 }
 0xb1a   : > { %3752 = vrot.lane.b32.xlu0 %v3559_v0, %s8725_s27  ;;  %v3570_v52 = vsel %vm594_vm11, %v3559_v0, %v3561_v38 }
 0xb1b   : > { %3754 = vrot.lane.b32.xlu1 %v3570_v52, %s8725_s27 }
 0xb1d   : > { %v11068_v20 = vpop.permute.xlu1 %3548  ;;  %v3575_v23 = vpop.permute.xlu0 %3574 }
 0xb1e   : > { %3688 = vrot.lane.b32.xlu0 %v3492_v21, %s8725_s27  ;;  %v3586_v44 = vsel %vm611_vm12, %v3575_v23, %v3577_v32 }
 0xb1f   : > { %3770 = vrot.lane.b32.xlu1 %v3586_v44, %s8725_s27 }
 0xb21   : > { %v11075_v37 = vpop.permute.xlu1 %3564  ;;  %v11077_v51 = vpop.permute.xlu0 %3590 }
 0xb22   : > { %3704 = vrot.lane.b32.xlu0 %v3514_v11, %s8725_s27 }
 0xb23   : > { %3744 = vrot.lane.b32.xlu1 %v11068_v20, %s8725_s27 }
 0xb25   : > { %v11084_v8 = vpop.permute.xlu1 %3580  ;;  %v11086_v18 = vpop.permute.xlu0 %3676 }
 0xb26   : > { %3720 = vrot.lane.b32.xlu0 %v3536_v29, %s8725_s27  ;;  %v3817_v61 = vsel %vm844_vm13, %v3675_v45, %v11086_v18 }
 0xb27   : > { %3760 = vrot.lane.b32.xlu1 %v11075_v37, %s8725_s27  ;;  %3930 = vmatprep.subr.bf16.mxu0 %v3817_v61 }
 0xb28   : > { %3931 = vmatpush1.bf16.msra.mxu0 %v3816_v24 }
 0xb29   : > { %v11097_v63 = vpop.permute.xlu1 %3596  ;;  %v11099_v46 = vpop.permute.xlu0 %3608 }
 0xb2a   : > { %3690 = vrot.lane.b32.xlu0 %v3493_v59, %s8725_s27  ;;  %v3618_v24 = vsel %vm645_vm15, %v11045_v33, %v11099_v46 }
 0xb2d   : > { %v3683_v4 = vpop.permute.xlu1 %3682  ;;  %v3487_v53 = vpop.permute.xlu0 %3486 }
 0xb2e   : > { %3708 = vrot.lane.b32.xlu0 %v3516_v50, %s8725_s27  ;;  %v3495_v43 = vsel %vm512_vm5, %v10972_v7, %v3487_v53 }
 0xb31   : > { %v11106_v10 = vpop.permute.xlu1 %3612  ;;  %v3509_v55 = vpop.permute.xlu0 %3508 }
 0xb32   : > { %3722 = vrot.lane.b32.xlu0 %v3537_v13, %s8725_s27  ;;  %v3517_v45 = vsel %vm535_vm9, %v10983_v3, %v3509_v55  ;;  %v7959_v13 = vld [vmem:[%s13950_s6 + $0x60] sm:$0xff] }
 0xb33   : > { %3712 = vrot.lane.b32.xlu1 %v3517_v45, %s8725_s27 }
 0xb35   : > { %v3531_v5 = vpop.permute.xlu0 %3530  ;;  %v3489_v9 = vpop.permute.xlu1 %3488 }
 0xb36   : > { %3738 = vrot.lane.b32.xlu0 %v3554_v12, %s8725_s27  ;;  %v3539_v22 = vsel %vm419_vm8, %v10997_v27, %v3531_v5  ;;  %v3496_v3 = vsel %vm512_vm5, %v3487_v53, %v3489_v9  ;;  %v3497_v32 = vsel %vm512_vm5, %v3489_v9, %v11011_v56  ;;  %v3819_v56 = vsel %vm844_vm13, %v11003_v40, %v3683_v4 }
 0xb37   : > { %3728 = vrot.lane.b32.xlu1 %v3539_v22, %s8725_s27 }
 0xb39   : > { %v3551_v17 = vpop.permute.xlu0 %3550  ;;  %v3511_v27 = vpop.permute.xlu1 %3510 }
 0xb3a   : > { %3756 = vrot.lane.b32.xlu0 %v3571_v58, %s8725_s27  ;;  %v3518_v38 = vsel %vm535_vm9, %v3509_v55, %v3511_v27  ;;  %v3519_v52 = vsel %vm535_vm9, %v3511_v27, %v11019_v41  ;;  %v3557_v21 = vsel %vm577_vm10, %v3551_v17, %v11009_v62  ;;  %v3556_v62 = vsel %vm577_vm10, %v11068_v20, %v3551_v17  ;;  %v8662_v20 = vld [vmem:[%s13949_s5 + $0x94] ss:$12 sps:$4 sm:$0xff]  }
 0xb3b   : > { %3698 = vrot.lane.b32.xlu1 %v3496_v3, %s8725_s27  ;;  %3962 = vmatprep.mubr.bf16.mxu0 %v8662_v20  ;;  %v3818_v55 = vsel %vm844_vm13, %v11086_v18, %v11053_v19 }
 0xb3c   : > { %4068 = vmatprep.mubr.bf16.mxu1 %v8662_v20 }
 0xb3d   : > { %v3567_v34 = vpop.permute.xlu0 %3566  ;;  %v3533_v15 = vpop.permute.xlu1 %3532 }
 0xb3e   : > { %3772 = vrot.lane.b32.xlu0 %v3587_v28, %s8725_s27  ;;  %v3540_v7 = vsel %vm419_vm8, %v3531_v5, %v3533_v15  ;;  %v3541_v40 = vsel %vm419_vm8, %v3533_v15, %v11025_v39  ;;  %v3573_v44 = vsel %vm594_vm11, %v3567_v34, %v11017_v26  ;;  %v3572_v26 = vsel %vm594_vm11, %v11075_v37, %v3567_v34 }
 0xb3f   : > { %3774 = vrot.lane.b32.xlu1 %v11047_v60, %s8725_s27  ;;  %v3619_v37 = vsel %vm645_vm15, %v11099_v46, %v11038_v48  ;;  %v7962_v46 = vld [vmem:[%s13950_s6 + $0x78] sm:$0xff] }
 0xb41   : > { %v3583_v35 = vpop.permute.xlu0 %3582 }
 0xb42   : > { %3696 = vrot.lane.b32.xlu0 %v3495_v43, %s8725_s27 }
 0xb43   : > { %3714 = vrot.lane.b32.xlu1 %v3518_v38, %s8725_s27 }
 0xb45   : > { %v3599_v30 = vpop.permute.xlu0 %3598 }
 0xb46   : > { %3700 = vrot.lane.b32.xlu0 %v3497_v32, %s8725_s27 }
 0xb47   : > { %3776 = vrot.lane.b32.xlu1 %v11084_v8, %s8725_s27 }
 0xb49   : > { %v11138_v60 = vpop.permute.xlu0 %3684 }
 0xb4a   : > { %3768 = vrot.lane.b32.xlu0 %v3575_v23, %s8725_s27  ;;  %v3820_v0 = vsel %vm844_vm13, %v3683_v4, %v11138_v60  ;;  %v3602_v23 = vsel %vm628_vm14, %v11077_v51, %v11063_v36 }
 0xb4b   : > { %3730 = vrot.lane.b32.xlu1 %v3540_v7, %s8725_s27  ;;  %3932 = vmatprep.subr.bf16.mxu0 %v3820_v0 }
 0xb4c   : > { %3933 = vmatpush1.bf16.msra.mxu0 %v3819_v56 }
 0xb4d   : > { %v3615_v11 = vpop.permute.xlu0 %3614 }
 0xb4e   : > { %3716 = vrot.lane.b32.xlu0 %v3519_v52, %s8725_s27 }
 0xb4f   : > { %3786 = vrot.lane.b32.xlu1 %v3602_v23, %s8725_s27 }
 0xb51   : > { %v11214_v29 = vpop.permute.xlu0 %3750 }
 0xb52   : > { %3710 = vrot.lane.b32.xlu0 %v11032_v49, %s8725_s27  ;;  %v3589_v49 = vsel %vm611_vm12, %v3583_v35, %v11023_v25 }
 0xb53   : > { %3748 = vrot.lane.b32.xlu1 %v3557_v21, %s8725_s27 }
 0xb56   : > { %3732 = vrot.lane.b32.xlu0 %v3541_v40, %s8725_s27 }
 0xb57   : > { %3718 = vrot.lane.b32.xlu1 %v11019_v41, %s8725_s27  ;;  %v3603_v41 = vsel %vm628_vm14, %v11063_v36, %v11049_v6  ;;  %v11194_v36 = vpop.permute.xlu1 %3702 }
 0xb5a   : > { %3782 = vrot.lane.b32.xlu0 %v11023_v25, %s8725_s27  ;;  %v3588_v25 = vsel %vm611_vm12, %v11084_v8, %v3583_v35 }
 0xb5b   : > { %3764 = vrot.lane.b32.xlu1 %v3573_v44, %s8725_s27 }
 0xb5e   : > { %3746 = vrot.lane.b32.xlu0 %v3556_v62, %s8725_s27 }
 0xb5f   : > { %3790 = vrot.lane.b32.xlu1 %v11049_v6, %s8725_s27  ;;  %v3605_v6 = vsel %vm628_vm14, %v3599_v30, %v11027_v16 }
 0xb62   : > { %3788 = vrot.lane.b32.xlu0 %v3603_v41, %s8725_s27 }
 0xb63   : > { %3780 = vrot.lane.b32.xlu1 %v3589_v49, %s8725_s27 }
 0xb66   : > { %3762 = vrot.lane.b32.xlu0 %v3572_v26, %s8725_s27 }
 0xb67   : > { %3792 = vrot.lane.b32.xlu1 %v11097_v63, %s8725_s27 }
 0xb6a   : > { %3784 = vrot.lane.b32.xlu0 %v11077_v51, %s8725_s27  ;;  %v3743_v51 = vpop.permute.xlu1 %3742 }
 0xb6b   : > { %3796 = vrot.lane.b32.xlu1 %v3605_v6, %s8725_s27 }
 0xb6e   : > { %3778 = vrot.lane.b32.xlu0 %v3588_v25, %s8725_s27  ;;  %v11212_v8 = vpop.permute.xlu1 %3758 }
 0xb6f   : > { %3734 = vrot.lane.b32.xlu1 %v11025_v39, %s8725_s27  ;;  %v3604_v39 = vsel %vm628_vm14, %v11097_v63, %v3599_v30 }
 0xb72   : > { %3726 = vrot.lane.b32.xlu0 %v11036_v31, %s8725_s27  ;;  %v3621_v31 = vsel %vm645_vm15, %v3615_v11, %v11030_v42 }
 0xb73   : > { %3804 = vrot.lane.b32.xlu1 %v3619_v37, %s8725_s27 }
 0xb75   : > { %v11221_v61 = vpop.permute.xlu1 %3692 }
 0xb76   : > { %3794 = vrot.lane.b32.xlu0 %v3604_v39, %s8725_s27 }
 0xb77   : > { %3806 = vrot.lane.b32.xlu1 %v11038_v48, %s8725_s27  ;;  %v11229_v48 = vpop.permute.xlu0 %3766 }
 0xb7a   : > { %3798 = vrot.lane.b32.xlu0 %v11027_v16, %s8725_s27  ;;  %v7960_v16 = vld [vmem:[%s13950_s6 + $0x68] sm:$0xff] }
 0xb7b   : > { %3812 = vrot.lane.b32.xlu1 %v3621_v31, %s8725_s27  ;;  %v11236_v59 = vpop.permute.xlu0 %3694 }
 0xb7e   : > { %3802 = vrot.lane.b32.xlu0 %v3618_v24, %s8725_s27  ;;  %v3821_v24 = vsel %vm844_vm13, %v11138_v60, %v11034_v57  ;;  %v3824_v57 = vsel %vm844_vm13, %v11221_v61, %v11236_v59 }
 0xb7f   : > { %3814 = vrot.lane.b32.xlu1 %v11030_v42, %s8725_s27  ;;  %v3620_v42 = vsel %vm645_vm15, %v11106_v10, %v3615_v11 }
 0xb81   : > { %v3707_v63 = vpop.permute.xlu1 %3706 }
 0xb82   : > { %3800 = vrot.lane.b32.xlu0 %v11045_v33, %s8725_s27 }
 0xb83   : > { %3629 = vperm.xlu1 %8625, %v7960_v16  }
 0xb85   : > { %v11241_v4 = vpop.permute.xlu1 %3724 }
 0xb86   : > { %3810 = vrot.lane.b32.xlu0 %v3620_v42, %s8725_s27 }
 0xb87   : > { %3639 = vperm.xlu1 %8625, %v7962_v46  }
 0xb88   : > { %v11246_v53 = vpop.permute.xlu0 %3736 }
 0xb89   : > { %v11248_v50 = vpop.permute.xlu1 %3740 }
 0xb8a   : > { %3808 = vrot.lane.b32.xlu0 %v11106_v10, %s8725_s27  ;;  %v3842_v33 = vsel %vm844_vm13, %v11248_v50, %v3743_v51  ;;  %v7961_v10 = vld [vmem:[%s13950_s6 + $0x70] sm:$0xff] }
 0xb8b   : > { %8193 = vmatprep.subr.bf16.mxu1 %v3842_v33 }
 0xb8c   : > { %8194 = vmatpush3.bf16.msra.mxu1 %v3818_v55  ;;  %v11260_v45 = vpop.permute.xlu0 %3752 }
 0xb8d   : > { %v11262_v5 = vpop.permute.xlu1 %3754 }
 0xb8e   : > { %3624 = vperm.xlu0 %8626, %v7959_v13  }
 0xb90   : > { %v3689_v12 = vpop.permute.xlu0 %3688 }
 0xb91   : > { %v11267_v9 = vpop.permute.xlu1 %3770 }
 0xb92   : > { %3634 = vperm.xlu0 %8626, %v7961_v10  }
 0xb94   : > { %v3705_v22 = vpop.permute.xlu0 %3704 }
 0xb95   : > { %v11269_v18 = vpop.permute.xlu1 %3744  ;;  %v3828_v49 = vsel %vm844_vm13, %v3705_v22, %v3707_v63 }
 0xb98   : > { %v3721_v19 = vpop.permute.xlu0 %3720 }
 0xb99   : > { %v11276_v28 = vpop.permute.xlu1 %3760 }
 0xb9c   : > { %v3691_v17 = vpop.permute.xlu0 %3690 }
 0xb9d   : > { %v3823_v58 = vsel %vm844_vm13, %v3691_v17, %v11221_v61  ;;  %v3822_v3 = vsel %vm844_vm13, %v3689_v12, %v3691_v17  ;;  %v3846_v17 = vsel %vm844_vm13, %v11260_v45, %v11262_v5 }
 0xb9e   : > { %3934 = vmatprep.subr.bf16.mxu0 %v3823_v58 }
 0xb9f   : > { %3935 = vmatpush1.bf16.msra.mxu0 %v3822_v3 }
 0xba0   : > { %v11274_v34 = vpop.permute.xlu0 %3708 }
 0xba1   : > { %v3829_v44 = vsel %vm844_vm13, %v3707_v63, %v11274_v34 }
 0xba4   : > { %v3723_v27 = vpop.permute.xlu0 %3722 }
 0xba5   : > { %v3713_v35 = vpop.permute.xlu1 %3712  ;;  %v3835_v37 = vsel %vm844_vm13, %v3723_v27, %v11241_v4  ;;  %v3834_v39 = vsel %vm844_vm13, %v3721_v19, %v3723_v27 }
 0xba8   : > { %v3739_v43 = vpop.permute.xlu0 %3738 }
 0xba9   : > { %v3729_v38 = vpop.permute.xlu1 %3728  ;;  %v3841_v33 = vsel %vm844_vm13, %v3739_v43, %v11248_v50  ;;  %v3840_v55 = vsel %vm844_vm13, %v11246_v53, %v3739_v43 }
 0xbac   : > { %v11278_v30 = vpop.permute.xlu0 %3756 }
 0xbad   : > { %v3699_v32 = vpop.permute.xlu1 %3698  ;;  %v3848_v63 = vsel %vm844_vm13, %v11278_v30, %v11212_v8 }
 0xbb0   : > { %v11280_v15 = vpop.permute.xlu0 %3772 }
 0xbb1   : > { %v3775_v7 = vpop.permute.xlu1 %3774  ;;  %v3853_v45 = vsel %vm844_vm13, %v11267_v9, %v11280_v15 }
 0xbb2   : > { %v3854_v61 = vsel %vm844_vm13, %v11280_v15, %v3775_v7 }
 0xbb4   : > { %v3697_v0 = vpop.permute.xlu0 %3696 }
 0xbb5   : > { %v3715_v56 = vpop.permute.xlu1 %3714  ;;  %v3825_v40 = vsel %vm844_vm13, %v3697_v0, %v3699_v32 }
 0xbb6   : > { %v3831_v20 = vsel %vm844_vm13, %v3713_v35, %v3715_v56 }
 0xbb8   : > { %v3701_v52 = vpop.permute.xlu0 %3700 }
 0xbb9   : > { %v11282_v23 = vpop.permute.xlu1 %3776  ;;  %v3826_v21 = vsel %vm844_vm13, %v3699_v32, %v3701_v52  ;;  %v3827_v10 = vsel %vm844_vm13, %v3701_v52, %v11194_v36  ;;  %v3847_v36 = vsel %vm844_vm13, %v11262_v5, %v11278_v30 }
 0xbba   : > { %3936 = vmatprep.subr.bf16.mxu0 %v3826_v21 }
 0xbbb   : > { %3937 = vmatpush1.bf16.msra.mxu0 %v3825_v40 }
 0xbbc   : > { %3938 = vmatprep.subr.bf16.mxu0 %v3829_v44  ;;  %v11288_v62 = vpop.permute.xlu0 %3768 }
 0xbbd   : > { %v3731_v41 = vpop.permute.xlu1 %3730  ;;  %v3852_v30 = vsel %vm844_vm13, %v11288_v62, %v11267_v9 }
 0xbbf   : > { %3939 = vmatpush1.bf16.msra.mxu0 %v3828_v49 }
 0xbc0   : > { %v3717_v26 = vpop.permute.xlu0 %3716 }
 0xbc1   : > { %v11291_v6 = vpop.permute.xlu1 %3786  ;;  %v3832_v25 = vsel %vm844_vm13, %v3715_v56, %v3717_v26 }
 0xbc2   : > { %3940 = vmatprep.subr.bf16.mxu0 %v3832_v25 }
 0xbc3   : > { %3941 = vmatpush1.bf16.msra.mxu0 %v3831_v20 }
 0xbc4   : > { %3942 = vmatprep.subr.bf16.mxu0 %v3835_v37  ;;  %v3711_v51 = vpop.permute.xlu0 %3710 }
 0xbc5   : > { %v3749_v11 = vpop.permute.xlu1 %3748 }
 0xbc6   : > { %v3845_v31 = vsel %vm844_vm13, %v3749_v11, %v11214_v29  ;;  %v3837_v29 = vsel %vm844_vm13, %v3729_v38, %v3731_v41 }
 0xbc7   : > { %3943 = vmatpush1.bf16.msra.mxu0 %v3834_v39  ;;  %8195 = vmatprep.subr.bf16.mxu1 %v3845_v31  ;;  %v8665_v31 = vld [vmem:[%s13949_s5 + $0xa8] ss:$12 sps:$4 sm:$0xff]  }
 0xbc8   : > { %8196 = vmatpush3.bf16.msra.mxu1 %v3821_v24  ;;  %v11303_v16 = vpop.permute.xlu0 %3732 }
 0xbc9   : > { %v3719_v46 = vpop.permute.xlu1 %3718  ;;  %8197 = vmatprep.subr.bf16.mxu1 %v3848_v63  ;;  %v3838_v42 = vsel %vm844_vm13, %v3731_v41, %v11303_v16  ;;  %v8660_v41 = vld [vmem:[%s13949_s5 + $0x90] ss:$12 sps:$4 sm:$0xff]   ;;  %v8666_v63 = vld [vmem:[%s13949_s5 + $0x98] ss:$12 sps:$4 sm:$0xff]  }
 0xbca   : > { %3944 = vmatprep.subr.bf16.mxu0 %v3838_v42 }
 0xbcb   : > { %3945 = vmatpush1.bf16.msra.mxu0 %v3837_v29 }
 0xbcc   : > { %3946 = vmatprep.subr.bf16.mxu0 %v3841_v33  ;;  %8198 = vmatpush3.bf16.msra.mxu1 %v3824_v57  ;;  %v3783_v60 = vpop.permute.xlu0 %3782  ;;  %v8667_v57 = vld [vmem:[%s13949_s5 + $0xb0] ss:$12 sps:$4 sm:$0xff]  }
 0xbcd   : > { %v3765_v8 = vpop.permute.xlu1 %3764 }
 0xbce   : > { %v3851_v13 = vsel %vm844_vm13, %v3765_v8, %v11229_v48  ;;  %v3830_v48 = vsel %vm844_vm13, %v11274_v34, %v3711_v51 }
 0xbcf   : > { %3947 = vmatpush1.bf16.msra.mxu0 %v3840_v55  ;;  %8199 = vmatprep.subr.bf16.mxu1 %v3851_v13 }
 0xbd0   : > { %8200 = vmatpush3.bf16.msra.mxu1 %v3827_v10  ;;  %v3747_v50 = vpop.permute.xlu0 %3746 }
 0xbd1   : > { %v3791_v59 = vpop.permute.xlu1 %3790  ;;  %8201 = vmatprep.subr.bf16.mxu1 %v3854_v61  ;;  %v3844_v12 = vsel %vm844_vm13, %v3747_v50, %v3749_v11  ;;  %v3843_v53 = vsel %vm844_vm13, %v11269_v18, %v3747_v50  ;;  %v3833_v18 = vsel %vm844_vm13, %v3717_v26, %v3719_v46 }
 0xbd2   : > { %3948 = vmatprep.subr.bf16.mxu0 %v3844_v12 }
 0xbd3   : > { %3949 = vmatpush1.bf16.msra.mxu0 %v3843_v53 }
 0xbd4   : > { %3950 = vmatprep.subr.bf16.mxu0 %v3847_v36  ;;  %8202 = vmatpush3.bf16.msra.mxu1 %v3830_v48  ;;  %v3789_v22 = vpop.permute.xlu0 %3788 }
 0xbd5   : > { %v3781_v19 = vpop.permute.xlu1 %3780  ;;  %v3860_v34 = vsel %vm844_vm13, %v3789_v22, %v3791_v59  ;;  %v3859_v15 = vsel %vm844_vm13, %v11291_v6, %v3789_v22 }
 0xbd6   : > { %v3857_v58 = vsel %vm844_vm13, %v3781_v19, %v3783_v60  ;;  %v8704_v60 = vld [vmem:[#allocation2] sm:$0xff] }
 0xbd7   : > { %3951 = vmatpush1.bf16.msra.mxu0 %v3846_v17  ;;  %8203 = vmatprep.subr.bf16.mxu1 %v3857_v58 }
 0xbd8   : > { %8204 = vmatpush3.bf16.msra.mxu1 %v3833_v18  ;;  %v3763_v3 = vpop.permute.xlu0 %3762 }
 0xbd9   : > { %v3793_v27 = vpop.permute.xlu1 %3792  ;;  %8205 = vmatprep.subr.bf16.mxu1 %v3860_v34  ;;  %v3850_v35 = vsel %vm844_vm13, %v3763_v3, %v3765_v8  ;;  %v3849_v43 = vsel %vm844_vm13, %v11276_v28, %v3763_v3  ;;  %v4212_v8 = vpack.c.bf16 %v8704_v60, %v8704_v60 }
 0xbda   : > { %3952 = vmatprep.subr.bf16.mxu0 %v3850_v35 }
 0xbdb   : > { %3953 = vmatpush1.bf16.msra.mxu0 %v3849_v43  ;;  %4228 = vrot.lane.b32.xlu1 %v4212_v8, %s8718_s12 }
 0xbdc   : > { %3954 = vmatprep.subr.bf16.mxu0 %v3853_v45  ;;  %v3785_v5 = vpop.permute.xlu0 %3784  ;;  %4424 = vrot.lane.b32.xlu0 %v4212_v8, %s8725_s27 }
 0xbdd   : > { %v3797_v38 = vpop.permute.xlu1 %3796  ;;  %v3858_v9 = vsel %vm844_vm13, %v3785_v5, %v11291_v6 }
 0xbdf   : > { %3955 = vmatpush1.bf16.msra.mxu0 %v3852_v30  ;;  %4236 = vrot.lane.b32.xlu1 %v4212_v8, %s8718_s12 }
 0xbe0   : > { %v3779_v32 = vpop.permute.xlu0 %3778 }
 0xbe1   : > { %v3735_v7 = vpop.permute.xlu1 %3734  ;;  %v3856_v0 = vsel %vm844_vm13, %v3779_v32, %v3781_v19  ;;  %v3855_v28 = vsel %vm844_vm13, %v11282_v23, %v3779_v32 }
 0xbe2   : > { %3956 = vmatprep.subr.bf16.mxu0 %v3856_v0  ;;  %v3839_v25 = vsel %vm844_vm13, %v11303_v16, %v3735_v7 }
 0xbe3   : > { %3957 = vmatpush1.bf16.msra.mxu0 %v3855_v28  ;;  %4250 = vrot.lane.b32.xlu1 %v4212_v8, %s8719_s15 }
 0xbe4   : > { %3958 = vmatprep.subr.bf16.mxu0 %v3859_v15  ;;  %v3727_v56 = vpop.permute.xlu0 %3726 }
 0xbe5   : > { %v3836_v52 = vsel %vm844_vm13, %v11241_v4, %v3727_v56  ;;  %v3805_v21 = vpop.permute.xlu1 %3804  ;;  %v8663_v4 = vld [vmem:[%s13949_s5 + $0xac] ss:$12 sps:$4 sm:$0xff]  }
 0xbe6   : > { %8206 = vmatpush3.bf16.msra.mxu1 %v3836_v52 }
 0xbe7   : > { %3959 = vmatpush1.bf16.msra.mxu0 %v3858_v9  ;;  %4258 = vrot.lane.b32.xlu1 %v4212_v8, %s8719_s15 }
 0xbe8   : > { %v3795_v40 = vpop.permute.xlu0 %3794 }
 0xbe9   : > { %v3807_v44 = vpop.permute.xlu1 %3806  ;;  %v3862_v23 = vsel %vm844_vm13, %v3795_v40, %v3797_v38  ;;  %v3861_v62 = vsel %vm844_vm13, %v3793_v27, %v3795_v40  ;;  %v4134_v40 = vld [vmem:[#allocation2 + $0x8] sm:$0xff] }
 0xbea   : > { %3960 = vmatprep.subr.bf16.mxu0 %v3862_v23  ;;  %v3866_v20 = vsel %vm844_vm13, %v3805_v21, %v3807_v44 }
 0xbeb   : > { %3961 = vmatpush1.bf16.msra.mxu0 %v3861_v62  ;;  %4272 = vrot.lane.b32.xlu1 %v4212_v8, %s8720_s22 }
 0xbec   : > { %v3799_v49 = vpop.permute.xlu0 %3798 }
 0xbed   : > { %v3813_v26 = vpop.permute.xlu1 %3812  ;;  %v3863_v6 = vsel %vm844_vm13, %v3797_v38, %v3799_v49 }
 0xbee   : > { %8207 = vmatprep.subr.bf16.mxu1 %v3863_v6  ;;  %3963 = vmatmul.mubr.bf16.vlgmr.msra.gmra.mrb[40].mxu0 %v8660_v41  ;;  %v4142_v6 = vld [vmem:[#allocation2 + $0x58] sm:$0xff] }
 0xbef   : > { %8208 = vmatpush3.bf16.msra.mxu1 %v3839_v25  ;;  %3972 = vmatprep.mubr.bf16.mxu0 %v8663_v4 }
 0xbf0   : > { %8410 = vmatprep.subr.bf16.mxu1 %v3866_v20  ;;  %v3803_v37 = vpop.permute.xlu0 %3802  ;;  %4280 = vrot.lane.b32.xlu1 %v4212_v8, %s8720_s22 }
 0xbf1   : > { %v3815_v51 = vpop.permute.xlu1 %3814  ;;  %v3865_v11 = vsel %vm844_vm13, %v3803_v37, %v3805_v21 }
 0xbf2   : > { %3983 = vmatprep.subr.bf16.mxu0 %v3865_v11  ;;  %4069 = vmatmul.mubr.bf16.vlgmr.msra.gmra.mrb[40].mxu1 %v8660_v41  ;;  %v3869_v39 = vsel %vm844_vm13, %v3813_v26, %v3815_v51 }
 0xbf3   : > { %8411 = vmatpush3.bf16.msra.mxu1 %v3866_v20  ;;  %4076 = vmatprep.mubr.bf16.mxu1 %v8663_v4 }
 0xbf4   : > { %8412 = vmatprep.subr.bf16.mxu1 %v3869_v39  ;;  %v3801_v24 = vpop.permute.xlu0 %3800  ;;  %4432 = vrot.lane.b32.xlu1 %v4212_v8, %s8725_s27  ;;  %v4139_v8 = vld [vmem:[#allocation2 + $0x38] sm:$0xff] }
 0xbf5   : > { %v3864_v16 = vsel %vm844_vm13, %v3801_v24, %v3803_v37 }
 0xbf6   : > { %3984 = vmatpush1.bf16.msra.mxu0 %v3864_v16 }
 0xbf7   : > { %8413 = vmatpush3.bf16.msra.mxu1 %v3869_v39  ;;  %3973 = vmatmul.mubr.bf16.gmra.mrb[44].mxu0 %v8665_v31  ;;  %v4137_v39 = vld [vmem:[#allocation2 + $0x28] sm:$0xff] }
 0xbf8   : > { %v3811_v46 = vpop.permute.xlu0 %3810  ;;  %4015 = vmatprep.mubr.bf16.mxu0 %v8727_v47 }
 0xbf9   : > { %v3868_v42 = vsel %vm844_vm13, %v3811_v46, %v3813_v26  ;;  %v4135_v26 = vld [vmem:[#allocation2 + $0x10] sm:$0xff] }
 0xbfa   : > { %3985 = vmatprep.subr.bf16.mxu0 %v3868_v42  ;;  %4077 = vmatmul.mubr.bf16.gmra.mrb[44].mxu1 %v8665_v31  ;;  %v4136_v31 = vld [vmem:[#allocation2 + $0x18] sm:$0xff]  ;;  %v4138_v42 = vld [vmem:[#allocation2 + $0x30] sm:$0xff] }
 0xbfb   : > { %8414 = vmatprep.mubr.msk.bf16.mxu1 %vm953_vm0, %v8666_v63 }
 0xbfc   : > { %v3809_v29 = vpop.permute.xlu0 %3808 }
 0xbfd   : > { %v3867_v33 = vsel %vm844_vm13, %v3809_v29, %v3811_v46  ;;  %v4145_v29 = vld [vmem:[#allocation2 + $0x78] sm:$0xff] }
 0xbfe   : > { %3986 = vmatpush1.bf16.msra.mxu0 %v3867_v33 }
 0xc01   : > { %7969 = vmatmul.mubr.msk.bf16.vlgmr.msra.gmra.mrb[40].mxu0 %vm953_vm0, %v8666_v63 }
 0xc02   : > { %8415 = vmatmul.mubr.msk.bf16.vlgmr.msra.gmra.mrb[48].mxu1 %vm953_vm0, %v8667_v57  ;;  %4025 = vmatprep.mubr.bf16.mxu0 %v8727_v47  ;;  %v3630_v48 = vpop.permute.xlu1 %3629 }
 0xc06   : > { %v11396_v3 = vpop.permute.xlu1 %3639 }
 0xc09   : > { %7970 = vmatmul.mubr.msk.bf16.gmra.mrb[44].mxu0 %vm953_vm0, %v8667_v57 }
 0xc0d   : > { %v3625_v12 = vpop.permute.xlu0 %3624 }
 0xc11   : > { %v3635_v18 = vpop.permute.xlu0 %3634 }
 0xcc5   : > { %v8209_v55 = vpop.f32.mrb[40].mxu1 }
 0xcc6   : > { %v8210_v13 = vpop.f32.mrb[41].mxu1 }
 0xcc7   : > { %v8211_v10 = vadd.f32 %v8210_v13, %v8209_v55  ;;  %v8212_v50 = vpop.f32.mrb[42].mxu1 }
 0xcc8   : > { %v8213_v61 = vpop.f32.mrb[43].mxu1 }
 0xcc9   : > { %v8214_v59 = vadd.f32 %v8213_v61, %v8212_v50  ;;  %v4071_v5 = vadd.f32 %v8211_v10, %v3625_v12 }
 0xccb   : > { %v4074_v9 = vadd.f32 %v8214_v59, %v3630_v48 }
 0xccd   : > { %v8215_v53 = vpop.f32.mrb[44].mxu1 }
 0xcce   : > { %v8216_v36 = vpop.f32.mrb[45].mxu1 }
 0xccf   : > { %v8217_v22 = vadd.f32 %v8216_v36, %v8215_v53  ;;  %v8218_v19 = vpop.f32.mrb[46].mxu1 }
 0xcd0   : > { %v8219_v17 = vpop.f32.mrb[47].mxu1 }
 0xcd1   : > { %v8220_v58 = vadd.f32 %v8219_v17, %v8218_v19  ;;  %v4079_v27 = vadd.f32 %v8217_v22, %v3635_v18  ;;  %v4140_v19 = vld [vmem:[#allocation2 + $0x48] sm:$0xff] }
 0xcd3   : > { %v4082_v0 = vadd.f32 %v8220_v58, %v11396_v3 }
 0xcd4   : > { %v4017_v34 = vpop.f32.mrb[40].mxu0 }
 0xcd5   : > { %v8490_v35 = vadd.f32 %v4017_v34, %v3625_v12  ;;  %v4019_v43 = vpop.f32.mrb[41].mxu0  ;;  %v8416_v45 = vpop.f32.mrb[48].mxu1 }
 0xcd6   : > { %v8491_v38 = vadd.f32 %v4019_v43, %v3625_v12  ;;  %v4128_v30 = vadd.f32 %v8416_v45, %v4079_v27  ;;  %v4021_v32 = vpop.f32.mrb[42].mxu0  ;;  %v4119_v7 = vpop.f32.mrb[49].mxu1  ;;  %v4141_v27 = vld [vmem:[#allocation2 + $0x50] sm:$0xff]  ;;  %v4143_v43 = vld [vmem:[#allocation2 + $0x68] sm:$0xff] }
 0xcd7   : > { %v4146_v28 = vmul.f32 %v8490_v35, %v9393_v1  ;;  %v8492_v15 = vadd.f32 %v4021_v32, %v3630_v48  ;;  %v4120_v56 = vadd.f32 %v4119_v7, %v4071_v5  ;;  %v4023_v52 = vpop.f32.mrb[43].mxu0  ;;  %v8417_v21 = vpop.f32.mrb[50].mxu1 }
 0xcd8   : > { %v4147_v44 = vmul.f32 %v8491_v38, %v9401_v54  ;;  %v4154_v23 = vmul.f32 %v4128_v30, %v9397_v14  ;;  %v8493_v62 = vadd.f32 %v4023_v52, %v3630_v48  ;;  %v4131_v41 = vadd.f32 %v8417_v21, %v4082_v0  ;;  %v4122_v4 = vpop.f32.mrb[51].mxu1  ;;  %v4144_v38 = vld [vmem:[#allocation2 + $0x70] sm:$0xff]  ;;  %v11478_v21 = vpop.permute.xlu1 %4228 }
 0xcd9   : > { %v4158_v49 = vadd.f32 %v4146_v28, %v4134_v40  ;;  %v4149_v25 = vmul.f32 %v8492_v15, %v9393_v1  ;;  %v4148_v20 = vmul.f32 %v4120_v56, %v9397_v14  ;;  %v4123_v37 = vadd.f32 %v4122_v4, %v4074_v9  ;;  %v11516_v4 = vpop.permute.xlu0 %4424 }
 0xcda   : > { %v4159_v51 = vadd.f32 %v4147_v44, %v4135_v26  ;;  %v4166_v11 = vadd.f32 %v4154_v23, %v4142_v6  ;;  %v4150_v24 = vmul.f32 %v8493_v62, %v9401_v54  ;;  %v4157_v16 = vmul.f32 %v4131_v41, %v9397_v14 }
 0xcdb   : > { %4170 = vst [vmem:[#allocation2 + $0x8] sm:$0xff] %v4158_v49  ;;  %v4161_v63 = vadd.f32 %v4149_v25, %v4137_v39  ;;  %v4160_v46 = vadd.f32 %v4148_v20, %v4136_v31  ;;  %v4151_v33 = vmul.f32 %v4123_v37, %v9397_v14 }
 0xcdc   : > { %4171 = vst [vmem:[#allocation2 + $0x10] sm:$0xff] %v4159_v51  ;;  %4178 = vst.msk [vmem:[#allocation2 + $0x58] sm:$0xff] %vm953_vm0, %v4166_v11  ;;  %v4162_v57 = vadd.f32 %v4150_v24, %v4138_v42  ;;  %v4169_v60 = vadd.f32 %v4157_v16, %v4145_v29  ;;  %v4027_v55 = vpop.f32.mrb[44].mxu0  ;;  %v11483_v9 = vpop.permute.xlu1 %4236 }
 0xcdd   : > { %4173 = vst [vmem:[#allocation2 + $0x28] sm:$0xff] %v4161_v63  ;;  %4172 = vst.msk [vmem:[#allocation2 + $0x18] sm:$0xff] %vm953_vm0, %v4160_v46  ;;  %v4163_v13 = vadd.f32 %v4151_v33, %v4139_v8  ;;  %v8494_v10 = vadd.f32 %v4027_v55, %v3635_v18  ;;  %v4029_v50 = vpop.f32.mrb[45].mxu0  ;;  %v11409_v61 = vpack.c.bf16 %v4161_v63, %v4158_v49 }
 0xcde   : > { %4174 = vst [vmem:[#allocation2 + $0x30] sm:$0xff] %v4162_v57  ;;  %4181 = vst.msk [vmem:[#allocation2 + $0x78] sm:$0xff] %vm953_vm0, %v4169_v60  ;;  %v8495_v59 = vadd.f32 %v4029_v50, %v3635_v18  ;;  %v4031_v12 = vpop.f32.mrb[46].mxu0  ;;  %v11412_v53 = vpack.c.bf16 %v4162_v57, %v4159_v51 }
 0xcdf   : > { %4175 = vst.msk [vmem:[#allocation2 + $0x38] sm:$0xff] %vm953_vm0, %v4163_v13  ;;  %v4152_v48 = vmul.f32 %v8494_v10, %v9393_v1  ;;  %v8496_v36 = vadd.f32 %v4031_v12, %v11396_v3  ;;  %v4033_v22 = vpop.f32.mrb[47].mxu0 }
 0xce0   : > { %v4153_v17 = vmul.f32 %v8495_v59, %v9401_v54  ;;  %v8497_v58 = vadd.f32 %v4033_v22, %v11396_v3  ;;  %v11489_v40 = vpop.permute.xlu1 %4250 }
 0xce1   : > { %v4164_v34 = vadd.f32 %v4152_v48, %v4140_v19  ;;  %v4155_v35 = vmul.f32 %v8496_v36, %v9393_v1 }
 0xce2   : > { %v4165_v18 = vadd.f32 %v4153_v17, %v4141_v27  ;;  %v4156_v45 = vmul.f32 %v8497_v58, %v9401_v54 }
 0xce3   : > { %4176 = vst [vmem:[#allocation2 + $0x48] sm:$0xff] %v4164_v34  ;;  %v4167_v5 = vadd.f32 %v4155_v35, %v4143_v43  ;;  %v4207_v32 = vld [vmem:[#allocation2 + $0x58] sm:$0xff] }
 0xce4   : > { %4177 = vst [vmem:[#allocation2 + $0x50] sm:$0xff] %v4165_v18  ;;  %v4168_v30 = vadd.f32 %v4156_v45, %v4144_v38  ;;  %v4199_v56 = vld [vmem:[#allocation2 + $0x18] sm:$0xff]  ;;  %v11494_v44 = vpop.permute.xlu1 %4258 }
 0xce5   : > { %4179 = vst [vmem:[#allocation2 + $0x68] sm:$0xff] %v4167_v5  ;;  %v4211_v7 = vld [vmem:[#allocation2 + $0x78] sm:$0xff]  ;;  %v4217_v0 = vpack.c.bf16 %v4167_v5, %v4164_v34 }
 0xce6   : > { %4180 = vst [vmem:[#allocation2 + $0x70] sm:$0xff] %v4168_v30  ;;  %v4219_v28 = vpack.c.bf16 %v4211_v7, %v4207_v32  ;;  %v11421_v3 = vpack.c.bf16 %v4168_v30, %v4165_v18  ;;  %v4203_v15 = vld [vmem:[#allocation2 + $0x38] sm:$0xff] }
 0xce7   : > { %v4215_v52 = vpack.c.bf16 %v4203_v15, %v4199_v56 }
 0xce8   : > { %4304 = vrot.lane.b32.xlu1 %v4219_v28, %s8721_s23  ;;  %4242 = vrot.lane.b32.xlu0 %v4219_v28, %s8718_s12  ;;  %v11504_v23 = vpop.permute.xlu1 %4272 }
 0xcec   : > { %4320 = vrot.lane.b32.xlu1 %v4219_v28, %s8722_s24  ;;  %4264 = vrot.lane.b32.xlu0 %v4219_v28, %s8719_s15  ;;  %v11508_v62 = vpop.permute.xlu1 %4280 }
 0xcf0   : > { %4336 = vrot.lane.b32.xlu1 %v4219_v28, %s8723_s25  ;;  %4286 = vrot.lane.b32.xlu0 %v4219_v28, %s8720_s22  ;;  %v11514_v41 = vpop.permute.xlu1 %4432 }
 0xcf4   : > { %4352 = vrot.lane.b32.xlu1 %v4219_v28, %s8724_s26  ;;  %4234 = vrot.lane.b32.xlu0 %v4215_v52, %s8718_s12 }
 0xcf8   : > { %4368 = vrot.lane.b32.xlu1 %v4219_v28, %s8726_s28  ;;  %4256 = vrot.lane.b32.xlu0 %v4215_v52, %s8719_s15 }
 0xcfc   : > { %4438 = vrot.lane.b32.xlu1 %v4219_v28, %s8725_s27  ;;  %4278 = vrot.lane.b32.xlu0 %v4215_v52, %s8720_s22 }
 0xd00   : > { %4362 = vrot.lane.b32.xlu1 %v4215_v52, %s8726_s28  ;;  %4298 = vrot.lane.b32.xlu0 %v4215_v52, %s8721_s23 }
 0xd04   : > { %4426 = vrot.lane.b32.xlu1 %v11409_v61, %s8725_s27  ;;  %4314 = vrot.lane.b32.xlu0 %v4215_v52, %s8722_s24 }
 0xd08   : > { %4358 = vrot.lane.b32.xlu1 %v11409_v61, %s8726_s28  ;;  %4330 = vrot.lane.b32.xlu0 %v4215_v52, %s8723_s25 }
 0xd0c   : > { %4232 = vrot.lane.b32.xlu1 %v11412_v53, %s8718_s12  ;;  %4346 = vrot.lane.b32.xlu0 %v4215_v52, %s8724_s26 }
 0xd10   : > { %4254 = vrot.lane.b32.xlu1 %v11412_v53, %s8719_s15  ;;  %4430 = vrot.lane.b32.xlu0 %v4215_v52, %s8725_s27 }
 0xd14   : > { %4276 = vrot.lane.b32.xlu1 %v11412_v53, %s8720_s22  ;;  %4230 = vrot.lane.b32.xlu0 %v11409_v61, %s8718_s12 }
 0xd18   : > { %4296 = vrot.lane.b32.xlu1 %v11412_v53, %s8721_s23  ;;  %4252 = vrot.lane.b32.xlu0 %v11409_v61, %s8719_s15 }
 0xd1c   : > { %4312 = vrot.lane.b32.xlu1 %v11412_v53, %s8722_s24  ;;  %4274 = vrot.lane.b32.xlu0 %v11409_v61, %s8720_s22 }
 0xd20   : > { %4328 = vrot.lane.b32.xlu1 %v11412_v53, %s8723_s25  ;;  %4294 = vrot.lane.b32.xlu0 %v11409_v61, %s8721_s23 }
 0xd24   : > { %4344 = vrot.lane.b32.xlu1 %v11412_v53, %s8724_s26  ;;  %4310 = vrot.lane.b32.xlu0 %v11409_v61, %s8722_s24 }
 0xd28   : > { %4300 = vrot.lane.b32.xlu1 %v4217_v0, %s8721_s23  ;;  %4326 = vrot.lane.b32.xlu0 %v11409_v61, %s8723_s25 }
 0xd2c   : > { %4316 = vrot.lane.b32.xlu1 %v4217_v0, %s8722_s24  ;;  %4342 = vrot.lane.b32.xlu0 %v11409_v61, %s8724_s26 }
 0xd30   : > { %4332 = vrot.lane.b32.xlu1 %v4217_v0, %s8723_s25  ;;  %4428 = vrot.lane.b32.xlu0 %v11412_v53, %s8725_s27 }
 0xd34   : > { %4348 = vrot.lane.b32.xlu1 %v4217_v0, %s8724_s26  ;;  %4360 = vrot.lane.b32.xlu0 %v11412_v53, %s8726_s28 }
 0xd38   : > { %4434 = vrot.lane.b32.xlu1 %v4217_v0, %s8725_s27  ;;  %4238 = vrot.lane.b32.xlu0 %v4217_v0, %s8718_s12 }
 0xd3c   : > { %4364 = vrot.lane.b32.xlu1 %v4217_v0, %s8726_s28  ;;  %4260 = vrot.lane.b32.xlu0 %v4217_v0, %s8719_s15 }
 0xd40   : > { %4240 = vrot.lane.b32.xlu1 %v11421_v3, %s8718_s12  ;;  %4282 = vrot.lane.b32.xlu0 %v4217_v0, %s8720_s22 }
 0xd44   : > { %4262 = vrot.lane.b32.xlu1 %v11421_v3, %s8719_s15  ;;  %4302 = vrot.lane.b32.xlu0 %v11421_v3, %s8721_s23 }
 0xd48   : > { %4284 = vrot.lane.b32.xlu1 %v11421_v3, %s8720_s22  ;;  %4318 = vrot.lane.b32.xlu0 %v11421_v3, %s8722_s24 }
 0xd4c   : > { %4334 = vrot.lane.b32.xlu0 %v11421_v3, %s8723_s25 }
 0xd50   : > { %4350 = vrot.lane.b32.xlu0 %v11421_v3, %s8724_s26 }
 0xd54   : > { %4436 = vrot.lane.b32.xlu0 %v11421_v3, %s8725_s27 }
 0xd58   : > { %4366 = vrot.lane.b32.xlu0 %v11421_v3, %s8726_s28 }
 0xd5a   : > { %v11520_v49 = vpop.permute.xlu1 %4304  ;;  %v11522_v26 = vpop.permute.xlu0 %4242 }
 0xd5b   : > { %4454 = vrot.lane.b32.xlu1 %v11522_v26, %s8725_s27 }
 0xd5c   : > { %4502 = vrot.lane.b32.xlu0 %v11520_v49, %s8725_s27 }
 0xd5e   : > { %v11528_v6 = vpop.permute.xlu1 %4320  ;;  %v11530_v25 = vpop.permute.xlu0 %4264 }
 0xd60   : > { %4518 = vrot.lane.b32.xlu0 %v11528_v6, %s8725_s27 }
 0xd62   : > { %v11534_v20 = vpop.permute.xlu1 %4336  ;;  %v11536_v37 = vpop.permute.xlu0 %4286 }
 0xd66   : > { %v11538_v51 = vpop.permute.xlu1 %4352  ;;  %v4235_v11 = vpop.permute.xlu0 %4234 }
 0xd67   : > { %4446 = vrot.lane.b32.xlu0 %v4235_v11, %s8725_s27 }
 0xd6a   : > { %v11541_v39 = vpop.permute.xlu1 %4368  ;;  %v11543_v31 = vpop.permute.xlu0 %4256 }
 0xd6e   : > { %v11545_v24 = vpop.permute.xlu1 %4438  ;;  %v11547_v16 = vpop.permute.xlu0 %4278 }
 0xd72   : > { %v11549_v63 = vpop.permute.xlu1 %4362  ;;  %v4299_v46 = vpop.permute.xlu0 %4298 }
 0xd73   : > { %4494 = vrot.lane.b32.xlu1 %v4299_v46, %s8725_s27 }
 0xd76   : > { %v4427_v42 = vpop.permute.xlu1 %4426  ;;  %v11552_v29 = vpop.permute.xlu0 %4314 }
 0xd77   : > { %4510 = vrot.lane.b32.xlu1 %v11552_v29, %s8725_s27  ;;  %v4568_v15 = vsel %vm844_vm13, %v11516_v4, %v4427_v42 }
 0xd7a   : > { %v11556_v33 = vpop.permute.xlu1 %4358  ;;  %v11558_v57 = vpop.permute.xlu0 %4330 }
 0xd7e   : > { %v4233_v60 = vpop.permute.xlu1 %4232  ;;  %v11560_v8 = vpop.permute.xlu0 %4346 }
 0xd7f   : > { %v4246_v55 = vsel %vm512_vm5, %v4233_v60, %v4235_v11 }
 0xd80   : > { %4444 = vrot.lane.b32.xlu1 %v4246_v55, %s8725_s27 }
 0xd82   : > { %v4255_v13 = vpop.permute.xlu1 %4254  ;;  %v11564_v10 = vpop.permute.xlu0 %4430 }
 0xd83   : > { %v4268_v11 = vsel %vm535_vm9, %v4255_v13, %v11543_v31 }
 0xd86   : > { %v4277_v50 = vpop.permute.xlu1 %4276  ;;  %v4231_v61 = vpop.permute.xlu0 %4230 }
 0xd87   : > { %v4290_v22 = vsel %vm419_vm8, %v4277_v50, %v11547_v16  ;;  %v4244_v45 = vsel %vm512_vm5, %v11478_v21, %v4231_v61  ;;  %v4245_v21 = vsel %vm512_vm5, %v4231_v61, %v4233_v60 }
 0xd8a   : > { %v4297_v59 = vpop.permute.xlu1 %4296  ;;  %v4253_v12 = vpop.permute.xlu0 %4252 }
 0xd8b   : > { %v4267_v53 = vsel %vm535_vm9, %v4253_v12, %v4255_v13  ;;  %v4307_v58 = vsel %vm577_vm10, %v4297_v59, %v4299_v46  ;;  %v4266_v32 = vsel %vm535_vm9, %v11489_v40, %v4253_v12 }
 0xd8c   : > { %4458 = vrot.lane.b32.xlu1 %v4267_v53, %s8725_s27 }
 0xd8e   : > { %v4313_v48 = vpop.permute.xlu1 %4312  ;;  %v4275_v36 = vpop.permute.xlu0 %4274 }
 0xd8f   : > { %v4288_v28 = vsel %vm419_vm8, %v11504_v23, %v4275_v36  ;;  %v4289_v4 = vsel %vm419_vm8, %v4275_v36, %v4277_v50  ;;  %v4323_v50 = vsel %vm594_vm11, %v4313_v48, %v11552_v29 }
 0xd90   : > { %4476 = vrot.lane.b32.xlu1 %v4290_v22, %s8725_s27 }
 0xd92   : > { %v4329_v19 = vpop.permute.xlu1 %4328  ;;  %v4295_v17 = vpop.permute.xlu0 %4294 }
 0xd93   : > { %4488 = vrot.lane.b32.xlu0 %v4295_v17, %s8725_s27  ;;  %v4306_v61 = vsel %vm577_vm10, %v4295_v17, %v4297_v59  ;;  %v4339_v59 = vsel %vm611_vm12, %v4329_v19, %v11558_v57 }
 0xd94   : > { %4492 = vrot.lane.b32.xlu1 %v4307_v58, %s8725_s27 }
 0xd96   : > { %v11574_v34 = vpop.permute.xlu1 %4344  ;;  %v4311_v27 = vpop.permute.xlu0 %4310 }
 0xd97   : > { %4504 = vrot.lane.b32.xlu0 %v4311_v27, %s8725_s27  ;;  %v4322_v35 = vsel %vm594_vm11, %v4311_v27, %v4313_v48 }
 0xd98   : > { %4506 = vrot.lane.b32.xlu1 %v4322_v35, %s8725_s27 }
 0xd9a   : > { %v11579_v18 = vpop.permute.xlu1 %4300  ;;  %v4327_v43 = vpop.permute.xlu0 %4326 }
 0xd9b   : > { %4440 = vrot.lane.b32.xlu0 %v4244_v45, %s8725_s27  ;;  %v4338_v5 = vsel %vm611_vm12, %v4327_v43, %v4329_v19 }
 0xd9c   : > { %4522 = vrot.lane.b32.xlu1 %v4338_v5, %s8725_s27 }
 0xd9e   : > { %v11586_v38 = vpop.permute.xlu1 %4316  ;;  %v11588_v30 = vpop.permute.xlu0 %4342 }
 0xd9f   : > { %4456 = vrot.lane.b32.xlu0 %v4266_v32, %s8725_s27 }
 0xda0   : > { %4496 = vrot.lane.b32.xlu1 %v11579_v18, %s8725_s27 }
 0xda2   : > { %v11595_v7 = vpop.permute.xlu1 %4332  ;;  %v11597_v0 = vpop.permute.xlu0 %4428 }
 0xda3   : > { %4472 = vrot.lane.b32.xlu0 %v4288_v28, %s8725_s27  ;;  %v4569_v3 = vsel %vm844_vm13, %v4427_v42, %v11597_v0 }
 0xda4   : > { %4512 = vrot.lane.b32.xlu1 %v11586_v38, %s8725_s27  ;;  %4682 = vmatprep.subr.bf16.mxu1 %v4569_v3 }
 0xda5   : > { %4683 = vmatpush1.bf16.msra.mxu1 %v4568_v15 }
 0xda6   : > { %v11608_v56 = vpop.permute.xlu1 %4348  ;;  %v11610_v52 = vpop.permute.xlu0 %4360 }
 0xda7   : > { %4442 = vrot.lane.b32.xlu0 %v4245_v21, %s8725_s27  ;;  %v4370_v15 = vsel %vm645_vm15, %v11556_v33, %v11610_v52 }
 0xdaa   : > { %v4435_v40 = vpop.permute.xlu1 %4434  ;;  %v4239_v23 = vpop.permute.xlu0 %4238 }
 0xdab   : > { %4460 = vrot.lane.b32.xlu0 %v4268_v11, %s8725_s27  ;;  %v4247_v29 = vsel %vm512_vm5, %v11483_v9, %v4239_v23  ;;  %v4940_v11 = vld [vmem:[#allocation3 + $0x20] sm:$0xff] }
 0xdae   : > { %v11617_v46 = vpop.permute.xlu1 %4364  ;;  %v4261_v55 = vpop.permute.xlu0 %4260 }
 0xdaf   : > { %4474 = vrot.lane.b32.xlu0 %v4289_v4, %s8725_s27  ;;  %v4269_v42 = vsel %vm535_vm9, %v11494_v44, %v4261_v55  ;;  %v4948_v4 = vld [vmem:[#allocation3 + $0x60] sm:$0xff] }
 0xdb0   : > { %4464 = vrot.lane.b32.xlu1 %v4269_v42, %s8725_s27 }
 0xdb2   : > { %v4283_v60 = vpop.permute.xlu0 %4282  ;;  %v4241_v12 = vpop.permute.xlu1 %4240 }
 0xdb3   : > { %4490 = vrot.lane.b32.xlu0 %v4306_v61, %s8725_s27  ;;  %v4291_v13 = vsel %vm419_vm8, %v11508_v62, %v4283_v60  ;;  %v4248_v44 = vsel %vm512_vm5, %v4239_v23, %v4241_v12  ;;  %v4249_v19 = vsel %vm512_vm5, %v4241_v12, %v11522_v26  ;;  %v4571_v26 = vsel %vm844_vm13, %v11514_v41, %v4435_v40  ;;  %v4936_v23 = vld [vmem:[#allocation3] sm:$0xff] }
 0xdb4   : > { %4480 = vrot.lane.b32.xlu1 %v4291_v13, %s8725_s27  ;;  %v4570_v13 = vsel %vm844_vm13, %v11597_v0, %v11564_v10  ;;  %v7981_v12 = vld [vmem:[%s13950_s6 + $0x80] sm:$0xff] }
 0xdb6   : > { %v4303_v53 = vpop.permute.xlu0 %4302  ;;  %v4263_v62 = vpop.permute.xlu1 %4262 }
 0xdb7   : > { %4508 = vrot.lane.b32.xlu0 %v4323_v50, %s8725_s27  ;;  %v4270_v48 = vsel %vm535_vm9, %v4261_v55, %v4263_v62  ;;  %v4271_v35 = vsel %vm535_vm9, %v4263_v62, %v11530_v25  ;;  %v4309_v45 = vsel %vm577_vm10, %v4303_v53, %v11520_v49  ;;  %v4308_v49 = vsel %vm577_vm10, %v11579_v18, %v4303_v53  ;;  %v8670_v18 = vld [vmem:[%s13949_s5 + $0xc4] ss:$12 sps:$4 sm:$0xff]  }
 0xdb8   : > { %4450 = vrot.lane.b32.xlu1 %v4248_v44, %s8725_s27  ;;  %4714 = vmatprep.mubr.bf16.mxu1 %v8670_v18  ;;  %v7983_v44 = vld [vmem:[%s13950_s6 + $0x90] sm:$0xff] }
 0xdb9   : > { %4820 = vmatprep.mubr.bf16.mxu0 %v8670_v18 }
 0xdba   : > { %v4319_v36 = vpop.permute.xlu0 %4318  ;;  %v4285_v58 = vpop.permute.xlu1 %4284 }
 0xdbb   : > { %4524 = vrot.lane.b32.xlu0 %v4339_v59, %s8725_s27  ;;  %v4292_v9 = vsel %vm419_vm8, %v4283_v60, %v4285_v58  ;;  %v4293_v41 = vsel %vm419_vm8, %v4285_v58, %v11536_v37  ;;  %v4325_v5 = vsel %vm594_vm11, %v4319_v36, %v11528_v6  ;;  %v4324_v6 = vsel %vm594_vm11, %v11586_v38, %v4319_v36 }
 0xdbc   : > { %4526 = vrot.lane.b32.xlu1 %v11558_v57, %s8725_s27  ;;  %v4371_v38 = vsel %vm645_vm15, %v11610_v52, %v11549_v63  ;;  %v7984_v52 = vld [vmem:[%s13950_s6 + $0x98] sm:$0xff]  ;;  %v4952_v60 = vpack.c.bf16 %v4940_v11, %v4936_v23 }
 0xdbe   : > { %v4335_v22 = vpop.permute.xlu0 %4334 }
 0xdbf   : > { %4448 = vrot.lane.b32.xlu0 %v4247_v29, %s8725_s27 }
 0xdc0   : > { %4466 = vrot.lane.b32.xlu1 %v4270_v48, %s8725_s27 }
 0xdc2   : > { %v4351_v17 = vpop.permute.xlu0 %4350 }
 0xdc3   : > { %4452 = vrot.lane.b32.xlu0 %v4249_v19, %s8725_s27 }
 0xdc4   : > { %4528 = vrot.lane.b32.xlu1 %v11595_v7, %s8725_s27 }
 0xdc6   : > { %v11649_v57 = vpop.permute.xlu0 %4436 }
 0xdc7   : > { %4520 = vrot.lane.b32.xlu0 %v4327_v43, %s8725_s27  ;;  %v4572_v27 = vsel %vm844_vm13, %v4435_v40, %v11649_v57  ;;  %v4354_v43 = vsel %vm628_vm14, %v11588_v30, %v11574_v34  ;;  %v4573_v11 = vsel %vm844_vm13, %v11649_v57, %v11545_v24 }
 0xdc8   : > { %4482 = vrot.lane.b32.xlu1 %v4292_v9, %s8725_s27  ;;  %4684 = vmatprep.subr.bf16.mxu1 %v4572_v27 }
 0xdc9   : > { %4685 = vmatpush1.bf16.msra.mxu1 %v4571_v26 }
 0xdca   : > { %v4367_v32 = vpop.permute.xlu0 %4366 }
 0xdcb   : > { %4468 = vrot.lane.b32.xlu0 %v4271_v35, %s8725_s27 }
 0xdcc   : > { %4538 = vrot.lane.b32.xlu1 %v4354_v43, %s8725_s27 }
 0xdce   : > { %v11725_v28 = vpop.permute.xlu0 %4502 }
 0xdcf   : > { %4462 = vrot.lane.b32.xlu0 %v11543_v31, %s8725_s27  ;;  %v4341_v31 = vsel %vm611_vm12, %v4335_v22, %v11534_v20 }
 0xdd0   : > { %4500 = vrot.lane.b32.xlu1 %v4309_v45, %s8725_s27 }
 0xdd3   : > { %4484 = vrot.lane.b32.xlu0 %v4293_v41, %s8725_s27 }
 0xdd4   : > { %4470 = vrot.lane.b32.xlu1 %v11530_v25, %s8725_s27  ;;  %v4355_v25 = vsel %vm628_vm14, %v11574_v34, %v11560_v8  ;;  %v11705_v34 = vpop.permute.xlu1 %4454 }
 0xdd7   : > { %4534 = vrot.lane.b32.xlu0 %v11534_v20, %s8725_s27  ;;  %v4340_v20 = vsel %vm611_vm12, %v11595_v7, %v4335_v22 }
 0xdd8   : > { %4516 = vrot.lane.b32.xlu1 %v4325_v5, %s8725_s27 }
 0xddb   : > { %4498 = vrot.lane.b32.xlu0 %v4308_v49, %s8725_s27 }
 0xddc   : > { %4542 = vrot.lane.b32.xlu1 %v11560_v8, %s8725_s27  ;;  %v4357_v8 = vsel %vm628_vm14, %v4351_v17, %v11538_v51 }
 0xddf   : > { %4540 = vrot.lane.b32.xlu0 %v4355_v25, %s8725_s27 }
 0xde0   : > { %4532 = vrot.lane.b32.xlu1 %v4341_v31, %s8725_s27 }
 0xde3   : > { %4514 = vrot.lane.b32.xlu0 %v4324_v6, %s8725_s27 }
 0xde4   : > { %4544 = vrot.lane.b32.xlu1 %v11608_v56, %s8725_s27 }
 0xde7   : > { %4536 = vrot.lane.b32.xlu0 %v11588_v30, %s8725_s27  ;;  %v4495_v30 = vpop.permute.xlu1 %4494 }
 0xde8   : > { %4548 = vrot.lane.b32.xlu1 %v4357_v8, %s8725_s27 }
 0xdeb   : > { %4530 = vrot.lane.b32.xlu0 %v4340_v20, %s8725_s27  ;;  %v11723_v7 = vpop.permute.xlu1 %4510 }
 0xdec   : > { %4486 = vrot.lane.b32.xlu1 %v11536_v37, %s8725_s27  ;;  %v4356_v37 = vsel %vm628_vm14, %v11608_v56, %v4351_v17 }
 0xdef   : > { %4478 = vrot.lane.b32.xlu0 %v11547_v16, %s8725_s27  ;;  %v4373_v16 = vsel %vm645_vm15, %v4367_v32, %v11541_v39 }
 0xdf0   : > { %4556 = vrot.lane.b32.xlu1 %v4371_v38, %s8725_s27 }
 0xdf2   : > { %v11732_v3 = vpop.permute.xlu1 %4444 }
 0xdf3   : > { %4546 = vrot.lane.b32.xlu0 %v4356_v37, %s8725_s27 }
 0xdf4   : > { %4558 = vrot.lane.b32.xlu1 %v11549_v63, %s8725_s27  ;;  %v11740_v63 = vpop.permute.xlu0 %4518 }
 0xdf7   : > { %4550 = vrot.lane.b32.xlu0 %v11538_v51, %s8725_s27  ;;  %v7982_v51 = vld [vmem:[%s13950_s6 + $0x88] sm:$0xff] }
 0xdf8   : > { %4564 = vrot.lane.b32.xlu1 %v4373_v16, %s8725_s27  ;;  %v11749_v21 = vpop.permute.xlu0 %4446 }
 0xdf9   : > { %v4576_v24 = vsel %vm844_vm13, %v11732_v3, %v11749_v21 }
 0xdfb   : > { %4554 = vrot.lane.b32.xlu0 %v4370_v15, %s8725_s27 }
 0xdfc   : > { %4566 = vrot.lane.b32.xlu1 %v11541_v39, %s8725_s27  ;;  %v4372_v39 = vsel %vm645_vm15, %v11617_v46, %v4367_v32 }
 0xdfe   : > { %v11745_v56 = vpop.permute.xlu1 %4458 }
 0xdff   : > { %4552 = vrot.lane.b32.xlu0 %v11556_v33, %s8725_s27  ;;  %v4944_v33 = vld [vmem:[#allocation3 + $0x40] sm:$0xff] }
 0xe00   : > { %4381 = vperm.xlu1 %8625, %v7982_v51   ;;  %v4956_v53 = vpack.c.bf16 %v4948_v4, %v4944_v33 }
 0xe02   : > { %v11754_v40 = vpop.permute.xlu1 %4476 }
 0xe03   : > { %4562 = vrot.lane.b32.xlu0 %v4372_v39, %s8725_s27 }
 0xe04   : > { %4391 = vperm.xlu1 %8625, %v7984_v52  }
 0xe05   : > { %v11759_v55 = vpop.permute.xlu0 %4488 }
 0xe06   : > { %v11761_v42 = vpop.permute.xlu1 %4492 }
 0xe07   : > { %4560 = vrot.lane.b32.xlu0 %v11617_v46, %s8725_s27  ;;  %v4594_v61 = vsel %vm844_vm13, %v11761_v42, %v4495_v30 }
 0xe08   : > { %8225 = vmatprep.subr.bf16.mxu0 %v4594_v61  ;;  %4968 = vrot.lane.b32.xlu1 %v4952_v60, %s8718_s12 }
 0xe09   : > { %8226 = vmatpush3.bf16.msra.mxu0 %v4570_v13  ;;  %v11774_v50 = vpop.permute.xlu0 %4504 }
 0xe0a   : > { %v11776_v46 = vpop.permute.xlu1 %4506 }
 0xe0b   : > { %4376 = vperm.xlu0 %8626, %v7981_v12  }
 0xe0c   : > { %4976 = vrot.lane.b32.xlu1 %v4956_v53, %s8718_s12 }
 0xe0d   : > { %v4441_v36 = vpop.permute.xlu0 %4440 }
 0xe0e   : > { %v11783_v0 = vpop.permute.xlu1 %4522 }
 0xe0f   : > { %4386 = vperm.xlu0 %8626, %v7983_v44  }
 0xe10   : > { %4990 = vrot.lane.b32.xlu1 %v4952_v60, %s8719_s15 }
 0xe11   : > { %v4457_v10 = vpop.permute.xlu0 %4456 }
 0xe12   : > { %v11787_v62 = vpop.permute.xlu1 %4496  ;;  %v4580_v30 = vsel %vm844_vm13, %v4457_v10, %v11745_v56 }
 0xe13   : > { %5164 = vrot.lane.b32.xlu0 %v4952_v60, %s8725_s27 }
 0xe14   : > { %4998 = vrot.lane.b32.xlu1 %v4956_v53, %s8719_s15 }
 0xe15   : > { %v4473_v59 = vpop.permute.xlu0 %4472 }
 0xe16   : > { %v11796_v19 = vpop.permute.xlu1 %4512 }
 0xe18   : > { %5012 = vrot.lane.b32.xlu1 %v4952_v60, %s8720_s22 }
 0xe19   : > { %v4443_v22 = vpop.permute.xlu0 %4442 }
 0xe1a   : > { %v4575_v29 = vsel %vm844_vm13, %v4443_v22, %v11732_v3  ;;  %v4574_v48 = vsel %vm844_vm13, %v4441_v36, %v4443_v22  ;;  %v4598_v22 = vsel %vm844_vm13, %v11774_v50, %v11776_v46 }
 0xe1b   : > { %4686 = vmatprep.subr.bf16.mxu1 %v4575_v29 }
 0xe1c   : > { %4687 = vmatpush1.bf16.msra.mxu1 %v4574_v48  ;;  %5020 = vrot.lane.b32.xlu1 %v4956_v53, %s8720_s22 }
 0xe1d   : > { %v11794_v17 = vpop.permute.xlu0 %4460 }
 0xe1e   : > { %v4581_v20 = vsel %vm844_vm13, %v11745_v56, %v11794_v17 }
 0xe20   : > { %5172 = vrot.lane.b32.xlu1 %v4956_v53, %s8725_s27 }
 0xe21   : > { %v4475_v58 = vpop.permute.xlu0 %4474 }
 0xe22   : > { %v4465_v9 = vpop.permute.xlu1 %4464  ;;  %v4587_v51 = vsel %vm844_vm13, %v4475_v58, %v11754_v40  ;;  %v4586_v23 = vsel %vm844_vm13, %v4473_v59, %v4475_v58 }
 0xe25   : > { %v4491_v27 = vpop.permute.xlu0 %4490 }
 0xe26   : > { %v4481_v26 = vpop.permute.xlu1 %4480  ;;  %v4593_v13 = vsel %vm844_vm13, %v4491_v27, %v11761_v42  ;;  %v4592_v12 = vsel %vm844_vm13, %v11759_v55, %v4491_v27 }
 0xe29   : > { %v11799_v35 = vpop.permute.xlu0 %4508 }
 0xe2a   : > { %v4451_v43 = vpop.permute.xlu1 %4450  ;;  %v4600_v4 = vsel %vm844_vm13, %v11799_v35, %v11723_v7 }
 0xe2d   : > { %v11801_v45 = vpop.permute.xlu0 %4524 }
 0xe2e   : > { %v4527_v41 = vpop.permute.xlu1 %4526  ;;  %v4605_v50 = vsel %vm844_vm13, %v11783_v0, %v11801_v45 }
 0xe2f   : > { %v4606_v3 = vsel %vm844_vm13, %v11801_v45, %v4527_v41 }
 0xe31   : > { %v4449_v5 = vpop.permute.xlu0 %4448 }
 0xe32   : > { %v4467_v49 = vpop.permute.xlu1 %4466  ;;  %v4577_v8 = vsel %vm844_vm13, %v4449_v5, %v4451_v43 }
 0xe33   : > { %v4583_v15 = vsel %vm844_vm13, %v4465_v9, %v4467_v49 }
 0xe35   : > { %v4453_v25 = vpop.permute.xlu0 %4452 }
 0xe36   : > { %v11803_v31 = vpop.permute.xlu1 %4528  ;;  %v4578_v6 = vsel %vm844_vm13, %v4451_v43, %v4453_v25  ;;  %v4579_v44 = vsel %vm844_vm13, %v4453_v25, %v11705_v34  ;;  %v4599_v34 = vsel %vm844_vm13, %v11776_v46, %v11799_v35 }
 0xe37   : > { %4688 = vmatprep.subr.bf16.mxu1 %v4578_v6 }
 0xe38   : > { %4689 = vmatpush1.bf16.msra.mxu1 %v4577_v8 }
 0xe39   : > { %4690 = vmatprep.subr.bf16.mxu1 %v4581_v20  ;;  %v11810_v18 = vpop.permute.xlu0 %4520 }
 0xe3a   : > { %v4483_v38 = vpop.permute.xlu1 %4482  ;;  %v4604_v35 = vsel %vm844_vm13, %v11810_v18, %v11783_v0 }
 0xe3c   : > { %4691 = vmatpush1.bf16.msra.mxu1 %v4580_v30 }
 0xe3d   : > { %v4469_v32 = vpop.permute.xlu0 %4468 }
 0xe3e   : > { %v11814_v37 = vpop.permute.xlu1 %4538  ;;  %v4584_v16 = vsel %vm844_vm13, %v4467_v49, %v4469_v32 }
 0xe3f   : > { %4692 = vmatprep.subr.bf16.mxu1 %v4584_v16 }
 0xe40   : > { %4693 = vmatpush1.bf16.msra.mxu1 %v4583_v15 }
 0xe41   : > { %4694 = vmatprep.subr.bf16.mxu1 %v4587_v51  ;;  %v4463_v52 = vpop.permute.xlu0 %4462 }
 0xe42   : > { %v4501_v39 = vpop.permute.xlu1 %4500 }
 0xe43   : > { %v4597_v56 = vsel %vm844_vm13, %v4501_v39, %v11725_v28  ;;  %v4589_v28 = vsel %vm844_vm13, %v4481_v26, %v4483_v38 }
 0xe44   : > { %4695 = vmatpush1.bf16.msra.mxu1 %v4586_v23  ;;  %8227 = vmatprep.subr.bf16.mxu0 %v4597_v56  ;;  %v8673_v56 = vld [vmem:[%s13949_s5 + $0xd8] ss:$12 sps:$4 sm:$0xff]  }
 0xe45   : > { %8228 = vmatpush3.bf16.msra.mxu0 %v4573_v11  ;;  %v11826_v33 = vpop.permute.xlu0 %4484 }
 0xe46   : > { %v4471_v60 = vpop.permute.xlu1 %4470  ;;  %8229 = vmatprep.subr.bf16.mxu0 %v4600_v4  ;;  %v4590_v61 = vsel %vm844_vm13, %v4483_v38, %v11826_v33  ;;  %v8668_v38 = vld [vmem:[%s13949_s5 + $0xc0] ss:$12 sps:$4 sm:$0xff]   ;;  %v8674_v4 = vld [vmem:[%s13949_s5 + $0xc8] ss:$12 sps:$4 sm:$0xff]  }
 0xe47   : > { %4696 = vmatprep.subr.bf16.mxu1 %v4590_v61 }
 0xe48   : > { %4697 = vmatpush1.bf16.msra.mxu1 %v4589_v28 }
 0xe49   : > { %4698 = vmatprep.subr.bf16.mxu1 %v4593_v13  ;;  %8230 = vmatpush3.bf16.msra.mxu0 %v4576_v24  ;;  %v4535_v57 = vpop.permute.xlu0 %4534  ;;  %v8675_v24 = vld [vmem:[%s13949_s5 + $0xe0] ss:$12 sps:$4 sm:$0xff]  }
 0xe4a   : > { %v4517_v7 = vpop.permute.xlu1 %4516 }
 0xe4b   : > { %v4603_v53 = vsel %vm844_vm13, %v4517_v7, %v11740_v63  ;;  %v4582_v63 = vsel %vm844_vm13, %v11794_v17, %v4463_v52 }
 0xe4c   : > { %4699 = vmatpush1.bf16.msra.mxu1 %v4592_v12  ;;  %8231 = vmatprep.subr.bf16.mxu0 %v4603_v53 }
 0xe4d   : > { %8232 = vmatpush3.bf16.msra.mxu0 %v4579_v44  ;;  %v4499_v42 = vpop.permute.xlu0 %4498 }
 0xe4e   : > { %v4543_v21 = vpop.permute.xlu1 %4542  ;;  %8233 = vmatprep.subr.bf16.mxu0 %v4606_v3  ;;  %v4596_v36 = vsel %vm844_vm13, %v4499_v42, %v4501_v39  ;;  %v4595_v55 = vsel %vm844_vm13, %v11787_v62, %v4499_v42  ;;  %v4585_v62 = vsel %vm844_vm13, %v4469_v32, %v4471_v60 }
 0xe4f   : > { %4700 = vmatprep.subr.bf16.mxu1 %v4596_v36 }
 0xe50   : > { %4701 = vmatpush1.bf16.msra.mxu1 %v4595_v55 }
 0xe51   : > { %4702 = vmatprep.subr.bf16.mxu1 %v4599_v34  ;;  %8234 = vmatpush3.bf16.msra.mxu0 %v4582_v63  ;;  %v4541_v10 = vpop.permute.xlu0 %4540 }
 0xe52   : > { %v4533_v59 = vpop.permute.xlu1 %4532  ;;  %v4612_v17 = vsel %vm844_vm13, %v4541_v10, %v4543_v21  ;;  %v4611_v45 = vsel %vm844_vm13, %v11814_v37, %v4541_v10 }
 0xe53   : > { %v4609_v29 = vsel %vm844_vm13, %v4533_v59, %v4535_v57 }
 0xe54   : > { %4703 = vmatpush1.bf16.msra.mxu1 %v4598_v22  ;;  %8235 = vmatprep.subr.bf16.mxu0 %v4609_v29 }
 0xe55   : > { %8236 = vmatpush3.bf16.msra.mxu0 %v4585_v62  ;;  %v4515_v48 = vpop.permute.xlu0 %4514 }
 0xe56   : > { %v4545_v58 = vpop.permute.xlu1 %4544  ;;  %8237 = vmatprep.subr.bf16.mxu0 %v4612_v17  ;;  %v4602_v9 = vsel %vm844_vm13, %v4515_v48, %v4517_v7  ;;  %v4601_v27 = vsel %vm844_vm13, %v11796_v19, %v4515_v48 }
 0xe57   : > { %4704 = vmatprep.subr.bf16.mxu1 %v4602_v9 }
 0xe58   : > { %4705 = vmatpush1.bf16.msra.mxu1 %v4601_v27 }
 0xe59   : > { %4706 = vmatprep.subr.bf16.mxu1 %v4605_v50  ;;  %v4537_v46 = vpop.permute.xlu0 %4536 }
 0xe5a   : > { %v4549_v26 = vpop.permute.xlu1 %4548  ;;  %v4610_v0 = vsel %vm844_vm13, %v4537_v46, %v11814_v37 }
 0xe5c   : > { %4707 = vmatpush1.bf16.msra.mxu1 %v4604_v35 }
 0xe5d   : > { %v4531_v43 = vpop.permute.xlu0 %4530 }
 0xe5e   : > { %v4487_v41 = vpop.permute.xlu1 %4486  ;;  %v4608_v5 = vsel %vm844_vm13, %v4531_v43, %v4533_v59  ;;  %v4607_v19 = vsel %vm844_vm13, %v11803_v31, %v4531_v43 }
 0xe5f   : > { %4708 = vmatprep.subr.bf16.mxu1 %v4608_v5  ;;  %v4591_v16 = vsel %vm844_vm13, %v11826_v33, %v4487_v41 }
 0xe60   : > { %4709 = vmatpush1.bf16.msra.mxu1 %v4607_v19 }
 0xe61   : > { %4710 = vmatprep.subr.bf16.mxu1 %v4611_v45  ;;  %v4479_v49 = vpop.permute.xlu0 %4478 }
 0xe62   : > { %v4588_v25 = vsel %vm844_vm13, %v11754_v40, %v4479_v49  ;;  %v4557_v6 = vpop.permute.xlu1 %4556  ;;  %v8671_v40 = vld [vmem:[%s13949_s5 + $0xdc] ss:$12 sps:$4 sm:$0xff]  }
 0xe63   : > { %8238 = vmatpush3.bf16.msra.mxu0 %v4588_v25 }
 0xe64   : > { %4711 = vmatpush1.bf16.msra.mxu1 %v4610_v0 }
 0xe65   : > { %v4547_v8 = vpop.permute.xlu0 %4546 }
 0xe66   : > { %v4559_v20 = vpop.permute.xlu1 %4558  ;;  %v4614_v31 = vsel %vm844_vm13, %v4547_v8, %v4549_v26  ;;  %v4613_v18 = vsel %vm844_vm13, %v4545_v58, %v4547_v8 }
 0xe67   : > { %4712 = vmatprep.subr.bf16.mxu1 %v4614_v31  ;;  %v4618_v15 = vsel %vm844_vm13, %v4557_v6, %v4559_v20 }
 0xe68   : > { %4713 = vmatpush1.bf16.msra.mxu1 %v4613_v18 }
 0xe69   : > { %v4551_v30 = vpop.permute.xlu0 %4550 }
 0xe6a   : > { %v4565_v32 = vpop.permute.xlu1 %4564  ;;  %v4615_v37 = vsel %vm844_vm13, %v4549_v26, %v4551_v30 }
 0xe6b   : > { %8239 = vmatprep.subr.bf16.mxu0 %v4615_v37  ;;  %4715 = vmatmul.mubr.bf16.vlgmr.msra.gmra.mrb[52].mxu1 %v8668_v38 }
 0xe6c   : > { %8240 = vmatpush3.bf16.msra.mxu0 %v4591_v16  ;;  %4724 = vmatprep.mubr.bf16.mxu1 %v8671_v40 }
 0xe6d   : > { %8418 = vmatprep.subr.bf16.mxu0 %v4618_v15  ;;  %v4555_v51 = vpop.permute.xlu0 %4554 }
 0xe6e   : > { %v4567_v52 = vpop.permute.xlu1 %4566  ;;  %v4617_v39 = vsel %vm844_vm13, %v4555_v51, %v4557_v6 }
 0xe6f   : > { %4735 = vmatprep.subr.bf16.mxu1 %v4617_v39  ;;  %4821 = vmatmul.mubr.bf16.vlgmr.msra.gmra.mrb[48].mxu0 %v8668_v38  ;;  %v4621_v23 = vsel %vm844_vm13, %v4565_v32, %v4567_v52 }
 0xe70   : > { %8419 = vmatpush3.bf16.msra.mxu0 %v4618_v15  ;;  %4828 = vmatprep.mubr.bf16.mxu0 %v8671_v40 }
 0xe71   : > { %8420 = vmatprep.subr.bf16.mxu0 %v4621_v23  ;;  %v4553_v11 = vpop.permute.xlu0 %4552 }
 0xe72   : > { %v4616_v33 = vsel %vm844_vm13, %v4553_v11, %v4555_v51 }
 0xe73   : > { %4736 = vmatpush1.bf16.msra.mxu1 %v4616_v33 }
 0xe74   : > { %8421 = vmatpush3.bf16.msra.mxu0 %v4621_v23  ;;  %4725 = vmatmul.mubr.bf16.gmra.mrb[56].mxu1 %v8673_v56 }
 0xe75   : > { %v4563_v60 = vpop.permute.xlu0 %4562  ;;  %4767 = vmatprep.mubr.bf16.mxu1 %v8727_v47 }
 0xe76   : > { %v4620_v61 = vsel %vm844_vm13, %v4563_v60, %v4565_v32 }
 0xe77   : > { %4737 = vmatprep.subr.bf16.mxu1 %v4620_v61  ;;  %4829 = vmatmul.mubr.bf16.gmra.mrb[52].mxu0 %v8673_v56 }
 0xe78   : > { %8422 = vmatprep.mubr.msk.bf16.mxu0 %vm953_vm0, %v8674_v4 }
 0xe79   : > { %v4561_v28 = vpop.permute.xlu0 %4560 }
 0xe7a   : > { %v4619_v13 = vsel %vm844_vm13, %v4561_v28, %v4563_v60 }
 0xe7b   : > { %4738 = vmatpush1.bf16.msra.mxu1 %v4619_v13 }
 0xe7e   : > { %7991 = vmatmul.mubr.msk.bf16.vlgmr.msra.gmra.mrb[52].mxu1 %vm953_vm0, %v8674_v4 }
 0xe7f   : > { %8423 = vmatmul.mubr.msk.bf16.vlgmr.msra.gmra.mrb[56].mxu0 %vm953_vm0, %v8675_v24  ;;  %4777 = vmatprep.mubr.bf16.mxu1 %v8727_v47  ;;  %v4382_v36 = vpop.permute.xlu1 %4381 }
 0xe83   : > { %v4392_v29 = vpop.permute.xlu1 %4391 }
 0xe86   : > { %7992 = vmatmul.mubr.msk.bf16.gmra.mrb[56].mxu1 %vm953_vm0, %v8675_v24 }
 0xe8a   : > { %v4377_v3 = vpop.permute.xlu0 %4376 }
 0xe8e   : > { %v4387_v22 = vpop.permute.xlu0 %4386 }
 0xf42   : > { %v8241_v57 = vpop.f32.mrb[48].mxu0 }
 0xf43   : > { %v8242_v7 = vpop.f32.mrb[49].mxu0 }
 0xf44   : > { %v8243_v12 = vadd.f32 %v8242_v7, %v8241_v57  ;;  %v8244_v53 = vpop.f32.mrb[50].mxu0 }
 0xf45   : > { %v8245_v44 = vpop.f32.mrb[51].mxu0 }
 0xf46   : > { %v8246_v42 = vadd.f32 %v8245_v44, %v8244_v53  ;;  %v4823_v27 = vadd.f32 %v8243_v12, %v4377_v3 }
 0xf48   : > { %v4826_v25 = vadd.f32 %v8246_v42, %v4382_v36 }
 0xf4a   : > { %v8247_v21 = vpop.f32.mrb[52].mxu0 }
 0xf4b   : > { %v8248_v55 = vpop.f32.mrb[53].mxu0 }
 0xf4c   : > { %v8249_v63 = vadd.f32 %v8248_v55, %v8247_v21  ;;  %v8250_v34 = vpop.f32.mrb[54].mxu0 }
 0xf4d   : > { %v8251_v10 = vpop.f32.mrb[55].mxu0 }
 0xf4e   : > { %v8252_v59 = vadd.f32 %v8251_v10, %v8250_v34  ;;  %v4831_v48 = vadd.f32 %v8249_v63, %v4387_v22 }
 0xf50   : > { %v4834_v43 = vadd.f32 %v8252_v59, %v4392_v29 }
 0xf51   : > { %v4769_v62 = vpop.f32.mrb[52].mxu1 }
 0xf52   : > { %v8498_v17 = vadd.f32 %v4769_v62, %v4377_v3  ;;  %v4771_v58 = vpop.f32.mrb[53].mxu1  ;;  %v8424_v9 = vpop.f32.mrb[56].mxu0 }
 0xf53   : > { %v8499_v50 = vadd.f32 %v4771_v58, %v4377_v3  ;;  %v4880_v46 = vadd.f32 %v8424_v9, %v4831_v48  ;;  %v4773_v26 = vpop.f32.mrb[54].mxu1  ;;  %v4871_v35 = vpop.f32.mrb[57].mxu0 }
 0xf54   : > { %v4886_v41 = vmax.f32 %v8498_v17, 0.0  ;;  %v8500_v5 = vadd.f32 %v4773_v26, %v4382_v36  ;;  %v4872_v19 = vadd.f32 %v4871_v35, %v4823_v27  ;;  %v4775_v45 = vpop.f32.mrb[55].mxu1  ;;  %v8425_v49 = vpop.f32.mrb[58].mxu0 }
 0xf55   : > { %v4887_v6 = vmax.f32 %v8499_v50, 0.0  ;;  %v4894_v0 = vmax.f32 %v4880_v46, 0.0  ;;  %v8501_v8 = vadd.f32 %v4775_v45, %v4382_v36  ;;  %v4883_v20 = vadd.f32 %v8425_v49, %v4834_v43  ;;  %v4874_v31 = vpop.f32.mrb[59].mxu0  ;;  %v11967_v58 = vpop.permute.xlu1 %4968 }
 0xf56   : > { %v4889_v18 = vmax.f32 %v8500_v5, 0.0  ;;  %v4888_v38 = vmax.f32 %v4872_v19, 0.0  ;;  %v4875_v40 = vadd.f32 %v4874_v31, %v4826_v25  ;;  %v4898_v16 = vmul.f32 %v4886_v41, %v9393_v1  ;;  %v12004_v43 = vpop.permute.xlu0 %5164 }
 0xf57   : > { %v4906_v30 = vmul.f32 %v4894_v0, %v9397_v14  ;;  %v4890_v32 = vmax.f32 %v8501_v8, 0.0  ;;  %v4897_v37 = vmax.f32 %v4883_v20, 0.0  ;;  %v4899_v39 = vmul.f32 %v4887_v6, %v9401_v54 }
 0xf58   : > { %v4901_v15 = vmul.f32 %v4889_v18, %v9393_v1  ;;  %v4900_v51 = vmul.f32 %v4888_v38, %v9397_v14  ;;  %v4891_v52 = vmax.f32 %v4875_v40, 0.0 }
 0xf59   : > { %4918 = vst.msk [vmem:[#allocation3 + $0x58] sm:$0xff] %vm953_vm0, %v4906_v30  ;;  %v4902_v23 = vmul.f32 %v4890_v32, %v9401_v54  ;;  %v4909_v56 = vmul.f32 %v4897_v37, %v9397_v14  ;;  %v4779_v11 = vpop.f32.mrb[56].mxu1  ;;  %v11971_v9 = vpop.permute.xlu1 %4976 }
 0xf5a   : > { %4912 = vst.msk [vmem:[#allocation3 + $0x18] sm:$0xff] %vm953_vm0, %v4900_v51  ;;  %v4903_v33 = vmul.f32 %v4891_v52, %v9397_v14  ;;  %v8502_v4 = vadd.f32 %v4779_v11, %v4387_v22  ;;  %v4781_v60 = vpop.f32.mrb[57].mxu1  ;;  %v4953_v61 = vpack.c.bf16 %v4901_v15, %v4898_v16 }
 0xf5b   : > { %4921 = vst.msk [vmem:[#allocation3 + $0x78] sm:$0xff] %vm953_vm0, %v4909_v56  ;;  %v8503_v28 = vadd.f32 %v4781_v60, %v4387_v22  ;;  %v4783_v13 = vpop.f32.mrb[58].mxu1  ;;  %v4954_v24 = vpack.c.bf16 %v4902_v23, %v4899_v39 }
 0xf5c   : > { %4915 = vst.msk [vmem:[#allocation3 + $0x38] sm:$0xff] %vm953_vm0, %v4903_v33  ;;  %v4892_v57 = vmax.f32 %v8502_v4, 0.0  ;;  %v8504_v7 = vadd.f32 %v4783_v13, %v4392_v29  ;;  %v4785_v12 = vpop.f32.mrb[59].mxu1 }
 0xf5d   : > { %v4893_v53 = vmax.f32 %v8503_v28, 0.0  ;;  %v8505_v44 = vadd.f32 %v4785_v12, %v4392_v29  ;;  %v11977_v27 = vpop.permute.xlu1 %4990 }
 0xf5e   : > { %v4895_v42 = vmax.f32 %v8504_v7, 0.0  ;;  %v4904_v21 = vmul.f32 %v4892_v57, %v9393_v1 }
 0xf5f   : > { %v4896_v3 = vmax.f32 %v8505_v44, 0.0  ;;  %v4905_v55 = vmul.f32 %v4893_v53, %v9401_v54 }
 0xf60   : > { %v4907_v36 = vmul.f32 %v4895_v42, %v9393_v1  ;;  %v4947_v34 = vld [vmem:[#allocation3 + $0x58] sm:$0xff] }
 0xf61   : > { %v4908_v63 = vmul.f32 %v4896_v3, %v9401_v54  ;;  %v4939_v48 = vld [vmem:[#allocation3 + $0x18] sm:$0xff]  ;;  %v11982_v50 = vpop.permute.xlu1 %4998 }
 0xf62   : > { %v4951_v10 = vld [vmem:[#allocation3 + $0x78] sm:$0xff]  ;;  %v4957_v59 = vpack.c.bf16 %v4907_v36, %v4904_v21 }
 0xf63   : > { %v4959_v22 = vpack.c.bf16 %v4951_v10, %v4947_v34  ;;  %v11927_v62 = vpack.c.bf16 %v4908_v63, %v4905_v55  ;;  %v4943_v29 = vld [vmem:[#allocation3 + $0x38] sm:$0xff] }
 0xf64   : > { %v4955_v17 = vpack.c.bf16 %v4943_v29, %v4939_v48 }
 0xf65   : > { %5044 = vrot.lane.b32.xlu1 %v4959_v22, %s8721_s23  ;;  %4982 = vrot.lane.b32.xlu0 %v4959_v22, %s8718_s12  ;;  %v11992_v46 = vpop.permute.xlu1 %5012 }
 0xf69   : > { %5060 = vrot.lane.b32.xlu1 %v4959_v22, %s8722_s24  ;;  %5004 = vrot.lane.b32.xlu0 %v4959_v22, %s8719_s15  ;;  %v11996_v26 = vpop.permute.xlu1 %5020 }
 0xf6d   : > { %5076 = vrot.lane.b32.xlu1 %v4959_v22, %s8723_s25  ;;  %5026 = vrot.lane.b32.xlu0 %v4959_v22, %s8720_s22  ;;  %v12002_v35 = vpop.permute.xlu1 %5172 }
 0xf71   : > { %5092 = vrot.lane.b32.xlu1 %v4959_v22, %s8724_s26  ;;  %4974 = vrot.lane.b32.xlu0 %v4955_v17, %s8718_s12 }
 0xf75   : > { %5108 = vrot.lane.b32.xlu1 %v4959_v22, %s8726_s28  ;;  %4996 = vrot.lane.b32.xlu0 %v4955_v17, %s8719_s15 }
 0xf79   : > { %5178 = vrot.lane.b32.xlu1 %v4959_v22, %s8725_s27  ;;  %5018 = vrot.lane.b32.xlu0 %v4955_v17, %s8720_s22 }
 0xf7d   : > { %5102 = vrot.lane.b32.xlu1 %v4955_v17, %s8726_s28  ;;  %5038 = vrot.lane.b32.xlu0 %v4955_v17, %s8721_s23 }
 0xf81   : > { %5166 = vrot.lane.b32.xlu1 %v4953_v61, %s8725_s27  ;;  %5054 = vrot.lane.b32.xlu0 %v4955_v17, %s8722_s24 }
 0xf85   : > { %5098 = vrot.lane.b32.xlu1 %v4953_v61, %s8726_s28  ;;  %5070 = vrot.lane.b32.xlu0 %v4955_v17, %s8723_s25 }
 0xf89   : > { %4972 = vrot.lane.b32.xlu1 %v4954_v24, %s8718_s12  ;;  %5086 = vrot.lane.b32.xlu0 %v4955_v17, %s8724_s26 }
 0xf8d   : > { %4994 = vrot.lane.b32.xlu1 %v4954_v24, %s8719_s15  ;;  %5170 = vrot.lane.b32.xlu0 %v4955_v17, %s8725_s27 }
 0xf91   : > { %5016 = vrot.lane.b32.xlu1 %v4954_v24, %s8720_s22  ;;  %4970 = vrot.lane.b32.xlu0 %v4953_v61, %s8718_s12 }
 0xf95   : > { %5036 = vrot.lane.b32.xlu1 %v4954_v24, %s8721_s23  ;;  %4992 = vrot.lane.b32.xlu0 %v4953_v61, %s8719_s15 }
 0xf99   : > { %5052 = vrot.lane.b32.xlu1 %v4954_v24, %s8722_s24  ;;  %5014 = vrot.lane.b32.xlu0 %v4953_v61, %s8720_s22 }
 0xf9d   : > { %5068 = vrot.lane.b32.xlu1 %v4954_v24, %s8723_s25  ;;  %5034 = vrot.lane.b32.xlu0 %v4953_v61, %s8721_s23 }
 0xfa1   : > { %5084 = vrot.lane.b32.xlu1 %v4954_v24, %s8724_s26  ;;  %5050 = vrot.lane.b32.xlu0 %v4953_v61, %s8722_s24 }
 0xfa5   : > { %5040 = vrot.lane.b32.xlu1 %v4957_v59, %s8721_s23  ;;  %5066 = vrot.lane.b32.xlu0 %v4953_v61, %s8723_s25 }
 0xfa9   : > { %5056 = vrot.lane.b32.xlu1 %v4957_v59, %s8722_s24  ;;  %5082 = vrot.lane.b32.xlu0 %v4953_v61, %s8724_s26 }
 0xfad   : > { %5072 = vrot.lane.b32.xlu1 %v4957_v59, %s8723_s25  ;;  %5168 = vrot.lane.b32.xlu0 %v4954_v24, %s8725_s27 }
 0xfb1   : > { %5088 = vrot.lane.b32.xlu1 %v4957_v59, %s8724_s26  ;;  %5100 = vrot.lane.b32.xlu0 %v4954_v24, %s8726_s28 }
 0xfb5   : > { %5174 = vrot.lane.b32.xlu1 %v4957_v59, %s8725_s27  ;;  %4978 = vrot.lane.b32.xlu0 %v4957_v59, %s8718_s12 }
 0xfb9   : > { %5104 = vrot.lane.b32.xlu1 %v4957_v59, %s8726_s28  ;;  %5000 = vrot.lane.b32.xlu0 %v4957_v59, %s8719_s15 }
 0xfbd   : > { %4980 = vrot.lane.b32.xlu1 %v11927_v62, %s8718_s12  ;;  %5022 = vrot.lane.b32.xlu0 %v4957_v59, %s8720_s22 }
 0xfc1   : > { %5002 = vrot.lane.b32.xlu1 %v11927_v62, %s8719_s15  ;;  %5042 = vrot.lane.b32.xlu0 %v11927_v62, %s8721_s23 }
 0xfc5   : > { %5024 = vrot.lane.b32.xlu1 %v11927_v62, %s8720_s22  ;;  %5058 = vrot.lane.b32.xlu0 %v11927_v62, %s8722_s24 }
 0xfc9   : > { %5074 = vrot.lane.b32.xlu0 %v11927_v62, %s8723_s25 }
 0xfcd   : > { %5090 = vrot.lane.b32.xlu0 %v11927_v62, %s8724_s26 }
 0xfd1   : > { %5176 = vrot.lane.b32.xlu0 %v11927_v62, %s8725_s27 }
 0xfd5   : > { %5106 = vrot.lane.b32.xlu0 %v11927_v62, %s8726_s28 }
 0xfd7   : > { %v12008_v41 = vpop.permute.xlu1 %5044  ;;  %v12010_v5 = vpop.permute.xlu0 %4982 }
 0xfd8   : > { %5194 = vrot.lane.b32.xlu1 %v12010_v5, %s8725_s27 }
 0xfd9   : > { %5242 = vrot.lane.b32.xlu0 %v12008_v41, %s8725_s27 }
 0xfdb   : > { %v12016_v19 = vpop.permute.xlu1 %5060  ;;  %v12018_v45 = vpop.permute.xlu0 %5004 }
 0xfdd   : > { %5258 = vrot.lane.b32.xlu0 %v12016_v19, %s8725_s27 }
 0xfdf   : > { %v12022_v49 = vpop.permute.xlu1 %5076  ;;  %v12024_v25 = vpop.permute.xlu0 %5026 }
 0xfe3   : > { %v12026_v6 = vpop.permute.xlu1 %5092  ;;  %v4975_v0 = vpop.permute.xlu0 %4974 }
 0xfe4   : > { %5186 = vrot.lane.b32.xlu0 %v4975_v0, %s8725_s27 }
 0xfe7   : > { %v12029_v8 = vpop.permute.xlu1 %5108  ;;  %v12031_v20 = vpop.permute.xlu0 %4996 }
 0xfeb   : > { %v12033_v31 = vpop.permute.xlu1 %5178  ;;  %v12035_v18 = vpop.permute.xlu0 %5018 }
 0xfef   : > { %v12037_v38 = vpop.permute.xlu1 %5102  ;;  %v5039_v40 = vpop.permute.xlu0 %5038 }
 0xff0   : > { %5234 = vrot.lane.b32.xlu1 %v5039_v40, %s8725_s27 }
 0xff3   : > { %v5167_v30 = vpop.permute.xlu1 %5166  ;;  %v12040_v32 = vpop.permute.xlu0 %5054 }
 0xff4   : > { %5250 = vrot.lane.b32.xlu1 %v12040_v32, %s8725_s27  ;;  %v5308_v29 = vsel %vm844_vm13, %v12004_v43, %v5167_v30 }
 0xff7   : > { %v12044_v37 = vpop.permute.xlu1 %5098  ;;  %v12046_v16 = vpop.permute.xlu0 %5070 }
 0xffb   : > { %v4973_v15 = vpop.permute.xlu1 %4972  ;;  %v12048_v51 = vpop.permute.xlu0 %5086 }
 0xffc   : > { %v4986_v52 = vsel %vm512_vm5, %v4973_v15, %v4975_v0 }
 0xffd   : > { %5184 = vrot.lane.b32.xlu1 %v4986_v52, %s8725_s27 }
 0xfff   : > { %v4995_v39 = vpop.permute.xlu1 %4994  ;;  %v12052_v23 = vpop.permute.xlu0 %5170 }
0x1000   : > { %v5008_v0 = vsel %vm535_vm9, %v4995_v39, %v12031_v20 }
0x1003   : > { %v5017_v56 = vpop.permute.xlu1 %5016  ;;  %v4971_v11 = vpop.permute.xlu0 %4970 }
0x1004   : > { %v5030_v13 = vsel %vm419_vm8, %v5017_v56, %v12035_v18  ;;  %v4984_v21 = vsel %vm512_vm5, %v11967_v58, %v4971_v11  ;;  %v4985_v58 = vsel %vm512_vm5, %v4971_v11, %v4973_v15 }
0x1007   : > { %v5037_v33 = vpop.permute.xlu1 %5036  ;;  %v4993_v4 = vpop.permute.xlu0 %4992 }
0x1008   : > { %v5007_v60 = vsel %vm535_vm9, %v4993_v4, %v4995_v39  ;;  %v5047_v7 = vsel %vm577_vm10, %v5037_v33, %v5039_v40  ;;  %v5006_v34 = vsel %vm535_vm9, %v11977_v27, %v4993_v4 }
0x1009   : > { %5198 = vrot.lane.b32.xlu1 %v5007_v60, %s8725_s27 }
0x100b   : > { %v5053_v61 = vpop.permute.xlu1 %5052  ;;  %v5015_v28 = vpop.permute.xlu0 %5014 }
0x100c   : > { %v5028_v22 = vsel %vm419_vm8, %v11992_v46, %v5015_v28  ;;  %v5029_v43 = vsel %vm419_vm8, %v5015_v28, %v5017_v56  ;;  %v5063_v56 = vsel %vm594_vm11, %v5053_v61, %v12040_v32 }
0x100d   : > { %5216 = vrot.lane.b32.xlu1 %v5030_v13, %s8725_s27 }
0x100f   : > { %v5069_v24 = vpop.permute.xlu1 %5068  ;;  %v5035_v57 = vpop.permute.xlu0 %5034 }
0x1010   : > { %5228 = vrot.lane.b32.xlu0 %v5035_v57, %s8725_s27  ;;  %v5046_v11 = vsel %vm577_vm10, %v5035_v57, %v5037_v33  ;;  %v5079_v33 = vsel %vm611_vm12, %v5069_v24, %v12046_v16 }
0x1011   : > { %5232 = vrot.lane.b32.xlu1 %v5047_v7, %s8725_s27 }
0x1013   : > { %v12062_v12 = vpop.permute.xlu1 %5084  ;;  %v5051_v53 = vpop.permute.xlu0 %5050 }
0x1014   : > { %5244 = vrot.lane.b32.xlu0 %v5051_v53, %s8725_s27  ;;  %v5062_v44 = vsel %vm594_vm11, %v5051_v53, %v5053_v61 }
0x1015   : > { %5246 = vrot.lane.b32.xlu1 %v5062_v44, %s8725_s27 }
0x1017   : > { %v12067_v42 = vpop.permute.xlu1 %5040  ;;  %v5067_v3 = vpop.permute.xlu0 %5066 }
0x1018   : > { %5180 = vrot.lane.b32.xlu0 %v4984_v21, %s8725_s27  ;;  %v5078_v36 = vsel %vm611_vm12, %v5067_v3, %v5069_v24 }
0x1019   : > { %5262 = vrot.lane.b32.xlu1 %v5078_v36, %s8725_s27 }
0x101b   : > { %v12074_v55 = vpop.permute.xlu1 %5056  ;;  %v12076_v63 = vpop.permute.xlu0 %5082 }
0x101c   : > { %5196 = vrot.lane.b32.xlu0 %v5006_v34, %s8725_s27 }
0x101d   : > { %5236 = vrot.lane.b32.xlu1 %v12067_v42, %s8725_s27 }
0x101f   : > { %v12083_v10 = vpop.permute.xlu1 %5072  ;;  %v12085_v59 = vpop.permute.xlu0 %5168 }
0x1020   : > { %5212 = vrot.lane.b32.xlu0 %v5028_v22, %s8725_s27  ;;  %v5309_v62 = vsel %vm844_vm13, %v5167_v30, %v12085_v59 }
0x1021   : > { %5252 = vrot.lane.b32.xlu1 %v12074_v55, %s8725_s27  ;;  %5422 = vmatprep.subr.bf16.mxu0 %v5309_v62 }
0x1022   : > { %5423 = vmatpush1.bf16.msra.mxu0 %v5308_v29 }
0x1023   : > { %v12096_v48 = vpop.permute.xlu1 %5088  ;;  %v12098_v17 = vpop.permute.xlu0 %5100 }
0x1024   : > { %5182 = vrot.lane.b32.xlu0 %v4985_v58, %s8725_s27  ;;  %v5110_v29 = vsel %vm645_vm15, %v12044_v37, %v12098_v17 }
0x1027   : > { %v5175_v27 = vpop.permute.xlu1 %5174  ;;  %v4979_v46 = vpop.permute.xlu0 %4978 }
0x1028   : > { %5200 = vrot.lane.b32.xlu0 %v5008_v0, %s8725_s27  ;;  %v4987_v32 = vsel %vm512_vm5, %v11971_v9, %v4979_v46 }
0x102b   : > { %v12105_v40 = vpop.permute.xlu1 %5104  ;;  %v5001_v52 = vpop.permute.xlu0 %5000 }
0x102c   : > { %5214 = vrot.lane.b32.xlu0 %v5029_v43, %s8725_s27  ;;  %v5009_v30 = vsel %vm535_vm9, %v11982_v50, %v5001_v52  ;;  %v8003_v43 = vld [vmem:[%s13950_s6 + $0xa0] sm:$0xff] }
0x102d   : > { %5204 = vrot.lane.b32.xlu1 %v5009_v30, %s8725_s27 }
0x102f   : > { %v5023_v15 = vpop.permute.xlu0 %5022  ;;  %v4981_v4 = vpop.permute.xlu1 %4980 }
0x1030   : > { %5230 = vrot.lane.b32.xlu0 %v5046_v11, %s8725_s27  ;;  %v5031_v39 = vsel %vm419_vm8, %v11996_v26, %v5023_v15  ;;  %v4988_v50 = vsel %vm512_vm5, %v4979_v46, %v4981_v4  ;;  %v4989_v24 = vsel %vm512_vm5, %v4981_v4, %v12010_v5  ;;  %v5311_v5 = vsel %vm844_vm13, %v12002_v35, %v5175_v27 }
0x1031   : > { %5220 = vrot.lane.b32.xlu1 %v5031_v39, %s8725_s27 }
0x1033   : > { %v5043_v60 = vpop.permute.xlu0 %5042  ;;  %v5003_v26 = vpop.permute.xlu1 %5002 }
0x1034   : > { %5248 = vrot.lane.b32.xlu0 %v5063_v56, %s8725_s27  ;;  %v5010_v61 = vsel %vm535_vm9, %v5001_v52, %v5003_v26  ;;  %v5011_v44 = vsel %vm535_vm9, %v5003_v26, %v12018_v45  ;;  %v5049_v21 = vsel %vm577_vm10, %v5043_v60, %v12008_v41  ;;  %v5048_v41 = vsel %vm577_vm10, %v12067_v42, %v5043_v60  ;;  %v8678_v42 = vld [vmem:[%s13949_s5 + $0xf4] ss:$12 sps:$4 sm:$0xff]  }
0x1035   : > { %5190 = vrot.lane.b32.xlu1 %v4988_v50, %s8725_s27  ;;  %5454 = vmatprep.mubr.bf16.mxu0 %v8678_v42  ;;  %v5310_v52 = vsel %vm844_vm13, %v12085_v59, %v12052_v23 }
0x1036   : > { %5560 = vmatprep.mubr.bf16.mxu1 %v8678_v42 }
0x1037   : > { %v5059_v28 = vpop.permute.xlu0 %5058  ;;  %v5025_v7 = vpop.permute.xlu1 %5024 }
0x1038   : > { %5264 = vrot.lane.b32.xlu0 %v5079_v33, %s8725_s27  ;;  %v5032_v9 = vsel %vm419_vm8, %v5023_v15, %v5025_v7  ;;  %v5033_v35 = vsel %vm419_vm8, %v5025_v7, %v12024_v25  ;;  %v5065_v36 = vsel %vm594_vm11, %v5059_v28, %v12016_v19  ;;  %v5064_v19 = vsel %vm594_vm11, %v12074_v55, %v5059_v28 }
0x1039   : > { %5266 = vrot.lane.b32.xlu1 %v12046_v16, %s8725_s27  ;;  %v5111_v55 = vsel %vm645_vm15, %v12098_v17, %v12037_v38  ;;  %v8006_v17 = vld [vmem:[%s13950_s6 + $0xb8] sm:$0xff] }
0x103b   : > { %v5075_v13 = vpop.permute.xlu0 %5074 }
0x103c   : > { %5188 = vrot.lane.b32.xlu0 %v4987_v32, %s8725_s27 }
0x103d   : > { %5206 = vrot.lane.b32.xlu1 %v5010_v61, %s8725_s27 }
0x103f   : > { %v5091_v57 = vpop.permute.xlu0 %5090 }
0x1040   : > { %5192 = vrot.lane.b32.xlu0 %v4989_v24, %s8725_s27 }
0x1041   : > { %5268 = vrot.lane.b32.xlu1 %v12083_v10, %s8725_s27 }
0x1043   : > { %v12137_v16 = vpop.permute.xlu0 %5176 }
0x1044   : > { %5260 = vrot.lane.b32.xlu0 %v5067_v3, %s8725_s27  ;;  %v5312_v53 = vsel %vm844_vm13, %v5175_v27, %v12137_v16  ;;  %v5094_v3 = vsel %vm628_vm14, %v12076_v63, %v12062_v12 }
0x1045   : > { %5222 = vrot.lane.b32.xlu1 %v5032_v9, %s8725_s27  ;;  %5424 = vmatprep.subr.bf16.mxu0 %v5312_v53 }
0x1046   : > { %5425 = vmatpush1.bf16.msra.mxu0 %v5311_v5 }
0x1047   : > { %v5107_v34 = vpop.permute.xlu0 %5106 }
0x1048   : > { %5208 = vrot.lane.b32.xlu0 %v5011_v44, %s8725_s27 }
0x1049   : > { %5278 = vrot.lane.b32.xlu1 %v5094_v3, %s8725_s27 }
0x104b   : > { %v12213_v22 = vpop.permute.xlu0 %5242 }
0x104c   : > { %5202 = vrot.lane.b32.xlu0 %v12031_v20, %s8725_s27  ;;  %v5081_v20 = vsel %vm611_vm12, %v5075_v13, %v12022_v49 }
0x104d   : > { %5240 = vrot.lane.b32.xlu1 %v5049_v21, %s8725_s27 }
0x1050   : > { %5224 = vrot.lane.b32.xlu0 %v5033_v35, %s8725_s27 }
0x1051   : > { %5210 = vrot.lane.b32.xlu1 %v12018_v45, %s8725_s27  ;;  %v5095_v45 = vsel %vm628_vm14, %v12062_v12, %v12048_v51  ;;  %v12193_v12 = vpop.permute.xlu1 %5194 }
0x1054   : > { %5274 = vrot.lane.b32.xlu0 %v12022_v49, %s8725_s27  ;;  %v5080_v49 = vsel %vm611_vm12, %v12083_v10, %v5075_v13 }
0x1055   : > { %5256 = vrot.lane.b32.xlu1 %v5065_v36, %s8725_s27 }
0x1058   : > { %5238 = vrot.lane.b32.xlu0 %v5048_v41, %s8725_s27 }
0x1059   : > { %5282 = vrot.lane.b32.xlu1 %v12048_v51, %s8725_s27  ;;  %v5097_v51 = vsel %vm628_vm14, %v5091_v57, %v12026_v6 }
0x105c   : > { %5280 = vrot.lane.b32.xlu0 %v5095_v45, %s8725_s27 }
0x105d   : > { %5272 = vrot.lane.b32.xlu1 %v5081_v20, %s8725_s27 }
0x1060   : > { %5254 = vrot.lane.b32.xlu0 %v5064_v19, %s8725_s27 }
0x1061   : > { %5284 = vrot.lane.b32.xlu1 %v12096_v48, %s8725_s27 }
0x1064   : > { %5276 = vrot.lane.b32.xlu0 %v12076_v63, %s8725_s27  ;;  %v5235_v63 = vpop.permute.xlu1 %5234 }
0x1065   : > { %5288 = vrot.lane.b32.xlu1 %v5097_v51, %s8725_s27 }
0x1068   : > { %5270 = vrot.lane.b32.xlu0 %v5080_v49, %s8725_s27  ;;  %v12211_v10 = vpop.permute.xlu1 %5250 }
0x1069   : > { %5226 = vrot.lane.b32.xlu1 %v12024_v25, %s8725_s27  ;;  %v5096_v25 = vsel %vm628_vm14, %v12096_v48, %v5091_v57 }
0x106c   : > { %5218 = vrot.lane.b32.xlu0 %v12035_v18, %s8725_s27  ;;  %v5113_v18 = vsel %vm645_vm15, %v5107_v34, %v12029_v8 }
0x106d   : > { %5296 = vrot.lane.b32.xlu1 %v5111_v55, %s8725_s27 }
0x106f   : > { %v12220_v62 = vpop.permute.xlu1 %5184 }
0x1070   : > { %5286 = vrot.lane.b32.xlu0 %v5096_v25, %s8725_s27 }
0x1071   : > { %5298 = vrot.lane.b32.xlu1 %v12037_v38, %s8725_s27  ;;  %v12228_v38 = vpop.permute.xlu0 %5258 }
0x1074   : > { %5290 = vrot.lane.b32.xlu0 %v12026_v6, %s8725_s27  ;;  %v8004_v6 = vld [vmem:[%s13950_s6 + $0xa8] sm:$0xff] }
0x1075   : > { %5304 = vrot.lane.b32.xlu1 %v5113_v18, %s8725_s27  ;;  %v12235_v58 = vpop.permute.xlu0 %5186 }
0x1078   : > { %5294 = vrot.lane.b32.xlu0 %v5110_v29, %s8725_s27  ;;  %v5313_v29 = vsel %vm844_vm13, %v12137_v16, %v12033_v31  ;;  %v5316_v31 = vsel %vm844_vm13, %v12220_v62, %v12235_v58 }
0x1079   : > { %5306 = vrot.lane.b32.xlu1 %v12029_v8, %s8725_s27  ;;  %v5112_v8 = vsel %vm645_vm15, %v12105_v40, %v5107_v34 }
0x107b   : > { %v5199_v48 = vpop.permute.xlu1 %5198 }
0x107c   : > { %5292 = vrot.lane.b32.xlu0 %v12044_v37, %s8725_s27 }
0x107d   : > { %5121 = vperm.xlu1 %8625, %v8004_v6  }
0x107f   : > { %v12240_v27 = vpop.permute.xlu1 %5216 }
0x1080   : > { %5302 = vrot.lane.b32.xlu0 %v5112_v8, %s8725_s27 }
0x1081   : > { %5131 = vperm.xlu1 %8625, %v8006_v17  }
0x1082   : > { %v12245_v46 = vpop.permute.xlu0 %5228 }
0x1083   : > { %v12247_v0 = vpop.permute.xlu1 %5232 }
0x1084   : > { %5300 = vrot.lane.b32.xlu0 %v12105_v40, %s8725_s27  ;;  %v5334_v37 = vsel %vm844_vm13, %v12247_v0, %v5235_v63  ;;  %v8005_v40 = vld [vmem:[%s13950_s6 + $0xb0] sm:$0xff] }
0x1085   : > { %8257 = vmatprep.subr.bf16.mxu1 %v5334_v37 }
0x1086   : > { %8258 = vmatpush3.bf16.msra.mxu1 %v5310_v52  ;;  %v12259_v30 = vpop.permute.xlu0 %5244 }
0x1087   : > { %v12261_v15 = vpop.permute.xlu1 %5246 }
0x1088   : > { %5116 = vperm.xlu0 %8626, %v8003_v43  }
0x108a   : > { %v5181_v11 = vpop.permute.xlu0 %5180 }
0x108b   : > { %v12266_v4 = vpop.permute.xlu1 %5262 }
0x108c   : > { %5126 = vperm.xlu0 %8626, %v8005_v40  }
0x108e   : > { %v5197_v39 = vpop.permute.xlu0 %5196 }
0x108f   : > { %v12268_v59 = vpop.permute.xlu1 %5236  ;;  %v5320_v20 = vsel %vm844_vm13, %v5197_v39, %v5199_v48 }
0x1092   : > { %v5213_v23 = vpop.permute.xlu0 %5212 }
0x1093   : > { %v12275_v33 = vpop.permute.xlu1 %5252 }
0x1096   : > { %v5183_v60 = vpop.permute.xlu0 %5182 }
0x1097   : > { %v5315_v56 = vsel %vm844_vm13, %v5183_v60, %v12220_v62  ;;  %v5314_v50 = vsel %vm844_vm13, %v5181_v11, %v5183_v60  ;;  %v5338_v60 = vsel %vm844_vm13, %v12259_v30, %v12261_v15 }
0x1098   : > { %5426 = vmatprep.subr.bf16.mxu0 %v5315_v56 }
0x1099   : > { %5427 = vmatpush1.bf16.msra.mxu0 %v5314_v50 }
0x109a   : > { %v12273_v28 = vpop.permute.xlu0 %5200 }
0x109b   : > { %v5321_v36 = vsel %vm844_vm13, %v5199_v48, %v12273_v28 }
0x109e   : > { %v5215_v26 = vpop.permute.xlu0 %5214 }
0x109f   : > { %v5205_v13 = vpop.permute.xlu1 %5204  ;;  %v5327_v55 = vsel %vm844_vm13, %v5215_v26, %v12240_v27  ;;  %v5326_v25 = vsel %vm844_vm13, %v5213_v23, %v5215_v26 }
0x10a2   : > { %v5231_v32 = vpop.permute.xlu0 %5230 }
0x10a3   : > { %v5221_v61 = vpop.permute.xlu1 %5220  ;;  %v5333_v37 = vsel %vm844_vm13, %v5231_v32, %v12247_v0  ;;  %v5332_v52 = vsel %vm844_vm13, %v12245_v46, %v5231_v32 }
0x10a6   : > { %v12277_v57 = vpop.permute.xlu0 %5248 }
0x10a7   : > { %v5191_v24 = vpop.permute.xlu1 %5190  ;;  %v5340_v48 = vsel %vm844_vm13, %v12277_v57, %v12211_v10 }
0x10aa   : > { %v12279_v7 = vpop.permute.xlu0 %5264 }
0x10ab   : > { %v5267_v9 = vpop.permute.xlu1 %5266  ;;  %v5345_v30 = vsel %vm844_vm13, %v12266_v4, %v12279_v7 }
0x10ac   : > { %v5346_v62 = vsel %vm844_vm13, %v12279_v7, %v5267_v9 }
0x10ae   : > { %v5189_v53 = vpop.permute.xlu0 %5188 }
0x10af   : > { %v5207_v5 = vpop.permute.xlu1 %5206  ;;  %v5317_v35 = vsel %vm844_vm13, %v5189_v53, %v5191_v24 }
0x10b0   : > { %v5323_v42 = vsel %vm844_vm13, %v5205_v13, %v5207_v5 }
0x10b2   : > { %v5193_v44 = vpop.permute.xlu0 %5192 }
0x10b3   : > { %v12281_v3 = vpop.permute.xlu1 %5268  ;;  %v5318_v21 = vsel %vm844_vm13, %v5191_v24, %v5193_v44  ;;  %v5319_v40 = vsel %vm844_vm13, %v5193_v44, %v12193_v12  ;;  %v5339_v12 = vsel %vm844_vm13, %v12261_v15, %v12277_v57 }
0x10b4   : > { %5428 = vmatprep.subr.bf16.mxu0 %v5318_v21 }
0x10b5   : > { %5429 = vmatpush1.bf16.msra.mxu0 %v5317_v35 }
0x10b6   : > { %5430 = vmatprep.subr.bf16.mxu0 %v5321_v36  ;;  %v12287_v41 = vpop.permute.xlu0 %5260 }
0x10b7   : > { %v5223_v45 = vpop.permute.xlu1 %5222  ;;  %v5344_v57 = vsel %vm844_vm13, %v12287_v41, %v12266_v4 }
0x10b9   : > { %5431 = vmatpush1.bf16.msra.mxu0 %v5320_v20 }
0x10ba   : > { %v5209_v19 = vpop.permute.xlu0 %5208 }
0x10bb   : > { %v12290_v51 = vpop.permute.xlu1 %5278  ;;  %v5324_v49 = vsel %vm844_vm13, %v5207_v5, %v5209_v19 }
0x10bc   : > { %5432 = vmatprep.subr.bf16.mxu0 %v5324_v49 }
0x10bd   : > { %5433 = vmatpush1.bf16.msra.mxu0 %v5323_v42 }
0x10be   : > { %5434 = vmatprep.subr.bf16.mxu0 %v5327_v55  ;;  %v5203_v63 = vpop.permute.xlu0 %5202 }
0x10bf   : > { %v5241_v34 = vpop.permute.xlu1 %5240 }
0x10c0   : > { %v5337_v18 = vsel %vm844_vm13, %v5241_v34, %v12213_v22  ;;  %v5329_v22 = vsel %vm844_vm13, %v5221_v61, %v5223_v45 }
0x10c1   : > { %5435 = vmatpush1.bf16.msra.mxu0 %v5326_v25  ;;  %8259 = vmatprep.subr.bf16.mxu1 %v5337_v18  ;;  %v8681_v18 = vld [vmem:[%s13949_s5 + $0x108] ss:$12 sps:$4 sm:$0xff]  }
0x10c2   : > { %8260 = vmatpush3.bf16.msra.mxu1 %v5313_v29  ;;  %v12302_v6 = vpop.permute.xlu0 %5224 }
0x10c3   : > { %v5211_v17 = vpop.permute.xlu1 %5210  ;;  %8261 = vmatprep.subr.bf16.mxu1 %v5340_v48  ;;  %v5330_v8 = vsel %vm844_vm13, %v5223_v45, %v12302_v6  ;;  %v8676_v45 = vld [vmem:[%s13949_s5 + $0xf0] ss:$12 sps:$4 sm:$0xff]   ;;  %v8682_v48 = vld [vmem:[%s13949_s5 + $0xf8] ss:$12 sps:$4 sm:$0xff]  }
0x10c4   : > { %5436 = vmatprep.subr.bf16.mxu0 %v5330_v8 }
0x10c5   : > { %5437 = vmatpush1.bf16.msra.mxu0 %v5329_v22 }
0x10c6   : > { %5438 = vmatprep.subr.bf16.mxu0 %v5333_v37  ;;  %8262 = vmatpush3.bf16.msra.mxu1 %v5316_v31  ;;  %v5275_v16 = vpop.permute.xlu0 %5274  ;;  %v8683_v31 = vld [vmem:[%s13949_s5 + $0x110] ss:$12 sps:$4 sm:$0xff]  }
0x10c7   : > { %v5257_v10 = vpop.permute.xlu1 %5256 }
0x10c8   : > { %v5343_v43 = vsel %vm844_vm13, %v5257_v10, %v12228_v38  ;;  %v5322_v38 = vsel %vm844_vm13, %v12273_v28, %v5203_v63 }
0x10c9   : > { %5439 = vmatpush1.bf16.msra.mxu0 %v5332_v52  ;;  %8263 = vmatprep.subr.bf16.mxu1 %v5343_v43 }
0x10ca   : > { %8264 = vmatpush3.bf16.msra.mxu1 %v5319_v40  ;;  %v5239_v0 = vpop.permute.xlu0 %5238 }
0x10cb   : > { %v5283_v58 = vpop.permute.xlu1 %5282  ;;  %8265 = vmatprep.subr.bf16.mxu1 %v5346_v62  ;;  %v5336_v11 = vsel %vm844_vm13, %v5239_v0, %v5241_v34  ;;  %v5335_v46 = vsel %vm844_vm13, %v12268_v59, %v5239_v0  ;;  %v5325_v59 = vsel %vm844_vm13, %v5209_v19, %v5211_v17 }
0x10cc   : > { %5440 = vmatprep.subr.bf16.mxu0 %v5336_v11 }
0x10cd   : > { %5441 = vmatpush1.bf16.msra.mxu0 %v5335_v46 }
0x10ce   : > { %5442 = vmatprep.subr.bf16.mxu0 %v5339_v12  ;;  %8266 = vmatpush3.bf16.msra.mxu1 %v5322_v38  ;;  %v5281_v39 = vpop.permute.xlu0 %5280 }
0x10cf   : > { %v5273_v23 = vpop.permute.xlu1 %5272  ;;  %v5352_v28 = vsel %vm844_vm13, %v5281_v39, %v5283_v58  ;;  %v5351_v7 = vsel %vm844_vm13, %v12290_v51, %v5281_v39 }
0x10d0   : > { %v5349_v56 = vsel %vm844_vm13, %v5273_v23, %v5275_v16  ;;  %v8705_v16 = vld [vmem:[#allocation2] sm:$0xff] }
0x10d1   : > { %5443 = vmatpush1.bf16.msra.mxu0 %v5338_v60  ;;  %8267 = vmatprep.subr.bf16.mxu1 %v5349_v56 }
0x10d2   : > { %8268 = vmatpush3.bf16.msra.mxu1 %v5325_v59  ;;  %v5255_v50 = vpop.permute.xlu0 %5254 }
0x10d3   : > { %v5285_v26 = vpop.permute.xlu1 %5284  ;;  %8269 = vmatprep.subr.bf16.mxu1 %v5352_v28  ;;  %v5342_v13 = vsel %vm844_vm13, %v5255_v50, %v5257_v10  ;;  %v5341_v32 = vsel %vm844_vm13, %v12275_v33, %v5255_v50  ;;  %v5704_v10 = vpack.c.bf16 %v8705_v16, %v8705_v16 }
0x10d4   : > { %5444 = vmatprep.subr.bf16.mxu0 %v5342_v13 }
0x10d5   : > { %5445 = vmatpush1.bf16.msra.mxu0 %v5341_v32  ;;  %5720 = vrot.lane.b32.xlu1 %v5704_v10, %s8718_s12 }
0x10d6   : > { %5446 = vmatprep.subr.bf16.mxu0 %v5345_v30  ;;  %v5277_v15 = vpop.permute.xlu0 %5276  ;;  %5916 = vrot.lane.b32.xlu0 %v5704_v10, %s8725_s27 }
0x10d7   : > { %v5289_v61 = vpop.permute.xlu1 %5288  ;;  %v5350_v4 = vsel %vm844_vm13, %v5277_v15, %v12290_v51 }
0x10d9   : > { %5447 = vmatpush1.bf16.msra.mxu0 %v5344_v57  ;;  %5728 = vrot.lane.b32.xlu1 %v5704_v10, %s8718_s12 }
0x10da   : > { %v5271_v24 = vpop.permute.xlu0 %5270 }
0x10db   : > { %v5227_v9 = vpop.permute.xlu1 %5226  ;;  %v5348_v53 = vsel %vm844_vm13, %v5271_v24, %v5273_v23  ;;  %v5347_v33 = vsel %vm844_vm13, %v12281_v3, %v5271_v24 }
0x10dc   : > { %5448 = vmatprep.subr.bf16.mxu0 %v5348_v53  ;;  %v5331_v49 = vsel %vm844_vm13, %v12302_v6, %v5227_v9 }
0x10dd   : > { %5449 = vmatpush1.bf16.msra.mxu0 %v5347_v33  ;;  %5742 = vrot.lane.b32.xlu1 %v5704_v10, %s8719_s15 }
0x10de   : > { %5450 = vmatprep.subr.bf16.mxu0 %v5351_v7  ;;  %v5219_v5 = vpop.permute.xlu0 %5218 }
0x10df   : > { %v5328_v44 = vsel %vm844_vm13, %v12240_v27, %v5219_v5  ;;  %v5297_v21 = vpop.permute.xlu1 %5296  ;;  %v8679_v27 = vld [vmem:[%s13949_s5 + $0x10c] ss:$12 sps:$4 sm:$0xff]  }
0x10e0   : > { %8270 = vmatpush3.bf16.msra.mxu1 %v5328_v44 }
0x10e1   : > { %5451 = vmatpush1.bf16.msra.mxu0 %v5350_v4  ;;  %5750 = vrot.lane.b32.xlu1 %v5704_v10, %s8719_s15 }
0x10e2   : > { %v5287_v35 = vpop.permute.xlu0 %5286 }
0x10e3   : > { %v5299_v36 = vpop.permute.xlu1 %5298  ;;  %v5354_v3 = vsel %vm844_vm13, %v5287_v35, %v5289_v61  ;;  %v5353_v41 = vsel %vm844_vm13, %v5285_v26, %v5287_v35  ;;  %v5626_v35 = vld [vmem:[#allocation2 + $0x8] sm:$0xff] }
0x10e4   : > { %5452 = vmatprep.subr.bf16.mxu0 %v5354_v3  ;;  %v5358_v42 = vsel %vm844_vm13, %v5297_v21, %v5299_v36 }
0x10e5   : > { %5453 = vmatpush1.bf16.msra.mxu0 %v5353_v41  ;;  %5764 = vrot.lane.b32.xlu1 %v5704_v10, %s8720_s22 }
0x10e6   : > { %v5291_v20 = vpop.permute.xlu0 %5290 }
0x10e7   : > { %v5305_v19 = vpop.permute.xlu1 %5304  ;;  %v5355_v51 = vsel %vm844_vm13, %v5289_v61, %v5291_v20 }
0x10e8   : > { %8271 = vmatprep.subr.bf16.mxu1 %v5355_v51  ;;  %5455 = vmatmul.mubr.bf16.vlgmr.msra.gmra.mrb[60].mxu0 %v8676_v45  ;;  %v5634_v51 = vld [vmem:[#allocation2 + $0x58] sm:$0xff] }
0x10e9   : > { %8272 = vmatpush3.bf16.msra.mxu1 %v5331_v49  ;;  %5464 = vmatprep.mubr.bf16.mxu0 %v8679_v27 }
0x10ea   : > { %8426 = vmatprep.subr.bf16.mxu1 %v5358_v42  ;;  %v5295_v55 = vpop.permute.xlu0 %5294  ;;  %5772 = vrot.lane.b32.xlu1 %v5704_v10, %s8720_s22 }
0x10eb   : > { %v5307_v63 = vpop.permute.xlu1 %5306  ;;  %v5357_v34 = vsel %vm844_vm13, %v5295_v55, %v5297_v21 }
0x10ec   : > { %5475 = vmatprep.subr.bf16.mxu0 %v5357_v34  ;;  %5561 = vmatmul.mubr.bf16.vlgmr.msra.gmra.mrb[60].mxu1 %v8676_v45  ;;  %v5361_v25 = vsel %vm844_vm13, %v5305_v19, %v5307_v63 }
0x10ed   : > { %8427 = vmatpush3.bf16.msra.mxu1 %v5358_v42  ;;  %5568 = vmatprep.mubr.bf16.mxu1 %v8679_v27 }
0x10ee   : > { %8428 = vmatprep.subr.bf16.mxu1 %v5361_v25  ;;  %v5293_v29 = vpop.permute.xlu0 %5292  ;;  %5924 = vrot.lane.b32.xlu1 %v5704_v10, %s8725_s27  ;;  %v5631_v10 = vld [vmem:[#allocation2 + $0x38] sm:$0xff] }
0x10ef   : > { %v5356_v6 = vsel %vm844_vm13, %v5293_v29, %v5295_v55 }
0x10f0   : > { %5476 = vmatpush1.bf16.msra.mxu0 %v5356_v6 }
0x10f1   : > { %8429 = vmatpush3.bf16.msra.mxu1 %v5361_v25  ;;  %5465 = vmatmul.mubr.bf16.gmra.mrb[64].mxu0 %v8681_v18  ;;  %v5629_v25 = vld [vmem:[#allocation2 + $0x28] sm:$0xff] }
0x10f2   : > { %v5303_v17 = vpop.permute.xlu0 %5302  ;;  %5507 = vmatprep.mubr.bf16.mxu0 %v8727_v47 }
0x10f3   : > { %v5360_v8 = vsel %vm844_vm13, %v5303_v17, %v5305_v19  ;;  %v5627_v19 = vld [vmem:[#allocation2 + $0x10] sm:$0xff] }
0x10f4   : > { %5477 = vmatprep.subr.bf16.mxu0 %v5360_v8  ;;  %5569 = vmatmul.mubr.bf16.gmra.mrb[64].mxu1 %v8681_v18  ;;  %v5628_v18 = vld [vmem:[#allocation2 + $0x18] sm:$0xff]  ;;  %v5630_v8 = vld [vmem:[#allocation2 + $0x30] sm:$0xff] }
0x10f5   : > { %8430 = vmatprep.mubr.msk.bf16.mxu1 %vm953_vm0, %v8682_v48 }
0x10f6   : > { %v5301_v22 = vpop.permute.xlu0 %5300 }
0x10f7   : > { %v5359_v37 = vsel %vm844_vm13, %v5301_v22, %v5303_v17  ;;  %v5637_v22 = vld [vmem:[#allocation2 + $0x78] sm:$0xff] }
0x10f8   : > { %5478 = vmatpush1.bf16.msra.mxu0 %v5359_v37 }
0x10fb   : > { %8013 = vmatmul.mubr.msk.bf16.vlgmr.msra.gmra.mrb[60].mxu0 %vm953_vm0, %v8682_v48 }
0x10fc   : > { %8431 = vmatmul.mubr.msk.bf16.vlgmr.msra.gmra.mrb[68].mxu1 %vm953_vm0, %v8683_v31  ;;  %5517 = vmatprep.mubr.bf16.mxu0 %v8727_v47  ;;  %v5122_v38 = vpop.permute.xlu1 %5121 }
0x1100   : > { %v12395_v50 = vpop.permute.xlu1 %5131 }
0x1103   : > { %8014 = vmatmul.mubr.msk.bf16.gmra.mrb[64].mxu0 %vm953_vm0, %v8683_v31 }
0x1107   : > { %v5117_v11 = vpop.permute.xlu0 %5116 }
0x110b   : > { %v5127_v59 = vpop.permute.xlu0 %5126 }
0x11bf   : > { %v8273_v52 = vpop.f32.mrb[60].mxu1 }
0x11c0   : > { %v8274_v43 = vpop.f32.mrb[61].mxu1 }
0x11c1   : > { %v8275_v40 = vadd.f32 %v8274_v43, %v8273_v52  ;;  %v8276_v0 = vpop.f32.mrb[62].mxu1 }
0x11c2   : > { %v8277_v62 = vpop.f32.mrb[63].mxu1 }
0x11c3   : > { %v8278_v58 = vadd.f32 %v8277_v62, %v8276_v0  ;;  %v5563_v15 = vadd.f32 %v8275_v40, %v5117_v11 }
0x11c5   : > { %v5566_v4 = vadd.f32 %v8278_v58, %v5122_v38 }
0x11c7   : > { %v8279_v46 = vpop.f32.mrb[64].mxu1 }
0x11c8   : > { %v8280_v12 = vpop.f32.mrb[65].mxu1 }
0x11c9   : > { %v8281_v39 = vadd.f32 %v8280_v12, %v8279_v46  ;;  %v8282_v23 = vpop.f32.mrb[66].mxu1 }
0x11ca   : > { %v8283_v60 = vpop.f32.mrb[67].mxu1 }
0x11cb   : > { %v8284_v56 = vadd.f32 %v8283_v60, %v8282_v23  ;;  %v5571_v26 = vadd.f32 %v8281_v39, %v5127_v59  ;;  %v5632_v23 = vld [vmem:[#allocation2 + $0x48] sm:$0xff] }
0x11cd   : > { %v5574_v53 = vadd.f32 %v8284_v56, %v12395_v50 }
0x11ce   : > { %v5509_v28 = vpop.f32.mrb[60].mxu0 }
0x11cf   : > { %v8506_v13 = vadd.f32 %v5509_v28, %v5117_v11  ;;  %v5511_v32 = vpop.f32.mrb[61].mxu0  ;;  %v8432_v30 = vpop.f32.mrb[68].mxu1 }
0x11d0   : > { %v8507_v61 = vadd.f32 %v5511_v32, %v5117_v11  ;;  %v5620_v57 = vadd.f32 %v8432_v30, %v5571_v26  ;;  %v5513_v24 = vpop.f32.mrb[62].mxu0  ;;  %v5611_v9 = vpop.f32.mrb[69].mxu1  ;;  %v5633_v26 = vld [vmem:[#allocation2 + $0x50] sm:$0xff]  ;;  %v5635_v32 = vld [vmem:[#allocation2 + $0x68] sm:$0xff] }
0x11d1   : > { %v5638_v33 = vmul.f32 %v8506_v13, %v9393_v1  ;;  %v8508_v7 = vadd.f32 %v5513_v24, %v5122_v38  ;;  %v5612_v5 = vadd.f32 %v5611_v9, %v5563_v15  ;;  %v5515_v44 = vpop.f32.mrb[63].mxu0  ;;  %v8433_v21 = vpop.f32.mrb[70].mxu1 }
0x11d2   : > { %v5639_v36 = vmul.f32 %v8507_v61, %v9401_v54  ;;  %v5646_v3 = vmul.f32 %v5620_v57, %v9397_v14  ;;  %v8509_v41 = vadd.f32 %v5515_v44, %v5122_v38  ;;  %v5623_v45 = vadd.f32 %v8433_v21, %v5574_v53  ;;  %v5614_v27 = vpop.f32.mrb[71].mxu1  ;;  %v5636_v61 = vld [vmem:[#allocation2 + $0x70] sm:$0xff]  ;;  %v12477_v21 = vpop.permute.xlu1 %5720 }
0x11d3   : > { %v5650_v20 = vadd.f32 %v5638_v33, %v5626_v35  ;;  %v5641_v49 = vmul.f32 %v8508_v7, %v9393_v1  ;;  %v5640_v42 = vmul.f32 %v5612_v5, %v9397_v14  ;;  %v5615_v55 = vadd.f32 %v5614_v27, %v5566_v4  ;;  %v12515_v27 = vpop.permute.xlu0 %5916 }
0x11d4   : > { %v5651_v63 = vadd.f32 %v5639_v36, %v5627_v19  ;;  %v5658_v34 = vadd.f32 %v5646_v3, %v5634_v51  ;;  %v5642_v29 = vmul.f32 %v8509_v41, %v9401_v54  ;;  %v5649_v6 = vmul.f32 %v5623_v45, %v9397_v14 }
0x11d5   : > { %5662 = vst [vmem:[#allocation2 + $0x8] sm:$0xff] %v5650_v20  ;;  %v5653_v48 = vadd.f32 %v5641_v49, %v5629_v25  ;;  %v5652_v17 = vadd.f32 %v5640_v42, %v5628_v18  ;;  %v5643_v37 = vmul.f32 %v5615_v55, %v9397_v14 }
0x11d6   : > { %5663 = vst [vmem:[#allocation2 + $0x10] sm:$0xff] %v5651_v63  ;;  %5670 = vst.msk [vmem:[#allocation2 + $0x58] sm:$0xff] %vm953_vm0, %v5658_v34  ;;  %v5654_v31 = vadd.f32 %v5642_v29, %v5630_v8  ;;  %v5661_v16 = vadd.f32 %v5649_v6, %v5637_v22  ;;  %v5519_v52 = vpop.f32.mrb[64].mxu0  ;;  %v12482_v4 = vpop.permute.xlu1 %5728 }
0x11d7   : > { %5665 = vst [vmem:[#allocation2 + $0x28] sm:$0xff] %v5653_v48  ;;  %5664 = vst.msk [vmem:[#allocation2 + $0x18] sm:$0xff] %vm953_vm0, %v5652_v17  ;;  %v5655_v43 = vadd.f32 %v5643_v37, %v5631_v10  ;;  %v8510_v40 = vadd.f32 %v5519_v52, %v5127_v59  ;;  %v5521_v0 = vpop.f32.mrb[65].mxu0  ;;  %v12408_v62 = vpack.c.bf16 %v5653_v48, %v5650_v20 }
0x11d8   : > { %5666 = vst [vmem:[#allocation2 + $0x30] sm:$0xff] %v5654_v31  ;;  %5673 = vst.msk [vmem:[#allocation2 + $0x78] sm:$0xff] %vm953_vm0, %v5661_v16  ;;  %v8511_v58 = vadd.f32 %v5521_v0, %v5127_v59  ;;  %v5523_v11 = vpop.f32.mrb[66].mxu0  ;;  %v12411_v46 = vpack.c.bf16 %v5654_v31, %v5651_v63 }
0x11d9   : > { %5667 = vst.msk [vmem:[#allocation2 + $0x38] sm:$0xff] %vm953_vm0, %v5655_v43  ;;  %v5644_v38 = vmul.f32 %v8510_v40, %v9393_v1  ;;  %v8512_v12 = vadd.f32 %v5523_v11, %v12395_v50  ;;  %v5525_v39 = vpop.f32.mrb[67].mxu0 }
0x11da   : > { %v5645_v60 = vmul.f32 %v8511_v58, %v9401_v54  ;;  %v8513_v56 = vadd.f32 %v5525_v39, %v12395_v50  ;;  %v12488_v35 = vpop.permute.xlu1 %5742 }
0x11db   : > { %v5656_v28 = vadd.f32 %v5644_v38, %v5632_v23  ;;  %v5647_v13 = vmul.f32 %v8512_v12, %v9393_v1 }
0x11dc   : > { %v5657_v59 = vadd.f32 %v5645_v60, %v5633_v26  ;;  %v5648_v30 = vmul.f32 %v8513_v56, %v9401_v54 }
0x11dd   : > { %5668 = vst [vmem:[#allocation2 + $0x48] sm:$0xff] %v5656_v28  ;;  %v5659_v15 = vadd.f32 %v5647_v13, %v5635_v32  ;;  %v5699_v24 = vld [vmem:[#allocation2 + $0x58] sm:$0xff] }
0x11de   : > { %5669 = vst [vmem:[#allocation2 + $0x50] sm:$0xff] %v5657_v59  ;;  %v5660_v57 = vadd.f32 %v5648_v30, %v5636_v61  ;;  %v5691_v5 = vld [vmem:[#allocation2 + $0x18] sm:$0xff]  ;;  %v12493_v36 = vpop.permute.xlu1 %5750 }
0x11df   : > { %5671 = vst [vmem:[#allocation2 + $0x68] sm:$0xff] %v5659_v15  ;;  %v5703_v9 = vld [vmem:[#allocation2 + $0x78] sm:$0xff]  ;;  %v5709_v53 = vpack.c.bf16 %v5659_v15, %v5656_v28 }
0x11e0   : > { %5672 = vst [vmem:[#allocation2 + $0x70] sm:$0xff] %v5660_v57  ;;  %v5711_v33 = vpack.c.bf16 %v5703_v9, %v5699_v24  ;;  %v12420_v50 = vpack.c.bf16 %v5660_v57, %v5657_v59  ;;  %v5695_v7 = vld [vmem:[#allocation2 + $0x38] sm:$0xff] }
0x11e1   : > { %v5707_v44 = vpack.c.bf16 %v5695_v7, %v5691_v5 }
0x11e2   : > { %5796 = vrot.lane.b32.xlu1 %v5711_v33, %s8721_s23  ;;  %5734 = vrot.lane.b32.xlu0 %v5711_v33, %s8718_s12  ;;  %v12503_v3 = vpop.permute.xlu1 %5764 }
0x11e6   : > { %5812 = vrot.lane.b32.xlu1 %v5711_v33, %s8722_s24  ;;  %5756 = vrot.lane.b32.xlu0 %v5711_v33, %s8719_s15  ;;  %v12507_v41 = vpop.permute.xlu1 %5772 }
0x11ea   : > { %5828 = vrot.lane.b32.xlu1 %v5711_v33, %s8723_s25  ;;  %5778 = vrot.lane.b32.xlu0 %v5711_v33, %s8720_s22  ;;  %v12513_v45 = vpop.permute.xlu1 %5924 }
0x11ee   : > { %5844 = vrot.lane.b32.xlu1 %v5711_v33, %s8724_s26  ;;  %5726 = vrot.lane.b32.xlu0 %v5707_v44, %s8718_s12 }
0x11f2   : > { %5860 = vrot.lane.b32.xlu1 %v5711_v33, %s8726_s28  ;;  %5748 = vrot.lane.b32.xlu0 %v5707_v44, %s8719_s15 }
0x11f6   : > { %5930 = vrot.lane.b32.xlu1 %v5711_v33, %s8725_s27  ;;  %5770 = vrot.lane.b32.xlu0 %v5707_v44, %s8720_s22 }
0x11fa   : > { %5854 = vrot.lane.b32.xlu1 %v5707_v44, %s8726_s28  ;;  %5790 = vrot.lane.b32.xlu0 %v5707_v44, %s8721_s23 }
0x11fe   : > { %5918 = vrot.lane.b32.xlu1 %v12408_v62, %s8725_s27  ;;  %5806 = vrot.lane.b32.xlu0 %v5707_v44, %s8722_s24 }
0x1202   : > { %5850 = vrot.lane.b32.xlu1 %v12408_v62, %s8726_s28  ;;  %5822 = vrot.lane.b32.xlu0 %v5707_v44, %s8723_s25 }
0x1206   : > { %5724 = vrot.lane.b32.xlu1 %v12411_v46, %s8718_s12  ;;  %5838 = vrot.lane.b32.xlu0 %v5707_v44, %s8724_s26 }
0x120a   : > { %5746 = vrot.lane.b32.xlu1 %v12411_v46, %s8719_s15  ;;  %5922 = vrot.lane.b32.xlu0 %v5707_v44, %s8725_s27 }
0x120e   : > { %5768 = vrot.lane.b32.xlu1 %v12411_v46, %s8720_s22  ;;  %5722 = vrot.lane.b32.xlu0 %v12408_v62, %s8718_s12 }
0x1212   : > { %5788 = vrot.lane.b32.xlu1 %v12411_v46, %s8721_s23  ;;  %5744 = vrot.lane.b32.xlu0 %v12408_v62, %s8719_s15 }
0x1216   : > { %5804 = vrot.lane.b32.xlu1 %v12411_v46, %s8722_s24  ;;  %5766 = vrot.lane.b32.xlu0 %v12408_v62, %s8720_s22 }
0x121a   : > { %5820 = vrot.lane.b32.xlu1 %v12411_v46, %s8723_s25  ;;  %5786 = vrot.lane.b32.xlu0 %v12408_v62, %s8721_s23 }
0x121e   : > { %5836 = vrot.lane.b32.xlu1 %v12411_v46, %s8724_s26  ;;  %5802 = vrot.lane.b32.xlu0 %v12408_v62, %s8722_s24 }
0x1222   : > { %5792 = vrot.lane.b32.xlu1 %v5709_v53, %s8721_s23  ;;  %5818 = vrot.lane.b32.xlu0 %v12408_v62, %s8723_s25 }
0x1226   : > { %5808 = vrot.lane.b32.xlu1 %v5709_v53, %s8722_s24  ;;  %5834 = vrot.lane.b32.xlu0 %v12408_v62, %s8724_s26 }
0x122a   : > { %5824 = vrot.lane.b32.xlu1 %v5709_v53, %s8723_s25  ;;  %5920 = vrot.lane.b32.xlu0 %v12411_v46, %s8725_s27 }
0x122e   : > { %5840 = vrot.lane.b32.xlu1 %v5709_v53, %s8724_s26  ;;  %5852 = vrot.lane.b32.xlu0 %v12411_v46, %s8726_s28 }
0x1232   : > { %5926 = vrot.lane.b32.xlu1 %v5709_v53, %s8725_s27  ;;  %5730 = vrot.lane.b32.xlu0 %v5709_v53, %s8718_s12 }
0x1236   : > { %5856 = vrot.lane.b32.xlu1 %v5709_v53, %s8726_s28  ;;  %5752 = vrot.lane.b32.xlu0 %v5709_v53, %s8719_s15 }
0x123a   : > { %5732 = vrot.lane.b32.xlu1 %v12420_v50, %s8718_s12  ;;  %5774 = vrot.lane.b32.xlu0 %v5709_v53, %s8720_s22 }
0x123e   : > { %5754 = vrot.lane.b32.xlu1 %v12420_v50, %s8719_s15  ;;  %5794 = vrot.lane.b32.xlu0 %v12420_v50, %s8721_s23 }
0x1242   : > { %5776 = vrot.lane.b32.xlu1 %v12420_v50, %s8720_s22  ;;  %5810 = vrot.lane.b32.xlu0 %v12420_v50, %s8722_s24 }
0x1246   : > { %5826 = vrot.lane.b32.xlu0 %v12420_v50, %s8723_s25 }
0x124a   : > { %5842 = vrot.lane.b32.xlu0 %v12420_v50, %s8724_s26 }
0x124e   : > { %5928 = vrot.lane.b32.xlu0 %v12420_v50, %s8725_s27 }
0x1252   : > { %5858 = vrot.lane.b32.xlu0 %v12420_v50, %s8726_s28 }
0x1254   : > { %v12519_v20 = vpop.permute.xlu1 %5796  ;;  %v12521_v19 = vpop.permute.xlu0 %5734 }
0x1255   : > { %5946 = vrot.lane.b32.xlu1 %v12521_v19, %s8725_s27 }
0x1256   : > { %5994 = vrot.lane.b32.xlu0 %v12519_v20, %s8725_s27 }
0x1258   : > { %v12527_v51 = vpop.permute.xlu1 %5812  ;;  %v12529_v49 = vpop.permute.xlu0 %5756 }
0x125a   : > { %6010 = vrot.lane.b32.xlu0 %v12527_v51, %s8725_s27 }
0x125c   : > { %v12533_v42 = vpop.permute.xlu1 %5828  ;;  %v12535_v55 = vpop.permute.xlu0 %5778 }
0x1260   : > { %v12537_v63 = vpop.permute.xlu1 %5844  ;;  %v5727_v34 = vpop.permute.xlu0 %5726 }
0x1261   : > { %5938 = vrot.lane.b32.xlu0 %v5727_v34, %s8725_s27 }
0x1264   : > { %v12540_v25 = vpop.permute.xlu1 %5860  ;;  %v12542_v18 = vpop.permute.xlu0 %5748 }
0x1268   : > { %v12544_v29 = vpop.permute.xlu1 %5930  ;;  %v12546_v6 = vpop.permute.xlu0 %5770 }
0x126c   : > { %v12548_v48 = vpop.permute.xlu1 %5854  ;;  %v5791_v17 = vpop.permute.xlu0 %5790 }
0x126d   : > { %5986 = vrot.lane.b32.xlu1 %v5791_v17, %s8725_s27 }
0x1270   : > { %v5919_v8 = vpop.permute.xlu1 %5918  ;;  %v12551_v22 = vpop.permute.xlu0 %5806 }
0x1271   : > { %6002 = vrot.lane.b32.xlu1 %v12551_v22, %s8725_s27  ;;  %v6060_v7 = vsel %vm844_vm13, %v12515_v27, %v5919_v8 }
0x1274   : > { %v12555_v37 = vpop.permute.xlu1 %5850  ;;  %v12557_v31 = vpop.permute.xlu0 %5822 }
0x1278   : > { %v5725_v16 = vpop.permute.xlu1 %5724  ;;  %v12559_v10 = vpop.permute.xlu0 %5838 }
0x1279   : > { %v5738_v52 = vsel %vm512_vm5, %v5725_v16, %v5727_v34 }
0x127a   : > { %5936 = vrot.lane.b32.xlu1 %v5738_v52, %s8725_s27 }
0x127c   : > { %v5747_v43 = vpop.permute.xlu1 %5746  ;;  %v12563_v40 = vpop.permute.xlu0 %5922 }
0x127d   : > { %v5760_v34 = vsel %vm535_vm9, %v5747_v43, %v12542_v18 }
0x1280   : > { %v5769_v0 = vpop.permute.xlu1 %5768  ;;  %v5723_v62 = vpop.permute.xlu0 %5722 }
0x1281   : > { %v5782_v39 = vsel %vm419_vm8, %v5769_v0, %v12546_v6  ;;  %v5736_v30 = vsel %vm512_vm5, %v12477_v21, %v5723_v62  ;;  %v5737_v21 = vsel %vm512_vm5, %v5723_v62, %v5725_v16 }
0x1284   : > { %v5789_v58 = vpop.permute.xlu1 %5788  ;;  %v5745_v11 = vpop.permute.xlu0 %5744 }
0x1285   : > { %v5759_v46 = vsel %vm535_vm9, %v5745_v11, %v5747_v43  ;;  %v5799_v56 = vsel %vm577_vm10, %v5789_v58, %v5791_v17  ;;  %v5758_v24 = vsel %vm535_vm9, %v12488_v35, %v5745_v11 }
0x1286   : > { %5950 = vrot.lane.b32.xlu1 %v5759_v46, %s8725_s27 }
0x1288   : > { %v5805_v38 = vpop.permute.xlu1 %5804  ;;  %v5767_v12 = vpop.permute.xlu0 %5766 }
0x1289   : > { %v5780_v33 = vsel %vm419_vm8, %v12503_v3, %v5767_v12  ;;  %v5781_v27 = vsel %vm419_vm8, %v5767_v12, %v5769_v0  ;;  %v5815_v0 = vsel %vm594_vm11, %v5805_v38, %v12551_v22 }
0x128a   : > { %5968 = vrot.lane.b32.xlu1 %v5782_v39, %s8725_s27 }
0x128c   : > { %v5821_v23 = vpop.permute.xlu1 %5820  ;;  %v5787_v60 = vpop.permute.xlu0 %5786 }
0x128d   : > { %5980 = vrot.lane.b32.xlu0 %v5787_v60, %s8725_s27  ;;  %v5798_v62 = vsel %vm577_vm10, %v5787_v60, %v5789_v58  ;;  %v5831_v58 = vsel %vm611_vm12, %v5821_v23, %v12557_v31 }
0x128e   : > { %5984 = vrot.lane.b32.xlu1 %v5799_v56, %s8725_s27 }
0x1290   : > { %v12573_v28 = vpop.permute.xlu1 %5836  ;;  %v5803_v26 = vpop.permute.xlu0 %5802 }
0x1291   : > { %5996 = vrot.lane.b32.xlu0 %v5803_v26, %s8725_s27  ;;  %v5814_v13 = vsel %vm594_vm11, %v5803_v26, %v5805_v38 }
0x1292   : > { %5998 = vrot.lane.b32.xlu1 %v5814_v13, %s8725_s27 }
0x1294   : > { %v12578_v59 = vpop.permute.xlu1 %5792  ;;  %v5819_v32 = vpop.permute.xlu0 %5818 }
0x1295   : > { %5932 = vrot.lane.b32.xlu0 %v5736_v30, %s8725_s27  ;;  %v5830_v15 = vsel %vm611_vm12, %v5819_v32, %v5821_v23 }
0x1296   : > { %6014 = vrot.lane.b32.xlu1 %v5830_v15, %s8725_s27 }
0x1298   : > { %v12585_v61 = vpop.permute.xlu1 %5808  ;;  %v12587_v57 = vpop.permute.xlu0 %5834 }
0x1299   : > { %5948 = vrot.lane.b32.xlu0 %v5758_v24, %s8725_s27 }
0x129a   : > { %5988 = vrot.lane.b32.xlu1 %v12578_v59, %s8725_s27 }
0x129c   : > { %v12594_v9 = vpop.permute.xlu1 %5824  ;;  %v12596_v53 = vpop.permute.xlu0 %5920 }
0x129d   : > { %5964 = vrot.lane.b32.xlu0 %v5780_v33, %s8725_s27  ;;  %v6061_v50 = vsel %vm844_vm13, %v5919_v8, %v12596_v53 }
0x129e   : > { %6004 = vrot.lane.b32.xlu1 %v12585_v61, %s8725_s27  ;;  %6174 = vmatprep.subr.bf16.mxu1 %v6061_v50 }
0x129f   : > { %6175 = vmatpush1.bf16.msra.mxu1 %v6060_v7 }
0x12a0   : > { %v12607_v5 = vpop.permute.xlu1 %5840  ;;  %v12609_v44 = vpop.permute.xlu0 %5852 }
0x12a1   : > { %5934 = vrot.lane.b32.xlu0 %v5737_v21, %s8725_s27  ;;  %v5862_v7 = vsel %vm645_vm15, %v12555_v37, %v12609_v44 }
0x12a4   : > { %v5927_v35 = vpop.permute.xlu1 %5926  ;;  %v5731_v3 = vpop.permute.xlu0 %5730 }
0x12a5   : > { %5952 = vrot.lane.b32.xlu0 %v5760_v34, %s8725_s27  ;;  %v5739_v22 = vsel %vm512_vm5, %v12482_v4, %v5731_v3  ;;  %v6432_v34 = vld [vmem:[#allocation3 + $0x20] sm:$0xff] }
0x12a8   : > { %v12616_v17 = vpop.permute.xlu1 %5856  ;;  %v5753_v52 = vpop.permute.xlu0 %5752 }
0x12a9   : > { %5966 = vrot.lane.b32.xlu0 %v5781_v27, %s8725_s27  ;;  %v5761_v8 = vsel %vm535_vm9, %v12493_v36, %v5753_v52  ;;  %v6440_v27 = vld [vmem:[#allocation3 + $0x60] sm:$0xff] }
0x12aa   : > { %5956 = vrot.lane.b32.xlu1 %v5761_v8, %s8725_s27 }
0x12ac   : > { %v5775_v16 = vpop.permute.xlu0 %5774  ;;  %v5733_v11 = vpop.permute.xlu1 %5732 }
0x12ad   : > { %5982 = vrot.lane.b32.xlu0 %v5798_v62, %s8725_s27  ;;  %v5783_v43 = vsel %vm419_vm8, %v12507_v41, %v5775_v16  ;;  %v5740_v36 = vsel %vm512_vm5, %v5731_v3, %v5733_v11  ;;  %v5741_v23 = vsel %vm512_vm5, %v5733_v11, %v12521_v19  ;;  %v6063_v19 = vsel %vm844_vm13, %v12513_v45, %v5927_v35  ;;  %v6428_v3 = vld [vmem:[#allocation3] sm:$0xff] }
0x12ae   : > { %5972 = vrot.lane.b32.xlu1 %v5783_v43, %s8725_s27  ;;  %v6062_v43 = vsel %vm844_vm13, %v12596_v53, %v12563_v40  ;;  %v8025_v11 = vld [vmem:[%s13950_s6 + $0xc0] sm:$0xff] }
0x12b0   : > { %v5795_v46 = vpop.permute.xlu0 %5794  ;;  %v5755_v41 = vpop.permute.xlu1 %5754 }
0x12b1   : > { %6000 = vrot.lane.b32.xlu0 %v5815_v0, %s8725_s27  ;;  %v5762_v38 = vsel %vm535_vm9, %v5753_v52, %v5755_v41  ;;  %v5763_v13 = vsel %vm535_vm9, %v5755_v41, %v12529_v49  ;;  %v5801_v30 = vsel %vm577_vm10, %v5795_v46, %v12519_v20  ;;  %v5800_v20 = vsel %vm577_vm10, %v12578_v59, %v5795_v46  ;;  %v8686_v59 = vld [vmem:[%s13949_s5 + $0x124] ss:$12 sps:$4 sm:$0xff]  }
0x12b2   : > { %5942 = vrot.lane.b32.xlu1 %v5740_v36, %s8725_s27  ;;  %6206 = vmatprep.mubr.bf16.mxu1 %v8686_v59  ;;  %v8027_v36 = vld [vmem:[%s13950_s6 + $0xd0] sm:$0xff] }
0x12b3   : > { %6312 = vmatprep.mubr.bf16.mxu0 %v8686_v59 }
0x12b4   : > { %v5811_v12 = vpop.permute.xlu0 %5810  ;;  %v5777_v56 = vpop.permute.xlu1 %5776 }
0x12b5   : > { %6016 = vrot.lane.b32.xlu0 %v5831_v58, %s8725_s27  ;;  %v5784_v4 = vsel %vm419_vm8, %v5775_v16, %v5777_v56  ;;  %v5785_v45 = vsel %vm419_vm8, %v5777_v56, %v12535_v55  ;;  %v5817_v15 = vsel %vm594_vm11, %v5811_v12, %v12527_v51  ;;  %v5816_v51 = vsel %vm594_vm11, %v12585_v61, %v5811_v12 }
0x12b6   : > { %6018 = vrot.lane.b32.xlu1 %v12557_v31, %s8725_s27  ;;  %v5863_v61 = vsel %vm645_vm15, %v12609_v44, %v12548_v48  ;;  %v8028_v44 = vld [vmem:[%s13950_s6 + $0xd8] sm:$0xff]  ;;  %v6444_v16 = vpack.c.bf16 %v6432_v34, %v6428_v3 }
0x12b8   : > { %v5827_v39 = vpop.permute.xlu0 %5826 }
0x12b9   : > { %5940 = vrot.lane.b32.xlu0 %v5739_v22, %s8725_s27 }
0x12ba   : > { %5958 = vrot.lane.b32.xlu1 %v5762_v38, %s8725_s27 }
0x12bc   : > { %v5843_v60 = vpop.permute.xlu0 %5842 }
0x12bd   : > { %5944 = vrot.lane.b32.xlu0 %v5741_v23, %s8725_s27 }
0x12be   : > { %6020 = vrot.lane.b32.xlu1 %v12594_v9, %s8725_s27 }
0x12c0   : > { %v12648_v31 = vpop.permute.xlu0 %5928 }
0x12c1   : > { %6012 = vrot.lane.b32.xlu0 %v5819_v32, %s8725_s27  ;;  %v6064_v26 = vsel %vm844_vm13, %v5927_v35, %v12648_v31  ;;  %v5846_v32 = vsel %vm628_vm14, %v12587_v57, %v12573_v28  ;;  %v6065_v34 = vsel %vm844_vm13, %v12648_v31, %v12544_v29 }
0x12c2   : > { %5974 = vrot.lane.b32.xlu1 %v5784_v4, %s8725_s27  ;;  %6176 = vmatprep.subr.bf16.mxu1 %v6064_v26 }
0x12c3   : > { %6177 = vmatpush1.bf16.msra.mxu1 %v6063_v19 }
0x12c4   : > { %v5859_v24 = vpop.permute.xlu0 %5858 }
0x12c5   : > { %5960 = vrot.lane.b32.xlu0 %v5763_v13, %s8725_s27 }
0x12c6   : > { %6030 = vrot.lane.b32.xlu1 %v5846_v32, %s8725_s27 }
0x12c8   : > { %v12724_v33 = vpop.permute.xlu0 %5994 }
0x12c9   : > { %5954 = vrot.lane.b32.xlu0 %v12542_v18, %s8725_s27  ;;  %v5833_v18 = vsel %vm611_vm12, %v5827_v39, %v12533_v42 }
0x12ca   : > { %5992 = vrot.lane.b32.xlu1 %v5801_v30, %s8725_s27 }
0x12cd   : > { %5976 = vrot.lane.b32.xlu0 %v5785_v45, %s8725_s27 }
0x12ce   : > { %5962 = vrot.lane.b32.xlu1 %v12529_v49, %s8725_s27  ;;  %v5847_v49 = vsel %vm628_vm14, %v12573_v28, %v12559_v10  ;;  %v12704_v28 = vpop.permute.xlu1 %5946 }
0x12d1   : > { %6026 = vrot.lane.b32.xlu0 %v12533_v42, %s8725_s27  ;;  %v5832_v42 = vsel %vm611_vm12, %v12594_v9, %v5827_v39 }
0x12d2   : > { %6008 = vrot.lane.b32.xlu1 %v5817_v15, %s8725_s27 }
0x12d5   : > { %5990 = vrot.lane.b32.xlu0 %v5800_v20, %s8725_s27 }
0x12d6   : > { %6034 = vrot.lane.b32.xlu1 %v12559_v10, %s8725_s27  ;;  %v5849_v10 = vsel %vm628_vm14, %v5843_v60, %v12537_v63 }
0x12d9   : > { %6032 = vrot.lane.b32.xlu0 %v5847_v49, %s8725_s27 }
0x12da   : > { %6024 = vrot.lane.b32.xlu1 %v5833_v18, %s8725_s27 }
0x12dd   : > { %6006 = vrot.lane.b32.xlu0 %v5816_v51, %s8725_s27 }
0x12de   : > { %6036 = vrot.lane.b32.xlu1 %v12607_v5, %s8725_s27 }
0x12e1   : > { %6028 = vrot.lane.b32.xlu0 %v12587_v57, %s8725_s27  ;;  %v5987_v57 = vpop.permute.xlu1 %5986 }
0x12e2   : > { %6040 = vrot.lane.b32.xlu1 %v5849_v10, %s8725_s27 }
0x12e5   : > { %6022 = vrot.lane.b32.xlu0 %v5832_v42, %s8725_s27  ;;  %v12722_v9 = vpop.permute.xlu1 %6002 }
0x12e6   : > { %5978 = vrot.lane.b32.xlu1 %v12535_v55, %s8725_s27  ;;  %v5848_v55 = vsel %vm628_vm14, %v12607_v5, %v5843_v60 }
0x12e9   : > { %5970 = vrot.lane.b32.xlu0 %v12546_v6, %s8725_s27  ;;  %v5865_v6 = vsel %vm645_vm15, %v5859_v24, %v12540_v25 }
0x12ea   : > { %6048 = vrot.lane.b32.xlu1 %v5863_v61, %s8725_s27 }
0x12ec   : > { %v12731_v50 = vpop.permute.xlu1 %5936 }
0x12ed   : > { %6038 = vrot.lane.b32.xlu0 %v5848_v55, %s8725_s27 }
0x12ee   : > { %6050 = vrot.lane.b32.xlu1 %v12548_v48, %s8725_s27  ;;  %v12739_v48 = vpop.permute.xlu0 %6010 }
0x12f1   : > { %6042 = vrot.lane.b32.xlu0 %v12537_v63, %s8725_s27  ;;  %v8026_v63 = vld [vmem:[%s13950_s6 + $0xc8] sm:$0xff] }
0x12f2   : > { %6056 = vrot.lane.b32.xlu1 %v5865_v6, %s8725_s27  ;;  %v12748_v21 = vpop.permute.xlu0 %5938 }
0x12f3   : > { %v6068_v29 = vsel %vm844_vm13, %v12731_v50, %v12748_v21 }
0x12f5   : > { %6046 = vrot.lane.b32.xlu0 %v5862_v7, %s8725_s27 }
0x12f6   : > { %6058 = vrot.lane.b32.xlu1 %v12540_v25, %s8725_s27  ;;  %v5864_v25 = vsel %vm645_vm15, %v12616_v17, %v5859_v24 }
0x12f8   : > { %v12744_v5 = vpop.permute.xlu1 %5950 }
0x12f9   : > { %6044 = vrot.lane.b32.xlu0 %v12555_v37, %s8725_s27  ;;  %v6436_v37 = vld [vmem:[#allocation3 + $0x40] sm:$0xff] }
0x12fa   : > { %5873 = vperm.xlu1 %8625, %v8026_v63   ;;  %v6448_v46 = vpack.c.bf16 %v6440_v27, %v6436_v37 }
0x12fc   : > { %v12753_v35 = vpop.permute.xlu1 %5968 }
0x12fd   : > { %6054 = vrot.lane.b32.xlu0 %v5864_v25, %s8725_s27 }
0x12fe   : > { %5883 = vperm.xlu1 %8625, %v8028_v44  }
0x12ff   : > { %v12758_v52 = vpop.permute.xlu0 %5980 }
0x1300   : > { %v12760_v8 = vpop.permute.xlu1 %5984 }
0x1301   : > { %6052 = vrot.lane.b32.xlu0 %v12616_v17, %s8725_s27  ;;  %v6086_v62 = vsel %vm844_vm13, %v12760_v8, %v5987_v57 }
0x1302   : > { %8289 = vmatprep.subr.bf16.mxu0 %v6086_v62  ;;  %6460 = vrot.lane.b32.xlu1 %v6444_v16, %s8718_s12 }
0x1303   : > { %8290 = vmatpush3.bf16.msra.mxu0 %v6062_v43  ;;  %v12773_v0 = vpop.permute.xlu0 %5996 }
0x1304   : > { %v12775_v17 = vpop.permute.xlu1 %5998 }
0x1305   : > { %5868 = vperm.xlu0 %8626, %v8025_v11  }
0x1306   : > { %6468 = vrot.lane.b32.xlu1 %v6448_v46, %s8718_s12 }
0x1307   : > { %v5933_v12 = vpop.permute.xlu0 %5932 }
0x1308   : > { %v12782_v53 = vpop.permute.xlu1 %6014 }
0x1309   : > { %5878 = vperm.xlu0 %8626, %v8027_v36  }
0x130a   : > { %6482 = vrot.lane.b32.xlu1 %v6444_v16, %s8719_s15 }
0x130b   : > { %v5949_v40 = vpop.permute.xlu0 %5948 }
0x130c   : > { %v12786_v41 = vpop.permute.xlu1 %5988  ;;  %v6072_v57 = vsel %vm844_vm13, %v5949_v40, %v12744_v5 }
0x130d   : > { %6656 = vrot.lane.b32.xlu0 %v6444_v16, %s8725_s27 }
0x130e   : > { %6490 = vrot.lane.b32.xlu1 %v6448_v46, %s8719_s15 }
0x130f   : > { %v5965_v58 = vpop.permute.xlu0 %5964 }
0x1310   : > { %v12795_v23 = vpop.permute.xlu1 %6004 }
0x1312   : > { %6504 = vrot.lane.b32.xlu1 %v6444_v16, %s8720_s22 }
0x1313   : > { %v5935_v39 = vpop.permute.xlu0 %5934 }
0x1314   : > { %v6067_v22 = vsel %vm844_vm13, %v5935_v39, %v12731_v50  ;;  %v6066_v38 = vsel %vm844_vm13, %v5933_v12, %v5935_v39  ;;  %v6090_v39 = vsel %vm844_vm13, %v12773_v0, %v12775_v17 }
0x1315   : > { %6178 = vmatprep.subr.bf16.mxu1 %v6067_v22 }
0x1316   : > { %6179 = vmatpush1.bf16.msra.mxu1 %v6066_v38  ;;  %6512 = vrot.lane.b32.xlu1 %v6448_v46, %s8720_s22 }
0x1317   : > { %v12793_v60 = vpop.permute.xlu0 %5952 }
0x1318   : > { %v6073_v42 = vsel %vm844_vm13, %v12744_v5, %v12793_v60 }
0x131a   : > { %6664 = vrot.lane.b32.xlu1 %v6448_v46, %s8725_s27 }
0x131b   : > { %v5967_v56 = vpop.permute.xlu0 %5966 }
0x131c   : > { %v5957_v4 = vpop.permute.xlu1 %5956  ;;  %v6079_v63 = vsel %vm844_vm13, %v5967_v56, %v12753_v35  ;;  %v6078_v3 = vsel %vm844_vm13, %v5965_v58, %v5967_v56 }
0x131f   : > { %v5983_v26 = vpop.permute.xlu0 %5982 }
0x1320   : > { %v5973_v19 = vpop.permute.xlu1 %5972  ;;  %v6085_v43 = vsel %vm844_vm13, %v5983_v26, %v12760_v8  ;;  %v6084_v11 = vsel %vm844_vm13, %v12758_v52, %v5983_v26 }
0x1323   : > { %v12798_v13 = vpop.permute.xlu0 %6000 }
0x1324   : > { %v5943_v32 = vpop.permute.xlu1 %5942  ;;  %v6092_v27 = vsel %vm844_vm13, %v12798_v13, %v12722_v9 }
0x1327   : > { %v12800_v30 = vpop.permute.xlu0 %6016 }
0x1328   : > { %v6019_v45 = vpop.permute.xlu1 %6018  ;;  %v6097_v0 = vsel %vm844_vm13, %v12782_v53, %v12800_v30 }
0x1329   : > { %v6098_v50 = vsel %vm844_vm13, %v12800_v30, %v6019_v45 }
0x132b   : > { %v5941_v15 = vpop.permute.xlu0 %5940 }
0x132c   : > { %v5959_v20 = vpop.permute.xlu1 %5958  ;;  %v6069_v10 = vsel %vm844_vm13, %v5941_v15, %v5943_v32 }
0x132d   : > { %v6075_v7 = vsel %vm844_vm13, %v5957_v4, %v5959_v20 }
0x132f   : > { %v5945_v49 = vpop.permute.xlu0 %5944 }
0x1330   : > { %v12802_v18 = vpop.permute.xlu1 %6020  ;;  %v6070_v51 = vsel %vm844_vm13, %v5943_v32, %v5945_v49  ;;  %v6071_v36 = vsel %vm844_vm13, %v5945_v49, %v12704_v28  ;;  %v6091_v28 = vsel %vm844_vm13, %v12775_v17, %v12798_v13 }
0x1331   : > { %6180 = vmatprep.subr.bf16.mxu1 %v6070_v51 }
0x1332   : > { %6181 = vmatpush1.bf16.msra.mxu1 %v6069_v10 }
0x1333   : > { %6182 = vmatprep.subr.bf16.mxu1 %v6073_v42  ;;  %v12809_v59 = vpop.permute.xlu0 %6012 }
0x1334   : > { %v5975_v61 = vpop.permute.xlu1 %5974  ;;  %v6096_v13 = vsel %vm844_vm13, %v12809_v59, %v12782_v53 }
0x1336   : > { %6183 = vmatpush1.bf16.msra.mxu1 %v6072_v57 }
0x1337   : > { %v5961_v24 = vpop.permute.xlu0 %5960 }
0x1338   : > { %v12813_v55 = vpop.permute.xlu1 %6030  ;;  %v6076_v6 = vsel %vm844_vm13, %v5959_v20, %v5961_v24 }
0x1339   : > { %6184 = vmatprep.subr.bf16.mxu1 %v6076_v6 }
0x133a   : > { %6185 = vmatpush1.bf16.msra.mxu1 %v6075_v7 }
0x133b   : > { %6186 = vmatprep.subr.bf16.mxu1 %v6079_v63  ;;  %v5955_v44 = vpop.permute.xlu0 %5954 }
0x133c   : > { %v5993_v25 = vpop.permute.xlu1 %5992 }
0x133d   : > { %v6089_v5 = vsel %vm844_vm13, %v5993_v25, %v12724_v33  ;;  %v6081_v33 = vsel %vm844_vm13, %v5973_v19, %v5975_v61 }
0x133e   : > { %6187 = vmatpush1.bf16.msra.mxu1 %v6078_v3  ;;  %8291 = vmatprep.subr.bf16.mxu0 %v6089_v5  ;;  %v8689_v5 = vld [vmem:[%s13949_s5 + $0x138] ss:$12 sps:$4 sm:$0xff]  }
0x133f   : > { %8292 = vmatpush3.bf16.msra.mxu0 %v6065_v34  ;;  %v12825_v37 = vpop.permute.xlu0 %5976 }
0x1340   : > { %v5963_v16 = vpop.permute.xlu1 %5962  ;;  %8293 = vmatprep.subr.bf16.mxu0 %v6092_v27  ;;  %v6082_v62 = vsel %vm844_vm13, %v5975_v61, %v12825_v37  ;;  %v8684_v61 = vld [vmem:[%s13949_s5 + $0x120] ss:$12 sps:$4 sm:$0xff]   ;;  %v8690_v27 = vld [vmem:[%s13949_s5 + $0x128] ss:$12 sps:$4 sm:$0xff]  }
0x1341   : > { %6188 = vmatprep.subr.bf16.mxu1 %v6082_v62 }
0x1342   : > { %6189 = vmatpush1.bf16.msra.mxu1 %v6081_v33 }
0x1343   : > { %6190 = vmatprep.subr.bf16.mxu1 %v6085_v43  ;;  %8294 = vmatpush3.bf16.msra.mxu0 %v6068_v29  ;;  %v6027_v31 = vpop.permute.xlu0 %6026  ;;  %v8691_v29 = vld [vmem:[%s13949_s5 + $0x140] ss:$12 sps:$4 sm:$0xff]  }
0x1344   : > { %v6009_v9 = vpop.permute.xlu1 %6008 }
0x1345   : > { %v6095_v46 = vsel %vm844_vm13, %v6009_v9, %v12739_v48  ;;  %v6074_v48 = vsel %vm844_vm13, %v12793_v60, %v5955_v44 }
0x1346   : > { %6191 = vmatpush1.bf16.msra.mxu1 %v6084_v11  ;;  %8295 = vmatprep.subr.bf16.mxu0 %v6095_v46 }
0x1347   : > { %8296 = vmatpush3.bf16.msra.mxu0 %v6071_v36  ;;  %v5991_v8 = vpop.permute.xlu0 %5990 }
0x1348   : > { %v6035_v21 = vpop.permute.xlu1 %6034  ;;  %8297 = vmatprep.subr.bf16.mxu0 %v6098_v50  ;;  %v6088_v12 = vsel %vm844_vm13, %v5991_v8, %v5993_v25  ;;  %v6087_v52 = vsel %vm844_vm13, %v12786_v41, %v5991_v8  ;;  %v6077_v41 = vsel %vm844_vm13, %v5961_v24, %v5963_v16 }
0x1349   : > { %6192 = vmatprep.subr.bf16.mxu1 %v6088_v12 }
0x134a   : > { %6193 = vmatpush1.bf16.msra.mxu1 %v6087_v52 }
0x134b   : > { %6194 = vmatprep.subr.bf16.mxu1 %v6091_v28  ;;  %8298 = vmatpush3.bf16.msra.mxu0 %v6074_v48  ;;  %v6033_v40 = vpop.permute.xlu0 %6032 }
0x134c   : > { %v6025_v58 = vpop.permute.xlu1 %6024  ;;  %v6104_v60 = vsel %vm844_vm13, %v6033_v40, %v6035_v21  ;;  %v6103_v30 = vsel %vm844_vm13, %v12813_v55, %v6033_v40 }
0x134d   : > { %v6101_v22 = vsel %vm844_vm13, %v6025_v58, %v6027_v31 }
0x134e   : > { %6195 = vmatpush1.bf16.msra.mxu1 %v6090_v39  ;;  %8299 = vmatprep.subr.bf16.mxu0 %v6101_v22 }
0x134f   : > { %8300 = vmatpush3.bf16.msra.mxu0 %v6077_v41  ;;  %v6007_v38 = vpop.permute.xlu0 %6006 }
0x1350   : > { %v6037_v56 = vpop.permute.xlu1 %6036  ;;  %8301 = vmatprep.subr.bf16.mxu0 %v6104_v60  ;;  %v6094_v4 = vsel %vm844_vm13, %v6007_v38, %v6009_v9  ;;  %v6093_v26 = vsel %vm844_vm13, %v12795_v23, %v6007_v38 }
0x1351   : > { %6196 = vmatprep.subr.bf16.mxu1 %v6094_v4 }
0x1352   : > { %6197 = vmatpush1.bf16.msra.mxu1 %v6093_v26 }
0x1353   : > { %6198 = vmatprep.subr.bf16.mxu1 %v6097_v0  ;;  %v6029_v17 = vpop.permute.xlu0 %6028 }
0x1354   : > { %v6041_v19 = vpop.permute.xlu1 %6040  ;;  %v6102_v53 = vsel %vm844_vm13, %v6029_v17, %v12813_v55 }
0x1356   : > { %6199 = vmatpush1.bf16.msra.mxu1 %v6096_v13 }
0x1357   : > { %v6023_v32 = vpop.permute.xlu0 %6022 }
0x1358   : > { %v5979_v45 = vpop.permute.xlu1 %5978  ;;  %v6100_v15 = vsel %vm844_vm13, %v6023_v32, %v6025_v58  ;;  %v6099_v23 = vsel %vm844_vm13, %v12802_v18, %v6023_v32 }
0x1359   : > { %6200 = vmatprep.subr.bf16.mxu1 %v6100_v15  ;;  %v6083_v6 = vsel %vm844_vm13, %v12825_v37, %v5979_v45 }
0x135a   : > { %6201 = vmatpush1.bf16.msra.mxu1 %v6099_v23 }
0x135b   : > { %6202 = vmatprep.subr.bf16.mxu1 %v6103_v30  ;;  %v5971_v20 = vpop.permute.xlu0 %5970 }
0x135c   : > { %v6080_v49 = vsel %vm844_vm13, %v12753_v35, %v5971_v20  ;;  %v6049_v51 = vpop.permute.xlu1 %6048  ;;  %v8687_v35 = vld [vmem:[%s13949_s5 + $0x13c] ss:$12 sps:$4 sm:$0xff]  }
0x135d   : > { %8302 = vmatpush3.bf16.msra.mxu0 %v6080_v49 }
0x135e   : > { %6203 = vmatpush1.bf16.msra.mxu1 %v6102_v53 }
0x135f   : > { %v6039_v10 = vpop.permute.xlu0 %6038 }
0x1360   : > { %v6051_v42 = vpop.permute.xlu1 %6050  ;;  %v6106_v18 = vsel %vm844_vm13, %v6039_v10, %v6041_v19  ;;  %v6105_v59 = vsel %vm844_vm13, %v6037_v56, %v6039_v10 }
0x1361   : > { %6204 = vmatprep.subr.bf16.mxu1 %v6106_v18  ;;  %v6110_v7 = vsel %vm844_vm13, %v6049_v51, %v6051_v42 }
0x1362   : > { %6205 = vmatpush1.bf16.msra.mxu1 %v6105_v59 }
0x1363   : > { %v6043_v57 = vpop.permute.xlu0 %6042 }
0x1364   : > { %v6057_v24 = vpop.permute.xlu1 %6056  ;;  %v6107_v55 = vsel %vm844_vm13, %v6041_v19, %v6043_v57 }
0x1365   : > { %8303 = vmatprep.subr.bf16.mxu0 %v6107_v55  ;;  %6207 = vmatmul.mubr.bf16.vlgmr.msra.gmra.mrb[72].mxu1 %v8684_v61 }
0x1366   : > { %8304 = vmatpush3.bf16.msra.mxu0 %v6083_v6  ;;  %6216 = vmatprep.mubr.bf16.mxu1 %v8687_v35 }
0x1367   : > { %8434 = vmatprep.subr.bf16.mxu0 %v6110_v7  ;;  %v6047_v63 = vpop.permute.xlu0 %6046 }
0x1368   : > { %v6059_v44 = vpop.permute.xlu1 %6058  ;;  %v6109_v25 = vsel %vm844_vm13, %v6047_v63, %v6049_v51 }
0x1369   : > { %6227 = vmatprep.subr.bf16.mxu1 %v6109_v25  ;;  %6313 = vmatmul.mubr.bf16.vlgmr.msra.gmra.mrb[68].mxu0 %v8684_v61  ;;  %v6113_v3 = vsel %vm844_vm13, %v6057_v24, %v6059_v44 }
0x136a   : > { %8435 = vmatpush3.bf16.msra.mxu0 %v6110_v7  ;;  %6320 = vmatprep.mubr.bf16.mxu0 %v8687_v35 }
0x136b   : > { %8436 = vmatprep.subr.bf16.mxu0 %v6113_v3  ;;  %v6045_v34 = vpop.permute.xlu0 %6044 }
0x136c   : > { %v6108_v37 = vsel %vm844_vm13, %v6045_v34, %v6047_v63 }
0x136d   : > { %6228 = vmatpush1.bf16.msra.mxu1 %v6108_v37 }
0x136e   : > { %8437 = vmatpush3.bf16.msra.mxu0 %v6113_v3  ;;  %6217 = vmatmul.mubr.bf16.gmra.mrb[76].mxu1 %v8689_v5 }
0x136f   : > { %v6055_v16 = vpop.permute.xlu0 %6054  ;;  %6259 = vmatprep.mubr.bf16.mxu1 %v8727_v47 }
0x1370   : > { %v6112_v62 = vsel %vm844_vm13, %v6055_v16, %v6057_v24 }
0x1371   : > { %6229 = vmatprep.subr.bf16.mxu1 %v6112_v62  ;;  %6321 = vmatmul.mubr.bf16.gmra.mrb[72].mxu0 %v8689_v5 }
0x1372   : > { %8438 = vmatprep.mubr.msk.bf16.mxu0 %vm953_vm0, %v8690_v27 }
0x1373   : > { %v6053_v33 = vpop.permute.xlu0 %6052 }
0x1374   : > { %v6111_v43 = vsel %vm844_vm13, %v6053_v33, %v6055_v16 }
0x1375   : > { %6230 = vmatpush1.bf16.msra.mxu1 %v6111_v43 }
0x1378   : > { %8035 = vmatmul.mubr.msk.bf16.vlgmr.msra.gmra.mrb[72].mxu1 %vm953_vm0, %v8690_v27 }
0x1379   : > { %8439 = vmatmul.mubr.msk.bf16.vlgmr.msra.gmra.mrb[76].mxu0 %vm953_vm0, %v8691_v29  ;;  %6269 = vmatprep.mubr.bf16.mxu1 %v8727_v47  ;;  %v5874_v12 = vpop.permute.xlu1 %5873 }
0x137d   : > { %v5884_v22 = vpop.permute.xlu1 %5883 }
0x1380   : > { %8036 = vmatmul.mubr.msk.bf16.gmra.mrb[76].mxu1 %vm953_vm0, %v8691_v29 }
0x1384   : > { %v5869_v50 = vpop.permute.xlu0 %5868 }
0x1388   : > { %v5879_v39 = vpop.permute.xlu0 %5878 }
0x143c   : > { %v8305_v31 = vpop.f32.mrb[68].mxu0 }
0x143d   : > { %v8306_v9 = vpop.f32.mrb[69].mxu0 }
0x143e   : > { %v8307_v11 = vadd.f32 %v8306_v9, %v8305_v31  ;;  %v8308_v46 = vpop.f32.mrb[70].mxu0 }
0x143f   : > { %v8309_v36 = vpop.f32.mrb[71].mxu0 }
0x1440   : > { %v8310_v8 = vadd.f32 %v8309_v36, %v8308_v46  ;;  %v6315_v26 = vadd.f32 %v8307_v11, %v5869_v50 }
0x1442   : > { %v6318_v49 = vadd.f32 %v8310_v8, %v5874_v12 }
0x1444   : > { %v8311_v21 = vpop.f32.mrb[72].mxu0 }
0x1445   : > { %v8312_v52 = vpop.f32.mrb[73].mxu0 }
0x1446   : > { %v8313_v48 = vadd.f32 %v8312_v52, %v8311_v21  ;;  %v8314_v28 = vpop.f32.mrb[74].mxu0 }
0x1447   : > { %v8315_v40 = vpop.f32.mrb[75].mxu0 }
0x1448   : > { %v8316_v58 = vadd.f32 %v8315_v40, %v8314_v28  ;;  %v6323_v38 = vadd.f32 %v8313_v48, %v5879_v39 }
0x144a   : > { %v6326_v32 = vadd.f32 %v8316_v58, %v5884_v22 }
0x144b   : > { %v6261_v41 = vpop.f32.mrb[72].mxu1 }
0x144c   : > { %v8514_v60 = vadd.f32 %v6261_v41, %v5869_v50  ;;  %v6263_v56 = vpop.f32.mrb[73].mxu1  ;;  %v8440_v4 = vpop.f32.mrb[76].mxu0 }
0x144d   : > { %v8515_v0 = vadd.f32 %v6263_v56, %v5869_v50  ;;  %v6372_v17 = vadd.f32 %v8440_v4, %v6323_v38  ;;  %v6265_v19 = vpop.f32.mrb[74].mxu1  ;;  %v6363_v13 = vpop.f32.mrb[77].mxu0 }
0x144e   : > { %v6378_v45 = vmax.f32 %v8514_v60, 0.0  ;;  %v8516_v15 = vadd.f32 %v6265_v19, %v5874_v12  ;;  %v6364_v23 = vadd.f32 %v6363_v13, %v6315_v26  ;;  %v6267_v30 = vpop.f32.mrb[75].mxu1  ;;  %v8441_v20 = vpop.f32.mrb[78].mxu0 }
0x144f   : > { %v6379_v51 = vmax.f32 %v8515_v0, 0.0  ;;  %v6386_v53 = vmax.f32 %v6372_v17, 0.0  ;;  %v8517_v10 = vadd.f32 %v6267_v30, %v5874_v12  ;;  %v6375_v42 = vadd.f32 %v8441_v20, %v6326_v32  ;;  %v6366_v18 = vpop.f32.mrb[79].mxu0  ;;  %v12966_v56 = vpop.permute.xlu1 %6460 }
0x1450   : > { %v6390_v59 = vmul.f32 %v6378_v45, %v9393_v1  ;;  %v6381_v61 = vmax.f32 %v8516_v15, 0.0  ;;  %v6380_v35 = vmax.f32 %v6364_v23, 0.0  ;;  %v6367_v57 = vadd.f32 %v6366_v18, %v6318_v49  ;;  %v13003_v32 = vpop.permute.xlu0 %6656 }
0x1451   : > { %v6391_v24 = vmul.f32 %v6379_v51, %v9401_v54  ;;  %v6398_v55 = vmul.f32 %v6386_v53, %v9397_v14  ;;  %v6382_v6 = vmax.f32 %v8517_v10, 0.0  ;;  %v6389_v7 = vmax.f32 %v6375_v42, 0.0 }
0x1452   : > { %6402 = vst [vmem:[#allocation3 + $0x8] sm:$0xff] %v6390_v59  ;;  %v6393_v63 = vmul.f32 %v6381_v61, %v9393_v1  ;;  %v6392_v44 = vmul.f32 %v6380_v35, %v9397_v14  ;;  %v6383_v25 = vmax.f32 %v6367_v57, 0.0 }
0x1453   : > { %6403 = vst [vmem:[#allocation3 + $0x10] sm:$0xff] %v6391_v24  ;;  %6410 = vst.msk [vmem:[#allocation3 + $0x58] sm:$0xff] %vm953_vm0, %v6398_v55  ;;  %v6394_v3 = vmul.f32 %v6382_v6, %v9401_v54  ;;  %v6401_v5 = vmul.f32 %v6389_v7, %v9397_v14  ;;  %v6271_v34 = vpop.f32.mrb[76].mxu1  ;;  %v12970_v4 = vpop.permute.xlu1 %6468 }
0x1454   : > { %6404 = vst.msk [vmem:[#allocation3 + $0x18] sm:$0xff] %vm953_vm0, %v6392_v44  ;;  %v6395_v37 = vmul.f32 %v6383_v25, %v9397_v14  ;;  %v8518_v27 = vadd.f32 %v6271_v34, %v5879_v39  ;;  %v6273_v16 = vpop.f32.mrb[77].mxu1  ;;  %v6445_v62 = vpack.c.bf16 %v6393_v63, %v6390_v59 }
0x1455   : > { %6413 = vst.msk [vmem:[#allocation3 + $0x78] sm:$0xff] %vm953_vm0, %v6401_v5  ;;  %v8519_v33 = vadd.f32 %v6273_v16, %v5879_v39  ;;  %v6275_v43 = vpop.f32.mrb[78].mxu1  ;;  %v6446_v29 = vpack.c.bf16 %v6394_v3, %v6391_v24 }
0x1456   : > { %6407 = vst.msk [vmem:[#allocation3 + $0x38] sm:$0xff] %vm953_vm0, %v6395_v37  ;;  %v6384_v31 = vmax.f32 %v8518_v27, 0.0  ;;  %v8520_v9 = vadd.f32 %v6275_v43, %v5884_v22  ;;  %v6277_v11 = vpop.f32.mrb[79].mxu1 }
0x1457   : > { %v6385_v46 = vmax.f32 %v8519_v33, 0.0  ;;  %v8521_v36 = vadd.f32 %v6277_v11, %v5884_v22  ;;  %v12976_v26 = vpop.permute.xlu1 %6482 }
0x1458   : > { %v6396_v8 = vmul.f32 %v6384_v31, %v9393_v1  ;;  %v6387_v50 = vmax.f32 %v8520_v9, 0.0 }
0x1459   : > { %v6397_v21 = vmul.f32 %v6385_v46, %v9401_v54  ;;  %v6388_v12 = vmax.f32 %v8521_v36, 0.0 }
0x145a   : > { %v6399_v52 = vmul.f32 %v6387_v50, %v9393_v1  ;;  %v6439_v28 = vld [vmem:[#allocation3 + $0x58] sm:$0xff] }
0x145b   : > { %v6400_v48 = vmul.f32 %v6388_v12, %v9401_v54  ;;  %v6431_v38 = vld [vmem:[#allocation3 + $0x18] sm:$0xff]  ;;  %v12981_v0 = vpop.permute.xlu1 %6490 }
0x145c   : > { %v6443_v40 = vld [vmem:[#allocation3 + $0x78] sm:$0xff]  ;;  %v6449_v58 = vpack.c.bf16 %v6399_v52, %v6396_v8 }
0x145d   : > { %v6451_v39 = vpack.c.bf16 %v6443_v40, %v6439_v28  ;;  %v12926_v41 = vpack.c.bf16 %v6400_v48, %v6397_v21  ;;  %v6435_v22 = vld [vmem:[#allocation3 + $0x38] sm:$0xff] }
0x145e   : > { %v6447_v60 = vpack.c.bf16 %v6435_v22, %v6431_v38 }
0x145f   : > { %6536 = vrot.lane.b32.xlu1 %v6451_v39, %s8721_s23  ;;  %6474 = vrot.lane.b32.xlu0 %v6451_v39, %s8718_s12  ;;  %v12991_v17 = vpop.permute.xlu1 %6504 }
0x1463   : > { %6552 = vrot.lane.b32.xlu1 %v6451_v39, %s8722_s24  ;;  %6496 = vrot.lane.b32.xlu0 %v6451_v39, %s8719_s15  ;;  %v12995_v19 = vpop.permute.xlu1 %6512 }
0x1467   : > { %6568 = vrot.lane.b32.xlu1 %v6451_v39, %s8723_s25  ;;  %6518 = vrot.lane.b32.xlu0 %v6451_v39, %s8720_s22  ;;  %v13001_v13 = vpop.permute.xlu1 %6664 }
0x146b   : > { %6584 = vrot.lane.b32.xlu1 %v6451_v39, %s8724_s26  ;;  %6466 = vrot.lane.b32.xlu0 %v6447_v60, %s8718_s12 }
0x146f   : > { %6600 = vrot.lane.b32.xlu1 %v6451_v39, %s8726_s28  ;;  %6488 = vrot.lane.b32.xlu0 %v6447_v60, %s8719_s15 }
0x1473   : > { %6670 = vrot.lane.b32.xlu1 %v6451_v39, %s8725_s27  ;;  %6510 = vrot.lane.b32.xlu0 %v6447_v60, %s8720_s22 }
0x1477   : > { %6594 = vrot.lane.b32.xlu1 %v6447_v60, %s8726_s28  ;;  %6530 = vrot.lane.b32.xlu0 %v6447_v60, %s8721_s23 }
0x147b   : > { %6658 = vrot.lane.b32.xlu1 %v6445_v62, %s8725_s27  ;;  %6546 = vrot.lane.b32.xlu0 %v6447_v60, %s8722_s24 }
0x147f   : > { %6590 = vrot.lane.b32.xlu1 %v6445_v62, %s8726_s28  ;;  %6562 = vrot.lane.b32.xlu0 %v6447_v60, %s8723_s25 }
0x1483   : > { %6464 = vrot.lane.b32.xlu1 %v6446_v29, %s8718_s12  ;;  %6578 = vrot.lane.b32.xlu0 %v6447_v60, %s8724_s26 }
0x1487   : > { %6486 = vrot.lane.b32.xlu1 %v6446_v29, %s8719_s15  ;;  %6662 = vrot.lane.b32.xlu0 %v6447_v60, %s8725_s27 }
0x148b   : > { %6508 = vrot.lane.b32.xlu1 %v6446_v29, %s8720_s22  ;;  %6462 = vrot.lane.b32.xlu0 %v6445_v62, %s8718_s12 }
0x148f   : > { %6528 = vrot.lane.b32.xlu1 %v6446_v29, %s8721_s23  ;;  %6484 = vrot.lane.b32.xlu0 %v6445_v62, %s8719_s15 }
0x1493   : > { %6544 = vrot.lane.b32.xlu1 %v6446_v29, %s8722_s24  ;;  %6506 = vrot.lane.b32.xlu0 %v6445_v62, %s8720_s22 }
0x1497   : > { %6560 = vrot.lane.b32.xlu1 %v6446_v29, %s8723_s25  ;;  %6526 = vrot.lane.b32.xlu0 %v6445_v62, %s8721_s23 }
0x149b   : > { %6576 = vrot.lane.b32.xlu1 %v6446_v29, %s8724_s26  ;;  %6542 = vrot.lane.b32.xlu0 %v6445_v62, %s8722_s24 }
0x149f   : > { %6532 = vrot.lane.b32.xlu1 %v6449_v58, %s8721_s23  ;;  %6558 = vrot.lane.b32.xlu0 %v6445_v62, %s8723_s25 }
0x14a3   : > { %6548 = vrot.lane.b32.xlu1 %v6449_v58, %s8722_s24  ;;  %6574 = vrot.lane.b32.xlu0 %v6445_v62, %s8724_s26 }
0x14a7   : > { %6564 = vrot.lane.b32.xlu1 %v6449_v58, %s8723_s25  ;;  %6660 = vrot.lane.b32.xlu0 %v6446_v29, %s8725_s27 }
0x14ab   : > { %6580 = vrot.lane.b32.xlu1 %v6449_v58, %s8724_s26  ;;  %6592 = vrot.lane.b32.xlu0 %v6446_v29, %s8726_s28 }
0x14af   : > { %6666 = vrot.lane.b32.xlu1 %v6449_v58, %s8725_s27  ;;  %6470 = vrot.lane.b32.xlu0 %v6449_v58, %s8718_s12 }
0x14b3   : > { %6596 = vrot.lane.b32.xlu1 %v6449_v58, %s8726_s28  ;;  %6492 = vrot.lane.b32.xlu0 %v6449_v58, %s8719_s15 }
0x14b7   : > { %6472 = vrot.lane.b32.xlu1 %v12926_v41, %s8718_s12  ;;  %6514 = vrot.lane.b32.xlu0 %v6449_v58, %s8720_s22 }
0x14bb   : > { %6494 = vrot.lane.b32.xlu1 %v12926_v41, %s8719_s15  ;;  %6534 = vrot.lane.b32.xlu0 %v12926_v41, %s8721_s23 }
0x14bf   : > { %6516 = vrot.lane.b32.xlu1 %v12926_v41, %s8720_s22  ;;  %6550 = vrot.lane.b32.xlu0 %v12926_v41, %s8722_s24 }
0x14c3   : > { %6566 = vrot.lane.b32.xlu0 %v12926_v41, %s8723_s25 }
0x14c7   : > { %6582 = vrot.lane.b32.xlu0 %v12926_v41, %s8724_s26 }
0x14cb   : > { %6668 = vrot.lane.b32.xlu0 %v12926_v41, %s8725_s27 }
0x14cf   : > { %6598 = vrot.lane.b32.xlu0 %v12926_v41, %s8726_s28 }
0x14d1   : > { %v13007_v45 = vpop.permute.xlu1 %6536  ;;  %v13009_v15 = vpop.permute.xlu0 %6474 }
0x14d2   : > { %6686 = vrot.lane.b32.xlu1 %v13009_v15, %s8725_s27 }
0x14d3   : > { %6734 = vrot.lane.b32.xlu0 %v13007_v45, %s8725_s27 }
0x14d5   : > { %v13015_v23 = vpop.permute.xlu1 %6552  ;;  %v13017_v30 = vpop.permute.xlu0 %6496 }
0x14d7   : > { %6750 = vrot.lane.b32.xlu0 %v13015_v23, %s8725_s27 }
0x14d9   : > { %v13021_v20 = vpop.permute.xlu1 %6568  ;;  %v13023_v49 = vpop.permute.xlu0 %6518 }
0x14dd   : > { %v13025_v51 = vpop.permute.xlu1 %6584  ;;  %v6467_v53 = vpop.permute.xlu0 %6466 }
0x14de   : > { %6678 = vrot.lane.b32.xlu0 %v6467_v53, %s8725_s27 }
0x14e1   : > { %v13028_v10 = vpop.permute.xlu1 %6600  ;;  %v13030_v42 = vpop.permute.xlu0 %6488 }
0x14e5   : > { %v13032_v18 = vpop.permute.xlu1 %6670  ;;  %v13034_v59 = vpop.permute.xlu0 %6510 }
0x14e9   : > { %v13036_v61 = vpop.permute.xlu1 %6594  ;;  %v6531_v35 = vpop.permute.xlu0 %6530 }
0x14ea   : > { %6726 = vrot.lane.b32.xlu1 %v6531_v35, %s8725_s27 }
0x14ed   : > { %v6659_v57 = vpop.permute.xlu1 %6658  ;;  %v13039_v24 = vpop.permute.xlu0 %6546 }
0x14ee   : > { %6742 = vrot.lane.b32.xlu1 %v13039_v24, %s8725_s27  ;;  %v6800_v22 = vsel %vm844_vm13, %v13003_v32, %v6659_v57 }
0x14f1   : > { %v13043_v55 = vpop.permute.xlu1 %6590  ;;  %v13045_v6 = vpop.permute.xlu0 %6562 }
0x14f5   : > { %v6465_v7 = vpop.permute.xlu1 %6464  ;;  %v13047_v63 = vpop.permute.xlu0 %6578 }
0x14f6   : > { %v6478_v44 = vsel %vm512_vm5, %v6465_v7, %v6467_v53 }
0x14f7   : > { %6676 = vrot.lane.b32.xlu1 %v6478_v44, %s8725_s27 }
0x14f9   : > { %v6487_v25 = vpop.permute.xlu1 %6486  ;;  %v13051_v3 = vpop.permute.xlu0 %6662 }
0x14fa   : > { %v6500_v53 = vsel %vm535_vm9, %v6487_v25, %v13030_v42 }
0x14fd   : > { %v6509_v5 = vpop.permute.xlu1 %6508  ;;  %v6463_v34 = vpop.permute.xlu0 %6462 }
0x14fe   : > { %v6522_v43 = vsel %vm419_vm8, %v6509_v5, %v13034_v59  ;;  %v6476_v21 = vsel %vm512_vm5, %v12966_v56, %v6463_v34  ;;  %v6477_v56 = vsel %vm512_vm5, %v6463_v34, %v6465_v7 }
0x1501   : > { %v6529_v37 = vpop.permute.xlu1 %6528  ;;  %v6485_v27 = vpop.permute.xlu0 %6484 }
0x1502   : > { %v6499_v16 = vsel %vm535_vm9, %v6485_v27, %v6487_v25  ;;  %v6539_v9 = vsel %vm577_vm10, %v6529_v37, %v6531_v35  ;;  %v6498_v28 = vsel %vm535_vm9, %v12976_v26, %v6485_v27 }
0x1503   : > { %6690 = vrot.lane.b32.xlu1 %v6499_v16, %s8725_s27 }
0x1505   : > { %v6545_v62 = vpop.permute.xlu1 %6544  ;;  %v6507_v33 = vpop.permute.xlu0 %6506 }
0x1506   : > { %v6520_v39 = vsel %vm419_vm8, %v12991_v17, %v6507_v33  ;;  %v6521_v32 = vsel %vm419_vm8, %v6507_v33, %v6509_v5  ;;  %v6555_v5 = vsel %vm594_vm11, %v6545_v62, %v13039_v24 }
0x1507   : > { %6708 = vrot.lane.b32.xlu1 %v6522_v43, %s8725_s27 }
0x1509   : > { %v6561_v29 = vpop.permute.xlu1 %6560  ;;  %v6527_v31 = vpop.permute.xlu0 %6526 }
0x150a   : > { %6720 = vrot.lane.b32.xlu0 %v6527_v31, %s8725_s27  ;;  %v6538_v34 = vsel %vm577_vm10, %v6527_v31, %v6529_v37  ;;  %v6571_v37 = vsel %vm611_vm12, %v6561_v29, %v13045_v6 }
0x150b   : > { %6724 = vrot.lane.b32.xlu1 %v6539_v9, %s8725_s27 }
0x150d   : > { %v13061_v11 = vpop.permute.xlu1 %6576  ;;  %v6543_v46 = vpop.permute.xlu0 %6542 }
0x150e   : > { %6736 = vrot.lane.b32.xlu0 %v6543_v46, %s8725_s27  ;;  %v6554_v36 = vsel %vm594_vm11, %v6543_v46, %v6545_v62 }
0x150f   : > { %6738 = vrot.lane.b32.xlu1 %v6554_v36, %s8725_s27 }
0x1511   : > { %v13066_v8 = vpop.permute.xlu1 %6532  ;;  %v6559_v50 = vpop.permute.xlu0 %6558 }
0x1512   : > { %6672 = vrot.lane.b32.xlu0 %v6476_v21, %s8725_s27  ;;  %v6570_v12 = vsel %vm611_vm12, %v6559_v50, %v6561_v29 }
0x1513   : > { %6754 = vrot.lane.b32.xlu1 %v6570_v12, %s8725_s27 }
0x1515   : > { %v13073_v52 = vpop.permute.xlu1 %6548  ;;  %v13075_v48 = vpop.permute.xlu0 %6574 }
0x1516   : > { %6688 = vrot.lane.b32.xlu0 %v6498_v28, %s8725_s27 }
0x1517   : > { %6728 = vrot.lane.b32.xlu1 %v13066_v8, %s8725_s27 }
0x1519   : > { %v13082_v40 = vpop.permute.xlu1 %6564  ;;  %v13084_v58 = vpop.permute.xlu0 %6660 }
0x151a   : > { %6704 = vrot.lane.b32.xlu0 %v6520_v39, %s8725_s27  ;;  %v6801_v41 = vsel %vm844_vm13, %v6659_v57, %v13084_v58 }
0x151b   : > { %6744 = vrot.lane.b32.xlu1 %v13073_v52, %s8725_s27  ;;  %6914 = vmatprep.subr.bf16.mxu0 %v6801_v41 }
0x151c   : > { %6915 = vmatpush1.bf16.msra.mxu0 %v6800_v22 }
0x151d   : > { %v13095_v38 = vpop.permute.xlu1 %6580  ;;  %v13097_v60 = vpop.permute.xlu0 %6592 }
0x151e   : > { %6674 = vrot.lane.b32.xlu0 %v6477_v56, %s8725_s27  ;;  %v6602_v22 = vsel %vm645_vm15, %v13043_v55, %v13097_v60 }
0x1521   : > { %v6667_v26 = vpop.permute.xlu1 %6666  ;;  %v6471_v17 = vpop.permute.xlu0 %6470 }
0x1522   : > { %6692 = vrot.lane.b32.xlu0 %v6500_v53, %s8725_s27  ;;  %v6479_v24 = vsel %vm512_vm5, %v12970_v4, %v6471_v17 }
0x1525   : > { %v13104_v35 = vpop.permute.xlu1 %6596  ;;  %v6493_v44 = vpop.permute.xlu0 %6492 }
0x1526   : > { %6706 = vrot.lane.b32.xlu0 %v6521_v32, %s8725_s27  ;;  %v6501_v57 = vsel %vm535_vm9, %v12981_v0, %v6493_v44  ;;  %v8047_v32 = vld [vmem:[%s13950_s6 + $0xe0] sm:$0xff] }
0x1527   : > { %6696 = vrot.lane.b32.xlu1 %v6501_v57, %s8725_s27 }
0x1529   : > { %v6515_v7 = vpop.permute.xlu0 %6514  ;;  %v6473_v27 = vpop.permute.xlu1 %6472 }
0x152a   : > { %6722 = vrot.lane.b32.xlu0 %v6538_v34, %s8725_s27  ;;  %v6523_v25 = vsel %vm419_vm8, %v12995_v19, %v6515_v7  ;;  %v6480_v0 = vsel %vm512_vm5, %v6471_v17, %v6473_v27  ;;  %v6481_v29 = vsel %vm512_vm5, %v6473_v27, %v13009_v15  ;;  %v6803_v15 = vsel %vm844_vm13, %v13001_v13, %v6667_v26 }
0x152b   : > { %6712 = vrot.lane.b32.xlu1 %v6523_v25, %s8725_s27 }
0x152d   : > { %v6535_v16 = vpop.permute.xlu0 %6534  ;;  %v6495_v19 = vpop.permute.xlu1 %6494 }
0x152e   : > { %6740 = vrot.lane.b32.xlu0 %v6555_v5, %s8725_s27  ;;  %v6502_v62 = vsel %vm535_vm9, %v6493_v44, %v6495_v19  ;;  %v6503_v36 = vsel %vm535_vm9, %v6495_v19, %v13017_v30  ;;  %v6541_v21 = vsel %vm577_vm10, %v6535_v16, %v13007_v45  ;;  %v6540_v45 = vsel %vm577_vm10, %v13066_v8, %v6535_v16  ;;  %v8694_v8 = vld [vmem:[%s13949_s5 + $0x154] ss:$12 sps:$4 sm:$0xff]  }
0x152f   : > { %6682 = vrot.lane.b32.xlu1 %v6480_v0, %s8725_s27  ;;  %6946 = vmatprep.mubr.bf16.mxu0 %v8694_v8  ;;  %v6802_v44 = vsel %vm844_vm13, %v13084_v58, %v13051_v3 }
0x1530   : > { %7052 = vmatprep.mubr.bf16.mxu1 %v8694_v8 }
0x1531   : > { %v6551_v33 = vpop.permute.xlu0 %6550  ;;  %v6517_v9 = vpop.permute.xlu1 %6516 }
0x1532   : > { %6756 = vrot.lane.b32.xlu0 %v6571_v37, %s8725_s27  ;;  %v6524_v4 = vsel %vm419_vm8, %v6515_v7, %v6517_v9  ;;  %v6525_v13 = vsel %vm419_vm8, %v6517_v9, %v13023_v49  ;;  %v6557_v12 = vsel %vm594_vm11, %v6551_v33, %v13015_v23  ;;  %v6556_v23 = vsel %vm594_vm11, %v13073_v52, %v6551_v33 }
0x1533   : > { %6758 = vrot.lane.b32.xlu1 %v13045_v6, %s8725_s27  ;;  %v6603_v52 = vsel %vm645_vm15, %v13097_v60, %v13036_v61  ;;  %v8050_v60 = vld [vmem:[%s13950_s6 + $0xf8] sm:$0xff] }
0x1535   : > { %v6567_v43 = vpop.permute.xlu0 %6566 }
0x1536   : > { %6680 = vrot.lane.b32.xlu0 %v6479_v24, %s8725_s27 }
0x1537   : > { %6698 = vrot.lane.b32.xlu1 %v6502_v62, %s8725_s27 }
0x1539   : > { %v6583_v31 = vpop.permute.xlu0 %6582 }
0x153a   : > { %6684 = vrot.lane.b32.xlu0 %v6481_v29, %s8725_s27 }
0x153b   : > { %6760 = vrot.lane.b32.xlu1 %v13082_v40, %s8725_s27 }
0x153d   : > { %v13136_v6 = vpop.permute.xlu0 %6668 }
0x153e   : > { %6752 = vrot.lane.b32.xlu0 %v6559_v50, %s8725_s27  ;;  %v6804_v46 = vsel %vm844_vm13, %v6667_v26, %v13136_v6  ;;  %v6586_v50 = vsel %vm628_vm14, %v13075_v48, %v13061_v11 }
0x153f   : > { %6714 = vrot.lane.b32.xlu1 %v6524_v4, %s8725_s27  ;;  %6916 = vmatprep.subr.bf16.mxu0 %v6804_v46 }
0x1540   : > { %6917 = vmatpush1.bf16.msra.mxu0 %v6803_v15 }
0x1541   : > { %v6599_v28 = vpop.permute.xlu0 %6598 }
0x1542   : > { %6700 = vrot.lane.b32.xlu0 %v6503_v36, %s8725_s27 }
0x1543   : > { %6770 = vrot.lane.b32.xlu1 %v6586_v50, %s8725_s27 }
0x1545   : > { %v13212_v39 = vpop.permute.xlu0 %6734 }
0x1546   : > { %6694 = vrot.lane.b32.xlu0 %v13030_v42, %s8725_s27  ;;  %v6573_v42 = vsel %vm611_vm12, %v6567_v43, %v13021_v20 }
0x1547   : > { %6732 = vrot.lane.b32.xlu1 %v6541_v21, %s8725_s27 }
0x154a   : > { %6716 = vrot.lane.b32.xlu0 %v6525_v13, %s8725_s27 }
0x154b   : > { %6702 = vrot.lane.b32.xlu1 %v13017_v30, %s8725_s27  ;;  %v6587_v30 = vsel %vm628_vm14, %v13061_v11, %v13047_v63  ;;  %v13192_v11 = vpop.permute.xlu1 %6686 }
0x154e   : > { %6766 = vrot.lane.b32.xlu0 %v13021_v20, %s8725_s27  ;;  %v6572_v20 = vsel %vm611_vm12, %v13082_v40, %v6567_v43 }
0x154f   : > { %6748 = vrot.lane.b32.xlu1 %v6557_v12, %s8725_s27 }
0x1552   : > { %6730 = vrot.lane.b32.xlu0 %v6540_v45, %s8725_s27 }
0x1553   : > { %6774 = vrot.lane.b32.xlu1 %v13047_v63, %s8725_s27  ;;  %v6589_v63 = vsel %vm628_vm14, %v6583_v31, %v13025_v51 }
0x1556   : > { %6772 = vrot.lane.b32.xlu0 %v6587_v30, %s8725_s27 }
0x1557   : > { %6764 = vrot.lane.b32.xlu1 %v6573_v42, %s8725_s27 }
0x155a   : > { %6746 = vrot.lane.b32.xlu0 %v6556_v23, %s8725_s27 }
0x155b   : > { %6776 = vrot.lane.b32.xlu1 %v13095_v38, %s8725_s27 }
0x155e   : > { %6768 = vrot.lane.b32.xlu0 %v13075_v48, %s8725_s27  ;;  %v6727_v48 = vpop.permute.xlu1 %6726 }
0x155f   : > { %6780 = vrot.lane.b32.xlu1 %v6589_v63, %s8725_s27 }
0x1562   : > { %6762 = vrot.lane.b32.xlu0 %v6572_v20, %s8725_s27  ;;  %v13210_v40 = vpop.permute.xlu1 %6742 }
0x1563   : > { %6718 = vrot.lane.b32.xlu1 %v13023_v49, %s8725_s27  ;;  %v6588_v49 = vsel %vm628_vm14, %v13095_v38, %v6583_v31 }
0x1566   : > { %6710 = vrot.lane.b32.xlu0 %v13034_v59, %s8725_s27  ;;  %v6605_v59 = vsel %vm645_vm15, %v6599_v28, %v13028_v10 }
0x1567   : > { %6788 = vrot.lane.b32.xlu1 %v6603_v52, %s8725_s27 }
0x1569   : > { %v13219_v41 = vpop.permute.xlu1 %6676 }
0x156a   : > { %6778 = vrot.lane.b32.xlu0 %v6588_v49, %s8725_s27 }
0x156b   : > { %6790 = vrot.lane.b32.xlu1 %v13036_v61, %s8725_s27  ;;  %v13227_v61 = vpop.permute.xlu0 %6750 }
0x156e   : > { %6782 = vrot.lane.b32.xlu0 %v13025_v51, %s8725_s27  ;;  %v8048_v51 = vld [vmem:[%s13950_s6 + $0xe8] sm:$0xff] }
0x156f   : > { %6796 = vrot.lane.b32.xlu1 %v6605_v59, %s8725_s27  ;;  %v13234_v56 = vpop.permute.xlu0 %6678 }
0x1572   : > { %6786 = vrot.lane.b32.xlu0 %v6602_v22, %s8725_s27  ;;  %v6805_v22 = vsel %vm844_vm13, %v13136_v6, %v13032_v18  ;;  %v6808_v18 = vsel %vm844_vm13, %v13219_v41, %v13234_v56 }
0x1573   : > { %6798 = vrot.lane.b32.xlu1 %v13028_v10, %s8725_s27  ;;  %v6604_v10 = vsel %vm645_vm15, %v13104_v35, %v6599_v28 }
0x1575   : > { %v6691_v38 = vpop.permute.xlu1 %6690 }
0x1576   : > { %6784 = vrot.lane.b32.xlu0 %v13043_v55, %s8725_s27 }
0x1577   : > { %6613 = vperm.xlu1 %8625, %v8048_v51  }
0x1579   : > { %v13239_v26 = vpop.permute.xlu1 %6708 }
0x157a   : > { %6794 = vrot.lane.b32.xlu0 %v6604_v10, %s8725_s27 }
0x157b   : > { %6623 = vperm.xlu1 %8625, %v8050_v60  }
0x157c   : > { %v13244_v17 = vpop.permute.xlu0 %6720 }
0x157d   : > { %v13246_v53 = vpop.permute.xlu1 %6724 }
0x157e   : > { %6792 = vrot.lane.b32.xlu0 %v13104_v35, %s8725_s27  ;;  %v6826_v55 = vsel %vm844_vm13, %v13246_v53, %v6727_v48  ;;  %v8049_v35 = vld [vmem:[%s13950_s6 + $0xf0] sm:$0xff] }
0x157f   : > { %8321 = vmatprep.subr.bf16.mxu1 %v6826_v55 }
0x1580   : > { %8322 = vmatpush3.bf16.msra.mxu1 %v6802_v44  ;;  %v13258_v57 = vpop.permute.xlu0 %6736 }
0x1581   : > { %v13260_v7 = vpop.permute.xlu1 %6738 }
0x1582   : > { %6608 = vperm.xlu0 %8626, %v8047_v32  }
0x1584   : > { %v6673_v34 = vpop.permute.xlu0 %6672 }
0x1585   : > { %v13265_v27 = vpop.permute.xlu1 %6754 }
0x1586   : > { %6618 = vperm.xlu0 %8626, %v8049_v35  }
0x1588   : > { %v6689_v25 = vpop.permute.xlu0 %6688 }
0x1589   : > { %v13267_v58 = vpop.permute.xlu1 %6728  ;;  %v6812_v42 = vsel %vm844_vm13, %v6689_v25, %v6691_v38 }
0x158c   : > { %v6705_v3 = vpop.permute.xlu0 %6704 }
0x158d   : > { %v13274_v37 = vpop.permute.xlu1 %6744 }
0x1590   : > { %v6675_v16 = vpop.permute.xlu0 %6674 }
0x1591   : > { %v6807_v5 = vsel %vm844_vm13, %v6675_v16, %v13219_v41  ;;  %v6806_v0 = vsel %vm844_vm13, %v6673_v34, %v6675_v16  ;;  %v6830_v16 = vsel %vm844_vm13, %v13258_v57, %v13260_v7 }
0x1592   : > { %6918 = vmatprep.subr.bf16.mxu0 %v6807_v5 }
0x1593   : > { %6919 = vmatpush1.bf16.msra.mxu0 %v6806_v0 }
0x1594   : > { %v13272_v33 = vpop.permute.xlu0 %6692 }
0x1595   : > { %v6813_v12 = vsel %vm844_vm13, %v6691_v38, %v13272_v33 }
0x1598   : > { %v6707_v19 = vpop.permute.xlu0 %6706 }
0x1599   : > { %v6697_v43 = vpop.permute.xlu1 %6696  ;;  %v6819_v52 = vsel %vm844_vm13, %v6707_v19, %v13239_v26  ;;  %v6818_v49 = vsel %vm844_vm13, %v6705_v3, %v6707_v19 }
0x159c   : > { %v6723_v24 = vpop.permute.xlu0 %6722 }
0x159d   : > { %v6713_v62 = vpop.permute.xlu1 %6712  ;;  %v6825_v55 = vsel %vm844_vm13, %v6723_v24, %v13246_v53  ;;  %v6824_v44 = vsel %vm844_vm13, %v13244_v17, %v6723_v24 }
0x15a0   : > { %v13276_v31 = vpop.permute.xlu0 %6740 }
0x15a1   : > { %v6683_v29 = vpop.permute.xlu1 %6682  ;;  %v6832_v38 = vsel %vm844_vm13, %v13276_v31, %v13210_v40 }
0x15a4   : > { %v13278_v9 = vpop.permute.xlu0 %6756 }
0x15a5   : > { %v6759_v4 = vpop.permute.xlu1 %6758  ;;  %v6837_v57 = vsel %vm844_vm13, %v13265_v27, %v13278_v9 }
0x15a6   : > { %v6838_v41 = vsel %vm844_vm13, %v13278_v9, %v6759_v4 }
0x15a8   : > { %v6681_v46 = vpop.permute.xlu0 %6680 }
0x15a9   : > { %v6699_v15 = vpop.permute.xlu1 %6698  ;;  %v6809_v13 = vsel %vm844_vm13, %v6681_v46, %v6683_v29 }
0x15aa   : > { %v6815_v8 = vsel %vm844_vm13, %v6697_v43, %v6699_v15 }
0x15ac   : > { %v6685_v36 = vpop.permute.xlu0 %6684 }
0x15ad   : > { %v13280_v50 = vpop.permute.xlu1 %6760  ;;  %v6810_v21 = vsel %vm844_vm13, %v6683_v29, %v6685_v36  ;;  %v6811_v35 = vsel %vm844_vm13, %v6685_v36, %v13192_v11  ;;  %v6831_v11 = vsel %vm844_vm13, %v13260_v7, %v13276_v31 }
0x15ae   : > { %6920 = vmatprep.subr.bf16.mxu0 %v6810_v21 }
0x15af   : > { %6921 = vmatpush1.bf16.msra.mxu0 %v6809_v13 }
0x15b0   : > { %6922 = vmatprep.subr.bf16.mxu0 %v6813_v12  ;;  %v13286_v45 = vpop.permute.xlu0 %6752 }
0x15b1   : > { %v6715_v30 = vpop.permute.xlu1 %6714  ;;  %v6836_v31 = vsel %vm844_vm13, %v13286_v45, %v13265_v27 }
0x15b3   : > { %6923 = vmatpush1.bf16.msra.mxu0 %v6812_v42 }
0x15b4   : > { %v6701_v23 = vpop.permute.xlu0 %6700 }
0x15b5   : > { %v13289_v63 = vpop.permute.xlu1 %6770  ;;  %v6816_v20 = vsel %vm844_vm13, %v6699_v15, %v6701_v23 }
0x15b6   : > { %6924 = vmatprep.subr.bf16.mxu0 %v6816_v20 }
0x15b7   : > { %6925 = vmatpush1.bf16.msra.mxu0 %v6815_v8 }
0x15b8   : > { %6926 = vmatprep.subr.bf16.mxu0 %v6819_v52  ;;  %v6695_v48 = vpop.permute.xlu0 %6694 }
0x15b9   : > { %v6733_v28 = vpop.permute.xlu1 %6732 }
0x15ba   : > { %v6829_v59 = vsel %vm844_vm13, %v6733_v28, %v13212_v39  ;;  %v6821_v39 = vsel %vm844_vm13, %v6713_v62, %v6715_v30 }
0x15bb   : > { %6927 = vmatpush1.bf16.msra.mxu0 %v6818_v49  ;;  %8323 = vmatprep.subr.bf16.mxu1 %v6829_v59  ;;  %v8697_v59 = vld [vmem:[%s13949_s5 + $0x168] ss:$12 sps:$4 sm:$0xff]  }
0x15bc   : > { %8324 = vmatpush3.bf16.msra.mxu1 %v6805_v22  ;;  %v13301_v51 = vpop.permute.xlu0 %6716 }
0x15bd   : > { %v6703_v60 = vpop.permute.xlu1 %6702  ;;  %8325 = vmatprep.subr.bf16.mxu1 %v6832_v38  ;;  %v6822_v10 = vsel %vm844_vm13, %v6715_v30, %v13301_v51  ;;  %v8692_v30 = vld [vmem:[%s13949_s5 + $0x150] ss:$12 sps:$4 sm:$0xff]   ;;  %v8698_v38 = vld [vmem:[%s13949_s5 + $0x158] ss:$12 sps:$4 sm:$0xff]  }
0x15be   : > { %6928 = vmatprep.subr.bf16.mxu0 %v6822_v10 }
0x15bf   : > { %6929 = vmatpush1.bf16.msra.mxu0 %v6821_v39 }
0x15c0   : > { %6930 = vmatprep.subr.bf16.mxu0 %v6825_v55  ;;  %8326 = vmatpush3.bf16.msra.mxu1 %v6808_v18  ;;  %v6767_v6 = vpop.permute.xlu0 %6766  ;;  %v8699_v18 = vld [vmem:[%s13949_s5 + $0x170] ss:$12 sps:$4 sm:$0xff]  }
0x15c1   : > { %v6749_v40 = vpop.permute.xlu1 %6748 }
0x15c2   : > { %v6835_v32 = vsel %vm844_vm13, %v6749_v40, %v13227_v61  ;;  %v6814_v61 = vsel %vm844_vm13, %v13272_v33, %v6695_v48 }
0x15c3   : > { %6931 = vmatpush1.bf16.msra.mxu0 %v6824_v44  ;;  %8327 = vmatprep.subr.bf16.mxu1 %v6835_v32 }
0x15c4   : > { %8328 = vmatpush3.bf16.msra.mxu1 %v6811_v35  ;;  %v6731_v53 = vpop.permute.xlu0 %6730 }
0x15c5   : > { %v6775_v56 = vpop.permute.xlu1 %6774  ;;  %8329 = vmatprep.subr.bf16.mxu1 %v6838_v41  ;;  %v6828_v34 = vsel %vm844_vm13, %v6731_v53, %v6733_v28  ;;  %v6827_v17 = vsel %vm844_vm13, %v13267_v58, %v6731_v53  ;;  %v6817_v58 = vsel %vm844_vm13, %v6701_v23, %v6703_v60 }
0x15c6   : > { %6932 = vmatprep.subr.bf16.mxu0 %v6828_v34 }
0x15c7   : > { %6933 = vmatpush1.bf16.msra.mxu0 %v6827_v17 }
0x15c8   : > { %6934 = vmatprep.subr.bf16.mxu0 %v6831_v11  ;;  %8330 = vmatpush3.bf16.msra.mxu1 %v6814_v61  ;;  %v6773_v25 = vpop.permute.xlu0 %6772 }
0x15c9   : > { %v6765_v3 = vpop.permute.xlu1 %6764  ;;  %v6844_v33 = vsel %vm844_vm13, %v6773_v25, %v6775_v56  ;;  %v6843_v9 = vsel %vm844_vm13, %v13289_v63, %v6773_v25 }
0x15ca   : > { %v6841_v5 = vsel %vm844_vm13, %v6765_v3, %v6767_v6  ;;  %v13387_v6 = vld [vmem:[#allocation2] sm:$0xff] }
0x15cb   : > { %6935 = vmatpush1.bf16.msra.mxu0 %v6830_v16  ;;  %8331 = vmatprep.subr.bf16.mxu1 %v6841_v5 }
0x15cc   : > { %8332 = vmatpush3.bf16.msra.mxu1 %v6817_v58  ;;  %v6747_v0 = vpop.permute.xlu0 %6746 }
0x15cd   : > { %v6777_v19 = vpop.permute.xlu1 %6776  ;;  %8333 = vmatprep.subr.bf16.mxu1 %v6844_v33  ;;  %v6834_v43 = vsel %vm844_vm13, %v6747_v0, %v6749_v40  ;;  %v6833_v24 = vsel %vm844_vm13, %v13274_v37, %v6747_v0  ;;  %v7184_v40 = vpack.c.bf16 %v13387_v6, %v13387_v6 }
0x15ce   : > { %6936 = vmatprep.subr.bf16.mxu0 %v6834_v43 }
0x15cf   : > { %6937 = vmatpush1.bf16.msra.mxu0 %v6833_v24  ;;  %7200 = vrot.lane.b32.xlu1 %v7184_v40, %s8718_s12 }
0x15d0   : > { %6938 = vmatprep.subr.bf16.mxu0 %v6837_v57  ;;  %v6769_v7 = vpop.permute.xlu0 %6768  ;;  %7252 = vrot.lane.b32.xlu0 %v7184_v40, %s8720_s22 }
0x15d1   : > { %v6781_v62 = vpop.permute.xlu1 %6780  ;;  %v6842_v27 = vsel %vm844_vm13, %v6769_v7, %v13289_v63 }
0x15d3   : > { %6939 = vmatpush1.bf16.msra.mxu0 %v6836_v31  ;;  %7208 = vrot.lane.b32.xlu1 %v7184_v40, %s8718_s12 }
0x15d4   : > { %v6763_v29 = vpop.permute.xlu0 %6762  ;;  %7370 = vrot.lane.b32.xlu0 %v7184_v40, %s8725_s27 }
0x15d5   : > { %v6719_v4 = vpop.permute.xlu1 %6718  ;;  %v6840_v46 = vsel %vm844_vm13, %v6763_v29, %v6765_v3  ;;  %v6839_v37 = vsel %vm844_vm13, %v13280_v50, %v6763_v29 }
0x15d6   : > { %6940 = vmatprep.subr.bf16.mxu0 %v6840_v46  ;;  %v6823_v20 = vsel %vm844_vm13, %v13301_v51, %v6719_v4 }
0x15d7   : > { %6941 = vmatpush1.bf16.msra.mxu0 %v6839_v37  ;;  %7222 = vrot.lane.b32.xlu1 %v7184_v40, %s8719_s15 }
0x15d8   : > { %6942 = vmatprep.subr.bf16.mxu0 %v6843_v9  ;;  %v6711_v15 = vpop.permute.xlu0 %6710 }
0x15d9   : > { %v6820_v36 = vsel %vm844_vm13, %v13239_v26, %v6711_v15  ;;  %v6789_v21 = vpop.permute.xlu1 %6788  ;;  %v8695_v26 = vld [vmem:[%s13949_s5 + $0x16c] ss:$12 sps:$4 sm:$0xff]  }
0x15da   : > { %8334 = vmatpush3.bf16.msra.mxu1 %v6820_v36 }
0x15db   : > { %6943 = vmatpush1.bf16.msra.mxu0 %v6842_v27  ;;  %7230 = vrot.lane.b32.xlu1 %v7184_v40, %s8719_s15  ;;  %v7118_v27 = vld [vmem:[#allocation2 + $0x8] sm:$0xff] }
0x15dc   : > { %v6779_v13 = vpop.permute.xlu0 %6778 }
0x15dd   : > { %v6791_v12 = vpop.permute.xlu1 %6790  ;;  %v6846_v50 = vsel %vm844_vm13, %v6779_v13, %v6781_v62  ;;  %v6845_v45 = vsel %vm844_vm13, %v6777_v19, %v6779_v13 }
0x15de   : > { %6944 = vmatprep.subr.bf16.mxu0 %v6846_v50  ;;  %v6850_v8 = vsel %vm844_vm13, %v6789_v21, %v6791_v12 }
0x15df   : > { %6945 = vmatpush1.bf16.msra.mxu0 %v6845_v45  ;;  %7244 = vrot.lane.b32.xlu1 %v7184_v40, %s8720_s22 }
0x15e0   : > { %v6783_v42 = vpop.permute.xlu0 %6782 }
0x15e1   : > { %v6797_v23 = vpop.permute.xlu1 %6796  ;;  %v6847_v63 = vsel %vm844_vm13, %v6781_v62, %v6783_v42  ;;  %v7119_v42 = vld [vmem:[#allocation2 + $0x10] sm:$0xff] }
0x15e2   : > { %8335 = vmatprep.subr.bf16.mxu1 %v6847_v63  ;;  %6947 = vmatmul.mubr.bf16.vlgmr.msra.gmra.mrb[80].mxu0 %v8692_v30 }
0x15e3   : > { %8336 = vmatpush3.bf16.msra.mxu1 %v6823_v20  ;;  %6956 = vmatprep.mubr.bf16.mxu0 %v8695_v26 }
0x15e4   : > { %8442 = vmatprep.subr.bf16.mxu1 %v6850_v8  ;;  %v6787_v52 = vpop.permute.xlu0 %6786  ;;  %7378 = vrot.lane.b32.xlu1 %v7184_v40, %s8725_s27  ;;  %v7123_v40 = vld [vmem:[#allocation2 + $0x38] sm:$0xff] }
0x15e5   : > { %v6799_v48 = vpop.permute.xlu1 %6798  ;;  %v6849_v28 = vsel %vm844_vm13, %v6787_v52, %v6789_v21 }
0x15e6   : > { %6967 = vmatprep.subr.bf16.mxu0 %v6849_v28  ;;  %7053 = vmatmul.mubr.bf16.vlgmr.msra.gmra.mrb[80].mxu1 %v8692_v30  ;;  %v6853_v49 = vsel %vm844_vm13, %v6797_v23, %v6799_v48  ;;  %v7121_v28 = vld [vmem:[#allocation2 + $0x28] sm:$0xff] }
0x15e7   : > { %8443 = vmatpush3.bf16.msra.mxu1 %v6850_v8  ;;  %7060 = vmatprep.mubr.bf16.mxu1 %v8695_v26 }
0x15e8   : > { %8444 = vmatprep.subr.bf16.mxu1 %v6853_v49  ;;  %v6785_v22 = vpop.permute.xlu0 %6784 }
0x15e9   : > { %v6848_v51 = vsel %vm844_vm13, %v6785_v22, %v6787_v52 }
0x15ea   : > { %6968 = vmatpush1.bf16.msra.mxu0 %v6848_v51 }
0x15eb   : > { %8445 = vmatpush3.bf16.msra.mxu1 %v6853_v49  ;;  %6957 = vmatmul.mubr.bf16.gmra.mrb[84].mxu0 %v8697_v59  ;;  %v7120_v49 = vld [vmem:[#allocation2 + $0x18] sm:$0xff] }
0x15ec   : > { %v6795_v60 = vpop.permute.xlu0 %6794  ;;  %6999 = vmatprep.mubr.bf16.mxu0 %v8727_v47 }
0x15ed   : > { %v6852_v10 = vsel %vm844_vm13, %v6795_v60, %v6797_v23  ;;  %v7126_v23 = vld [vmem:[#allocation2 + $0x58] sm:$0xff] }
0x15ee   : > { %6969 = vmatprep.subr.bf16.mxu0 %v6852_v10  ;;  %7061 = vmatmul.mubr.bf16.gmra.mrb[84].mxu1 %v8697_v59  ;;  %v7129_v10 = vld [vmem:[#allocation2 + $0x78] sm:$0xff] }
0x15ef   : > { %8446 = vmatprep.mubr.msk.bf16.mxu1 %vm953_vm0, %v8698_v38 }
0x15f0   : > { %v6793_v39 = vpop.permute.xlu0 %6792 }
0x15f1   : > { %v6851_v55 = vsel %vm844_vm13, %v6793_v39, %v6795_v60  ;;  %v7122_v60 = vld [vmem:[#allocation2 + $0x30] sm:$0xff] }
0x15f2   : > { %6970 = vmatpush1.bf16.msra.mxu0 %v6851_v55 }
0x15f5   : > { %8057 = vmatmul.mubr.msk.bf16.vlgmr.msra.gmra.mrb[80].mxu0 %vm953_vm0, %v8698_v38 }
0x15f6   : > { %8447 = vmatmul.mubr.msk.bf16.vlgmr.msra.gmra.mrb[88].mxu1 %vm953_vm0, %v8699_v18  ;;  %7009 = vmatprep.mubr.bf16.mxu0 %v8727_v47  ;;  %v6614_v17 = vpop.permute.xlu1 %6613 }
0x15fa   : > { %v13399_v58 = vpop.permute.xlu1 %6623 }
0x15fd   : > { %8058 = vmatmul.mubr.msk.bf16.gmra.mrb[84].mxu0 %vm953_vm0, %v8699_v18 }
0x15fe   : > { %7698 = vmatprep.mubr.bf16.mxu0 %v8727_v47 }
0x1601   : > { %v6609_v56 = vpop.permute.xlu0 %6608 }
0x1605   : > { %v6619_v5 = vpop.permute.xlu0 %6618 }
0x16b9   : > { %v8337_v47 = vpop.f32.mrb[80].mxu1 }
0x16ba   : > { %v8338_v44 = vpop.f32.mrb[81].mxu1 }
0x16bb   : > { %v8339_v32 = vadd.f32 %v8338_v44, %v8337_v47  ;;  %v8340_v35 = vpop.f32.mrb[82].mxu1 }
0x16bc   : > { %v8341_v53 = vpop.f32.mrb[83].mxu1 }
0x16bd   : > { %v8342_v41 = vadd.f32 %v8341_v53, %v8340_v35  ;;  %v7055_v57 = vadd.f32 %v8339_v32, %v6609_v56 }
0x16bf   : > { %v7058_v21 = vadd.f32 %v8342_v41, %v6614_v17 }
0x16c1   : > { %v8343_v34 = vpop.f32.mrb[84].mxu1 }
0x16c2   : > { %v8344_v61 = vpop.f32.mrb[85].mxu1 }
0x16c3   : > { %v8345_v11 = vadd.f32 %v8344_v61, %v8343_v34  ;;  %v8346_v25 = vpop.f32.mrb[86].mxu1 }
0x16c4   : > { %v8347_v3 = vpop.f32.mrb[87].mxu1 }
0x16c5   : > { %v8348_v16 = vadd.f32 %v8347_v3, %v8346_v25  ;;  %v7063_v33 = vadd.f32 %v8345_v11, %v6619_v5  ;;  %v7124_v11 = vld [vmem:[#allocation2 + $0x48] sm:$0xff] }
0x16c7   : > { %v7066_v4 = vadd.f32 %v8348_v16, %v13399_v58 }
0x16c8   : > { %v7001_v0 = vpop.f32.mrb[80].mxu0 }
0x16c9   : > { %v8522_v19 = vadd.f32 %v7001_v0, %v6609_v56  ;;  %v7003_v43 = vpop.f32.mrb[81].mxu0  ;;  %v8448_v24 = vpop.f32.mrb[88].mxu1  ;;  %v7125_v0 = vld [vmem:[#allocation2 + $0x50] sm:$0xff] }
0x16ca   : > { %v8523_v7 = vadd.f32 %v7003_v43, %v6609_v56  ;;  %v7112_v62 = vadd.f32 %v8448_v24, %v7063_v33  ;;  %v7005_v31 = vpop.f32.mrb[82].mxu0  ;;  %v7103_v29 = vpop.f32.mrb[89].mxu1 }
0x16cb   : > { %v7130_v46 = vmul.f32 %v8522_v19, %v9393_v1  ;;  %v8524_v37 = vadd.f32 %v7005_v31, %v6614_v17  ;;  %v7104_v9 = vadd.f32 %v7103_v29, %v7055_v57  ;;  %v7007_v15 = vpop.f32.mrb[83].mxu0  ;;  %v8449_v36 = vpop.f32.mrb[90].mxu1  ;;  %v7127_v19 = vld [vmem:[#allocation2 + $0x68] sm:$0xff]  ;;  %v7128_v57 = vld [vmem:[#allocation2 + $0x70] sm:$0xff] }
0x16cc   : > { %v7131_v13 = vmul.f32 %v8523_v7, %v9401_v54  ;;  %v7138_v12 = vmul.f32 %v7112_v62, %v9397_v14  ;;  %v8525_v50 = vadd.f32 %v7007_v15, %v6614_v17  ;;  %v7115_v45 = vadd.f32 %v8449_v36, %v7066_v4  ;;  %v7106_v30 = vpop.f32.mrb[91].mxu1 }
0x16cd   : > { %v7142_v26 = vadd.f32 %v7130_v46, %v7118_v27  ;;  %v7133_v63 = vmul.f32 %v8524_v37, %v9393_v1  ;;  %v7132_v20 = vmul.f32 %v7104_v9, %v9397_v14  ;;  %v7107_v8 = vadd.f32 %v7106_v30, %v7058_v21  ;;  %v13484_v37 = vpop.permute.xlu1 %7200  ;;  %v13511_v27 = vpop.permute.xlu0 %7252 }
0x16ce   : > { %v7143_v52 = vadd.f32 %v7131_v13, %v7119_v42  ;;  %v7150_v48 = vadd.f32 %v7138_v12, %v7126_v23  ;;  %v7134_v59 = vmul.f32 %v8525_v50, %v9401_v54  ;;  %v7141_v22 = vmul.f32 %v7115_v45, %v9397_v14 }
0x16cf   : > { %7154 = vst [vmem:[#allocation2 + $0x8] sm:$0xff] %v7142_v26  ;;  %v7145_v51 = vadd.f32 %v7133_v63, %v7121_v28  ;;  %v7144_v38 = vadd.f32 %v7132_v20, %v7120_v49  ;;  %v7135_v39 = vmul.f32 %v7107_v8, %v9397_v14 }
0x16d0   : > { %7155 = vst [vmem:[#allocation2 + $0x10] sm:$0xff] %v7143_v52  ;;  %7162 = vst.msk [vmem:[#allocation2 + $0x58] sm:$0xff] %vm953_vm0, %v7150_v48  ;;  %v7146_v55 = vadd.f32 %v7134_v59, %v7122_v60  ;;  %v7153_v18 = vadd.f32 %v7141_v22, %v7129_v10  ;;  %v7011_v47 = vpop.f32.mrb[84].mxu0 }
0x16d1   : > { %7157 = vst [vmem:[#allocation2 + $0x28] sm:$0xff] %v7145_v51  ;;  %7156 = vst.msk [vmem:[#allocation2 + $0x18] sm:$0xff] %vm953_vm0, %v7144_v38  ;;  %v7147_v44 = vadd.f32 %v7135_v39, %v7123_v40  ;;  %v8526_v32 = vadd.f32 %v7011_v47, %v6619_v5  ;;  %v7013_v35 = vpop.f32.mrb[85].mxu0  ;;  %v13412_v53 = vpack.c.bf16 %v7145_v51, %v7142_v26  ;;  %v13490_v9 = vpop.permute.xlu1 %7208 }
0x16d2   : > { %7158 = vst [vmem:[#allocation2 + $0x30] sm:$0xff] %v7146_v55  ;;  %7165 = vst.msk [vmem:[#allocation2 + $0x78] sm:$0xff] %vm953_vm0, %v7153_v18  ;;  %v8527_v41 = vadd.f32 %v7013_v35, %v6619_v5  ;;  %v7015_v14 = vpop.f32.mrb[86].mxu0  ;;  %v13415_v56 = vpack.c.bf16 %v7146_v55, %v7143_v52  ;;  %v13519_v12 = vpop.permute.xlu0 %7370 }
0x16d3   : > { %7159 = vst.msk [vmem:[#allocation2 + $0x38] sm:$0xff] %vm953_vm0, %v7147_v44  ;;  %v7136_v34 = vmul.f32 %v8526_v32, %v9393_v1  ;;  %v8528_v17 = vadd.f32 %v7015_v14, %v13399_v58  ;;  %v7017_v61 = vpop.f32.mrb[87].mxu0 }
0x16d4   : > { %v7137_v25 = vmul.f32 %v8527_v41, %v9401_v54  ;;  %v8529_v3 = vadd.f32 %v7017_v61, %v13399_v58 }
0x16d5   : > { %v7148_v16 = vadd.f32 %v7136_v34, %v7124_v11  ;;  %v7139_v33 = vmul.f32 %v8528_v17, %v9393_v1  ;;  %v13495_v15 = vpop.permute.xlu1 %7222 }
0x16d6   : > { %v7149_v5 = vadd.f32 %v7137_v25, %v7125_v0  ;;  %v7140_v43 = vmul.f32 %v8529_v3, %v9401_v54 }
0x16d7   : > { %7160 = vst [vmem:[#allocation2 + $0x48] sm:$0xff] %v7148_v16  ;;  %v7151_v24 = vadd.f32 %v7139_v33, %v7127_v19  ;;  %v7179_v62 = vld [vmem:[#allocation2 + $0x58] sm:$0xff] }
0x16d8   : > { %7161 = vst [vmem:[#allocation2 + $0x50] sm:$0xff] %v7149_v5  ;;  %v7152_v7 = vadd.f32 %v7140_v43, %v7128_v57  ;;  %v7171_v54 = vld [vmem:[#allocation2 + $0x18] sm:$0xff] }
0x16d9   : > { %7163 = vst [vmem:[#allocation2 + $0x68] sm:$0xff] %v7151_v24  ;;  %v7183_v31 = vld [vmem:[#allocation2 + $0x78] sm:$0xff]  ;;  %v7189_v29 = vpack.c.bf16 %v7151_v24, %v7148_v16  ;;  %v13505_v36 = vpop.permute.xlu1 %7230 }
0x16da   : > { %7164 = vst [vmem:[#allocation2 + $0x70] sm:$0xff] %v7152_v7  ;;  %v7191_v4 = vpack.c.bf16 %v7183_v31, %v7179_v62  ;;  %v13424_v58 = vpack.c.bf16 %v7152_v7, %v7149_v5  ;;  %v7175_v1 = vld [vmem:[#allocation2 + $0x38] sm:$0xff] }
0x16db   : > { %v7187_v46 = vpack.c.bf16 %v7175_v1, %v7171_v54 }
0x16dc   : > { %7258 = vrot.lane.b32.xlu1 %v7191_v4, %s8720_s22  ;;  %7214 = vrot.lane.b32.xlu0 %v7191_v4, %s8718_s12 }
0x16dd   : > { %v13509_v21 = vpop.permute.xlu1 %7244 }
0x16e0   : > { %7340 = vrot.lane.b32.xlu1 %v7191_v4, %s8726_s28  ;;  %7236 = vrot.lane.b32.xlu0 %v7191_v4, %s8719_s15 }
0x16e1   : > { %v13517_v13 = vpop.permute.xlu1 %7378 }
0x16e4   : > { %7276 = vrot.lane.b32.xlu1 %v7191_v4, %s8721_s23  ;;  %7206 = vrot.lane.b32.xlu0 %v7187_v46, %s8718_s12 }
0x16e8   : > { %7292 = vrot.lane.b32.xlu1 %v7191_v4, %s8722_s24  ;;  %7228 = vrot.lane.b32.xlu0 %v7187_v46, %s8719_s15 }
0x16ec   : > { %7308 = vrot.lane.b32.xlu1 %v7191_v4, %s8723_s25  ;;  %7250 = vrot.lane.b32.xlu0 %v7187_v46, %s8720_s22 }
0x16f0   : > { %7324 = vrot.lane.b32.xlu1 %v7191_v4, %s8724_s26  ;;  %7334 = vrot.lane.b32.xlu0 %v7187_v46, %s8726_s28 }
0x16f4   : > { %7384 = vrot.lane.b32.xlu1 %v7191_v4, %s8725_s27  ;;  %7270 = vrot.lane.b32.xlu0 %v7187_v46, %s8721_s23 }
0x16f8   : > { %7372 = vrot.lane.b32.xlu1 %v13412_v53, %s8725_s27  ;;  %7286 = vrot.lane.b32.xlu0 %v7187_v46, %s8722_s24 }
0x16fc   : > { %7204 = vrot.lane.b32.xlu1 %v13415_v56, %s8718_s12  ;;  %7302 = vrot.lane.b32.xlu0 %v7187_v46, %s8723_s25 }
0x1700   : > { %7226 = vrot.lane.b32.xlu1 %v13415_v56, %s8719_s15  ;;  %7318 = vrot.lane.b32.xlu0 %v7187_v46, %s8724_s26 }
0x1704   : > { %7248 = vrot.lane.b32.xlu1 %v13415_v56, %s8720_s22  ;;  %7376 = vrot.lane.b32.xlu0 %v7187_v46, %s8725_s27 }
0x1708   : > { %7332 = vrot.lane.b32.xlu1 %v13415_v56, %s8726_s28  ;;  %7202 = vrot.lane.b32.xlu0 %v13412_v53, %s8718_s12 }
0x170c   : > { %7268 = vrot.lane.b32.xlu1 %v13415_v56, %s8721_s23  ;;  %7224 = vrot.lane.b32.xlu0 %v13412_v53, %s8719_s15 }
0x1710   : > { %7284 = vrot.lane.b32.xlu1 %v13415_v56, %s8722_s24  ;;  %7246 = vrot.lane.b32.xlu0 %v13412_v53, %s8720_s22 }
0x1714   : > { %7300 = vrot.lane.b32.xlu1 %v13415_v56, %s8723_s25  ;;  %7330 = vrot.lane.b32.xlu0 %v13412_v53, %s8726_s28 }
0x1718   : > { %7316 = vrot.lane.b32.xlu1 %v13415_v56, %s8724_s26  ;;  %7266 = vrot.lane.b32.xlu0 %v13412_v53, %s8721_s23 }
0x171c   : > { %7254 = vrot.lane.b32.xlu1 %v7189_v29, %s8720_s22  ;;  %7282 = vrot.lane.b32.xlu0 %v13412_v53, %s8722_s24 }
0x1720   : > { %7336 = vrot.lane.b32.xlu1 %v7189_v29, %s8726_s28  ;;  %7298 = vrot.lane.b32.xlu0 %v13412_v53, %s8723_s25 }
0x1724   : > { %7272 = vrot.lane.b32.xlu1 %v7189_v29, %s8721_s23  ;;  %7314 = vrot.lane.b32.xlu0 %v13412_v53, %s8724_s26 }
0x1728   : > { %7288 = vrot.lane.b32.xlu1 %v7189_v29, %s8722_s24  ;;  %7374 = vrot.lane.b32.xlu0 %v13415_v56, %s8725_s27 }
0x172c   : > { %7304 = vrot.lane.b32.xlu1 %v7189_v29, %s8723_s25  ;;  %7210 = vrot.lane.b32.xlu0 %v7189_v29, %s8718_s12 }
0x1730   : > { %7320 = vrot.lane.b32.xlu1 %v7189_v29, %s8724_s26  ;;  %7232 = vrot.lane.b32.xlu0 %v7189_v29, %s8719_s15 }
0x1734   : > { %7380 = vrot.lane.b32.xlu1 %v7189_v29, %s8725_s27  ;;  %7256 = vrot.lane.b32.xlu0 %v13424_v58, %s8720_s22 }
0x1738   : > { %7212 = vrot.lane.b32.xlu1 %v13424_v58, %s8718_s12  ;;  %7338 = vrot.lane.b32.xlu0 %v13424_v58, %s8726_s28 }
0x173c   : > { %7234 = vrot.lane.b32.xlu1 %v13424_v58, %s8719_s15  ;;  %7274 = vrot.lane.b32.xlu0 %v13424_v58, %s8721_s23 }
0x1740   : > { %7290 = vrot.lane.b32.xlu0 %v13424_v58, %s8722_s24 }
0x1744   : > { %7306 = vrot.lane.b32.xlu0 %v13424_v58, %s8723_s25  ;;  %s349_s25 = scalar_lea.vmem %s13953_s9, %s8602_s13 }
0x1748   : > { %7322 = vrot.lane.b32.xlu0 %v13424_v58, %s8724_s26 }
0x174c   : > { %7382 = vrot.lane.b32.xlu0 %v13424_v58, %s8725_s27 }
0x174e   : > { %v13523_v50 = vpop.permute.xlu1 %7258  ;;  %v13525_v45 = vpop.permute.xlu0 %7214 }
0x174f   : > { %7400 = vrot.lane.b32.xlu1 %v13525_v45, %s8725_s27 }
0x1752   : > { %v13529_v30 = vpop.permute.xlu1 %7340  ;;  %v13531_v26 = vpop.permute.xlu0 %7236 }
0x1756   : > { %v13533_v42 = vpop.permute.xlu1 %7276  ;;  %v7207_v23 = vpop.permute.xlu0 %7206 }
0x1757   : > { %7448 = vrot.lane.b32.xlu0 %v13533_v42, %s8725_s27 }
0x175a   : > { %v13537_v63 = vpop.permute.xlu1 %7292  ;;  %v13539_v20 = vpop.permute.xlu0 %7228 }
0x175b   : > { %7464 = vrot.lane.b32.xlu0 %v13537_v63, %s8725_s27 }
0x175e   : > { %v13543_v8 = vpop.permute.xlu1 %7308  ;;  %v13545_v52 = vpop.permute.xlu0 %7250 }
0x175f   : > { %7392 = vrot.lane.b32.xlu0 %v7207_v23, %s8725_s27 }
0x1762   : > { %v13548_v48 = vpop.permute.xlu1 %7324  ;;  %v13550_v28 = vpop.permute.xlu0 %7334 }
0x1766   : > { %v13552_v49 = vpop.permute.xlu1 %7384  ;;  %v13554_v59 = vpop.permute.xlu0 %7270 }
0x1767   : > { %7440 = vrot.lane.b32.xlu1 %v13554_v59, %s8725_s27 }
0x176a   : > { %v7373_v22 = vpop.permute.xlu1 %7372  ;;  %v7287_v51 = vpop.permute.xlu0 %7286 }
0x176b   : > { %7456 = vrot.lane.b32.xlu1 %v7287_v51, %s8725_s27  ;;  %v7514_v31 = vsel %vm844_vm13, %v13519_v12, %v7373_v22 }
0x176e   : > { %v7205_v38 = vpop.permute.xlu1 %7204  ;;  %v7303_v60 = vpop.permute.xlu0 %7302 }
0x176f   : > { %7472 = vrot.lane.b32.xlu1 %v7303_v60, %s8725_s27  ;;  %v7218_v17 = vsel %vm512_vm5, %v7205_v38, %v7207_v23 }
0x1772   : > { %v7227_v10 = vpop.permute.xlu1 %7226  ;;  %v13560_v39 = vpop.permute.xlu0 %7318 }
0x1773   : > { %v7240_v25 = vsel %vm535_vm9, %v7227_v10, %v13539_v20 }
0x1776   : > { %v7249_v55 = vpop.permute.xlu1 %7248  ;;  %v13562_v18 = vpop.permute.xlu0 %7376 }
0x1777   : > { %v7262_v3 = vsel %vm419_vm8, %v7249_v55, %v13545_v52 }
0x177a   : > { %v7333_v40 = vpop.permute.xlu1 %7332  ;;  %v7203_v47 = vpop.permute.xlu0 %7202 }
0x177b   : > { %v7216_v19 = vsel %vm512_vm5, %v13484_v37, %v7203_v47  ;;  %v7217_v37 = vsel %vm512_vm5, %v7203_v47, %v7205_v38 }
0x177e   : > { %v13564_v44 = vpop.permute.xlu1 %7268  ;;  %v7225_v32 = vpop.permute.xlu0 %7224 }
0x177f   : > { %v7238_v7 = vsel %vm535_vm9, %v13495_v15, %v7225_v32 }
0x1782   : > { %v13566_v35 = vpop.permute.xlu1 %7284  ;;  %v7247_v53 = vpop.permute.xlu0 %7246 }
0x1783   : > { %v7295_v29 = vsel %vm594_vm11, %v13566_v35, %v7287_v51  ;;  %v7260_v58 = vsel %vm419_vm8, %v13509_v21, %v7247_v53  ;;  %v7239_v21 = vsel %vm535_vm9, %v7225_v32, %v7227_v10  ;;  %v7261_v51 = vsel %vm419_vm8, %v7247_v53, %v7249_v55 }
0x1784   : > { %v7279_v55 = vsel %vm577_vm10, %v13564_v44, %v13554_v59 }
0x1786   : > { %v13568_v41 = vpop.permute.xlu1 %7300  ;;  %v7331_v14 = vpop.permute.xlu0 %7330 }
0x1787   : > { %7498 = vrot.lane.b32.xlu1 %v7331_v14, %s8725_s27  ;;  %v7342_v33 = vsel %vm645_vm15, %v7331_v14, %v7333_v40  ;;  %v7311_v54 = vsel %vm611_vm12, %v13568_v41, %v7303_v60  ;;  %v7343_v60 = vsel %vm645_vm15, %v7333_v40, %v13550_v28 }
0x178a   : > { %v13571_v56 = vpop.permute.xlu1 %7316  ;;  %v7267_v34 = vpop.permute.xlu0 %7266 }
0x178b   : > { %7390 = vrot.lane.b32.xlu1 %v7218_v17, %s8725_s27  ;;  %7434 = vrot.lane.b32.xlu0 %v7267_v34, %s8725_s27  ;;  %v7278_v24 = vsel %vm577_vm10, %v7267_v34, %v13564_v44 }
0x178e   : > { %v13576_v61 = vpop.permute.xlu1 %7254  ;;  %v7283_v11 = vpop.permute.xlu0 %7282 }
0x178f   : > { %7406 = vrot.lane.b32.xlu1 %v7240_v25, %s8725_s27  ;;  %7450 = vrot.lane.b32.xlu0 %v7283_v11, %s8725_s27  ;;  %v7294_v14 = vsel %vm594_vm11, %v7283_v11, %v13566_v35  ;;  %v7263_v35 = vsel %vm419_vm8, %v13511_v27, %v13576_v61 }
0x1792   : > { %v7299_v16 = vpop.permute.xlu0 %7298  ;;  %v13584_v0 = vpop.permute.xlu1 %7336 }
0x1793   : > { %7422 = vrot.lane.b32.xlu1 %v7262_v3, %s8725_s27  ;;  %7466 = vrot.lane.b32.xlu0 %v7299_v16, %s8725_s27  ;;  %v7310_v44 = vsel %vm611_vm12, %v7299_v16, %v13568_v41 }
0x1796   : > { %v13589_v5 = vpop.permute.xlu0 %7314  ;;  %v13595_v43 = vpop.permute.xlu1 %7272 }
0x1797   : > { %7500 = vrot.lane.b32.xlu1 %v7342_v33, %s8725_s27  ;;  %7386 = vrot.lane.b32.xlu0 %v7216_v19, %s8725_s27 }
0x179a   : > { %v13599_v57 = vpop.permute.xlu0 %7374  ;;  %v13613_v1 = vpop.permute.xlu1 %7288 }
0x179b   : > { %7436 = vrot.lane.b32.xlu1 %v7278_v24, %s8725_s27  ;;  %7402 = vrot.lane.b32.xlu0 %v7238_v7, %s8725_s27  ;;  %v7515_v62 = vsel %vm844_vm13, %v7373_v22, %v13599_v57 }
0x179c   : > { %7625 = vmatprep.subr.bf16.mxu1 %v7515_v62 }
0x179d   : > { %7626 = vmatpush1.bf16.msra.mxu1 %v7514_v31 }
0x179e   : > { %v7211_v4 = vpop.permute.xlu0 %7210  ;;  %v13622_v15 = vpop.permute.xlu1 %7304 }
0x179f   : > { %7454 = vrot.lane.b32.xlu1 %v7295_v29, %s8725_s27  ;;  %7418 = vrot.lane.b32.xlu0 %v7260_v58, %s8725_s27  ;;  %v7219_v47 = vsel %vm512_vm5, %v13490_v9, %v7211_v4  ;;  %v7326_v29 = vsel %vm628_vm14, %v13589_v5, %v13571_v56 }
0x17a2   : > { %v7233_v46 = vpop.permute.xlu0 %7232  ;;  %v13628_v22 = vpop.permute.xlu1 %7320 }
0x17a3   : > { %7470 = vrot.lane.b32.xlu1 %v7311_v54, %s8725_s27  ;;  %7388 = vrot.lane.b32.xlu0 %v7217_v37, %s8725_s27  ;;  %v7241_v40 = vsel %vm535_vm9, %v13505_v36, %v7233_v46 }
0x17a6   : > { %v7257_v12 = vpop.permute.xlu0 %7256  ;;  %v7381_v10 = vpop.permute.xlu1 %7380 }
0x17a7   : > { %7506 = vrot.lane.b32.xlu1 %v13584_v0, %s8725_s27  ;;  %7404 = vrot.lane.b32.xlu0 %v7239_v21, %s8725_s27  ;;  %v7517_v41 = vsel %vm844_vm13, %v13517_v13, %v7381_v10  ;;  %v7264_v27 = vsel %vm419_vm8, %v13576_v61, %v7257_v12  ;;  %v8728_v13 = vmov 1983009808   ;;  %v7166_v61 = vld [vmem:[%s13951_s7] sm:$0x3f]  ;;  %v7265_v62 = vsel %vm419_vm8, %v7257_v12, %v13523_v50 }
0x17a8   : > { %v7354_v16 = vunpack.c.l.s4 %v8728_v13  ;;  %v7352_v24 = vcombine.high %v7166_v61, %v7166_v61 }
0x17aa   : > { %v7339_v23 = vpop.permute.xlu0 %7338  ;;  %v7213_v34 = vpop.permute.xlu1 %7212  ;;  %v7355_v19 = vunpack.c.0.s8 %v7354_v16 }
0x17ab   : > { %7442 = vrot.lane.b32.xlu1 %v13595_v43, %s8725_s27  ;;  %7420 = vrot.lane.b32.xlu0 %v7261_v51, %s8725_s27  ;;  %v7220_v9 = vsel %vm512_vm5, %v7211_v4, %v7213_v34  ;;  %v7221_v3 = vsel %vm512_vm5, %v7213_v34, %v13525_v45  ;;  %v7344_v33 = vsel %vm645_vm15, %v13584_v0, %v7339_v23 }
0x17ae   : > { %v7275_v38 = vpop.permute.xlu0 %7274  ;;  %v7235_v17 = vpop.permute.xlu1 %7234 }
0x17af   : > { %7458 = vrot.lane.b32.xlu1 %v13613_v1, %s8725_s27  ;;  %7502 = vrot.lane.b32.xlu0 %v7343_v60, %s8725_s27  ;;  %v7242_v25 = vsel %vm535_vm9, %v7233_v46, %v7235_v17  ;;  %v7243_v45 = vsel %vm535_vm9, %v7235_v17, %v13531_v26  ;;  %v7280_v0 = vsel %vm577_vm10, %v13595_v43, %v7275_v38 }
0x17b0   : > { %v7281_v31 = vsel %vm577_vm10, %v7275_v38, %v13533_v42 }
0x17b2   : > { %v7291_v32 = vpop.permute.xlu0 %7290 }
0x17b3   : > { %7394 = vrot.lane.b32.xlu1 %v7219_v47, %s8725_s27  ;;  %7438 = vrot.lane.b32.xlu0 %v7279_v55, %s8725_s27  ;;  %v7296_v43 = vsel %vm594_vm11, %v13613_v1, %v7291_v32  ;;  %v7297_v42 = vsel %vm594_vm11, %v7291_v32, %v13537_v63 }
0x17b6   : > { %v13648_v53 = vpop.permute.xlu0 %7306 }
0x17b7   : > { %7410 = vrot.lane.b32.xlu1 %v7241_v40, %s8725_s27  ;;  %7452 = vrot.lane.b32.xlu0 %v7294_v14, %s8725_s27  ;;  %v7312_v4 = vsel %vm611_vm12, %v13622_v15, %v13648_v53  ;;  %v7313_v54 = vsel %vm611_vm12, %v13648_v53, %v13543_v8 }
0x17ba   : > { %v13655_v59 = vpop.permute.xlu0 %7322 }
0x17bb   : > { %7396 = vrot.lane.b32.xlu1 %v7220_v9, %s8725_s27  ;;  %7468 = vrot.lane.b32.xlu0 %v7310_v44, %s8725_s27  ;;  %v7328_v63 = vsel %vm628_vm14, %v13628_v22, %v13655_v59 }
0x17be   : > { %v13661_v36 = vpop.permute.xlu0 %7382 }
0x17bf   : > { %7474 = vrot.lane.b32.xlu1 %v13622_v15, %s8725_s27  ;;  %v7518_v11 = vsel %vm844_vm13, %v7381_v10, %v13661_v36  ;;  %7426 = vrot.lane.b32.xlu0 %v7263_v35, %s8725_s27 }
0x17c0   : > { %7627 = vmatprep.subr.bf16.mxu1 %v7518_v11 }
0x17c1   : > { %7628 = vmatpush1.bf16.msra.mxu1 %v7517_v41  ;;  %v13731_v58 = vpop.permute.xlu1 %7400 }
0x17c3   : > { %7412 = vrot.lane.b32.xlu1 %v7242_v25, %s8725_s27  ;;  %7398 = vrot.lane.b32.xlu0 %v7221_v3, %s8725_s27 }
0x17c7   : > { %7428 = vrot.lane.b32.xlu1 %v7264_v27, %s8725_s27  ;;  %7408 = vrot.lane.b32.xlu0 %v13539_v20, %s8725_s27  ;;  %v7358_v20 = vsub.s32 %v7355_v19, %v8817_v2  ;;  %v7327_v2 = vsel %vm628_vm14, %v13571_v56, %v13560_v39 }
0x17c9   : > { %v13693_v7 = vrot.slane %v7352_v24, %v7358_v20  ;;  %v13735_v56 = vrot.slane %v7166_v61, %v7358_v20 }
0x17cb   : > { %7508 = vrot.lane.b32.xlu1 %v7344_v33, %s8725_s27  ;;  %7414 = vrot.lane.b32.xlu0 %v7243_v45, %s8725_s27  ;;  %v13743_v1 = vcombine.high %v13735_v56, %v13735_v56 }
0x17cd   : > { %7657 = vmatprep.mubr.bf16.mxu1 %v13743_v1 }
0x17cf   : > { %7416 = vrot.lane.b32.xlu1 %v13531_v26, %s8725_s27  ;;  %7480 = vrot.lane.b32.xlu0 %v13543_v8, %s8725_s27  ;;  %v7345_v26 = vsel %vm645_vm15, %v7339_v23, %v13529_v30  ;;  %v7329_v8 = vsel %vm628_vm14, %v13655_v59, %v13548_v48 }
0x17d3   : > { %7444 = vrot.lane.b32.xlu1 %v7280_v0, %s8725_s27  ;;  %7430 = vrot.lane.b32.xlu0 %v7265_v62, %s8725_s27 }
0x17d7   : > { %7486 = vrot.lane.b32.xlu1 %v7327_v2, %s8725_s27  ;;  %7510 = vrot.lane.b32.xlu0 %v7345_v26, %s8725_s27 }
0x17db   : > { %7460 = vrot.lane.b32.xlu1 %v7296_v43, %s8725_s27  ;;  %7446 = vrot.lane.b32.xlu0 %v7281_v31, %s8725_s27 }
0x17df   : > { %7488 = vrot.lane.b32.xlu1 %v13560_v39, %s8725_s27  ;;  %7484 = vrot.lane.b32.xlu0 %v7326_v29, %s8725_s27  ;;  %v13739_v39 = vpop.permute.xlu1 %7440 }
0x17e3   : > { %7476 = vrot.lane.b32.xlu1 %v7312_v4, %s8725_s27  ;;  %7462 = vrot.lane.b32.xlu0 %v7297_v42, %s8725_s27  ;;  %v13756_v46 = vpop.permute.xlu1 %7456 }
0x17e7   : > { %7490 = vrot.lane.b32.xlu1 %v13628_v22, %s8725_s27  ;;  %7482 = vrot.lane.b32.xlu0 %v13589_v5, %s8725_s27  ;;  %v13754_v5 = vpop.permute.xlu0 %7448  ;;  %v13770_v15 = vpop.permute.xlu1 %7472  ;;  %v7787_v22 = vld [vmem:[%s8849_s18] sm:$0xff] }
0x17e8   : > { %v7791_v51 = vcombine.high %v7787_v22, %v7787_v22 }
0x17eb   : > { %7492 = vrot.lane.b32.xlu1 %v7328_v63, %s8725_s27  ;;  %7478 = vrot.lane.b32.xlu0 %v7313_v54, %s8725_s27  ;;  %v13765_v37 = vpop.permute.xlu0 %7464 }
0x17ef   : > { %7432 = vrot.lane.b32.xlu1 %v13523_v50, %s8725_s27  ;;  %7424 = vrot.lane.b32.xlu0 %v13545_v52, %s8725_s27  ;;  %v7393_v50 = vpop.permute.xlu0 %7392 }
0x17f3   : > { %7512 = vrot.lane.b32.xlu1 %v13529_v30, %s8725_s27  ;;  %7494 = vrot.lane.b32.xlu0 %v7329_v8, %s8725_s27  ;;  %v7167_v30 = vld [vmem:[%s13952_s8] sm:$0xf] }
0x17f7   : > { %7496 = vrot.lane.b32.xlu0 %v13548_v48, %s8725_s27  ;;  %7792 = vrot.lane.b32.xlu1 %v7787_v22, %s8720_s22 }
0x17f9   : > { %v7499_v12 = vpop.permute.xlu1 %7498 }
0x17fb   : > { %7504 = vrot.lane.b32.xlu0 %v13550_v28, %s8725_s27  ;;  %v7788_v28 = vld [vmem:[%s8849_s18 + $0x8] sm:$0xf] }
0x17fc   : > { %7796 = vrot.lane.b32.xlu1 %v7788_v28, %s8720_s22 }
0x17fd   : > { %v7391_v52 = vpop.permute.xlu1 %7390  ;;  %v13776_v21 = vpop.permute.xlu0 %7434 }
0x17fe   : > { %v13782_v23 = vsel %vm844_vm13, %v7391_v52, %v7393_v50 }
0x17ff   : > { %7348 = vperm.xlu0 %8626, %v7167_v30  }
0x1801   : > { %v13786_v48 = vpop.permute.xlu1 %7406  ;;  %v13788_v38 = vpop.permute.xlu0 %7450 }
0x1803   : > { %7794 = vrot.lane.b32.xlu0 %v7791_v51, %s8720_s22 }
0x1805   : > { %v13793_v60 = vpop.permute.xlu1 %7422  ;;  %v13795_v10 = vpop.permute.xlu0 %7466 }
0x1809   : > { %v7501_v47 = vpop.permute.xlu1 %7500  ;;  %v7387_v32 = vpop.permute.xlu0 %7386 }
0x180a   : > { %v7562_v13 = vsel %vm844_vm13, %v7499_v12, %v7501_v47 }
0x180d   : > { %v13797_v55 = vpop.permute.xlu1 %7436  ;;  %v7403_v40 = vpop.permute.xlu0 %7402 }
0x1811   : > { %v13799_v53 = vpop.permute.xlu1 %7454  ;;  %v7419_v14 = vpop.permute.xlu0 %7418 }
0x1815   : > { %v13801_v34 = vpop.permute.xlu1 %7470  ;;  %v7389_v9 = vpop.permute.xlu0 %7388 }
0x1816   : > { %v7520_v59 = vsel %vm844_vm13, %v7387_v32, %v7389_v9  ;;  %v7521_v44 = vsel %vm844_vm13, %v7389_v9, %v7391_v52 }
0x1817   : > { %7629 = vmatprep.subr.bf16.mxu1 %v7521_v44  ;;  %v7538_v44 = vsel %vm844_vm13, %v13776_v21, %v13797_v55 }
0x1818   : > { %7630 = vmatpush1.bf16.msra.mxu1 %v7520_v59 }
0x1819   : > { %v7507_v35 = vpop.permute.xlu1 %7506  ;;  %v7405_v17 = vpop.permute.xlu0 %7404 }
0x181a   : > { %v7527_v29 = vsel %vm844_vm13, %v7405_v17, %v13786_v48  ;;  %v7526_v42 = vsel %vm844_vm13, %v7403_v40, %v7405_v17 }
0x181d   : > { %v13805_v11 = vpop.permute.xlu1 %7442  ;;  %v7421_v41 = vpop.permute.xlu0 %7420 }
0x181e   : > { %v7533_v52 = vsel %vm844_vm13, %v7421_v41, %v13793_v60  ;;  %v7532_v22 = vsel %vm844_vm13, %v7419_v14, %v7421_v41 }
0x1821   : > { %v13807_v25 = vpop.permute.xlu1 %7458  ;;  %v13809_v3 = vpop.permute.xlu0 %7502 }
0x1822   : > { %v7563_v27 = vsel %vm844_vm13, %v7501_v47, %v13809_v3 }
0x1823   : > { %7666 = vmatprep.subr.bf16.mxu0 %v7563_v27 }
0x1824   : > { %7667 = vmatpush1.bf16.msra.mxu0 %v7562_v13 }
0x1825   : > { %v7395_v16 = vpop.permute.xlu1 %7394  ;;  %v7439_v33 = vpop.permute.xlu0 %7438 }
0x1826   : > { %v7539_v9 = vsel %vm844_vm13, %v13797_v55, %v7439_v33  ;;  %v7540_v27 = vsel %vm844_vm13, %v7439_v33, %v13739_v39  ;;  %v7546_v33 = vsel %vm844_vm13, %v13799_v53, %v13756_v46 }
0x1829   : > { %v7411_v19 = vpop.permute.xlu1 %7410  ;;  %v13814_v45 = vpop.permute.xlu0 %7452 }
0x182a   : > { %v7545_v39 = vsel %vm844_vm13, %v13814_v45, %v13799_v53 }
0x182d   : > { %v7397_v61 = vpop.permute.xlu1 %7396  ;;  %v13816_v24 = vpop.permute.xlu0 %7468 }
0x182e   : > { %v7523_v43 = vsel %vm844_vm13, %v7395_v16, %v7397_v61 }
0x1831   : > { %v13818_v20 = vpop.permute.xlu1 %7474  ;;  %v7427_v0 = vpop.permute.xlu0 %7426 }
0x1835   : > { %v7413_v62 = vpop.permute.xlu1 %7412  ;;  %v13820_v2 = vpop.permute.xlu0 %7398 }
0x1836   : > { %v7524_v26 = vsel %vm844_vm13, %v7397_v61, %v13820_v2  ;;  %v7529_v50 = vsel %vm844_vm13, %v7411_v19, %v7413_v62  ;;  %v7516_v19 = vsel %vm844_vm13, %v13599_v57, %v13562_v18  ;;  %v7519_v57 = vsel %vm844_vm13, %v13661_v36, %v13552_v49 }
0x1837   : > { %7631 = vmatprep.subr.bf16.mxu1 %v7524_v26  ;;  %v7551_v49 = vsel %vm844_vm13, %v13816_v24, %v13801_v34  ;;  %v7525_v53 = vsel %vm844_vm13, %v13820_v2, %v13731_v58 }
0x1838   : > { %7632 = vmatpush1.bf16.msra.mxu1 %v7523_v43 }
0x1839   : > { %v7429_v31 = vpop.permute.xlu1 %7428  ;;  %7633 = vmatprep.subr.bf16.mxu1 %v7527_v29  ;;  %v13827_v4 = vpop.permute.xlu0 %7408 }
0x183a   : > { %v7535_v32 = vsel %vm844_vm13, %v7427_v0, %v7429_v31 }
0x183c   : > { %7634 = vmatpush1.bf16.msra.mxu1 %v7526_v42 }
0x183d   : > { %v7509_v63 = vpop.permute.xlu1 %7508  ;;  %v13830_v54 = vpop.permute.xlu0 %7414 }
0x183e   : > { %v7530_v8 = vsel %vm844_vm13, %v7413_v62, %v13830_v54  ;;  %v7565_v17 = vsel %vm844_vm13, %v7507_v35, %v7509_v63  ;;  %v7528_v62 = vsel %vm844_vm13, %v13786_v48, %v13827_v4 }
0x183f   : > { %7635 = vmatprep.subr.bf16.mxu1 %v7530_v8  ;;  %v8707_v8 = vld [vmem:[#allocation2] sm:$0xff] }
0x1840   : > { %7636 = vmatpush1.bf16.msra.mxu1 %v7529_v50 }
0x1841   : > { %v13835_v12 = vpop.permute.xlu1 %7416  ;;  %7637 = vmatprep.subr.bf16.mxu1 %v7533_v52  ;;  %v13839_v30 = vpop.permute.xlu0 %7480 }
0x1842   : > { %v7531_v48 = vsel %vm844_vm13, %v13830_v54, %v13835_v12 }
0x1844   : > { %7638 = vmatpush1.bf16.msra.mxu1 %v7532_v22 }
0x1845   : > { %v7445_v51 = vpop.permute.xlu1 %7444  ;;  %v13842_v28 = vpop.permute.xlu0 %7430 }
0x1846   : > { %v7536_v47 = vsel %vm844_vm13, %v7429_v31, %v13842_v28  ;;  %v7541_v21 = vsel %vm844_vm13, %v13805_v11, %v7445_v51  ;;  %v7544_v11 = vsel %vm844_vm13, %v13788_v38, %v13814_v45  ;;  %v7550_v38 = vsel %vm844_vm13, %v13795_v10, %v13816_v24 }
0x1847   : > { %7639 = vmatprep.subr.bf16.mxu1 %v7536_v47 }
0x1848   : > { %7640 = vmatpush1.bf16.msra.mxu1 %v7535_v32 }
0x1849   : > { %v13847_v40 = vpop.permute.xlu1 %7486  ;;  %7641 = vmatprep.subr.bf16.mxu1 %v7539_v9  ;;  %v13851_v59 = vpop.permute.xlu0 %7510 }
0x184a   : > { %v7566_v14 = vsel %vm844_vm13, %v7509_v63, %v13851_v59 }
0x184b   : > { %7668 = vmatprep.subr.bf16.mxu0 %v7566_v14 }
0x184c   : > { %7642 = vmatpush1.bf16.msra.mxu1 %v7538_v44  ;;  %7669 = vmatpush1.bf16.msra.mxu0 %v7565_v17 }
0x184d   : > { %v7461_v41 = vpop.permute.xlu1 %7460  ;;  %8353 = vmatprep.subr.bf16.mxu0 %v7540_v27  ;;  %v7447_v13 = vpop.permute.xlu0 %7446 }
0x184e   : > { %v7542_v16 = vsel %vm844_vm13, %v7445_v51, %v7447_v13  ;;  %v7543_v35 = vsel %vm844_vm13, %v7447_v13, %v13754_v5 }
0x184f   : > { %7643 = vmatprep.subr.bf16.mxu1 %v7542_v16  ;;  %8061 = vmatmul.mubr.msk.bf16.vlgmr.msra.gmra.mrb[88].mxu0 %vm953_vm0, %v13693_v7 }
0x1850   : > { %7644 = vmatpush1.bf16.msra.mxu1 %v7541_v21  ;;  %8354 = vmatpush3.bf16.msra.mxu0 %v7516_v19 }
0x1851   : > { %v7489_v55 = vpop.permute.xlu1 %7488  ;;  %7645 = vmatprep.subr.bf16.mxu1 %v7545_v39  ;;  %8355 = vmatprep.subr.bf16.mxu0 %v7543_v35  ;;  %v7485_v18 = vpop.permute.xlu0 %7484 }
0x1852   : > { %7739 = vmatprep.mubr.bf16.mxu0 %v13743_v1  ;;  %v7547_v1 = vsel %vm844_vm13, %v13807_v25, %v7461_v41  ;;  %v7557_v58 = vsel %vm844_vm13, %v7485_v18, %v13847_v40 }
0x1854   : > { %7646 = vmatpush1.bf16.msra.mxu1 %v7544_v11  ;;  %8356 = vmatpush3.bf16.msra.mxu0 %v7519_v57 }
0x1855   : > { %8357 = vmatprep.subr.bf16.mxu0 %v7546_v33  ;;  %v7463_v5 = vpop.permute.xlu0 %7462  ;;  %v7477_v61 = vpop.permute.xlu1 %7476 }
0x1856   : > { %v7548_v0 = vsel %vm844_vm13, %v7461_v41, %v7463_v5  ;;  %v7549_v36 = vsel %vm844_vm13, %v7463_v5, %v13765_v37  ;;  %v7553_v10 = vsel %vm844_vm13, %v13818_v20, %v7477_v61  ;;  %v7558_v20 = vsel %vm844_vm13, %v13847_v40, %v7489_v55 }
0x1857   : > { %7647 = vmatprep.subr.bf16.mxu1 %v7548_v0 }
0x1858   : > { %7648 = vmatpush1.bf16.msra.mxu1 %v7547_v1  ;;  %8358 = vmatpush3.bf16.msra.mxu0 %v13782_v23  ;;  %v7552_v23 = vsel %vm844_vm13, %v13801_v34, %v13770_v15 }
0x1859   : > { %7649 = vmatprep.subr.bf16.mxu1 %v7551_v49  ;;  %8359 = vmatprep.subr.bf16.mxu0 %v7549_v36  ;;  %v7483_v46 = vpop.permute.xlu0 %7482  ;;  %v7491_v25 = vpop.permute.xlu1 %7490 }
0x185a   : > { %v7556_v2 = vsel %vm844_vm13, %v7483_v46, %v7485_v18 }
0x185c   : > { %7650 = vmatpush1.bf16.msra.mxu1 %v7550_v38  ;;  %8360 = vmatpush3.bf16.msra.mxu0 %v7525_v53 }
0x185d   : > { %8361 = vmatprep.subr.bf16.mxu0 %v7552_v23  ;;  %v7479_v37 = vpop.permute.xlu0 %7478  ;;  %v7493_v24 = vpop.permute.xlu1 %7492 }
0x185e   : > { %v7554_v45 = vsel %vm844_vm13, %v7477_v61, %v7479_v37  ;;  %v7555_v15 = vsel %vm844_vm13, %v7479_v37, %v13839_v30  ;;  %v7559_v31 = vsel %vm844_vm13, %v7491_v25, %v7493_v24 }
0x185f   : > { %7651 = vmatprep.subr.bf16.mxu1 %v7554_v45 }
0x1860   : > { %7652 = vmatpush1.bf16.msra.mxu1 %v7553_v10  ;;  %8362 = vmatpush3.bf16.msra.mxu0 %v7528_v62 }
0x1861   : > { %7653 = vmatprep.subr.bf16.mxu1 %v7557_v58  ;;  %8363 = vmatprep.subr.bf16.mxu0 %v7555_v15  ;;  %v7425_v34 = vpop.permute.xlu0 %7424  ;;  %v7433_v4 = vpop.permute.xlu1 %7432 }
0x1862   : > { %v7534_v29 = vsel %vm844_vm13, %v13793_v60, %v7425_v34  ;;  %v7537_v54 = vsel %vm844_vm13, %v13842_v28, %v7433_v4 }
0x1864   : > { %7654 = vmatpush1.bf16.msra.mxu1 %v7556_v2  ;;  %8364 = vmatpush3.bf16.msra.mxu0 %v7531_v48 }
0x1865   : > { %8365 = vmatprep.subr.bf16.mxu0 %v7558_v20  ;;  %v7495_v26 = vpop.permute.xlu0 %7494  ;;  %v7513_v12 = vpop.permute.xlu1 %7512 }
0x1866   : > { %v7560_v43 = vsel %vm844_vm13, %v7493_v24, %v7495_v26 }
0x1867   : > { %7655 = vmatprep.subr.bf16.mxu1 %v7560_v43 }
0x1868   : > { %7656 = vmatpush1.bf16.msra.mxu1 %v7559_v31  ;;  %8366 = vmatpush3.bf16.msra.mxu0 %v7534_v29 }
0x1869   : > { %v7497_v42 = vpop.permute.xlu0 %7496  ;;  %8450 = vmatprep.subr.bf16.mxu1 %v13387_v6  ;;  %v7567_v6 = vsel %vm844_vm13, %v13851_v59, %v7513_v12  ;;  %v7793_v28 = vpop.permute.xlu1 %7792 }
0x186a   : > { %v7561_v63 = vsel %vm844_vm13, %v7495_v26, %v7497_v42 }
0x186b   : > { %7658 = vmatmul.mubr.bf16.vlgmr.msra.gmra.mrb[92].mxu1 %v13735_v56  ;;  %8367 = vmatprep.subr.bf16.mxu0 %v7561_v63 }
0x186c   : > { %8368 = vmatpush3.bf16.msra.mxu0 %v7537_v54  ;;  %8454 = vmatprep.mubr.msk.bf16.mxu1 %vm8729_vm1, %v8707_v8 }
0x186d   : > { %v7505_v60 = vpop.permute.xlu0 %7504 }
0x186e   : > { %v7564_v50 = vsel %vm844_vm13, %v13809_v3, %v7505_v60  ;;  %v7797_v40 = vpop.permute.xlu1 %7796 }
0x186f   : > { %7740 = vmatmul.mubr.bf16.vlgmr.msra.gmra.mrb[92].mxu0 %v13735_v56  ;;  %8451 = vmatpush3.bf16.msra.mxu1 %v7564_v50 }
0x1870   : > { %8452 = vmatprep.subr.bf16.mxu1 %v8707_v8 }
0x1873   : > { %8453 = vmatpush3.bf16.msra.mxu1 %v7567_v6 }
0x1876   : > { %8455 = vmatmul.mubr.msk.bf16.vlgmr.msra.gmra.mrb[96].mxu1 %vm953_vm0, %v13693_v7 }
0x187e   : > { %v7349_v47 = vpop.permute.xlu0 %7348 }
0x1882   : > { %v7795_v32 = vpop.permute.xlu0 %7794 }
0x1883   : > { %v7798_v44 = vsel %vm419_vm8, %v7793_v28, %v7795_v32  ;;  %v7799_v41 = vsel %vm419_vm8, %v7795_v32, %v7797_v40 }
0x1922   : > { %v7700_v52 = vpop.f32.mrb[88].mxu0 }
0x1923   : > { %v7702_v30 = vpop.f32.mrb[89].mxu0 }
0x1924   : > { %v7704_v22 = vpop.f32.mrb[90].mxu0 }
0x1925   : > { %v7705_v51 = vpop.f32.mrb[91].mxu0 }
0x193e   : > { %v7659_v3 = vpop.f32.mrb[92].mxu1 }
0x193f   : > { %v7660_v56 = vadd.f32 %v7659_v3, %v7349_v47  ;;  %v7661_v9 = vpop.f32.mrb[93].mxu1 }
0x1940   : > { %v7662_v14 = vadd.f32 %v7661_v9, %v7349_v47  ;;  %v7663_v59 = vpop.f32.mrb[94].mxu1 }
0x1941   : > { %v7701_v17 = vadd.f32 %v7700_v52, %v7660_v56  ;;  %v7664_v7 = vpop.f32.mrb[95].mxu1 }
0x1942   : > { %v7703_v27 = vadd.f32 %v7702_v30, %v7662_v14  ;;  %v8369_v13 = vpop.f32.mrb[92].mxu0 }
0x1943   : > { %v7803_v16 = vadd.f32 %v7798_v44, %v7701_v17  ;;  %v8370_v19 = vpop.f32.mrb[93].mxu0 }
0x1944   : > { %v7804_v21 = vadd.f32 %v7799_v41, %v7703_v27  ;;  %v8371_v55 = vadd.f32 %v8370_v19, %v8369_v13  ;;  %v8372_v39 = vpop.f32.mrb[94].mxu0 }
0x1945   : > { %v8373_v35 = vpop.f32.mrb[95].mxu0 }
0x1946   : > { %v7808_v18 = vcombine.low %v7803_v16, %v7804_v21  ;;  %v7742_v57 = vadd.f32 %v8371_v55, %v7349_v47 }
0x1948   : > { %7810 = vst [vmem:[%s349_s25] sm:$0xff] %v7808_v18 }
0x1949   : > { %v7781_v11 = vpop.f32.mrb[96].mxu1 }
0x194a   : > { %v7782_v33 = vadd.f32 %v7781_v11, %v7742_v57  ;;  %v8456_v5 = vpop.f32.mrb[97].mxu1 }
0x194b   : > { %v7784_v61 = vpop.f32.mrb[98].mxu1 }
0x194c   : > { %v7805_v0 = vadd.f32 %v7797_v40, %v7782_v33  ;;  %v8457_v1 = vpop.f32.mrb[99].mxu1 }
0x194e   : > { %7812 = vst.msk [vmem:[%s349_s25 + $0x8] sm:$0xf] %vm7811_vm2, %v7805_v0 }
0x194f PF: > { %s19_s30 = sadd.s32 1, %s8714_s30  }
0x1950   : > { %p16_p4 = scmp.ge.s32.totalorder %s19_s30, 4  }
0x1952   :  { %18 = sbr.rel (!%p16_p4) target bundleno = 1 (0x1), region = 103 }

</bundles_post_ra>
